<compile_context>
chip_gen: v7x
topology: tpu7x:2x2x1
jax: 0.10.0
libtpu: 0.0.40
codegen_flags: <defaults>
</compile_context>

<pallas_src>
import functools

import jax
import jax.numpy as jnp
from jax import lax
from jax.experimental import pallas as pl
from jax.experimental.pallas import tpu as pltpu

LRELU_SLOPE = 0.1


class HParams:
    # Small synthetic MRF config (same structure as HiFi-GAN kr/dr lists).
    resblock_kernel_sizes = [3, 5]
    resblock_dilation_sizes = [[1, 3], [1, 3]]


def get_padding(kernel_size, stride, dilation):
    if stride == 1:
        return int((kernel_size * dilation - dilation) / 2)
    return 0


def _round_up(x, m):
    return ((x + m - 1) // m) * m


# ----------------------------------------------------------------------------
# Fully fused MRF kernel: per grid step (one batch element, one T tile) it
#   1. assembles the halo-extended x window (center + slim neighbour blocks)
#      and zeroes every row outside [0, T) in one select,
#   2. runs every resblock chain (conv1 -> lrelu -> conv2 -> lrelu -> residual)
#      on that window, shrinking the halo as it goes,
#   3. sums the resblock outputs and applies the final 1/kr scale,
#   4. writes a single (t_tile, C) f32 output block.
# ----------------------------------------------------------------------------
def _mrf_kernel(x_c_ref, x_l_ref, x_r_ref, *rest,
                blocks, t_tile, max_halo, halo_pad, t_true, inv_kr):
    *w_refs, o_ref = rest
    assert len(w_refs) == 4 * sum(len(taps) for taps in blocks)

    t = pl.program_id(1)
    tile_start = t * t_tile
    win_len = t_tile + 2 * max_halo

    # One position iota + validity mask per tile (hoisted out of the conv
    # chain).  Intermediate re-masks below are single broadcast multiplies.
    rows = lax.broadcasted_iota(jnp.int32, (win_len, 1), 0)
    pos = tile_start - max_halo + rows
    valid_b = jnp.logical_and(pos >= 0, pos < t_true)      # (win_len, 1) bool
    valid_f = valid_b.astype(jnp.float32)                   # (win_len, 1) f32

    center = x_c_ref[...].astype(jnp.float32)
    if max_halo > 0:
        left = x_l_ref[halo_pad - max_halo:, :].astype(jnp.float32)
        right = x_r_ref[:max_halo, :].astype(jnp.float32)
        window = jnp.concatenate([left, center, right], axis=0)
    else:
        window = center
    # One select cleans everything outside [0, T): sequence-start/end halos
    # (clamped neighbour blocks), the ragged last tile, and any OOB-read
    # garbage.  Matches Conv1d zero padding for the first conv of each block.
    window = jnp.where(valid_b, window, 0.0)

    def mask(v, w):
        # Rows of v sit at absolute positions tile_start - w + i.
        off = max_halo - w
        return v * valid_f[off:off + v.shape[0], :]

    acc = None
    w_idx = 0
    for taps in blocks:
        halo_b = sum(d * (k - 1) for k, d in taps)
        off = max_halo - halo_b
        cur = window[off:off + t_tile + 2 * halo_b, :] if off > 0 else window
        width = halo_b
        for (k, d) in taps:
            h = d * (k - 1) // 2
            w1 = w_refs[w_idx][...]
            b1 = w_refs[w_idx + 1][...].astype(jnp.float32)
            w2 = w_refs[w_idx + 2][...]
            b2 = w_refs[w_idx + 3][...].astype(jnp.float32)
            w_idx += 4

            # conv1: K dilated taps folded into one MXU contraction.
            # TODO(synk): on v5e (128-deep MXU, single vst slot) benchmark K
            # accumulating per-tap matmuls against this lane-concat variant.
            w1_len = t_tile + 2 * (width - h)
            x_taps = jnp.concatenate(
                [cur[j * d:j * d + w1_len, :] for j in range(k)],
                axis=-1).astype(jnp.bfloat16)
            o1 = jnp.dot(x_taps, w1, preferred_element_type=jnp.float32) + b1
            o1 = jnp.maximum(o1, LRELU_SLOPE * o1)          # leaky_relu
            if width - h > 0:
                o1 = mask(o1, width - h)   # conv2 must see zeros outside [0,T)

            # conv2 (same k, d as conv1, per the reference module).
            new_width = width - 2 * h
            w2_len = t_tile + 2 * new_width
            o1_taps = jnp.concatenate(
                [o1[j * d:j * d + w2_len, :] for j in range(k)],
                axis=-1).astype(jnp.bfloat16)
            o2 = jnp.dot(o1_taps, w2, preferred_element_type=jnp.float32) + b2
            o2 = jnp.maximum(o2, LRELU_SLOPE * o2)

            cur = cur[2 * h:2 * h + w2_len, :] + o2          # residual add
            if new_width > 0:
                cur = mask(cur, new_width)   # keep zero padding for next pair
            width = new_width
        assert width == 0                    # trace-time sanity
        acc = cur if acc is None else acc + cur              # fused MRF sum

    out = acc * inv_kr if inv_kr != 1.0 else acc             # fused  / kr
    o_ref[...] = out.astype(o_ref.dtype)


# ----------------------------------------------------------------------------
# Wrappers.
# ----------------------------------------------------------------------------
def mrf_forward(params, hp, x, *, t_tile=None):
    """Channels-last entry: x (B, T, C) (f32 or bf16) -> (B, T, C) f32.

    Channels-last consumers should call this directly to skip the (B, C, T)
    relayout passes of `mrf_module_forward`.
    """
    B, T, C = x.shape
    kr = hp.resblock_kernel_sizes
    dr = hp.resblock_dilation_sizes
    n_blocks = len(dr)
    if not isinstance(kr, list):
        kr = [kr] * n_blocks

    blocks = []
    for i in range(n_blocks):
        dils = dr[i]
        ks = kr[i] if isinstance(kr[i], list) else [kr[i]] * len(dils)
        blocks.append(tuple(zip(ks, dils)))
    blocks = tuple(blocks)
    for taps in blocks:
        for k, d in taps:
            assert (d * (k - 1)) % 2 == 0, "same-length conv needs even (k-1)*d"

    max_halo = max(sum(d * (k - 1) for k, d in taps) for taps in blocks)
    # Multiple-of-8 (sublane aligned) halo blocks instead of power-of-2:
    # less redundant halo DMA for large-halo configs (e.g. k=11 -> 90 -> 96).
    halo_pad = max(8, _round_up(max_halo, 8)) if max_halo > 0 else 8

    if t_tile is None:
        # Big tiles amortize per-grid-step overhead (512 ~ 85% of HBM roofline
        # vs 63% at 256); bounded by T and kept a multiple of halo_pad so the
        # neighbour-halo block indexing stays exact.
        target = 1024 if T >= 16384 else 512
        target = min(target, _round_up(T, 8))
        t_tile = max(halo_pad, (target // halo_pad) * halo_pad)
        # v7x megacore: keep >= 4 grid steps so both TensorCores get work on
        # short-audio / small-batch inputs (inert on single-TC v5e/v6e).
        while B * pl.cdiv(T, t_tile) < 4 and t_tile >= max(2 * halo_pad, 256):
            t_tile = max(halo_pad, ((t_tile // 2) // halo_pad) * halo_pad)
    assert t_tile % halo_pad == 0 and t_tile % 8 == 0

    n_t = pl.cdiv(T, t_tile)          # ragged last tile: no pad / slice glue
    r = t_tile // halo_pad
    n_halo_blocks = pl.cdiv(T, halo_pad)

    in_specs = [
        # Center tile streams along the (fastest-varying) T grid axis.
        pl.BlockSpec((None, t_tile, C), lambda b, t: (b, t, 0)),
        # Slim left / right neighbour blocks for the conv halo (clamped at the
        # sequence ends; the in-kernel position mask zero-fills them), so no
        # padded HBM copy of x is ever materialized.
        pl.BlockSpec((None, halo_pad, C),
                     lambda b, t: (b, jnp.maximum(t * r - 1, 0), 0)),
        pl.BlockSpec((None, halo_pad, C),
                     lambda b, t: (b, jnp.minimum((t + 1) * r,
                                                  n_halo_blocks - 1), 0)),
    ]
    args = [x, x, x]

    w_bytes = 0
    for bi, taps in enumerate(blocks):
        for pi, (k, _d) in enumerate(taps):
            prm = params[bi][pi]
            # (Cout, Cin, K) -> per-tap (K, Cin, Cout) -> flat (K*Cin, Cout) bf16.
            w1 = jnp.transpose(prm["w1"], (2, 1, 0)).reshape(k * C, C).astype(jnp.bfloat16)
            w2 = jnp.transpose(prm["w2"], (2, 1, 0)).reshape(k * C, C).astype(jnp.bfloat16)
            b1 = prm["b1"].reshape(1, C).astype(jnp.float32)
            b2 = prm["b2"].reshape(1, C).astype(jnp.float32)
            for arr in (w1, b1, w2, b2):
                # Constant index_map -> weights stay resident in VMEM across
                # the whole (B, T) grid; only activation tiles stream.
                in_specs.append(pl.BlockSpec(arr.shape, lambda b, t: (0, 0)))
                args.append(arr)
                w_bytes += arr.size * arr.dtype.itemsize

    # Rough VMEM footprint: resident weights (+ 2nd pipeline buffer) +
    # streamed activation tiles (x2 buffers) + in-kernel temporaries.  Raise
    # the scoped limit only when needed (production C=512 / k=11 configs).
    # TODO(synk): on v7x (64 MiB physical VMEM), if it still does not fit,
    # single-buffer the weight specs (pl.Buffered(1)) and/or fall back to
    # per-resblock (or per-(k,d)-pair) fusion instead of whole-MRF fusion.
    tile_bytes = (t_tile + 2 * halo_pad) * C * x.dtype.itemsize + t_tile * C * 4
    tmp_bytes = 12 * (t_tile + 2 * max_halo) * C * 4
    est_vmem = 2 * (w_bytes + tile_bytes) + tmp_bytes
    cp_kwargs = dict(dimension_semantics=("parallel", "parallel"))
    if est_vmem > 28 * 1024 * 1024:
        cp_kwargs["vmem_limit_bytes"] = int(min(est_vmem, 100 * 1024 * 1024))

    kernel = functools.partial(
        _mrf_kernel, blocks=blocks, t_tile=t_tile, max_halo=max_halo,
        halo_pad=halo_pad, t_true=T, inv_kr=1.0 / n_blocks)

    return pl.pallas_call(
        kernel,
        out_shape=jax.ShapeDtypeStruct((B, T, C), jnp.float32),
        grid=(B, n_t),
        in_specs=in_specs,
        out_specs=pl.BlockSpec((None, t_tile, C), lambda b, t: (b, t, 0)),
        compiler_params=pltpu.CompilerParams(**cp_kwargs),
    )(*args)


def mrf_module_forward(params, hp, x_ncw, *, t_tile=None):
    """PyTorch-layout entry point: x (B, C, T) -> (B, C, T).

    The bf16 cast is folded into the input relayout pass (single HBM pass,
    half the bytes for the kernel read).  Channels-last consumers should call
    mrf_forward() directly and skip both transposes.
    """
    x = jnp.transpose(x_ncw, (0, 2, 1)).astype(jnp.bfloat16)
    y = mrf_forward(params, hp, x, t_tile=t_tile)
    return jnp.transpose(y, (0, 2, 1))


# ----------------------------------------------------------------------------
# Pure-JAX reference (f32) for a numerical sanity check.
# ----------------------------------------------------------------------------
def _conv1d_ref(x, w, b, dilation, padding):
    y = lax.conv_general_dilated(
        x, w, window_strides=(1,), padding=[(padding, padding)],
        rhs_dilation=(dilation,),
        dimension_numbers=("NWC", "OIW", "NWC"))
    return y + b[None, None, :]


def mrf_ref(params, hp, x):
    kr = hp.resblock_kernel_sizes
    dr = hp.resblock_dilation_sizes
    n_blocks = len(dr)
    if not isinstance(kr, list):
        kr = [kr] * n_blocks
    xs = None
    for i in range(n_blocks):
        dils = dr[i]
        ks = kr[i] if isinstance(kr[i], list) else [kr[i]] * len(dils)
        cur = x
        for prm, k, d in zip(params[i], ks, dils):
            pad = get_padding(k, 1, d)
            o1 = _conv1d_ref(cur, prm["w1"], prm["b1"], d, pad)
            o1 = jnp.where(o1 > 0, o1, LRELU_SLOPE * o1)
            o2 = _conv1d_ref(o1, prm["w2"], prm["b2"], d, pad)
            o2 = jnp.where(o2 > 0, o2, LRELU_SLOPE * o2)
            cur = cur + o2
        xs = cur if xs is None else xs + cur
    return xs / n_blocks


# ----------------------------------------------------------------------------
# Deterministic synthetic parameters (weight_norm only re-parametrizes
# training, so effective weights are used directly).
# ----------------------------------------------------------------------------
def init_mrf_params(key, hp, channels, w_std=0.05, b_std=0.1):
    kr = hp.resblock_kernel_sizes
    dr = hp.resblock_dilation_sizes
    n_blocks = len(dr)
    if not isinstance(kr, list):
        kr = [kr] * n_blocks
    n_keys = 4 * sum(len(d) for d in dr) + 2
    keys = iter(jax.random.split(key, n_keys))
    params = []
    for i in range(n_blocks):
        dils = dr[i]
        ks = kr[i] if isinstance(kr[i], list) else [kr[i]] * len(dils)
        block = []
        for k, _d in zip(ks, dils):
            block.append({
                "w1": w_std * jax.random.normal(next(keys), (channels, channels, k), jnp.float32),
                "b1": b_std * jax.random.normal(next(keys), (channels,), jnp.float32),
                "w2": w_std * jax.random.normal(next(keys), (channels, channels, k), jnp.float32),
                "b2": b_std * jax.random.normal(next(keys), (channels,), jnp.float32),
            })
        params.append(block)
    return params


if __name__ == "__main__":
    hp = HParams()
    key = jax.random.PRNGKey(0)
    pkey, xkey = jax.random.split(key)

    B, C, T = 2, 128, 200            # PyTorch layout (B, C, T); T not tile-aligned
    params = init_mrf_params(pkey, hp, C)
    x_ncw = jax.random.normal(xkey, (B, C, T), jnp.float32)

    @jax.jit
    def fwd(p, xx):
        return mrf_module_forward(p, hp, xx)

    out = jax.block_until_ready(fwd(params, x_ncw))
    assert out.shape == (B, C, T), out.shape
    assert bool(jnp.all(jnp.isfinite(out)))

    # Compare the fused bf16 Pallas path against the pure-JAX f32 reference.
    ref_fn = jax.jit(lambda p, xx: mrf_ref(p, hp, xx))
    ref = jnp.transpose(ref_fn(params, jnp.transpose(x_ncw, (0, 2, 1))),
                        (0, 2, 1))
    err = float(jnp.max(jnp.abs(out - ref)))
    tol = 0.05 * float(jnp.max(jnp.abs(ref))) + 0.05
    assert err < tol, (err, tol)

    print("KERNEL_OK")
</pallas_src>

<mosaic_0001>
module attributes {stable_mosaic.version = 11 : i64} {
  func.func @_mrf_kernel(%arg0: i32, %arg1: i32, %arg2: memref<1x192x128xbf16, #tpu.memory_space<vmem>>, %arg3: memref<1x16x128xbf16, #tpu.memory_space<vmem>>, %arg4: memref<1x16x128xbf16, #tpu.memory_space<vmem>>, %arg5: memref<384x128xbf16, #tpu.memory_space<vmem>>, %arg6: memref<1x128xf32, #tpu.memory_space<vmem>>, %arg7: memref<384x128xbf16, #tpu.memory_space<vmem>>, %arg8: memref<1x128xf32, #tpu.memory_space<vmem>>, %arg9: memref<384x128xbf16, #tpu.memory_space<vmem>>, %arg10: memref<1x128xf32, #tpu.memory_space<vmem>>, %arg11: memref<384x128xbf16, #tpu.memory_space<vmem>>, %arg12: memref<1x128xf32, #tpu.memory_space<vmem>>, %arg13: memref<640x128xbf16, #tpu.memory_space<vmem>>, %arg14: memref<1x128xf32, #tpu.memory_space<vmem>>, %arg15: memref<640x128xbf16, #tpu.memory_space<vmem>>, %arg16: memref<1x128xf32, #tpu.memory_space<vmem>>, %arg17: memref<640x128xbf16, #tpu.memory_space<vmem>>, %arg18: memref<1x128xf32, #tpu.memory_space<vmem>>, %arg19: memref<640x128xbf16, #tpu.memory_space<vmem>>, %arg20: memref<1x128xf32, #tpu.memory_space<vmem>>, %arg21: memref<1x192x128xf32, #tpu.memory_space<vmem>>) attributes {dimension_semantics = [#tpu.dimension_semantics<parallel>, #tpu.dimension_semantics<parallel>], iteration_bounds = array<i64: 2, 2>, scalar_prefetch = 0 : i64, scratch_operands = 0 : i64, tpu.core_type = #tpu.core_type<tc>, window_params = [{transform_indices = @transform_0, window_bounds = array<i64: 1, 192, 128>}, {transform_indices = @transform_1, window_bounds = array<i64: 1, 16, 128>}, {transform_indices = @transform_2, window_bounds = array<i64: 1, 16, 128>}, {pipeline_mode = #tpu.pipeline_mode<synchronous>, transform_indices = @transform_3, window_bounds = array<i64: 384, 128>}, {pipeline_mode = #tpu.pipeline_mode<synchronous>, transform_indices = @transform_4, window_bounds = array<i64: 1, 128>}, {pipeline_mode = #tpu.pipeline_mode<synchronous>, transform_indices = @transform_5, window_bounds = array<i64: 384, 128>}, {pipeline_mode = #tpu.pipeline_mode<synchronous>, transform_indices = @transform_6, window_bounds = array<i64: 1, 128>}, {pipeline_mode = #tpu.pipeline_mode<synchronous>, transform_indices = @transform_7, window_bounds = array<i64: 384, 128>}, {pipeline_mode = #tpu.pipeline_mode<synchronous>, transform_indices = @transform_8, window_bounds = array<i64: 1, 128>}, {pipeline_mode = #tpu.pipeline_mode<synchronous>, transform_indices = @transform_9, window_bounds = array<i64: 384, 128>}, {pipeline_mode = #tpu.pipeline_mode<synchronous>, transform_indices = @transform_10, window_bounds = array<i64: 1, 128>}, {pipeline_mode = #tpu.pipeline_mode<synchronous>, transform_indices = @transform_11, window_bounds = array<i64: 640, 128>}, {pipeline_mode = #tpu.pipeline_mode<synchronous>, transform_indices = @transform_12, window_bounds = array<i64: 1, 128>}, {pipeline_mode = #tpu.pipeline_mode<synchronous>, transform_indices = @transform_13, window_bounds = array<i64: 640, 128>}, {pipeline_mode = #tpu.pipeline_mode<synchronous>, transform_indices = @transform_14, window_bounds = array<i64: 1, 128>}, {pipeline_mode = #tpu.pipeline_mode<synchronous>, transform_indices = @transform_15, window_bounds = array<i64: 640, 128>}, {pipeline_mode = #tpu.pipeline_mode<synchronous>, transform_indices = @transform_16, window_bounds = array<i64: 1, 128>}, {pipeline_mode = #tpu.pipeline_mode<synchronous>, transform_indices = @transform_17, window_bounds = array<i64: 640, 128>}, {pipeline_mode = #tpu.pipeline_mode<synchronous>, transform_indices = @transform_18, window_bounds = array<i64: 1, 128>}, {transform_indices = @transform_19, window_bounds = array<i64: 1, 192, 128>}]} {
    %c192_i32 = arith.constant 192 : i32
    %0 = arith.muli %arg1, %c192_i32 : i32
    %1 = tpu.iota {dimensions = array<i32: 0>} : vector<224x1xi32>
    %c16_i32 = arith.constant 16 : i32
    %2 = arith.subi %0, %c16_i32 : i32
    %3 = vector.broadcast %2 : i32 to vector<224x1xi32>
    %4 = arith.addi %3, %1 : vector<224x1xi32>
    %c0_i32 = arith.constant 0 : i32
    %5 = vector.broadcast %c0_i32 : i32 to vector<224x1xi32>
    %6 = arith.cmpi sge, %4, %5 : vector<224x1xi32>
    %c200_i32 = arith.constant 200 : i32
    %7 = vector.broadcast %c200_i32 : i32 to vector<224x1xi32>
    %8 = arith.cmpi slt, %4, %7 : vector<224x1xi32>
    %9 = arith.andi %6, %8 : vector<224x1xi1>
    %10 = arith.extui %9 : vector<224x1xi1> to vector<224x1xi32>
    %11 = arith.sitofp %10 : vector<224x1xi32> to vector<224x1xf32>
    %c0 = arith.constant 0 : index
    %c0_0 = arith.constant 0 : index
    %c0_1 = arith.constant 0 : index
    %12 = vector.load %arg2[%c0, %c0_0, %c0_1] : memref<1x192x128xbf16, #tpu.memory_space<vmem>>, vector<1x192x128xbf16>
    %13 = vector.shape_cast %12 : vector<1x192x128xbf16> to vector<192x128xbf16>
    %14 = arith.extf %13 : vector<192x128xbf16> to vector<192x128xf32>
    %c0_2 = arith.constant 0 : index
    %c0_3 = arith.constant 0 : index
    %c0_4 = arith.constant 0 : index
    %15 = vector.load %arg3[%c0_2, %c0_3, %c0_4] : memref<1x16x128xbf16, #tpu.memory_space<vmem>>, vector<1x16x128xbf16>
    %16 = vector.shape_cast %15 : vector<1x16x128xbf16> to vector<16x128xbf16>
    %17 = arith.extf %16 : vector<16x128xbf16> to vector<16x128xf32>
    %c0_5 = arith.constant 0 : index
    %c0_6 = arith.constant 0 : index
    %c0_7 = arith.constant 0 : index
    %18 = vector.load %arg4[%c0_5, %c0_6, %c0_7] : memref<1x16x128xbf16, #tpu.memory_space<vmem>>, vector<1x16x128xbf16>
    %19 = vector.shape_cast %18 : vector<1x16x128xbf16> to vector<16x128xbf16>
    %20 = arith.extf %19 : vector<16x128xbf16> to vector<16x128xf32>
    %21 = tpu.concatenate %17, %14, %20 in 0 : vector<16x128xf32>, vector<192x128xf32>, vector<16x128xf32> -> vector<224x128xf32>
    %cst = arith.constant 0.000000e+00 : f32
    %22 = vector.shape_cast %9 : vector<224x1xi1> to vector<224x1xi1>
    %23 = vector.broadcast %22 : vector<224x1xi1> to vector<224x128xi1>
    %24 = vector.broadcast %cst : f32 to vector<224x128xf32>
    %25 = arith.select %23, %21, %24 : vector<224x128xi1>, vector<224x128xf32>
    %26 = vector.extract_strided_slice %25 {offsets = [8, 0], sizes = [208, 128], strides = [1, 1]} : vector<224x128xf32> to vector<208x128xf32>
    %c0_8 = arith.constant 0 : index
    %c0_9 = arith.constant 0 : index
    %27 = vector.load %arg5[%c0_8, %c0_9] : memref<384x128xbf16, #tpu.memory_space<vmem>>, vector<384x128xbf16>
    %c0_10 = arith.constant 0 : index
    %c0_11 = arith.constant 0 : index
    %28 = vector.load %arg6[%c0_10, %c0_11] : memref<1x128xf32, #tpu.memory_space<vmem>>, vector<1x128xf32>
    %c0_12 = arith.constant 0 : index
    %c0_13 = arith.constant 0 : index
    %29 = vector.load %arg7[%c0_12, %c0_13] : memref<384x128xbf16, #tpu.memory_space<vmem>>, vector<384x128xbf16>
    %c0_14 = arith.constant 0 : index
    %c0_15 = arith.constant 0 : index
    %30 = vector.load %arg8[%c0_14, %c0_15] : memref<1x128xf32, #tpu.memory_space<vmem>>, vector<1x128xf32>
    %31 = vector.extract_strided_slice %26 {offsets = [0, 0], sizes = [206, 128], strides = [1, 1]} : vector<208x128xf32> to vector<206x128xf32>
    %32 = vector.extract_strided_slice %26 {offsets = [1, 0], sizes = [206, 128], strides = [1, 1]} : vector<208x128xf32> to vector<206x128xf32>
    %33 = vector.extract_strided_slice %26 {offsets = [2, 0], sizes = [206, 128], strides = [1, 1]} : vector<208x128xf32> to vector<206x128xf32>
    %34 = tpu.concatenate %31, %32, %33 in 1 : vector<206x128xf32>, vector<206x128xf32>, vector<206x128xf32> -> vector<206x384xf32>
    %35 = arith.truncf %34 : vector<206x384xf32> to vector<206x384xbf16>
    %cst_16 = arith.constant dense<0.000000e+00> : vector<206x128xf32>
    %36 = tpu.matmul %35, %27, %cst_16 {dimension_numbers = #tpu.dot_dimension_numbers<[1], [0], [0], [1], [0, 0, 1, 1], [], []>} : vector<206x384xbf16>, vector<384x128xbf16>, vector<206x128xf32> -> vector<206x128xf32>
    %37 = vector.broadcast %28 : vector<1x128xf32> to vector<206x128xf32>
    %38 = arith.addf %36, %37 : vector<206x128xf32>
    %cst_17 = arith.constant 1.000000e-01 : f32
    %39 = vector.broadcast %cst_17 : f32 to vector<206x128xf32>
    %40 = arith.mulf %39, %38 : vector<206x128xf32>
    %41 = arith.maximumf %38, %40 : vector<206x128xf32>
    %42 = vector.extract_strided_slice %11 {offsets = [9, 0], sizes = [206, 1], strides = [1, 1]} : vector<224x1xf32> to vector<206x1xf32>
    %43 = vector.broadcast %42 : vector<206x1xf32> to vector<206x128xf32>
    %44 = arith.mulf %41, %43 : vector<206x128xf32>
    %45 = vector.extract_strided_slice %44 {offsets = [0, 0], sizes = [204, 128], strides = [1, 1]} : vector<206x128xf32> to vector<204x128xf32>
    %46 = vector.extract_strided_slice %44 {offsets = [1, 0], sizes = [204, 128], strides = [1, 1]} : vector<206x128xf32> to vector<204x128xf32>
    %47 = vector.extract_strided_slice %44 {offsets = [2, 0], sizes = [204, 128], strides = [1, 1]} : vector<206x128xf32> to vector<204x128xf32>
    %48 = tpu.concatenate %45, %46, %47 in 1 : vector<204x128xf32>, vector<204x128xf32>, vector<204x128xf32> -> vector<204x384xf32>
    %49 = arith.truncf %48 : vector<204x384xf32> to vector<204x384xbf16>
    %cst_18 = arith.constant dense<0.000000e+00> : vector<204x128xf32>
    %50 = tpu.matmul %49, %29, %cst_18 {dimension_numbers = #tpu.dot_dimension_numbers<[1], [0], [0], [1], [0, 0, 1, 1], [], []>} : vector<204x384xbf16>, vector<384x128xbf16>, vector<204x128xf32> -> vector<204x128xf32>
    %51 = vector.broadcast %30 : vector<1x128xf32> to vector<204x128xf32>
    %52 = arith.addf %50, %51 : vector<204x128xf32>
    %cst_19 = arith.constant 1.000000e-01 : f32
    %53 = vector.broadcast %cst_19 : f32 to vector<204x128xf32>
    %54 = arith.mulf %53, %52 : vector<204x128xf32>
    %55 = arith.maximumf %52, %54 : vector<204x128xf32>
    %56 = vector.extract_strided_slice %26 {offsets = [2, 0], sizes = [204, 128], strides = [1, 1]} : vector<208x128xf32> to vector<204x128xf32>
    %57 = arith.addf %56, %55 : vector<204x128xf32>
    %58 = vector.extract_strided_slice %11 {offsets = [10, 0], sizes = [204, 1], strides = [1, 1]} : vector<224x1xf32> to vector<204x1xf32>
    %59 = vector.broadcast %58 : vector<204x1xf32> to vector<204x128xf32>
    %60 = arith.mulf %57, %59 : vector<204x128xf32>
    %c0_20 = arith.constant 0 : index
    %c0_21 = arith.constant 0 : index
    %61 = vector.load %arg9[%c0_20, %c0_21] : memref<384x128xbf16, #tpu.memory_space<vmem>>, vector<384x128xbf16>
    %c0_22 = arith.constant 0 : index
    %c0_23 = arith.constant 0 : index
    %62 = vector.load %arg10[%c0_22, %c0_23] : memref<1x128xf32, #tpu.memory_space<vmem>>, vector<1x128xf32>
    %c0_24 = arith.constant 0 : index
    %c0_25 = arith.constant 0 : index
    %63 = vector.load %arg11[%c0_24, %c0_25] : memref<384x128xbf16, #tpu.memory_space<vmem>>, vector<384x128xbf16>
    %c0_26 = arith.constant 0 : index
    %c0_27 = arith.constant 0 : index
    %64 = vector.load %arg12[%c0_26, %c0_27] : memref<1x128xf32, #tpu.memory_space<vmem>>, vector<1x128xf32>
    %65 = vector.extract_strided_slice %60 {offsets = [0, 0], sizes = [198, 128], strides = [1, 1]} : vector<204x128xf32> to vector<198x128xf32>
    %66 = vector.extract_strided_slice %60 {offsets = [3, 0], sizes = [198, 128], strides = [1, 1]} : vector<204x128xf32> to vector<198x128xf32>
    %67 = vector.extract_strided_slice %60 {offsets = [6, 0], sizes = [198, 128], strides = [1, 1]} : vector<204x128xf32> to vector<198x128xf32>
    %68 = tpu.concatenate %65, %66, %67 in 1 : vector<198x128xf32>, vector<198x128xf32>, vector<198x128xf32> -> vector<198x384xf32>
    %69 = arith.truncf %68 : vector<198x384xf32> to vector<198x384xbf16>
    %cst_28 = arith.constant dense<0.000000e+00> : vector<198x128xf32>
    %70 = tpu.matmul %69, %61, %cst_28 {dimension_numbers = #tpu.dot_dimension_numbers<[1], [0], [0], [1], [0, 0, 1, 1], [], []>} : vector<198x384xbf16>, vector<384x128xbf16>, vector<198x128xf32> -> vector<198x128xf32>
    %71 = vector.broadcast %62 : vector<1x128xf32> to vector<198x128xf32>
    %72 = arith.addf %70, %71 : vector<198x128xf32>
    %cst_29 = arith.constant 1.000000e-01 : f32
    %73 = vector.broadcast %cst_29 : f32 to vector<198x128xf32>
    %74 = arith.mulf %73, %72 : vector<198x128xf32>
    %75 = arith.maximumf %72, %74 : vector<198x128xf32>
    %76 = vector.extract_strided_slice %11 {offsets = [13, 0], sizes = [198, 1], strides = [1, 1]} : vector<224x1xf32> to vector<198x1xf32>
    %77 = vector.broadcast %76 : vector<198x1xf32> to vector<198x128xf32>
    %78 = arith.mulf %75, %77 : vector<198x128xf32>
    %79 = vector.extract_strided_slice %78 {offsets = [0, 0], sizes = [192, 128], strides = [1, 1]} : vector<198x128xf32> to vector<192x128xf32>
    %80 = vector.extract_strided_slice %78 {offsets = [3, 0], sizes = [192, 128], strides = [1, 1]} : vector<198x128xf32> to vector<192x128xf32>
    %81 = vector.extract_strided_slice %78 {offsets = [6, 0], sizes = [192, 128], strides = [1, 1]} : vector<198x128xf32> to vector<192x128xf32>
    %82 = tpu.concatenate %79, %80, %81 in 1 : vector<192x128xf32>, vector<192x128xf32>, vector<192x128xf32> -> vector<192x384xf32>
    %83 = arith.truncf %82 : vector<192x384xf32> to vector<192x384xbf16>
    %cst_30 = arith.constant dense<0.000000e+00> : vector<192x128xf32>
    %84 = tpu.matmul %83, %63, %cst_30 {dimension_numbers = #tpu.dot_dimension_numbers<[1], [0], [0], [1], [0, 0, 1, 1], [], []>} : vector<192x384xbf16>, vector<384x128xbf16>, vector<192x128xf32> -> vector<192x128xf32>
    %85 = vector.broadcast %64 : vector<1x128xf32> to vector<192x128xf32>
    %86 = arith.addf %84, %85 : vector<192x128xf32>
    %cst_31 = arith.constant 1.000000e-01 : f32
    %87 = vector.broadcast %cst_31 : f32 to vector<192x128xf32>
    %88 = arith.mulf %87, %86 : vector<192x128xf32>
    %89 = arith.maximumf %86, %88 : vector<192x128xf32>
    %90 = vector.extract_strided_slice %60 {offsets = [6, 0], sizes = [192, 128], strides = [1, 1]} : vector<204x128xf32> to vector<192x128xf32>
    %91 = arith.addf %90, %89 : vector<192x128xf32>
    %c0_32 = arith.constant 0 : index
    %c0_33 = arith.constant 0 : index
    %92 = vector.load %arg13[%c0_32, %c0_33] : memref<640x128xbf16, #tpu.memory_space<vmem>>, vector<640x128xbf16>
    %c0_34 = arith.constant 0 : index
    %c0_35 = arith.constant 0 : index
    %93 = vector.load %arg14[%c0_34, %c0_35] : memref<1x128xf32, #tpu.memory_space<vmem>>, vector<1x128xf32>
    %c0_36 = arith.constant 0 : index
    %c0_37 = arith.constant 0 : index
    %94 = vector.load %arg15[%c0_36, %c0_37] : memref<640x128xbf16, #tpu.memory_space<vmem>>, vector<640x128xbf16>
    %c0_38 = arith.constant 0 : index
    %c0_39 = arith.constant 0 : index
    %95 = vector.load %arg16[%c0_38, %c0_39] : memref<1x128xf32, #tpu.memory_space<vmem>>, vector<1x128xf32>
    %96 = vector.extract_strided_slice %25 {offsets = [0, 0], sizes = [220, 128], strides = [1, 1]} : vector<224x128xf32> to vector<220x128xf32>
    %97 = vector.extract_strided_slice %25 {offsets = [1, 0], sizes = [220, 128], strides = [1, 1]} : vector<224x128xf32> to vector<220x128xf32>
    %98 = vector.extract_strided_slice %25 {offsets = [2, 0], sizes = [220, 128], strides = [1, 1]} : vector<224x128xf32> to vector<220x128xf32>
    %99 = vector.extract_strided_slice %25 {offsets = [3, 0], sizes = [220, 128], strides = [1, 1]} : vector<224x128xf32> to vector<220x128xf32>
    %100 = vector.extract_strided_slice %25 {offsets = [4, 0], sizes = [220, 128], strides = [1, 1]} : vector<224x128xf32> to vector<220x128xf32>
    %101 = tpu.concatenate %96, %97, %98, %99, %100 in 1 : vector<220x128xf32>, vector<220x128xf32>, vector<220x128xf32>, vector<220x128xf32>, vector<220x128xf32> -> vector<220x640xf32>
    %102 = arith.truncf %101 : vector<220x640xf32> to vector<220x640xbf16>
    %cst_40 = arith.constant dense<0.000000e+00> : vector<220x128xf32>
    %103 = tpu.matmul %102, %92, %cst_40 {dimension_numbers = #tpu.dot_dimension_numbers<[1], [0], [0], [1], [0, 0, 1, 1], [], []>} : vector<220x640xbf16>, vector<640x128xbf16>, vector<220x128xf32> -> vector<220x128xf32>
    %104 = vector.broadcast %93 : vector<1x128xf32> to vector<220x128xf32>
    %105 = arith.addf %103, %104 : vector<220x128xf32>
    %cst_41 = arith.constant 1.000000e-01 : f32
    %106 = vector.broadcast %cst_41 : f32 to vector<220x128xf32>
    %107 = arith.mulf %106, %105 : vector<220x128xf32>
    %108 = arith.maximumf %105, %107 : vector<220x128xf32>
    %109 = vector.extract_strided_slice %11 {offsets = [2, 0], sizes = [220, 1], strides = [1, 1]} : vector<224x1xf32> to vector<220x1xf32>
    %110 = vector.broadcast %109 : vector<220x1xf32> to vector<220x128xf32>
    %111 = arith.mulf %108, %110 : vector<220x128xf32>
    %112 = vector.extract_strided_slice %111 {offsets = [0, 0], sizes = [216, 128], strides = [1, 1]} : vector<220x128xf32> to vector<216x128xf32>
    %113 = vector.extract_strided_slice %111 {offsets = [1, 0], sizes = [216, 128], strides = [1, 1]} : vector<220x128xf32> to vector<216x128xf32>
    %114 = vector.extract_strided_slice %111 {offsets = [2, 0], sizes = [216, 128], strides = [1, 1]} : vector<220x128xf32> to vector<216x128xf32>
    %115 = vector.extract_strided_slice %111 {offsets = [3, 0], sizes = [216, 128], strides = [1, 1]} : vector<220x128xf32> to vector<216x128xf32>
    %116 = vector.extract_strided_slice %111 {offsets = [4, 0], sizes = [216, 128], strides = [1, 1]} : vector<220x128xf32> to vector<216x128xf32>
    %117 = tpu.concatenate %112, %113, %114, %115, %116 in 1 : vector<216x128xf32>, vector<216x128xf32>, vector<216x128xf32>, vector<216x128xf32>, vector<216x128xf32> -> vector<216x640xf32>
    %118 = arith.truncf %117 : vector<216x640xf32> to vector<216x640xbf16>
    %cst_42 = arith.constant dense<0.000000e+00> : vector<216x128xf32>
    %119 = tpu.matmul %118, %94, %cst_42 {dimension_numbers = #tpu.dot_dimension_numbers<[1], [0], [0], [1], [0, 0, 1, 1], [], []>} : vector<216x640xbf16>, vector<640x128xbf16>, vector<216x128xf32> -> vector<216x128xf32>
    %120 = vector.broadcast %95 : vector<1x128xf32> to vector<216x128xf32>
    %121 = arith.addf %119, %120 : vector<216x128xf32>
    %cst_43 = arith.constant 1.000000e-01 : f32
    %122 = vector.broadcast %cst_43 : f32 to vector<216x128xf32>
    %123 = arith.mulf %122, %121 : vector<216x128xf32>
    %124 = arith.maximumf %121, %123 : vector<216x128xf32>
    %125 = vector.extract_strided_slice %25 {offsets = [4, 0], sizes = [216, 128], strides = [1, 1]} : vector<224x128xf32> to vector<216x128xf32>
    %126 = arith.addf %125, %124 : vector<216x128xf32>
    %127 = vector.extract_strided_slice %11 {offsets = [4, 0], sizes = [216, 1], strides = [1, 1]} : vector<224x1xf32> to vector<216x1xf32>
    %128 = vector.broadcast %127 : vector<216x1xf32> to vector<216x128xf32>
    %129 = arith.mulf %126, %128 : vector<216x128xf32>
    %c0_44 = arith.constant 0 : index
    %c0_45 = arith.constant 0 : index
    %130 = vector.load %arg17[%c0_44, %c0_45] : memref<640x128xbf16, #tpu.memory_space<vmem>>, vector<640x128xbf16>
    %c0_46 = arith.constant 0 : index
    %c0_47 = arith.constant 0 : index
    %131 = vector.load %arg18[%c0_46, %c0_47] : memref<1x128xf32, #tpu.memory_space<vmem>>, vector<1x128xf32>
    %c0_48 = arith.constant 0 : index
    %c0_49 = arith.constant 0 : index
    %132 = vector.load %arg19[%c0_48, %c0_49] : memref<640x128xbf16, #tpu.memory_space<vmem>>, vector<640x128xbf16>
    %c0_50 = arith.constant 0 : index
    %c0_51 = arith.constant 0 : index
    %133 = vector.load %arg20[%c0_50, %c0_51] : memref<1x128xf32, #tpu.memory_space<vmem>>, vector<1x128xf32>
    %134 = vector.extract_strided_slice %129 {offsets = [0, 0], sizes = [204, 128], strides = [1, 1]} : vector<216x128xf32> to vector<204x128xf32>
    %135 = vector.extract_strided_slice %129 {offsets = [3, 0], sizes = [204, 128], strides = [1, 1]} : vector<216x128xf32> to vector<204x128xf32>
    %136 = vector.extract_strided_slice %129 {offsets = [6, 0], sizes = [204, 128], strides = [1, 1]} : vector<216x128xf32> to vector<204x128xf32>
    %137 = vector.extract_strided_slice %129 {offsets = [9, 0], sizes = [204, 128], strides = [1, 1]} : vector<216x128xf32> to vector<204x128xf32>
    %138 = vector.extract_strided_slice %129 {offsets = [12, 0], sizes = [204, 128], strides = [1, 1]} : vector<216x128xf32> to vector<204x128xf32>
    %139 = tpu.concatenate %134, %135, %136, %137, %138 in 1 : vector<204x128xf32>, vector<204x128xf32>, vector<204x128xf32>, vector<204x128xf32>, vector<204x128xf32> -> vector<204x640xf32>
    %140 = arith.truncf %139 : vector<204x640xf32> to vector<204x640xbf16>
    %cst_52 = arith.constant dense<0.000000e+00> : vector<204x128xf32>
    %141 = tpu.matmul %140, %130, %cst_52 {dimension_numbers = #tpu.dot_dimension_numbers<[1], [0], [0], [1], [0, 0, 1, 1], [], []>} : vector<204x640xbf16>, vector<640x128xbf16>, vector<204x128xf32> -> vector<204x128xf32>
    %142 = vector.broadcast %131 : vector<1x128xf32> to vector<204x128xf32>
    %143 = arith.addf %141, %142 : vector<204x128xf32>
    %cst_53 = arith.constant 1.000000e-01 : f32
    %144 = vector.broadcast %cst_53 : f32 to vector<204x128xf32>
    %145 = arith.mulf %144, %143 : vector<204x128xf32>
    %146 = arith.maximumf %143, %145 : vector<204x128xf32>
    %147 = vector.extract_strided_slice %11 {offsets = [10, 0], sizes = [204, 1], strides = [1, 1]} : vector<224x1xf32> to vector<204x1xf32>
    %148 = vector.broadcast %147 : vector<204x1xf32> to vector<204x128xf32>
    %149 = arith.mulf %146, %148 : vector<204x128xf32>
    %150 = vector.extract_strided_slice %149 {offsets = [0, 0], sizes = [192, 128], strides = [1, 1]} : vector<204x128xf32> to vector<192x128xf32>
    %151 = vector.extract_strided_slice %149 {offsets = [3, 0], sizes = [192, 128], strides = [1, 1]} : vector<204x128xf32> to vector<192x128xf32>
    %152 = vector.extract_strided_slice %149 {offsets = [6, 0], sizes = [192, 128], strides = [1, 1]} : vector<204x128xf32> to vector<192x128xf32>
    %153 = vector.extract_strided_slice %149 {offsets = [9, 0], sizes = [192, 128], strides = [1, 1]} : vector<204x128xf32> to vector<192x128xf32>
    %154 = vector.extract_strided_slice %149 {offsets = [12, 0], sizes = [192, 128], strides = [1, 1]} : vector<204x128xf32> to vector<192x128xf32>
    %155 = tpu.concatenate %150, %151, %152, %153, %154 in 1 : vector<192x128xf32>, vector<192x128xf32>, vector<192x128xf32>, vector<192x128xf32>, vector<192x128xf32> -> vector<192x640xf32>
    %156 = arith.truncf %155 : vector<192x640xf32> to vector<192x640xbf16>
    %cst_54 = arith.constant dense<0.000000e+00> : vector<192x128xf32>
    %157 = tpu.matmul %156, %132, %cst_54 {dimension_numbers = #tpu.dot_dimension_numbers<[1], [0], [0], [1], [0, 0, 1, 1], [], []>} : vector<192x640xbf16>, vector<640x128xbf16>, vector<192x128xf32> -> vector<192x128xf32>
    %158 = vector.broadcast %133 : vector<1x128xf32> to vector<192x128xf32>
    %159 = arith.addf %157, %158 : vector<192x128xf32>
    %cst_55 = arith.constant 1.000000e-01 : f32
    %160 = vector.broadcast %cst_55 : f32 to vector<192x128xf32>
    %161 = arith.mulf %160, %159 : vector<192x128xf32>
    %162 = arith.maximumf %159, %161 : vector<192x128xf32>
    %163 = vector.extract_strided_slice %129 {offsets = [12, 0], sizes = [192, 128], strides = [1, 1]} : vector<216x128xf32> to vector<192x128xf32>
    %164 = arith.addf %163, %162 : vector<192x128xf32>
    %165 = arith.addf %91, %164 : vector<192x128xf32>
    %cst_56 = arith.constant 5.000000e-01 : f32
    %166 = vector.broadcast %cst_56 : f32 to vector<192x128xf32>
    %167 = arith.mulf %165, %166 : vector<192x128xf32>
    %c0_57 = arith.constant 0 : index
    %c0_58 = arith.constant 0 : index
    %c0_59 = arith.constant 0 : index
    %168 = vector.load %arg21[%c0_57, %c0_58, %c0_59] : memref<1x192x128xf32, #tpu.memory_space<vmem>>, vector<1x192x128xf32>
    %169 = vector.shape_cast %168 : vector<1x192x128xf32> to vector<192x128xf32>
    %170 = vector.shape_cast %167 : vector<192x128xf32> to vector<1x192x128xf32>
    tpu.vector_store %arg21[%c0_57, %c0_58, %c0_59], %170 {strides = array<i32>} : memref<1x192x128xf32, #tpu.memory_space<vmem>>, vector<1x192x128xf32>,
    return
  }
  func.func @transform_0(%arg0: i32, %arg1: i32) -> (i32, i32, i32) {
    %c0_i32 = arith.constant 0 : i32
    %c0_i32_0 = arith.constant 0 : i32
    return %arg0, %arg1, %c0_i32 : i32, i32, i32
  }
  func.func @transform_1(%arg0: i32, %arg1: i32) -> (i32, i32, i32) {
    %c12_i32 = arith.constant 12 : i32
    %0 = arith.muli %arg1, %c12_i32 : i32
    %c1_i32 = arith.constant 1 : i32
    %1 = arith.subi %0, %c1_i32 : i32
    %c0_i32 = arith.constant 0 : i32
    %2 = arith.maxsi %1, %c0_i32 : i32
    %c0_i32_0 = arith.constant 0 : i32
    %c0_i32_1 = arith.constant 0 : i32
    return %arg0, %2, %c0_i32_0 : i32, i32, i32
  }
  func.func @transform_2(%arg0: i32, %arg1: i32) -> (i32, i32, i32) {
    %c1_i32 = arith.constant 1 : i32
    %0 = arith.addi %arg1, %c1_i32 : i32
    %c12_i32 = arith.constant 12 : i32
    %1 = arith.muli %0, %c12_i32 : i32
    %c12_i32_0 = arith.constant 12 : i32
    %2 = arith.minsi %1, %c12_i32_0 : i32
    %c0_i32 = arith.constant 0 : i32
    %c0_i32_1 = arith.constant 0 : i32
    return %arg0, %2, %c0_i32 : i32, i32, i32
  }
  func.func @transform_3(%arg0: i32, %arg1: i32) -> (i32, i32) {
    %c0_i32 = arith.constant 0 : i32
    %c0_i32_0 = arith.constant 0 : i32
    %c0_i32_1 = arith.constant 0 : i32
    return %c0_i32, %c0_i32_0 : i32, i32
  }
  func.func @transform_4(%arg0: i32, %arg1: i32) -> (i32, i32) {
    %c0_i32 = arith.constant 0 : i32
    %c0_i32_0 = arith.constant 0 : i32
    %c0_i32_1 = arith.constant 0 : i32
    return %c0_i32, %c0_i32_0 : i32, i32
  }
  func.func @transform_5(%arg0: i32, %arg1: i32) -> (i32, i32) {
    %c0_i32 = arith.constant 0 : i32
    %c0_i32_0 = arith.constant 0 : i32
    %c0_i32_1 = arith.constant 0 : i32
    return %c0_i32, %c0_i32_0 : i32, i32
  }
  func.func @transform_6(%arg0: i32, %arg1: i32) -> (i32, i32) {
    %c0_i32 = arith.constant 0 : i32
    %c0_i32_0 = arith.constant 0 : i32
    %c0_i32_1 = arith.constant 0 : i32
    return %c0_i32, %c0_i32_0 : i32, i32
  }
  func.func @transform_7(%arg0: i32, %arg1: i32) -> (i32, i32) {
    %c0_i32 = arith.constant 0 : i32
    %c0_i32_0 = arith.constant 0 : i32
    %c0_i32_1 = arith.constant 0 : i32
    return %c0_i32, %c0_i32_0 : i32, i32
  }
  func.func @transform_8(%arg0: i32, %arg1: i32) -> (i32, i32) {
    %c0_i32 = arith.constant 0 : i32
    %c0_i32_0 = arith.constant 0 : i32
    %c0_i32_1 = arith.constant 0 : i32
    return %c0_i32, %c0_i32_0 : i32, i32
  }
  func.func @transform_9(%arg0: i32, %arg1: i32) -> (i32, i32) {
    %c0_i32 = arith.constant 0 : i32
    %c0_i32_0 = arith.constant 0 : i32
    %c0_i32_1 = arith.constant 0 : i32
    return %c0_i32, %c0_i32_0 : i32, i32
  }
  func.func @transform_10(%arg0: i32, %arg1: i32) -> (i32, i32) {
    %c0_i32 = arith.constant 0 : i32
    %c0_i32_0 = arith.constant 0 : i32
    %c0_i32_1 = arith.constant 0 : i32
    return %c0_i32, %c0_i32_0 : i32, i32
  }
  func.func @transform_11(%arg0: i32, %arg1: i32) -> (i32, i32) {
    %c0_i32 = arith.constant 0 : i32
    %c0_i32_0 = arith.constant 0 : i32
    %c0_i32_1 = arith.constant 0 : i32
    return %c0_i32, %c0_i32_0 : i32, i32
  }
  func.func @transform_12(%arg0: i32, %arg1: i32) -> (i32, i32) {
    %c0_i32 = arith.constant 0 : i32
    %c0_i32_0 = arith.constant 0 : i32
    %c0_i32_1 = arith.constant 0 : i32
    return %c0_i32, %c0_i32_0 : i32, i32
  }
  func.func @transform_13(%arg0: i32, %arg1: i32) -> (i32, i32) {
    %c0_i32 = arith.constant 0 : i32
    %c0_i32_0 = arith.constant 0 : i32
    %c0_i32_1 = arith.constant 0 : i32
    return %c0_i32, %c0_i32_0 : i32, i32
  }
  func.func @transform_14(%arg0: i32, %arg1: i32) -> (i32, i32) {
    %c0_i32 = arith.constant 0 : i32
    %c0_i32_0 = arith.constant 0 : i32
    %c0_i32_1 = arith.constant 0 : i32
    return %c0_i32, %c0_i32_0 : i32, i32
  }
  func.func @transform_15(%arg0: i32, %arg1: i32) -> (i32, i32) {
    %c0_i32 = arith.constant 0 : i32
    %c0_i32_0 = arith.constant 0 : i32
    %c0_i32_1 = arith.constant 0 : i32
    return %c0_i32, %c0_i32_0 : i32, i32
  }
  func.func @transform_16(%arg0: i32, %arg1: i32) -> (i32, i32) {
    %c0_i32 = arith.constant 0 : i32
    %c0_i32_0 = arith.constant 0 : i32
    %c0_i32_1 = arith.constant 0 : i32
    return %c0_i32, %c0_i32_0 : i32, i32
  }
  func.func @transform_17(%arg0: i32, %arg1: i32) -> (i32, i32) {
    %c0_i32 = arith.constant 0 : i32
    %c0_i32_0 = arith.constant 0 : i32
    %c0_i32_1 = arith.constant 0 : i32
    return %c0_i32, %c0_i32_0 : i32, i32
  }
  func.func @transform_18(%arg0: i32, %arg1: i32) -> (i32, i32) {
    %c0_i32 = arith.constant 0 : i32
    %c0_i32_0 = arith.constant 0 : i32
    %c0_i32_1 = arith.constant 0 : i32
    return %c0_i32, %c0_i32_0 : i32, i32
  }
  func.func @transform_19(%arg0: i32, %arg1: i32) -> (i32, i32, i32) {
    %c0_i32 = arith.constant 0 : i32
    %c0_i32_0 = arith.constant 0 : i32
    return %arg0, %arg1, %c0_i32 : i32, i32, i32
  }
}

</mosaic_0001>

<bundles_post_ra>
// kernel: fwd.1
= control target key start
LH: loop header
LB: loop body
LE: loop exit
PB: predicated region body
PF: predicated region fallthrough
CT: control target
= control target key end

     0   :  { %s18548_s0 = inlined_call_operand.vmem [shape: bf16[2,200,128], index: 0, kind: input, shape index: {}, may-alias: {0,1,2}]   ;;  %s18549_s1 = inlined_call_operand.vmem [shape: bf16[2,200,128], index: 1, kind: input, shape index: {}, may-alias: {0,1,2}]   ;;  %s18550_s2 = inlined_call_operand.vmem [shape: bf16[2,200,128], index: 2, kind: input, shape index: {}, may-alias: {0,1,2}]   ;;  %s18551_s3 = inlined_call_operand.vmem [shape: bf16[384,128], index: 3, kind: input, shape index: {}]   ;;  %s18552_s4 = inlined_call_operand.vmem [shape: f32[1,128], index: 4, kind: input, shape index: {}]   ;;  %s18553_s5 = inlined_call_operand.vmem [shape: bf16[384,128], index: 5, kind: input, shape index: {}]   ;;  %s18554_s6 = inlined_call_operand.vmem [shape: f32[1,128], index: 6, kind: input, shape index: {}]   ;;  %s18555_s7 = inlined_call_operand.vmem [shape: bf16[384,128], index: 7, kind: input, shape index: {}]   ;;  %s18556_s8 = inlined_call_operand.vmem [shape: f32[1,128], index: 8, kind: input, shape index: {}]   ;;  %s18557_s9 = inlined_call_operand.vmem [shape: bf16[384,128], index: 9, kind: input, shape index: {}]   ;;  %s18558_s10 = inlined_call_operand.vmem [shape: f32[1,128], index: 10, kind: input, shape index: {}]   ;;  %s18559_s11 = inlined_call_operand.vmem [shape: bf16[640,128], index: 11, kind: input, shape index: {}]   ;;  %s18560_s12 = inlined_call_operand.vmem [shape: f32[1,128], index: 12, kind: input, shape index: {}]   ;;  %s18561_s13 = inlined_call_operand.vmem [shape: bf16[640,128], index: 13, kind: input, shape index: {}]   ;;  %s18562_s14 = inlined_call_operand.vmem [shape: f32[1,128], index: 14, kind: input, shape index: {}]   ;;  %s18563_s15 = inlined_call_operand.vmem [shape: bf16[640,128], index: 15, kind: input, shape index: {}]   ;;  %s18564_s16 = inlined_call_operand.vmem [shape: f32[1,128], index: 16, kind: input, shape index: {}]   ;;  %s18565_s17 = inlined_call_operand.vmem [shape: bf16[640,128], index: 17, kind: input, shape index: {}]   ;;  %s18566_s18 = inlined_call_operand.vmem [shape: f32[1,128], index: 18, kind: input, shape index: {}]   ;;  %s18567_s19 = inlined_call_operand.hbm [shape: f32[2,200,128], index: 19, kind: output, shape index: {}]  }
   0x1   :  { %18956 = sst [smem:[#allocation177_spill]] %s18548_s0 }
   0x2   :  { %18957 = sst [smem:[#allocation178_spill]] %s18549_s1 }
   0x3   :  { %18958 = sst [smem:[#allocation179_spill]] %s18550_s2 }
   0x4   :  { %18959 = sst [smem:[#allocation180_spill]] %s18551_s3 }
   0x5   :  { %18960 = sst [smem:[#allocation181_spill]] %s18566_s18 }
   0x6   :  { %18961 = sst [smem:[#allocation182_spill]] %s18567_s19 }
   0x7   :  { %24 = vsyncpa [#allocation3], 0 }
   0x8   :  { %26 = vsyncpa [#allocation3 + $0x1], 0  ;;  %s12832_s0 = smov 0   ;;  %s12834_s30 = smov 0  }
   0x9   :  { %s12836_s20 = smov 0   ;;  %s12838_s21 = smov 0  }
   0xa   :  { %s12840_s1 = smov 0   ;;  %s12842_s22 = smov 0  }
   0xb   :  { %s12844_s2 = smov 0   ;;  %s12846_s23 = smov 0  }
   0xc LB: > { %18962 = sst [smem:[#allocation5_spill]] %s12697_s0  ;;  %s10082_s24 = sadd.s32 4294967295, %s12725_s23   ;;  %s12725_s23 = sphi %s12846_s23, %s32_s23   ;;  %s12721_s2 = sphi %s12844_s2, %s20149_s2   ;;  %s12717_s22 = sphi %s12842_s22, %s20148_s22   ;;  %s12713_s1 = sphi %s12840_s1, %s20147_s1   ;;  %s12709_s21 = sphi %s12838_s21, %s20146_s21   ;;  %s12705_s20 = sphi %s12836_s20, %s20145_s20   ;;  %s12701_s30 = sphi %s12834_s30, %s20144_s30   ;;  %s12697_s0 = sphi %s12832_s0, %s20143_s0  }
   0xd   : > { %18963 = sst [smem:[#allocation6_spill]] %s12701_s30  ;;  %s10083_s25 = sadd.s32 4294967294, %s12725_s23  }
   0xe   : > { %18964 = sst [smem:[#allocation7_spill]] %s12705_s20  ;;  %s41_s3 = sadd.s32 1, %s12717_s22 }
   0xf   : > { %18965 = sst [smem:[#allocation8_spill]] %s12713_s1  ;;  %p42_p0 = scmp.ge.s32.totalorder %s41_s3, 2 }
  0x10   : > { %18966 = sst [smem:[#allocation9_spill]] %s12717_s22  ;;  %s44_s26 = sadd.s32 1, %s12721_s2 }
  0x11   : > { %18967 = sst [smem:[#allocation10_spill]] %s12721_s2  ;;  %p499_p1 = scmp.ne.s32.totalorder %s12705_s20, %s12701_s30 }
  0x12   : > { %18968 = sst [smem:[#allocation11_spill]] %s12725_s23  ;;  %p500_p2 = scmp.eq.s32.totalorder %s10082_s24, 3 }
  0x13   : > { %s20151_s3 = smov (%p42_p0, %s41_s3), 0  ;;  %s20153_s26 = smov (!%p42_p0, %s44_s26), %s12721_s2 }
  0x14   : > { %18969 = sst [smem:[#allocation12_spill]] %s20151_s3  ;;  %s485_s27 = ssub.s32 %s12717_s22, %s20151_s3 }
  0x15   : > { %p12883_p3 = por %p500_p2, %p499_p1  ;;  %p46_p4 = scmp.ge.s32.totalorder %s20153_s26, 2 }
  0x16   : > { %p505_p5 = scmp.ne.s32.totalorder %s12701_s30, %s12697_s0  ;;  %p506_p6 = scmp.eq.s32.totalorder %s10083_s25, 3 }
  0x17   : > { %s18970_s28 = scalar_select %p12883_p3, 1, 0 }
  0x18   : > { %p10088_p7 = scmp.ge.s32.totalorder %s12725_s23, 1  ;;  %s20155_s26 = smov (%p46_p4, %s20153_s26), 0 }
  0x19   : > { %18971 = sst [smem:[#allocation13_spill]] %s18970_s28  ;;  %p12892_p8 = por %p506_p6, %p505_p5 }
  0x1a   : > { %18972 = sst [smem:[#allocation14_spill]] %s20155_s26  ;;  %p651_p9 = scmp.lt.s32.totalorder %s12725_s23, 5 }
  0x1b   : > { %s18973_s29 = scalar_select %p12892_p8, 1, 0 }
  0x1c   : > { %s484_s24 = ssub.s32 %s12721_s2, %s20155_s26  ;;  %s489_s19 = sadd.s32 1, %s12705_s20 }
  0x1d   : > { %18974 = sst [smem:[#allocation15_spill]] %s18973_s29  ;;  %s486_s18 = sor.u32 %s485_s27, %s484_s24 }
  0x1e   : > { %p652_p10 = pnand %p10088_p7, %p651_p9  ;;  %p487_p11 = scmp.eq.s32.totalorder %s486_s18, 0 }
  0x20   : > { %s12901_s3 = scalar_select %p487_p11, %s12705_s20, %s489_s19  }
  0x21   : > { %655 = sbr.rel (%p652_p10) target bundleno = 2395 (0x95b), region = 96 }
  0x22   : > { %18975 = sst [smem:[#allocation16_spill]] %s12901_s3 }
  0x28   : > { %s18976_s25 = sld [smem:[#allocation180_spill]]  ;;  %v18599_v2 = vmov 0.0   ;;  %s12911_s27 = smul.u32 24, %s12709_s21  ;;  %v826_v11 = vlaneseq  ;;  %v18981_v44 = vmov 0  ;;  %v18984_v45 = vmov 0 }
  0x29   : > { %11805 = vmatprep.subr.bf16.mxu1 %v18599_v2  ;;  %p754_p12 = scmp.lt.s32.totalorder %s12713_s1, 1  ;;  %s767_s30 = smul.u32 12, %s12709_s21  ;;  %v18987_v49 = vmov 0  ;;  %vm18585_vm13 = vcmask 1046528   ;;  %vm18583_vm14 = vcmask 1045504   ;;  %v18990_v51 = vmov 0 }
  0x2a   : > { %p756_p13 = scmp.lt.s32.totalorder %s12911_s27, 24  ;;  %v12956_v15 = vshrl.u32 %v826_v11, 7  ;;  %s825_s0 = smul.u32 192, %s12709_s21  ;;  %v18996_v56 = vmov 0 }
  0x2b   : > { %s755_s18 = scalar_select %p754_p12, %s12713_s1, 1 }
  0x2c   : > { %s757_s20 = scalar_select %p756_p13, %s12911_s27, 24  ;;  %18977 = vst [vmem:[#allocation17_spill] sm:$0xff] %v12956_v15  ;;  %v828_v19 = vadd.s32 8, %v12956_v15  ;;  %v829_v22 = vadd.s32 16, %v12956_v15  ;;  %v830_v24 = vadd.s32 24, %v12956_v15  ;;  %v831_v25 = vadd.s32 32, %v12956_v15 }
  0x2d   : > { %s12944_s2 = smul.u32 25, %s755_s18  ;;  %s10090_s22 = sadd.s32 4294967295, %s767_s30  ;;  %v832_v55 = vadd.s32 40, %v12956_v15 }
  0x2e   : > { %v12322_v0 = vld [vmem:[%s18976_s25 + $0x40] sm:$0xff]   ;;  %v12325_v4 = vld [vmem:[%s18976_s25 + $0x48] sm:$0xff]   ;;  %v12328_v7 = vld [vmem:[%s18976_s25 + $0x50] sm:$0xff]   ;;  %p769_p0 = scmp.gt.s32.totalorder %s10090_s22, 0  ;;  %s18978_s23 = sld [smem:[#allocation177_spill]] }
  0x2f   : > { %v12323_v1 = vld [vmem:[%s18976_s25] sm:$0xff]   ;;  %10503 = vmatprep.subr.bf16.mxu0 %v12322_v0  ;;  %v12326_v5 = vld [vmem:[%s18976_s25 + $0x8] sm:$0xff]   ;;  %v12329_v8 = vld [vmem:[%s18976_s25 + $0x10] sm:$0xff]   ;;  %s759_s30 = sadd.s32 %s12944_s2, %s757_s20  ;;  %s20069_s28 = sld [smem:[#allocation181_spill]] }
  0x30   : > { %v12324_v3 = vld [vmem:[%s18976_s25 + $0x80] sm:$0xff]   ;;  %10504 = vmatpush3.bf16.msra.mxu0 %v12323_v1  ;;  %v12327_v6 = vld [vmem:[%s18976_s25 + $0x88] sm:$0xff]   ;;  %v12330_v9 = vld [vmem:[%s18976_s25 + $0x90] sm:$0xff]   ;;  %s20157_s22 = smov (!%p769_p0, %s10090_s22), 0  ;;  %s10089_s18 = sshll.u32 %s759_s30, 2 }
  0x31   : > { %11806 = vmatpush3.bf16.msra.mxu1 %v12324_v3  ;;  %10505 = vmatprep.subr.bf16.mxu0 %v12325_v4  ;;  %v12331_v10 = vld [vmem:[%s18976_s25 + $0x58] sm:$0xff]   ;;  %v12334_v14 = vld [vmem:[%s18976_s25 + $0x60] sm:$0xff]   ;;  %s10091_s29 = sshll.u32 %s20157_s22, 1  ;;  %v12337_v18 = vld [vmem:[%s18976_s25 + $0x68] sm:$0xff]   ;;  %s18979_s30 = sld [smem:[#allocation178_spill]] }
  0x32   : > { %11807 = vmatprep.subr.bf16.mxu1 %v18599_v2  ;;  %v12332_v12 = vld [vmem:[%s18976_s25 + $0x18] sm:$0xff]   ;;  %v12335_v16 = vld [vmem:[%s18976_s25 + $0x20] sm:$0xff]   ;;  %p778_p1 = scmp.lt.s32.totalorder %s10091_s29, 24  ;;  %v12338_v20 = vld [vmem:[%s18976_s25 + $0x28] sm:$0xff]   ;;  %s19140_s22 = sld [smem:[#allocation179_spill]] }
  0x33   : > { %v12333_v13 = vld [vmem:[%s18976_s25 + $0x98] sm:$0xff]   ;;  %v12336_v17 = vld [vmem:[%s18976_s25 + $0xa0] sm:$0xff]   ;;  %v12339_v21 = vld [vmem:[%s18976_s25 + $0xa8] sm:$0xff]  }
  0x34   : > { %10506 = vmatpush3.bf16.msra.mxu0 %v12326_v5  ;;  %s20159_s29 = smov (!%p778_p1, %s10091_s29), 24  ;;  %v12340_v23 = vld [vmem:[%s18976_s25 + $0x70] sm:$0xff]   ;;  %s12984_s1 = scalar_lea.vmem %s18978_s23, %s10089_s18  ;;  %v12343_v32 = vld [vmem:[%s18976_s25 + $0x78] sm:$0xff]  }
  0x35   : > { %11808 = vmatpush3.bf16.msra.mxu1 %v12327_v6  ;;  %10507 = vmatprep.subr.bf16.mxu0 %v12328_v7  ;;  %s781_s20 = sadd.s32 %s12944_s2, %s20159_s29  ;;  %v12341_v26 = vld [vmem:[%s18976_s25 + $0x30] sm:$0xff]   ;;  %s10095_s18 = sadd.s32 4294967280, %s825_s0  ;;  %v13001_v28 = vld [vmem:[%s12984_s1] sm:$0xf]  ;;  %v13004_v29 = vld [vmem:[%s12984_s1 + $0x4] sm:$0xf] }
  0x36   : > { %11809 = vmatprep.subr.bf16.mxu1 %v18599_v2  ;;  %s10092_s19 = sshll.u32 %s781_s20, 2  ;;  %v12998_v27 = vstv %s10095_s18  ;;  %v13007_v30 = vld [vmem:[%s12984_s1 + $0x8] sm:$0xf]  ;;  %v12342_v31 = vld [vmem:[%s18976_s25 + $0xb0] sm:$0xff]   ;;  %v1049_v36 = vunpack.c.l.bf16 %v13001_v28  ;;  %v1050_v39 = vunpack.c.l.bf16 %v13004_v29  ;;  %v12344_v43 = vld [vmem:[%s18976_s25 + $0x38] sm:$0xff]  }
  0x37   : > { %s12996_s23 = scalar_lea.vmem %s18979_s30, %s10092_s19  ;;  %18980 = vst [vmem:[#allocation18_spill] sm:$0xff] %v12998_v27  ;;  %v857_v33 = vadd.s32 %v12998_v27, %v12956_v15  ;;  %v858_v34 = vadd.s32 %v12998_v27, %v828_v19  ;;  %v859_v35 = vadd.s32 %v12998_v27, %v829_v22  ;;  %v860_v37 = vadd.s32 %v12998_v27, %v830_v24  ;;  %v12345_v48 = vld [vmem:[%s18976_s25 + $0xb8] sm:$0xff]   ;;  %v13101_v6 = vld [vmem:[%s12984_s1 + $0xc] sm:$0xf]  ;;  %s793_s19 = sadd.s32 1, %s12709_s21 }
  0x38   : > { %10508 = vmatpush3.bf16.msra.mxu0 %v12329_v8  ;;  %v861_v38 = vadd.s32 %v12998_v27, %v831_v25  ;;  %v1051_v40 = vunpack.c.l.bf16 %v13007_v30  ;;  %v1073_v41 = vld [vmem:[%s12996_s23] sm:$0xf]  ;;  %v13027_v42 = vld [vmem:[%s12996_s23 + $0x4] sm:$0xf]  ;;  %v1052_v19 = vunpack.c.l.bf16 %v13101_v6  ;;  %v19008_v24 = vmov 0  ;;  %s13269_s24 = smul.u32 12, %s793_s19 }
  0x39   : > { %11810 = vmatpush3.bf16.msra.mxu1 %v12330_v9  ;;  %10509 = vmatprep.subr.bf16.mxu0 %v12331_v10  ;;  %vm885_vm0 = vcmp.ge.s32.totalorder %v857_v33, 0  ;;  %vm886_vm1 = vcmp.ge.s32.totalorder %v858_v34, 0  ;;  %vm887_vm2 = vcmp.ge.s32.totalorder %v859_v35, 0  ;;  %vm913_vm3 = vcmp.lt.s32.totalorder %v857_v33, 200  ;;  %v12366_v22 = vld [vmem:[%s18553_s5 + $0x58] sm:$0xff]  }
  0x3a   : > { %11811 = vmatprep.subr.bf16.mxu1 %v18599_v2  ;;  %vm888_vm4 = vcmp.ge.s32.totalorder %v860_v37, 0  ;;  %vm889_vm5 = vcmp.ge.s32.totalorder %v861_v38, 0  ;;  %vm914_vm6 = vcmp.lt.s32.totalorder %v858_v34, 200  ;;  %vm915_vm7 = vcmp.lt.s32.totalorder %v859_v35, 200  ;;  %vm13032_vm8 = vmand %vm885_vm0, %vm913_vm3  ;;  %p795_p2 = scmp.lt.s32.totalorder %s13269_s24, 12 }
  0x3b   : > { %v18982_v44 = vsel %vm13032_vm8, 4294967295, %v18981_v44  ;;  %vm916_vm9 = vcmp.lt.s32.totalorder %v860_v37, 200  ;;  %vm917_vm10 = vcmp.lt.s32.totalorder %v861_v38, 200  ;;  %vm13036_vm11 = vmand %vm886_vm1, %vm914_vm6  ;;  %v1075_v46 = vunpack.c.l.bf16 %v1073_v41  ;;  %v12359_v41 = vld [vmem:[%s18553_s5 + $0x80] sm:$0xff]  }
  0x3c   : > { %10510 = vmatpush3.bf16.msra.mxu0 %v12332_v12  ;;  %18983 = vst [vmem:[#allocation19_spill] sm:$0xff] %v18982_v44  ;;  %v18985_v45 = vsel %vm13036_vm11, 4294967295, %v18984_v45  ;;  %v1076_v47 = vunpack.c.l.bf16 %v13027_v42  ;;  %vm13046_vm12 = vmand %vm887_vm2, %vm915_vm7  ;;  %v10476_v50 = vcombine.low %v13027_v42, %v13001_v28  ;;  %vm18590_vm0 = vmmov 0   ;;  %s20161_s24 = smov (!%p795_p2, %s13269_s24), 12 }
  0x3d   : > { %11812 = vmatpush3.bf16.msra.mxu1 %v12333_v13  ;;  %10511 = vmatprep.subr.bf16.mxu0 %v12334_v14  ;;  %18986 = vst [vmem:[#allocation20_spill] sm:$0xff] %v18985_v45  ;;  %v18988_v49 = vsel %vm13046_vm12, 4294967295, %v18987_v49  ;;  %vm13053_vm15 = vmand %vm888_vm4, %vm916_vm9  ;;  %v13059_v52 = vsel %vm13032_vm8, %v1075_v46, 0.0  ;;  %v13067_v54 = vsel %vm13046_vm12, %v1049_v36, 0.0  ;;  %v862_v14 = vadd.s32 %v12998_v27, %v832_v55  ;;  %s10093_s0 = sshll.u32 %s20161_s24, 1 }
  0x3e   : > { %11813 = vmatprep.subr.bf16.mxu1 %v18599_v2  ;;  %18989 = vst [vmem:[#allocation21_spill] sm:$0xff] %v18988_v49  ;;  %v18991_v51 = vsel %vm13053_vm15, 4294967295, %v18990_v51  ;;  %18993 = vst [vmem:[#allocation23_spill] sm:$0xff] %v13059_v52  ;;  %v13063_v53 = vsel %vm13036_vm11, %v1076_v47, 0.0  ;;  %11821 = vmatprep.mubr.msk.bf16.mxu1 %vm18590_vm0, %v18599_v2  ;;  %v13080_v57 = vsel %vm13053_vm15, %v1050_v39, 0.0  ;;  %v1263_v59 = vrot.slane %v13067_v54, 1 }
  0x3f   : > { %18992 = vst [vmem:[#allocation22_spill] sm:$0xff] %v18991_v51  ;;  %18994 = vst [vmem:[#allocation24_spill] sm:$0xff] %v13063_v53  ;;  %v1262_v58 = vrot.slane %v13063_v53, 1  ;;  %v4805_v60 = vrot.slane %v13059_v52, 1  ;;  %v1265_v62 = vrot.slane %v13080_v57, 1  ;;  %v1340_v63 = vrot.slane %v13063_v53, 2 }
  0x40   : > { %10512 = vmatpush3.bf16.msra.mxu0 %v12335_v16  ;;  %18995 = vst [vmem:[#allocation25_spill] sm:$0xff] %v13067_v54  ;;  %vm13074_vm1 = vmand %vm889_vm5, %vm917_vm10  ;;  %v1341_v0 = vrot.slane %v13067_v54, 2  ;;  %v1343_v5 = vrot.slane %v13080_v57, 2  ;;  %v4812_v10 = vrot.slane %v13059_v52, 2  ;;  %vm890_vm3 = vcmp.ge.s32.totalorder %v862_v14, 0  ;;  %p13479_p4 = scmp.lt.s32.totalorder %s10093_s0, 24 }
  0x41   : > { %11814 = vmatpush3.bf16.msra.mxu1 %v12336_v17  ;;  %10513 = vmatprep.subr.bf16.mxu0 %v12337_v18  ;;  %v18997_v56 = vsel %vm13074_vm1, 4294967295, %v18996_v56  ;;  %18999 = vst [vmem:[#allocation27_spill] sm:$0xff] %v13080_v57  ;;  %v13087_v61 = vsel %vm13074_vm1, %v1051_v40, 0.0  ;;  %v13093_v1 = vsel %vm18585_vm13, %v1262_v58, %v1263_v59  ;;  %v13097_v4 = vsel %vm18585_vm13, %v4805_v60, %v1262_v58  ;;  %vm10149_vm2 = vmpackc.low %vm13046_vm12, %vm13036_vm11  ;;  %v13176_v40 = vld [vmem:[%s12984_s1 + $0x1c] sm:$0xf]  ;;  %v12360_v60 = vld [vmem:[%s18553_s5 + $0x48] sm:$0xff]  }
  0x42   : > { %11815 = vmatprep.subr.bf16.mxu1 %v18599_v2  ;;  %18998 = vst [vmem:[#allocation26_spill] sm:$0xff] %v18997_v56  ;;  %19000 = vst [vmem:[#allocation28_spill] sm:$0xff] %v13087_v61  ;;  %v1267_v3 = vrot.slane %v13087_v61, 1  ;;  %v13105_v7 = vsel %vm18585_vm13, %v1263_v59, %v1265_v62  ;;  %v13110_v9 = vsel %vm18583_vm14, %v1340_v63, %v1341_v0  ;;  %vm918_vm4 = vcmp.lt.s32.totalorder %v862_v14, 200  ;;  %s20163_s0 = smov (!%p13479_p4, %s10093_s0), 24 }
  0x43   : > { %19001 = vst [vmem:[#allocation29_spill] sm:$0xff] %v13093_v1  ;;  %19002 = vst [vmem:[#allocation30_spill] sm:$0xff] %v13097_v4  ;;  %v1418_v12 = vpack.c.bf16 %v13105_v7, %v13093_v1  ;;  %v13123_v13 = vsel %vm18583_vm14, %v1341_v0, %v1343_v5  ;;  %v13131_v18 = vsel %vm18583_vm14, %v4812_v10, %v1340_v63  ;;  %v833_v28 = vadd.s32 48, %v12956_v15  ;;  %s807_s24 = sadd.s32 %s12944_s2, %s20163_s0 }
  0x44   : > { %10514 = vmatpush3.bf16.msra.mxu0 %v12338_v20  ;;  %19003 = vst [vmem:[#allocation31_spill] sm:$0xff] %v13105_v7  ;;  %19004 = vst [vmem:[#allocation32_spill] sm:$0xff] %v13110_v9  ;;  %v13114_v11 = vsel %vm18585_vm13, %v1265_v62, %v1267_v3  ;;  %v1419_v17 = vpack.c.bf16 %v13123_v13, %v13110_v9  ;;  %v13135_v20 = vld [vmem:[%s12984_s1 + $0x10] sm:$0xf]  ;;  %v10477_v25 = vcombine.low %v13004_v29, %v13007_v30  ;;  %v12357_v29 = vld [vmem:[%s18553_s5 + $0x40] sm:$0xff]   ;;  %v19015_v59 = vmov 0 }
  0x45   : > { %11816 = vmatpush3.bf16.msra.mxu1 %v12339_v21  ;;  %10515 = vmatprep.subr.bf16.mxu0 %v12340_v23  ;;  %19005 = vst [vmem:[#allocation33_spill] sm:$0xff] %v13114_v11  ;;  %19006 = vst [vmem:[#allocation34_spill] sm:$0xff] %v13123_v13  ;;  %v13138_v21 = vld [vmem:[%s12984_s1 + $0x14] sm:$0xf]  ;;  %v13143_v23 = vld [vmem:[%s12984_s1 + $0x18] sm:$0xf]  ;;  %v1053_v33 = vunpack.c.l.bf16 %v13135_v20  ;;  %v863_v39 = vadd.s32 %v12998_v27, %v833_v28  ;;  %v1056_v14 = vunpack.c.l.bf16 %v13176_v40 }
  0x46   : > { %11817 = vmatprep.subr.bf16.mxu1 %v18599_v2  ;;  %19007 = vst [vmem:[#allocation35_spill] sm:$0xff] %v13131_v18  ;;  %1638 = vmatprep.mubr.bf16.mxu0 %v1418_v12  ;;  %vm13145_vm5 = vmand %vm890_vm3, %vm918_vm4  ;;  %v1054_v34 = vunpack.c.l.bf16 %v13138_v21  ;;  %v835_v35 = vadd.s32 64, %v12956_v15  ;;  %v12358_v30 = vld [vmem:[%s18553_s5] sm:$0xff]   ;;  %v1055_v47 = vunpack.c.l.bf16 %v13143_v23  ;;  %v19018_v62 = vmov 0  ;;  %s13640_s2 = sshll.u32 %s807_s24, 2 }
  0x47   : > { %v19009_v24 = vsel %vm13145_vm5, 4294967295, %v19008_v24  ;;  %vm10152_vm6 = vmpackc.low %vm13074_vm1, %vm13053_vm15  ;;  %vm891_vm7 = vcmp.ge.s32.totalorder %v863_v39, 0  ;;  %vm919_vm9 = vcmp.lt.s32.totalorder %v863_v39, 200  ;;  %v19023_v28 = vmov 0  ;;  %v13283_v39 = vld [vmem:[%s12984_s1 + $0x24] sm:$0xf]  ;;  %s13725_s3 = scalar_lea.vmem %s19140_s22, %s13640_s2 }
  0x48   : > { %10516 = vmatpush3.bf16.msra.mxu0 %v12341_v26  ;;  %19010 = vst [vmem:[#allocation36_spill] sm:$0xff] %v19009_v24  ;;  %v1345_v26 = vrot.slane %v13087_v61, 2  ;;  %v865_v46 = vadd.s32 %v12998_v27, %v835_v35  ;;  %vm13199_vm3 = vmand %vm891_vm7, %vm919_vm9  ;;  %v10479_v16 = vcombine.low %v13138_v21, %v13143_v23  ;;  %v1058_v8 = vunpack.c.l.bf16 %v13283_v39  ;;  %v12367_v21 = vld [vmem:[%s18553_s5 + $0x18] sm:$0xff]   ;;  %v13542_v7 = vld [vmem:[%s12984_s1 + $0x44] sm:$0xf]  ;;  %s20058_s2 = sld [smem:[#allocation6_spill]] }
  0x49   : > { %11818 = vmatpush3.bf16.msra.mxu1 %v12342_v31  ;;  %10517 = vmatprep.subr.bf16.mxu0 %v12343_v32  ;;  %v834_v31 = vadd.s32 56, %v12956_v15  ;;  %v13156_v32 = vsel %vm13145_vm5, %v1052_v19, 0.0  ;;  %v19016_v59 = vsel %vm13199_vm3, 4294967295, %v19015_v59  ;;  %v13214_v63 = vsel %vm13199_vm3, %v1053_v33, 0.0  ;;  %v12368_v23 = vld [vmem:[%s18553_s5 + $0x98] sm:$0xff]  }
  0x4a   : > { %11819 = vmatprep.subr.bf16.mxu1 %v18599_v2  ;;  %19011 = vst [vmem:[#allocation37_spill] sm:$0xff] %v13156_v32  ;;  %v1269_v36 = vrot.slane %v13156_v32, 1  ;;  %v13171_v37 = vsel %vm18583_vm14, %v1343_v5, %v1345_v26  ;;  %v1347_v38 = vrot.slane %v13156_v32, 2  ;;  %19017 = vst [vmem:[#allocation41_spill] sm:$0xff] %v19016_v59  ;;  %vm893_vm7 = vcmp.ge.s32.totalorder %v865_v46, 0 }
  0x4b   : > { %19012 = vst [vmem:[#allocation38_spill] sm:$0xff] %v13171_v37  ;;  %v864_v42 = vadd.s32 %v12998_v27, %v834_v31  ;;  %19021 = vst [vmem:[#allocation43_spill] sm:$0xff] %v13214_v63  ;;  %vm921_vm9 = vcmp.lt.s32.totalorder %v865_v46, 200  ;;  %v1271_v10 = vrot.slane %v13214_v63, 1  ;;  %v1349_v12 = vrot.slane %v13214_v63, 2 }
  0x4c   : > { %10518 = vmatpush3.bf16.msra.mxu0 %v12344_v43  ;;  %v836_v43 = vadd.s32 72, %v12956_v15  ;;  %v13244_v31 = vld [vmem:[%s12984_s1 + $0x20] sm:$0xf]  ;;  %v19106_v44 = vmov 0 }
  0x4d   : > { %11820 = vmatpush3.bf16.msra.mxu1 %v12345_v48  ;;  %10618 = vmatprep.subr.bf16.mxu0 %v12357_v29  ;;  %v13186_v48 = vsel %vm18585_vm13, %v1267_v3, %v1269_v36  ;;  %vm892_vm10 = vcmp.ge.s32.totalorder %v864_v42, 0  ;;  %v12361_v3 = vld [vmem:[%s18553_s5 + $0x8] sm:$0xff]   ;;  %v13250_v33 = vsel %vm18585_vm13, %v1269_v36, %v1271_v10  ;;  %v19029_v29 = vmov 0 }
  0x4e   : > { %11873 = vmatprep.subr.bf16.mxu1 %v18599_v2  ;;  %19013 = vst [vmem:[#allocation39_spill] sm:$0xff] %v13186_v48  ;;  %v1421_v55 = vpack.c.bf16 %v13186_v48, %v13114_v11  ;;  %v866_v0 = vadd.s32 %v12998_v27, %v836_v43  ;;  %19026 = vst [vmem:[#allocation46_spill] sm:$0xff] %v13250_v33  ;;  %v13595_v11 = vld [vmem:[%s12984_s1 + $0x48] sm:$0xf]  ;;  %s746_s19 = sand.u32 1, %s20058_s2  }
  0x4f   : > { %10151 = vmatmul.mubr.msk.bf16.vlgmr.msra.gmra.mrb[0].mxu0 %vm10149_vm2, %v10476_v50  ;;  %v13193_v50 = vsel %vm18583_vm14, %v1345_v26, %v1347_v38  ;;  %vm920_vm2 = vcmp.lt.s32.totalorder %v864_v42, 200  ;;  %vm13239_vm14 = vmand %vm893_vm7, %vm921_vm9  ;;  %s18319_s26 = smul.u32 192, %s746_s19 }
  0x50   : > { %11822 = vmatmul.mubr.bf16.vlgmr.msra.gmra.mrb[0].mxu1 %v1419_v17  ;;  %19014 = vst [vmem:[#allocation40_spill] sm:$0xff] %v13193_v50  ;;  %10619 = vmatpush3.bf16.msra.mxu0 %v12358_v30  ;;  %v1422_v58 = vpack.c.bf16 %v13193_v50, %v13171_v37  ;;  %vm13208_vm4 = vmand %vm892_vm10, %vm920_vm2  ;;  %v12362_v17 = vld [vmem:[%s18553_s5 + $0x88] sm:$0xff]   ;;  %vm894_vm10 = vcmp.ge.s32.totalorder %v866_v0, 0  ;;  %vm922_vm2 = vcmp.lt.s32.totalorder %v866_v0, 200  ;;  %v19024_v28 = vsel %vm13239_vm14, 4294967295, %v19023_v28  ;;  %v12364_v0 = vld [vmem:[%s18553_s5 + $0x10] sm:$0xff]  }
  0x51   : > { %11825 = vmatprep.mubr.msk.bf16.mxu1 %vm18590_vm0, %v18599_v2  ;;  %11874 = vmatpush3.bf16.msra.mxu1 %v12359_v41  ;;  %v19019_v62 = vsel %vm13208_vm4, 4294967295, %v19018_v62  ;;  %v13222_v5 = vsel %vm13208_vm4, %v1054_v34, 0.0  ;;  %19025 = vst [vmem:[#allocation45_spill] sm:$0xff] %v19024_v28  ;;  %v10478_v34 = vcombine.low %v13101_v6, %v13135_v20  ;;  %vm13259_vm7 = vmand %vm894_vm10, %vm922_vm2  ;;  %v13265_v30 = vsel %vm13239_vm14, %v1055_v47, 0.0  ;;  %v13475_v37 = vld [vmem:[%s12984_s1 + $0x3c] sm:$0xf] }
  0x52   : > { %11875 = vmatprep.subr.bf16.mxu1 %v18599_v2  ;;  %19020 = vst [vmem:[#allocation42_spill] sm:$0xff] %v19019_v62  ;;  %1646 = vmatprep.mubr.bf16.mxu0 %v1421_v55  ;;  %19022 = vst [vmem:[#allocation44_spill] sm:$0xff] %v13222_v5  ;;  %v1273_v19 = vrot.slane %v13222_v5, 1  ;;  %v1351_v26 = vrot.slane %v13222_v5, 2  ;;  %v19030_v29 = vsel %vm13259_vm7, 4294967295, %v19029_v29  ;;  %v13279_v36 = vsel %vm13259_vm7, %v1056_v14, 0.0 }
  0x53   : > { %10620 = vmatprep.subr.bf16.mxu0 %v12360_v60  ;;  %19031 = vst [vmem:[#allocation48_spill] sm:$0xff] %v19030_v29  ;;  %19032 = vst [vmem:[#allocation49_spill] sm:$0xff] %v13265_v30  ;;  %v18588_v43 = vrot.slane %v13279_v36, 1  ;;  %v1353_v46 = vrot.slane %v13265_v30, 2  ;;  %v18584_v55 = vrot.slane %v13279_v36, 2  ;;  %v838_v60 = vadd.s32 88, %v12956_v15 }
  0x54   : > { %10621 = vmatpush3.bf16.msra.mxu0 %v12361_v3  ;;  %v13272_v6 = vsel %vm18585_vm13, %v1271_v10, %v1273_v19  ;;  %19036 = vst [vmem:[#allocation52_spill] sm:$0xff] %v13279_v36  ;;  %vm10155_vm10 = vmpackc.low %vm13199_vm3, %vm13145_vm5  ;;  %v13315_v14 = vld [vmem:[%s12984_s1 + $0x28] sm:$0xf]  ;;  %s18349_s30 = scalar_lea.vmem [#allocation2], %s18319_s26 }
  0x55   : > { %19033 = vst [vmem:[#allocation50_spill] sm:$0xff] %v13272_v6  ;;  %11876 = vmatpush3.bf16.msra.mxu1 %v12362_v17  ;;  %v1424_v41 = vpack.c.bf16 %v13272_v6, %v13250_v33  ;;  %v12365_v17 = vld [vmem:[%s18553_s5 + $0x90] sm:$0xff]   ;;  %v19077_v6 = vmov 0 }
  0x56   : > { %11877 = vmatprep.subr.bf16.mxu1 %v18599_v2 }
  0x57   : > { %10154 = vmatmul.mubr.msk.bf16.gmra.mrb[4].mxu0 %vm10152_vm6, %v10477_v25  ;;  %v12363_v25 = vld [vmem:[%s18553_s5 + $0x50] sm:$0xff]   ;;  %vm19027_vm6 = vcmask 1045504  }
  0x58   : > { %11826 = vmatmul.mubr.bf16.gmra.mrb[4].mxu1 %v1422_v58  ;;  %v13257_v35 = vsel %vm19027_vm6, %v1347_v38, %v1349_v12  ;;  %vm19034_vm9 = vmmov %vm19027_vm6  ;;  %v1275_v38 = vrot.slane %v13265_v30, 1  ;;  %10622 = vmatprep.subr.bf16.mxu0 %v12363_v25  ;;  %v837_v58 = vadd.s32 80, %v12956_v15 }
  0x59   : > { %11829 = vmatprep.mubr.msk.bf16.mxu1 %vm18590_vm0, %v18599_v2  ;;  %19028 = vst [vmem:[#allocation47_spill] sm:$0xff] %v13257_v35  ;;  %v13275_v20 = vsel %vm19034_vm9, %v1349_v12, %v1351_v26  ;;  %1654 = vmatprep.mubr.bf16.mxu0 %v1424_v41  ;;  %vm19039_vm2 = vmmov %vm19027_vm6  ;;  %v1057_v12 = vunpack.c.l.bf16 %v13244_v31  ;;  %v13330_v41 = vld [vmem:[%s12984_s1 + $0x2c] sm:$0xf] }
  0x5a   : > { %19035 = vst [vmem:[#allocation51_spill] sm:$0xff] %v13275_v20  ;;  %v1425_v42 = vpack.c.bf16 %v13275_v20, %v13257_v35  ;;  %v13297_v47 = vsel %vm18585_vm13, %v1273_v19, %v1275_v38  ;;  %v13308_v3 = vsel %vm18585_vm13, %v1275_v38, %v18588_v43  ;;  %v13311_v10 = vsel %vm19039_vm2, %v1351_v26, %v1353_v46  ;;  %vm19041_vm6 = vmmov %vm19039_vm2 }
  0x5b   : > { %19037 = vst [vmem:[#allocation53_spill] sm:$0xff] %v13297_v47  ;;  %19038 = vst [vmem:[#allocation54_spill] sm:$0xff] %v13308_v3  ;;  %v1427_v19 = vpack.c.bf16 %v13308_v3, %v13297_v47  ;;  %v13325_v25 = vsel %vm19041_vm6, %v1353_v46, %v18584_v55  ;;  %v867_v38 = vadd.s32 %v12998_v27, %v837_v58  ;;  %10623 = vmatpush3.bf16.msra.mxu0 %v12364_v0  ;;  %v19046_v0 = vmov 0  ;;  %v13408_v3 = vld [vmem:[%s12984_s1 + $0x30] sm:$0xf] }
  0x5c   : > { %19040 = vst [vmem:[#allocation55_spill] sm:$0xff] %v13311_v10  ;;  %19042 = vst [vmem:[#allocation56_spill] sm:$0xff] %v13325_v25  ;;  %v868_v26 = vadd.s32 %v12998_v27, %v838_v60  ;;  %v839_v46 = vadd.s32 96, %v12956_v15  ;;  %v840_v55 = vadd.s32 104, %v12956_v15  ;;  %11878 = vmatpush3.bf16.msra.mxu1 %v12365_v17  ;;  %10624 = vmatprep.subr.bf16.mxu0 %v12366_v22  ;;  %v1060_v43 = vunpack.c.l.bf16 %v13330_v41 }
  0x5d   : > { %vm895_vm9 = vcmp.ge.s32.totalorder %v867_v38, 0  ;;  %vm923_vm6 = vcmp.lt.s32.totalorder %v867_v38, 200  ;;  %v841_v38 = vadd.s32 112, %v12956_v15  ;;  %11879 = vmatprep.subr.bf16.mxu1 %v18599_v2 }
  0x5e   : > { %vm896_vm2 = vcmp.ge.s32.totalorder %v868_v26, 0  ;;  %vm924_vm13 = vcmp.lt.s32.totalorder %v868_v26, 200  ;;  %v869_v58 = vadd.s32 %v12998_v27, %v839_v46  ;;  %v870_v60 = vadd.s32 %v12998_v27, %v840_v55  ;;  %v12369_v55 = vld [vmem:[%s18553_s5 + $0x60] sm:$0xff]  }
  0x5f   : > { %10157 = vmatmul.mubr.msk.bf16.gmra.mrb[8].mxu0 %vm10155_vm10, %v10478_v34  ;;  %v1428_v34 = vpack.c.bf16 %v13325_v25, %v13311_v10  ;;  %vm13356_vm10 = vmand %vm895_vm9, %vm923_vm6  ;;  %v842_v26 = vadd.s32 120, %v12956_v15  ;;  %v19051_v25 = vrot.slane %v13279_v36, 1  ;;  %v19055_v10 = vmov 0 }
  0x60   : > { %11830 = vmatmul.mubr.bf16.gmra.mrb[8].mxu1 %v1425_v42  ;;  %1662 = vmatprep.mubr.bf16.mxu0 %v1427_v19  ;;  %v19043_v42 = vmov 0  ;;  %vm13362_vm8 = vmand %vm896_vm2, %vm924_vm13  ;;  %v13368_v17 = vsel %vm13356_vm10, %v1057_v12, 0.0  ;;  %v1059_v19 = vunpack.c.l.bf16 %v13315_v14  ;;  %vm898_vm2 = vcmp.ge.s32.totalorder %v870_v60, 0 }
  0x61   : > { %11833 = vmatprep.mubr.msk.bf16.mxu1 %vm18590_vm0, %v18599_v2  ;;  %v19044_v42 = vsel %vm13356_vm10, 4294967295, %v19043_v42  ;;  %v19047_v0 = vsel %vm13362_vm8, 4294967295, %v19046_v0  ;;  %19049 = vst [vmem:[#allocation59_spill] sm:$0xff] %v13368_v17  ;;  %v13379_v46 = vsel %vm13362_vm8, %v1058_v8, 0.0  ;;  %v1279_v12 = vrot.slane %v13368_v17, 1  ;;  %10625 = vmatpush3.bf16.msra.mxu0 %v12367_v21 }
  0x62   : > { %19045 = vst [vmem:[#allocation57_spill] sm:$0xff] %v19044_v42  ;;  %19048 = vst [vmem:[#allocation58_spill] sm:$0xff] %v19047_v0  ;;  %11880 = vmatpush3.bf16.msra.mxu1 %v12368_v23  ;;  %v1281_v22 = vrot.slane %v13379_v46, 1  ;;  %v1357_v8 = vrot.slane %v13368_v17, 2  ;;  %vm925_vm6 = vcmp.lt.s32.totalorder %v869_v58, 200  ;;  %10626 = vmatprep.subr.bf16.mxu0 %v12369_v55  ;;  %vm19052_vm0 = vcmask 1046528  }
  0x63   : > { %19050 = vst [vmem:[#allocation60_spill] sm:$0xff] %v13379_v46  ;;  %11881 = vmatprep.subr.bf16.mxu1 %v18599_v2  ;;  %v13398_v21 = vsel %vm19052_vm0, %v19051_v25, %v1279_v12  ;;  %v1359_v23 = vrot.slane %v13379_v46, 2  ;;  %vm926_vm13 = vcmp.lt.s32.totalorder %v870_v60, 200  ;;  %vm19054_vm9 = vcmp.ge.s32.totalorder %v869_v58, 0  ;;  %v12370_v55 = vld [vmem:[%s18553_s5 + $0x20] sm:$0xff]   ;;  %vm19058_vm5 = vmmov %vm19052_vm0 }
  0x64   : > { %19053 = vst [vmem:[#allocation61_spill] sm:$0xff] %v13398_v21  ;;  %vm13402_vm3 = vmand %vm19054_vm9, %vm925_vm6  ;;  %v871_v20 = vadd.s32 %v12998_v27, %v841_v38  ;;  %v13414_v2 = vsel %vm19058_vm5, %v1279_v12, %v1281_v22  ;;  %v19060_v25 = vmov 0  ;;  %v872_v60 = vadd.s32 %v12998_v27, %v842_v26  ;;  %v13426_v38 = vld [vmem:[%s12984_s1 + $0x34] sm:$0xf] }
  0x65   : > { %v19056_v10 = vsel %vm13402_vm3, 4294967295, %v19055_v10  ;;  %19059 = vst [vmem:[#allocation63_spill] sm:$0xff] %v13414_v2  ;;  %vm13416_vm0 = vmand %vm898_vm2, %vm926_vm13  ;;  %v13422_v58 = vsel %vm13402_vm3, %v1059_v19, 0.0  ;;  %v1430_v35 = vpack.c.bf16 %v13414_v2, %v13398_v21  ;;  %10627 = vmatpush3.bf16.msra.mxu0 %v12370_v55  ;;  %v12371_v19 = vld [vmem:[%s18553_s5 + $0xa0] sm:$0xff]   ;;  %v19066_v26 = vrot.slane %v13279_v36, 2 }
  0x66   : > { %19057 = vst [vmem:[#allocation62_spill] sm:$0xff] %v19056_v10  ;;  %v19061_v25 = vsel %vm13416_vm0, 4294967295, %v19060_v25  ;;  %19063 = vst [vmem:[#allocation65_spill] sm:$0xff] %v13422_v58  ;;  %v13432_v50 = vsel %vm13416_vm0, %v1060_v43, 0.0  ;;  %v1283_v12 = vrot.slane %v13422_v58, 1  ;;  %vm19067_vm13 = vcmask 1045504   ;;  %11882 = vmatpush3.bf16.msra.mxu1 %v12371_v19 }
  0x67   : > { %19062 = vst [vmem:[#allocation64_spill] sm:$0xff] %v19061_v25  ;;  %19064 = vst [vmem:[#allocation66_spill] sm:$0xff] %v13432_v50  ;;  %v13447_v43 = vsel %vm19067_vm13, %v19066_v26, %v1357_v8  ;;  %v1285_v2 = vrot.slane %v13432_v50, 1  ;;  %v1361_v55 = vrot.slane %v13422_v58, 2  ;;  %vm899_vm9 = vcmp.ge.s32.totalorder %v871_v20, 0 }
  0x68   : > { %vm19065_vm5 = vmpackc.low %vm13239_vm14, %vm13208_vm4  ;;  %11834 = vmatmul.mubr.bf16.gmra.mrb[12].mxu1 %v1428_v34  ;;  %19068 = vst [vmem:[#allocation67_spill] sm:$0xff] %v13447_v43  ;;  %v19069_v21 = vmov 0.0   ;;  %vm19070_vm2 = vmmov 0   ;;  %vm927_vm14 = vcmp.lt.s32.totalorder %v871_v20, 200  ;;  %vm928_vm4 = vcmp.lt.s32.totalorder %v872_v60, 200  ;;  %v12372_v34 = vld [vmem:[%s18553_s5 + $0x68] sm:$0xff]  }
  0x69   : > { %10160 = vmatmul.mubr.msk.bf16.gmra.mrb[12].mxu0 %vm19065_vm5, %v10479_v16  ;;  %11837 = vmatprep.mubr.msk.bf16.mxu1 %vm19070_vm2, %v19069_v21  ;;  %vm19071_vm6 = vmmov %vm19067_vm13  ;;  %vm900_vm5 = vcmp.ge.s32.totalorder %v872_v60, 0  ;;  %vm19073_vm13 = vcmask 1046528   ;;  %v13472_v20 = vld [vmem:[%s12984_s1 + $0x38] sm:$0xf]  ;;  %v1062_v13 = vunpack.c.l.bf16 %v13426_v38  ;;  %v12374_v60 = vld [vmem:[%s18553_s5 + $0xa8] sm:$0xff]  }
  0x6a   : > { %1670 = vmatprep.mubr.bf16.mxu0 %v1430_v35  ;;  %v13454_v16 = vsel %vm19071_vm6, %v1357_v8, %v1359_v23  ;;  %v13460_v26 = vsel %vm19073_vm13, %v1281_v22, %v1283_v12  ;;  %vm19075_vm1 = vmmov %vm19073_vm13  ;;  %v1061_v8 = vunpack.c.l.bf16 %v13408_v3  ;;  %v12373_v22 = vld [vmem:[%s18553_s5 + $0x28] sm:$0xff]   ;;  %v19081_v35 = vmov 0  ;;  %10628 = vmatprep.subr.bf16.mxu0 %v12372_v34 }
  0x6b   : > { %19072 = vst [vmem:[#allocation68_spill] sm:$0xff] %v13454_v16  ;;  %19074 = vst [vmem:[#allocation69_spill] sm:$0xff] %v13460_v26  ;;  %v13463_v47 = vsel %vm19075_vm1, %v1283_v12, %v1285_v2  ;;  %v10480_v12 = vcombine.low %v13176_v40, %v13244_v31  ;;  %11883 = vmatprep.subr.bf16.mxu1 %v19069_v21  ;;  %v1431_v19 = vpack.c.bf16 %v13454_v16, %v13447_v43 }
  0x6c   : > { %19076 = vst [vmem:[#allocation70_spill] sm:$0xff] %v13463_v47  ;;  %vm13466_vm15 = vmand %vm899_vm9, %vm927_vm14  ;;  %v843_v40 = vadd.s32 128, %v12956_v15  ;;  %v844_v31 = vadd.s32 136, %v12956_v15  ;;  %10629 = vmatpush3.bf16.msra.mxu0 %v12373_v22  ;;  %v1433_v34 = vpack.c.bf16 %v13463_v47, %v13460_v26  ;;  %v19088_v43 = vrot.slane %v13432_v50, 2  ;;  %v13529_v26 = vld [vmem:[%s12984_s1 + $0x40] sm:$0xf]  ;;  %11884 = vmatpush3.bf16.msra.mxu1 %v12374_v60 }
  0x6d   : > { %v19078_v6 = vsel %vm13466_vm15, 4294967295, %v19077_v6  ;;  %vm13489_vm14 = vmand %vm900_vm5, %vm928_vm4  ;;  %v13499_v33 = vsel %vm13466_vm15, %v1061_v8, 0.0  ;;  %11885 = vmatprep.subr.bf16.mxu1 %v19069_v21  ;;  %v10481_v60 = vcombine.low %v13283_v39, %v13315_v14  ;;  %v1065_v14 = vunpack.c.l.bf16 %v13529_v26 }
  0x6e   : > { %19079 = vst [vmem:[#allocation71_spill] sm:$0xff] %v19078_v6  ;;  %v19082_v35 = vsel %vm13489_vm14, 4294967295, %v19081_v35  ;;  %19084 = vst [vmem:[#allocation73_spill] sm:$0xff] %v13499_v33  ;;  %v13517_v16 = vsel %vm13489_vm14, %v1062_v13, 0.0  ;;  %v1287_v22 = vrot.slane %v13499_v33, 1  ;;  %v873_v9 = vadd.s32 %v12998_v27, %v843_v40 }
  0x6f   : > { %19083 = vst [vmem:[#allocation72_spill] sm:$0xff] %v19082_v35  ;;  %vm10161_vm1 = vmpackc.low %vm13356_vm10, %vm13259_vm7  ;;  %v1289_v18 = vrot.slane %v13517_v16, 1  ;;  %v874_v47 = vadd.s32 %v12998_v27, %v844_v31  ;;  %v1365_v13 = vrot.slane %v13499_v33, 2  ;;  %v19112_v1 = vrot.slane %v13517_v16, 2 }
  0x70   : > { %vm19085_vm4 = vmmov %vm19071_vm6  ;;  %19087 = vst [vmem:[#allocation75_spill] sm:$0xff] %v13517_v16  ;;  %11838 = vmatmul.mubr.bf16.gmra.mrb[16].mxu1 %v1431_v19  ;;  %v19095_v19 = vmov 0 }
  0x71   : > { %v13513_v8 = vsel %vm19085_vm4, %v1359_v23, %v1361_v55  ;;  %vm19089_vm9 = vmmov %vm19085_vm4  ;;  %v1063_v23 = vunpack.c.l.bf16 %v13472_v20  ;;  %10163 = vmatmul.mubr.msk.bf16.gmra.mrb[16].mxu0 %vm10161_vm1, %v10480_v12  ;;  %vm902_vm4 = vcmp.ge.s32.totalorder %v874_v47, 0  ;;  %11841 = vmatprep.mubr.msk.bf16.mxu1 %vm19070_vm2, %v19069_v21  ;;  %vm930_vm12 = vcmp.lt.s32.totalorder %v874_v47, 200 }
  0x72   : > { %19086 = vst [vmem:[#allocation74_spill] sm:$0xff] %v13513_v8  ;;  %v13523_v48 = vsel %vm19089_vm9, %v1361_v55, %v19088_v43  ;;  %v1064_v43 = vunpack.c.l.bf16 %v13475_v37  ;;  %v845_v55 = vadd.s32 144, %v12956_v15  ;;  %vm19091_vm6 = vmmov %vm19073_vm13  ;;  %vm901_vm13 = vcmp.ge.s32.totalorder %v873_v9, 0  ;;  %1678 = vmatprep.mubr.bf16.mxu0 %v1433_v34 }
  0x73   : > { %19090 = vst [vmem:[#allocation76_spill] sm:$0xff] %v13523_v48  ;;  %v13551_v40 = vsel %vm19091_vm6, %v1285_v2, %v1287_v22  ;;  %vm19093_vm5 = vmmov %vm19091_vm6  ;;  %vm929_vm9 = vcmp.lt.s32.totalorder %v873_v9, 200  ;;  %v1434_v12 = vpack.c.bf16 %v13523_v48, %v13513_v8  ;;  %v19098_v9 = vmov 0 }
  0x74   : > { %19092 = vst [vmem:[#allocation77_spill] sm:$0xff] %v13551_v40  ;;  %v13554_v31 = vsel %vm19093_vm5, %v1287_v22, %v1289_v18  ;;  %vm13563_vm1 = vmand %vm901_vm13, %vm929_vm9  ;;  %v846_v22 = vadd.s32 152, %v12956_v15  ;;  %v875_v34 = vadd.s32 %v12998_v27, %v845_v55  ;;  %v847_v2 = vadd.s32 160, %v12956_v15 }
  0x75   : > { %19094 = vst [vmem:[#allocation78_spill] sm:$0xff] %v13554_v31  ;;  %v19096_v19 = vsel %vm13563_vm1, 4294967295, %v19095_v19  ;;  %v1436_v39 = vpack.c.bf16 %v13554_v31, %v13551_v40  ;;  %vm13571_vm6 = vmand %vm902_vm4, %vm930_vm12  ;;  %v13577_v47 = vsel %vm13563_vm1, %v1063_v23, 0.0  ;;  %v1066_v31 = vunpack.c.l.bf16 %v13542_v7 }
  0x76   : > { %19097 = vst [vmem:[#allocation79_spill] sm:$0xff] %v19096_v19  ;;  %v19099_v9 = vsel %vm13571_vm6, 4294967295, %v19098_v9  ;;  %19101 = vst [vmem:[#allocation81_spill] sm:$0xff] %v13577_v47  ;;  %v13583_v55 = vsel %vm13571_vm6, %v1064_v43, 0.0  ;;  %v876_v48 = vadd.s32 %v12998_v27, %v846_v22  ;;  %v848_v8 = vadd.s32 168, %v12956_v15 }
  0x77   : > { %19100 = vst [vmem:[#allocation80_spill] sm:$0xff] %v19099_v9  ;;  %19102 = vst [vmem:[#allocation82_spill] sm:$0xff] %v13583_v55  ;;  %v1291_v23 = vrot.slane %v13577_v47, 1  ;;  %v1293_v40 = vrot.slane %v13583_v55, 1  ;;  %vm903_vm5 = vcmp.ge.s32.totalorder %v875_v34, 0  ;;  %vm931_vm13 = vcmp.lt.s32.totalorder %v875_v34, 200 }
  0x78   : > { %vm10164_vm12 = vmpackc.low %vm13402_vm3, %vm13362_vm8  ;;  %vm904_vm4 = vcmp.ge.s32.totalorder %v876_v48, 0  ;;  %vm932_vm9 = vcmp.lt.s32.totalorder %v876_v48, 200  ;;  %v19103_v43 = vmov 0  ;;  %v1369_v22 = vrot.slane %v13577_v47, 2  ;;  %11842 = vmatmul.mubr.bf16.gmra.mrb[20].mxu1 %v1434_v12 }
  0x79   : > { %vm13597_vm10 = vmand %vm903_vm5, %vm931_vm13  ;;  %v877_v4 = vadd.s32 %v12998_v27, %v847_v2  ;;  %10166 = vmatmul.mubr.msk.bf16.gmra.mrb[20].mxu0 %vm10164_vm12, %v10481_v60  ;;  %v19109_v34 = vrot.slane %v13432_v50, 2  ;;  %vm19110_vm3 = vcmask 1045504   ;;  %11845 = vmatprep.mubr.msk.bf16.mxu1 %vm19070_vm2, %v19069_v21  ;;  %vm19116_vm12 = vcmask 1046528   ;;  %v13638_v2 = vld [vmem:[%s12984_s1 + $0x4c] sm:$0xf] }
  0x7a   : > { %v19104_v43 = vsel %vm13597_vm10, 4294967295, %v19103_v43  ;;  %vm13604_vm7 = vmand %vm904_vm4, %vm932_vm9  ;;  %v13622_v33 = vsel %vm13597_vm10, %v1065_v14, 0.0  ;;  %1686 = vmatprep.mubr.bf16.mxu0 %v1436_v39  ;;  %v13627_v60 = vsel %vm19116_vm12, %v1289_v18, %v1291_v23  ;;  %v1067_v39 = vunpack.c.l.bf16 %v13595_v11 }
  0x7b   : > { %19105 = vst [vmem:[#allocation83_spill] sm:$0xff] %v19104_v43  ;;  %v19107_v44 = vsel %vm13604_vm7, 4294967295, %v19106_v44  ;;  %v13612_v48 = vsel %vm19110_vm3, %v19109_v34, %v1365_v13  ;;  %vm19113_vm5 = vmmov %vm19110_vm3  ;;  %vm905_vm13 = vcmp.ge.s32.totalorder %v877_v4, 0  ;;  %vm933_vm4 = vcmp.lt.s32.totalorder %v877_v4, 200  ;;  %v13664_v34 = vld [vmem:[%s12984_s1 + $0x54] sm:$0xf] }
  0x7c   : > { %19108 = vst [vmem:[#allocation84_spill] sm:$0xff] %v19107_v44  ;;  %19111 = vst [vmem:[#allocation85_spill] sm:$0xff] %v13612_v48  ;;  %v13617_v52 = vsel %vm19113_vm5, %v1365_v13, %v19112_v1  ;;  %v13634_v1 = vsel %vm13604_vm7, %v1066_v31, 0.0  ;;  %v878_v13 = vadd.s32 %v12998_v27, %v848_v8  ;;  %v10482_v18 = vcombine.low %v13330_v41, %v13408_v3 }
  0x7d   : > { %19114 = vst [vmem:[#allocation86_spill] sm:$0xff] %v13617_v52  ;;  %19115 = vst [vmem:[#allocation87_spill] sm:$0xff] %v13622_v33  ;;  %v1437_v14 = vpack.c.bf16 %v13617_v52, %v13612_v48  ;;  %v1295_v31 = vrot.slane %v13622_v33, 1  ;;  %v19121_v8 = vmov 0  ;;  %v1068_v41 = vunpack.c.l.bf16 %v13638_v2 }
  0x7e   : > { %19117 = vst [vmem:[#allocation88_spill] sm:$0xff] %v13627_v60  ;;  %vm19118_vm3 = vmmov %vm19116_vm12  ;;  %vm906_vm9 = vcmp.ge.s32.totalorder %v878_v13, 0  ;;  %v1373_v47 = vrot.slane %v13622_v33, 2  ;;  %v19124_v52 = vmov 0  ;;  %v849_v50 = vadd.s32 176, %v12956_v15 }
  0x7f   : > { %v13630_v12 = vsel %vm19118_vm3, %v1291_v23, %v1293_v40  ;;  %19120 = vst [vmem:[#allocation90_spill] sm:$0xff] %v13634_v1  ;;  %vm13648_vm5 = vmand %vm905_vm13, %vm933_vm4  ;;  %v13653_v23 = vld [vmem:[%s12984_s1 + $0x50] sm:$0xf]  ;;  %vm934_vm3 = vcmp.lt.s32.totalorder %v878_v13, 200  ;;  %v850_v3 = vadd.s32 184, %v12956_v15  ;;  %vm19130_vm4 = vcmask 1045504  }
  0x80   : > { %19119 = vst [vmem:[#allocation89_spill] sm:$0xff] %v13630_v12  ;;  %v19122_v8 = vsel %vm13648_vm5, 4294967295, %v19121_v8  ;;  %vm10167_vm12 = vmpackc.low %vm13466_vm15, %vm13416_vm0  ;;  %v1439_v4 = vpack.c.bf16 %v13630_v12, %v13627_v60  ;;  %v13673_v48 = vsel %vm13648_vm5, %v1067_v39, 0.0  ;;  %v879_v46 = vadd.s32 %v12998_v27, %v849_v50  ;;  %11846 = vmatmul.mubr.bf16.gmra.mrb[24].mxu1 %v1437_v14  ;;  %v13708_v13 = vld [vmem:[%s12984_s1 + $0x58] sm:$0xf] }
  0x81   : > { %19123 = vst [vmem:[#allocation91_spill] sm:$0xff] %v19122_v8  ;;  %vm13667_vm13 = vmand %vm906_vm9, %vm934_vm3  ;;  %v1299_v60 = vrot.slane %v13673_v48, 1  ;;  %v880_v17 = vadd.s32 %v12998_v27, %v850_v3  ;;  %10169 = vmatmul.mubr.msk.bf16.gmra.mrb[24].mxu0 %vm10167_vm12, %v10482_v18  ;;  %v19132_v58 = vrot.slane %v13583_v55, 2  ;;  %vm19135_vm3 = vcmask 1046528   ;;  %v13711_v18 = vld [vmem:[%s12984_s1 + $0x5c] sm:$0xf]  ;;  %11849 = vmatprep.mubr.msk.bf16.mxu1 %vm19070_vm2, %v19069_v21 }
  0x82   : > { %v19125_v52 = vsel %vm13667_vm13, 4294967295, %v19124_v52  ;;  %19127 = vst [vmem:[#allocation93_spill] sm:$0xff] %v13673_v48  ;;  %v13680_v12 = vsel %vm13667_vm13, %v1068_v41, 0.0  ;;  %v19129_v41 = vrot.slane %v13517_v16, 2  ;;  %vm19133_vm9 = vmmov %vm19130_vm4  ;;  %v13704_v50 = vsel %vm19135_vm3, %v1293_v40, %v1295_v31  ;;  %1694 = vmatprep.mubr.bf16.mxu0 %v1439_v4  ;;  %v13760_v16 = vld [vmem:[%s13725_s3] sm:$0xf] }
  0x83   : > { %19126 = vst [vmem:[#allocation92_spill] sm:$0xff] %v19125_v52  ;;  %19128 = vst [vmem:[#allocation94_spill] sm:$0xff] %v13680_v12  ;;  %v13701_v39 = vsel %vm19133_vm9, %v1369_v22, %v19132_v58  ;;  %v1069_v3 = vunpack.c.l.bf16 %v13653_v23  ;;  %v19137_v14 = vrot.slane %v13634_v1, 1  ;;  %vm908_vm9 = vcmp.ge.s32.totalorder %v880_v17, 0 }
  0x84   : > { %v13696_v33 = vsel %vm19130_vm4, %v19129_v41, %v1369_v22  ;;  %19134 = vst [vmem:[#allocation96_spill] sm:$0xff] %v13701_v39  ;;  %19136 = vst [vmem:[#allocation97_spill] sm:$0xff] %v13704_v50  ;;  %vm907_vm4 = vcmp.ge.s32.totalorder %v879_v46, 0  ;;  %v1070_v58 = vunpack.c.l.bf16 %v13664_v34  ;;  %vm936_vm15 = vcmp.lt.s32.totalorder %v880_v17, 200 }
  0x85   : > { %19131 = vst [vmem:[#allocation95_spill] sm:$0xff] %v13696_v33  ;;  %vm19138_vm12 = vmmov %vm19135_vm3  ;;  %vm935_vm3 = vcmp.lt.s32.totalorder %v879_v46, 200  ;;  %v10483_v40 = vcombine.low %v13426_v38, %v13472_v20  ;;  %v19141_v22 = vmov 0  ;;  %v852_v4 = vadd.s32 200, %v12956_v15 }
  0x86   : > { %v13718_v41 = vsel %vm19138_vm12, %v1295_v31, %v19137_v14  ;;  %vm13729_vm0 = vmand %vm907_vm4, %vm935_vm3  ;;  %v851_v31 = vadd.s32 192, %v12956_v15  ;;  %v1440_v17 = vpack.c.bf16 %v13701_v39, %v13696_v33  ;;  %v19144_v14 = vmov 0 }
  0x87   : > { %19139 = vst [vmem:[#allocation98_spill] sm:$0xff] %v13718_v41  ;;  %v19142_v22 = vsel %vm13729_vm0, 4294967295, %v19141_v22  ;;  %v1442_v46 = vpack.c.bf16 %v13718_v41, %v13704_v50  ;;  %vm13739_vm12 = vmand %vm908_vm9, %vm936_vm15  ;;  %v13745_v38 = vsel %vm13729_vm0, %v1069_v3, 0.0  ;;  %v853_v20 = vadd.s32 208, %v12956_v15 }
  0x88   : > { %19143 = vst [vmem:[#allocation99_spill] sm:$0xff] %v19142_v22  ;;  %v19145_v14 = vsel %vm13739_vm12, 4294967295, %v19144_v14  ;;  %19147 = vst [vmem:[#allocation101_spill] sm:$0xff] %v13745_v38  ;;  %v13754_v39 = vsel %vm13739_vm12, %v1070_v58, 0.0  ;;  %v881_v41 = vadd.s32 %v12998_v27, %v851_v31  ;;  %v1071_v33 = vunpack.c.l.bf16 %v13708_v13  ;;  %11850 = vmatmul.mubr.bf16.gmra.mrb[28].mxu1 %v1440_v17 }
  0x89   : > { %19146 = vst [vmem:[#allocation100_spill] sm:$0xff] %v19145_v14  ;;  %vm10170_vm4 = vmpackc.low %vm13563_vm1, %vm13489_vm14  ;;  %v1072_v50 = vunpack.c.l.bf16 %v13711_v18  ;;  %v1303_v3 = vrot.slane %v13745_v38, 1  ;;  %v1381_v15 = vrot.slane %v13745_v38, 2  ;;  %v882_v36 = vadd.s32 %v12998_v27, %v852_v4  ;;  %11853 = vmatprep.mubr.msk.bf16.mxu1 %vm19070_vm2, %v19069_v21 }
  0x8a   : > { %19148 = vst [vmem:[#allocation102_spill] sm:$0xff] %v13754_v39  ;;  %v883_v30 = vadd.s32 %v12998_v27, %v853_v20  ;;  %v19149_v5 = vrot.slane %v13583_v55, 2  ;;  %vm19150_vm15 = vcmask 1045504   ;;  %vm909_vm9 = vcmp.ge.s32.totalorder %v881_v41, 0  ;;  %10172 = vmatmul.mubr.msk.bf16.gmra.mrb[28].mxu0 %vm10170_vm4, %v10483_v40 }
  0x8b   : > { %vm937_vm3 = vcmp.lt.s32.totalorder %v881_v41, 200  ;;  %v19152_v31 = vrot.slane %v13634_v1, 2  ;;  %vm19153_vm1 = vmmov %vm19150_vm15  ;;  %vm910_vm14 = vcmp.ge.s32.totalorder %v882_v36, 0  ;;  %vm938_vm8 = vcmp.lt.s32.totalorder %v882_v36, 200  ;;  %1702 = vmatprep.mubr.bf16.mxu0 %v1442_v46 }
  0x8c   : > { %v13769_v58 = vsel %vm19150_vm15, %v19149_v5, %v1373_v47  ;;  %vm13776_vm11 = vmand %vm909_vm9, %vm937_vm3  ;;  %v19155_v4 = vmov 0  ;;  %v1079_v20 = vunpack.c.l.bf16 %v13760_v16  ;;  %v19158_v5 = vrot.slane %v13634_v1, 1 }
  0x8d   : > { %19151 = vst [vmem:[#allocation103_spill] sm:$0xff] %v13769_v58  ;;  %v13774_v63 = vsel %vm19153_vm1, %v1373_v47, %v19152_v31  ;;  %v19156_v4 = vsel %vm13776_vm11, 4294967295, %v19155_v4  ;;  %vm19159_vm4 = vcmask 1046528   ;;  %v19161_v47 = vrot.slane %v13680_v12, 1  ;;  %vm13793_vm15 = vmand %vm910_vm14, %vm938_vm8 }
  0x8e   : > { %19154 = vst [vmem:[#allocation104_spill] sm:$0xff] %v13774_v63  ;;  %19157 = vst [vmem:[#allocation105_spill] sm:$0xff] %v19156_v4  ;;  %v13786_v41 = vsel %vm19159_vm4, %v19158_v5, %v1299_v60  ;;  %v19164_v36 = vmov 0  ;;  %v13799_v17 = vsel %vm13776_vm11, %v1071_v33, 0.0  ;;  %vm911_vm9 = vcmp.ge.s32.totalorder %v883_v30, 0 }
  0x8f   : > { %19160 = vst [vmem:[#allocation106_spill] sm:$0xff] %v13786_v41  ;;  %vm19162_vm1 = vmmov %vm19159_vm4  ;;  %v19165_v36 = vsel %vm13793_vm15, 4294967295, %v19164_v36  ;;  %v1305_v46 = vrot.slane %v13754_v39, 1  ;;  %v1383_v31 = vrot.slane %v13754_v39, 2  ;;  %v13805_v5 = vsel %vm13793_vm15, %v1072_v50, 0.0 }
  0x90   : > { %v13791_v40 = vsel %vm19162_vm1, %v1299_v60, %v19161_v47  ;;  %19166 = vst [vmem:[#allocation108_spill] sm:$0xff] %v19165_v36  ;;  %19167 = vst [vmem:[#allocation109_spill] sm:$0xff] %v13799_v17  ;;  %vm939_vm3 = vcmp.lt.s32.totalorder %v883_v30, 200  ;;  %v1307_v60 = vrot.slane %v13799_v17, 1  ;;  %v1385_v47 = vrot.slane %v13799_v17, 2 }
  0x91   : > { %19163 = vst [vmem:[#allocation107_spill] sm:$0xff] %v13791_v40  ;;  %19168 = vst [vmem:[#allocation110_spill] sm:$0xff] %v13805_v5  ;;  %v19169_v27 = vmov 0  ;;  %v10484_v33 = vcombine.low %v13475_v37, %v13529_v26  ;;  %v1443_v50 = vpack.c.bf16 %v13774_v63, %v13769_v58  ;;  %v1309_v30 = vrot.slane %v13805_v5, 1 }
  0x92   : > { %vm13809_vm8 = vmand %vm911_vm9, %vm939_vm3  ;;  %v1445_v39 = vpack.c.bf16 %v13791_v40, %v13786_v41  ;;  %v1387_v38 = vrot.slane %v13805_v5, 2  ;;  %v19174_v26 = vrot.slane %v13673_v48, 2  ;;  %vm19176_vm1 = vcmask 1045504  }
  0x93   : > { %v19170_v27 = vsel %vm13809_vm8, 4294967295, %v19169_v27  ;;  %vm10173_vm14 = vmpackc.low %vm13597_vm10, %vm13571_vm6  ;;  %v13824_v17 = vsel %vm13809_vm8, %v1079_v20, 0.0  ;;  %11854 = vmatmul.mubr.bf16.gmra.mrb[32].mxu1 %v1443_v50  ;;  %v19175_v20 = vrot.slane %v13634_v1, 2  ;;  %v19178_v40 = vrot.slane %v13680_v12, 2 }
  0x94   : > { %19171 = vst [vmem:[#allocation111_spill] sm:$0xff] %v19170_v27  ;;  %19172 = vst [vmem:[#allocation112_spill] sm:$0xff] %v13824_v17  ;;  %v13834_v37 = vrot.slane %v13824_v17, 1  ;;  %10175 = vmatmul.mubr.msk.bf16.gmra.mrb[32].mxu0 %vm10173_vm14, %v10484_v33  ;;  %11857 = vmatprep.mubr.msk.bf16.mxu1 %vm19070_vm2, %v19069_v21  ;;  %v19179_v58 = vmov %v19174_v26  ;;  %v19182_v33 = vrot.slane %v13680_v12, 1  ;;  %vm19183_vm3 = vcmask 1046528  }
  0x95   : > { %vm10176_vm4 = vmpackc.low %vm13648_vm5, %vm13604_vm7  ;;  %1710 = vmatprep.mubr.bf16.mxu0 %v1445_v39  ;;  %v13843_v63 = vsel %vm19176_vm1, %v19175_v20, %v19174_v26  ;;  %v10485_v5 = vcombine.low %v13542_v7, %v13595_v11  ;;  %v19187_v7 = vmov %v19178_v40 }
  0x96   : > { %19173 = vst [vmem:[#allocation113_spill] sm:$0xff] %v13834_v37  ;;  %19177 = vst [vmem:[#allocation114_spill] sm:$0xff] %v13843_v63  ;;  %v13855_v39 = vsel %vm19183_vm3, %v19182_v33, %v1303_v3 }
  0x97   : > { %vm19180_vm9 = vmmov %vm19176_vm1  ;;  %19184 = vst [vmem:[#allocation116_spill] sm:$0xff] %v13855_v39 }
  0x98   : > { %v13850_v41 = vsel %vm19180_vm9, %v19179_v58, %v19178_v40  ;;  %vm19185_vm14 = vmmov %vm19183_vm3  ;;  %v13880_v11 = vsel %vm19180_vm9, %v19187_v7, %v1381_v15  ;;  %v12376_v7 = vld [vmem:[%s18553_s5 + $0x30] sm:$0xff]  }
  0x99   : > { %19181 = vst [vmem:[#allocation115_spill] sm:$0xff] %v13850_v41  ;;  %v13858_v50 = vsel %vm19185_vm14, %v1303_v3, %v1305_v46  ;;  %v1446_v26 = vpack.c.bf16 %v13850_v41, %v13843_v63  ;;  %vm10179_vm1 = vmpackc.low %vm13729_vm0, %vm13667_vm13  ;;  %v13886_v58 = vsel %vm19185_vm14, %v1305_v46, %v1307_v60 }
  0x9a   : > { %19186 = vst [vmem:[#allocation117_spill] sm:$0xff] %v13858_v50  ;;  %v1448_v20 = vpack.c.bf16 %v13858_v50, %v13855_v39  ;;  %19188 = vst [vmem:[#allocation118_spill] sm:$0xff] %v13880_v11 }
  0x9b   : > { %11858 = vmatmul.mubr.bf16.gmra.mrb[36].mxu1 %v1446_v26  ;;  %vm19189_vm3 = vmmov %vm19180_vm9  ;;  %19191 = vst [vmem:[#allocation120_spill] sm:$0xff] %v13886_v58 }
  0x9c   : > { %10178 = vmatmul.mubr.msk.bf16.gmra.mrb[36].mxu0 %vm10176_vm4, %v10485_v5  ;;  %11861 = vmatprep.mubr.msk.bf16.mxu1 %vm19070_vm2, %v19069_v21  ;;  %v13883_v3 = vsel %vm19189_vm3, %v1381_v15, %v1383_v31  ;;  %vm19192_vm0 = vmmov %vm19185_vm14  ;;  %v10486_v5 = vcombine.low %v13638_v2, %v13653_v23  ;;  %v10487_v23 = vcombine.low %v13664_v34, %v13708_v13 }
  0x9d   : > { %1718 = vmatprep.mubr.bf16.mxu0 %v1448_v20  ;;  %19190 = vst [vmem:[#allocation119_spill] sm:$0xff] %v13883_v3  ;;  %v13889_v40 = vsel %vm19192_vm0, %v1307_v60, %v1309_v30  ;;  %v1449_v33 = vpack.c.bf16 %v13883_v3, %v13880_v11  ;;  %vm19194_vm4 = vmmov %vm19189_vm3  ;;  %v10488_v13 = vcombine.low %v13711_v18, %v13760_v16  ;;  %v12377_v16 = vld [vmem:[%s18553_s5 + $0xb0] sm:$0xff]   ;;  %v12378_v18 = vld [vmem:[%s18553_s5 + $0x78] sm:$0xff]  }
  0x9e   : > { %19193 = vst [vmem:[#allocation121_spill] sm:$0xff] %v13889_v40  ;;  %v1451_v26 = vpack.c.bf16 %v13889_v40, %v13886_v58  ;;  %v13900_v15 = vsel %vm19194_vm4, %v1383_v31, %v1385_v47  ;;  %vm19196_vm0 = vmmov %vm19189_vm3  ;;  %11886 = vmatpush3.bf16.msra.mxu1 %v12377_v16  ;;  %vm19203_vm4 = vnez %v18985_v45 }
  0x9f   : > { %19195 = vst [vmem:[#allocation122_spill] sm:$0xff] %v13900_v15  ;;  %v13903_v46 = vsel %vm19196_vm0, %v1385_v47, %v1387_v38  ;;  %vm19198_vm9 = vmmov %vm19185_vm14  ;;  %v13920_v47 = vrot.slane %v13824_v17, 2  ;;  %11887 = vmatprep.subr.bf16.mxu1 %v19069_v21 }
  0xa0   : > { %19197 = vst [vmem:[#allocation123_spill] sm:$0xff] %v13903_v46  ;;  %v13907_v2 = vsel %vm19198_vm9, %v1309_v30, %v13834_v37  ;;  %v1452_v60 = vpack.c.bf16 %v13903_v46, %v13900_v15  ;;  %v12375_v30 = vld [vmem:[%s18553_s5 + $0x70] sm:$0xff]   ;;  %vm19201_vm3 = vmmov %vm19196_vm0  ;;  %vm19205_vm0 = vnez %v18988_v49  ;;  %vm19207_vm9 = vnez %v18991_v51 }
  0xa1   : > { %19199 = vst [vmem:[#allocation124_spill] sm:$0xff] %v13907_v2  ;;  %v1454_v31 = vpack.c.bf16 %v13834_v37, %v13907_v2  ;;  %19200 = vst [vmem:[#allocation125_spill] sm:$0xff] %v13920_v47  ;;  %10630 = vmatprep.subr.bf16.mxu0 %v12375_v30  ;;  %v13929_v34 = vsel %vm19201_vm3, %v1387_v38, %v13920_v47  ;;  %v12379_v38 = vld [vmem:[%s18553_s5 + $0x38] sm:$0xff]   ;;  %v13974_v16 = vsel %vm19205_vm0, 1.0, %v19069_v21  ;;  %vm19210_vm3 = vnez %v18997_v56 }
  0xa2   : > { %19202 = vst [vmem:[#allocation126_spill] sm:$0xff] %v13929_v34  ;;  %v1455_v20 = vpack.c.bf16 %v13920_v47, %v13929_v34  ;;  %vm10185_vm14 = vmpackc.low %vm13809_vm8, %vm13793_vm15  ;;  %10631 = vmatpush3.bf16.msra.mxu0 %v12376_v7  ;;  %v13969_v7 = vsel %vm19203_vm4, 1.0, %v19069_v21 }
  0xa3   : > { %11862 = vmatmul.mubr.bf16.gmra.mrb[40].mxu1 %v1449_v33  ;;  %10632 = vmatprep.subr.bf16.mxu0 %v12378_v18  ;;  %v12381_v33 = vld [vmem:[%s18555_s7 + $0x40] sm:$0xff]   ;;  %19204 = vst [vmem:[#allocation127_spill] sm:$0xff] %v13969_v7  ;;  %19206 = vst [vmem:[#allocation128_spill] sm:$0xff] %v13974_v16 }
  0xa4   : > { %10181 = vmatmul.mubr.msk.bf16.gmra.mrb[40].mxu0 %vm10179_vm1, %v10486_v5  ;;  %11865 = vmatprep.mubr.msk.bf16.mxu1 %vm19070_vm2, %v19069_v21  ;;  %vm10182_vm1 = vmpackc.low %vm13776_vm11, %vm13739_vm12  ;;  %v12380_v5 = vld [vmem:[%s18553_s5 + $0xb8] sm:$0xff]  }
  0xa5   : > { %1726 = vmatprep.mubr.bf16.mxu0 %v1451_v26  ;;  %11888 = vmatpush3.bf16.msra.mxu1 %v12380_v5 }
  0xa6   : > { %10633 = vmatpush3.bf16.msra.mxu0 %v12379_v38  ;;  %11941 = vmatprep.subr.bf16.mxu1 %v19069_v21 }
  0xa7   : > { %10733 = vmatprep.subr.bf16.mxu0 %v12381_v33 }
  0xab   : > { %11866 = vmatmul.mubr.bf16.gmra.mrb[44].mxu1 %v1452_v60 }
  0xac   : > { %10184 = vmatmul.mubr.msk.bf16.gmra.mrb[44].mxu0 %vm10182_vm1, %v10487_v23  ;;  %11869 = vmatprep.mubr.msk.bf16.mxu1 %vm19070_vm2, %v19069_v21  ;;  %vm19209_vm1 = vcmask 1046528  }
  0xad   : > { %1734 = vmatprep.mubr.bf16.mxu0 %v1454_v31  ;;  %v13964_v31 = vld [vmem:[%s18552_s4] ss:$0 sm:$0xff] }
  0xb3   : > { %11870 = vmatmul.mubr.bf16.gmra.mrb[48].mxu1 %v1455_v20 }
  0xb4   : > { %10187 = vmatmul.mubr.msk.bf16.gmra.mrb[48].mxu0 %vm10185_vm14, %v10488_v13  ;;  %11889 = vmatprep.mubr.msk.bf16.mxu1 %vm19070_vm2, %v19069_v21  ;;  %vm19212_vm14 = vmmov %vm19209_vm1 }
 0x122   : > { %v10519_v26 = vpop.f32.mrb[0].mxu0 }
 0x123   : > { %v1777_v23 = vpop.f32.mrb[0].mxu1  ;;  %v10520_v60 = vpop.f32.mrb[1].mxu0 }
 0x124   : > { %v11823_v30 = vpop.f32.mrb[1].mxu1  ;;  %v10521_v13 = vadd.f32 %v10520_v60, %v10519_v26  ;;  %v10522_v20 = vpop.f32.mrb[2].mxu0  ;;  %v13980_v26 = vsel %vm19207_vm9, 1.0, %v19069_v21  ;;  %v1958_v60 = vrot.slane %v13969_v7, 1  ;;  %vm19213_vm9 = vnez %v19009_v24 }
 0x125   : > { %v1780_v18 = vpop.f32.mrb[2].mxu1  ;;  %v10523_v38 = vpop.f32.mrb[3].mxu0  ;;  %19208 = vst [vmem:[#allocation129_spill] sm:$0xff] %v13980_v26  ;;  %v1959_v30 = vrot.slane %v13974_v16, 1  ;;  %v1961_v37 = vrot.slane %v13980_v26, 1 }
 0x126   : > { %v11824_v5 = vpop.f32.mrb[3].mxu1  ;;  %v1641_v33 = vadd.f32 %v10521_v13, %v13964_v31  ;;  %v10524_v47 = vadd.f32 %v10523_v38, %v10522_v20 }
 0x127   : > { %v1960_v13 = vsel %vm19209_vm1, %v1958_v60, %v1959_v30  ;;  %vm19215_vm1 = vnez %v19016_v59 }
 0x128   : > { %v1778_v34 = vadd.f32 %v1777_v23, %v1641_v33  ;;  %v1644_v46 = vadd.f32 %v10524_v47, %v13964_v31  ;;  %v13990_v23 = vsel %vm19210_vm3, 1.0, %v19069_v21  ;;  %v1962_v33 = vsel %vm19212_vm14, %v1959_v30, %v1961_v37 }
 0x129   : > { %19211 = vst [vmem:[#allocation130_spill] sm:$0xff] %v13990_v23  ;;  %v14008_v39 = vsel %vm19215_vm1, 1.0, %v19069_v21  ;;  %vm19217_vm14 = vnez %v19019_v62  ;;  %vm19219_vm1 = vcmask 1046528   ;;  %vm19224_vm3 = vcmask 1045504  }
 0x12a   : > { %v1880_v15 = vmul.f32 0.1, %v1778_v34  ;;  %v1781_v3 = vadd.f32 %v1780_v18, %v1644_v46  ;;  %v10525_v5 = vpop.f32.mrb[4].mxu0  ;;  %v13996_v46 = vsel %vm19213_vm9, 1.0, %v19069_v21  ;;  %19216 = vst [vmem:[#allocation132_spill] sm:$0xff] %v14008_v39  ;;  %vm19221_vm9 = vmmov %vm19219_vm1 }
 0x12b   : > { %v1785_v2 = vpop.f32.mrb[4].mxu1  ;;  %v10526_v20 = vpop.f32.mrb[5].mxu0  ;;  %19214 = vst [vmem:[#allocation131_spill] sm:$0xff] %v13996_v46 }
 0x12c   : > { %v11827_v38 = vpop.f32.mrb[5].mxu1  ;;  %v1906_v40 = vmax.f32 %v1778_v34, %v1880_v15  ;;  %v1881_v11 = vmul.f32 0.1, %v1781_v3  ;;  %v10527_v41 = vadd.f32 %v10526_v20, %v10525_v5  ;;  %v10528_v58 = vpop.f32.mrb[6].mxu0  ;;  %v1963_v20 = vrot.slane %v13990_v23, 1 }
 0x12d   : > { %v1788_v47 = vpop.f32.mrb[6].mxu1  ;;  %v10529_v50 = vpop.f32.mrb[7].mxu0 }
 0x12e   : > { %v11828_v18 = vpop.f32.mrb[7].mxu1  ;;  %v13998_v60 = vmul.f32 %v1960_v13, %v1906_v40  ;;  %v1907_v15 = vmax.f32 %v1781_v3, %v1881_v11  ;;  %v1649_v34 = vadd.f32 %v10527_v41, %v13964_v31  ;;  %v10530_v5 = vadd.f32 %v10529_v50, %v10528_v58 }
 0x12f   : > { %v1965_v18 = vrot.slane %v13996_v46, 1  ;;  %v14014_v11 = vsel %vm19217_vm14, 1.0, %v19069_v21  ;;  %vm19220_vm14 = vmmov %vm19219_vm1 }
 0x130   : > { %v14002_v38 = vmul.f32 %v1962_v33, %v1907_v15  ;;  %v1786_v63 = vadd.f32 %v1785_v2, %v1649_v34  ;;  %v1652_v30 = vadd.f32 %v10530_v5, %v13964_v31  ;;  %19218 = vst [vmem:[#allocation133_spill] sm:$0xff] %v14014_v11  ;;  %v2087_v41 = vrot.slane %v13998_v60, 1 }
 0x131   : > { %v2164_v33 = vrot.slane %v13998_v60, 2  ;;  %v1964_v15 = vsel %vm19219_vm1, %v1961_v37, %v1963_v20  ;;  %v1967_v5 = vrot.slane %v14008_v39, 1  ;;  %v1966_v45 = vsel %vm19221_vm9, %v1963_v20, %v1965_v18 }
 0x132   : > { %v2165_v50 = vrot.slane %v14002_v38, 2  ;;  %v1882_v3 = vmul.f32 0.1, %v1786_v63  ;;  %v1789_v58 = vadd.f32 %v1788_v47, %v1652_v30  ;;  %v10531_v40 = vpop.f32.mrb[8].mxu0  ;;  %v2088_v13 = vrot.slane %v14002_v38, 1 }
 0x133   : > { %v1793_v2 = vpop.f32.mrb[8].mxu1  ;;  %v10532_v34 = vpop.f32.mrb[9].mxu0  ;;  %v2241_v59 = vpack.c.bf16 %v14002_v38, %v13998_v60  ;;  %v1969_v12 = vrot.slane %v14014_v11, 1  ;;  %vm19222_vm1 = vnez %v19024_v28 }
 0x134   : > { %v11831_v62 = vpop.f32.mrb[9].mxu1  ;;  %v1908_v24 = vmax.f32 %v1786_v63, %v1882_v3  ;;  %v1883_v56 = vmul.f32 0.1, %v1789_v58  ;;  %v10533_v51 = vadd.f32 %v10532_v34, %v10531_v40  ;;  %v10534_v49 = vpop.f32.mrb[10].mxu0  ;;  %v2089_v30 = vsel %vm19220_vm14, %v2087_v41, %v2088_v13  ;;  %vm19225_vm14 = vmmov %vm19221_vm9 }
 0x135   : > { %v1796_v47 = vpop.f32.mrb[10].mxu1  ;;  %v10535_v17 = vpop.f32.mrb[11].mxu0  ;;  %v14030_v62 = vsel %vm19222_vm1, 1.0, %v19069_v21  ;;  %v2166_v60 = vsel %vm19224_vm3, %v2164_v33, %v2165_v50  ;;  %v1968_v41 = vsel %vm19225_vm14, %v1965_v18, %v1967_v5  ;;  %v1970_v28 = vsel %vm19221_vm9, %v1967_v5, %v1969_v12  ;;  %vm19232_vm1 = vmmov %vm19221_vm9 }
 0x136   : > { %v11832_v37 = vpop.f32.mrb[11].mxu1  ;;  %19223 = vst [vmem:[#allocation134_spill] sm:$0xff] %v14030_v62  ;;  %v14033_v63 = vmul.f32 %v1964_v15, %v1908_v24  ;;  %v1909_v38 = vmax.f32 %v1789_v58, %v1883_v56  ;;  %v1657_v3 = vadd.f32 %v10533_v51, %v13964_v31  ;;  %v10536_v40 = vadd.f32 %v10535_v17, %v10534_v49 }
 0x137   : > { %v1971_v1 = vrot.slane %v14030_v62, 1  ;;  %vm19226_vm3 = vnez %v19030_v29  ;;  %vm19228_vm14 = vcmask 1045504  }
 0x138   : > { %v2167_v20 = vrot.slane %v14033_v63, 2  ;;  %v14038_v34 = vmul.f32 %v1966_v45, %v1909_v38  ;;  %v1794_v37 = vadd.f32 %v1793_v2, %v1657_v3  ;;  %v1660_v48 = vadd.f32 %v10536_v40, %v13964_v31 }
 0x139   : > { %v2090_v24 = vrot.slane %v14033_v63, 1  ;;  %v14047_v51 = vsel %vm19226_vm3, 1.0, %v19069_v21  ;;  %vm19231_vm3 = vcmask 1045504  }
 0x13a   : > { %19227 = vst [vmem:[#allocation135_spill] sm:$0xff] %v14047_v51  ;;  %v1884_v49 = vmul.f32 0.1, %v1794_v37  ;;  %v1797_v56 = vadd.f32 %v1796_v47, %v1660_v48  ;;  %v2168_v45 = vsel %vm19228_vm14, %v2165_v50, %v2167_v20  ;;  %v2092_v58 = vrot.slane %v14038_v34, 1  ;;  %v12382_v50 = vld [vmem:[%s18555_s7] sm:$0xff]  }
 0x13b   : > { %v1801_v18 = vpop.f32.mrb[12].mxu1  ;;  %v2091_v15 = vsel %vm19221_vm9, %v2088_v13, %v2090_v24  ;;  %v2243_v5 = vpack.c.bf16 %v2168_v45, %v2166_v60  ;;  %v2169_v38 = vrot.slane %v14038_v34, 2  ;;  %v12383_v13 = vld [vmem:[%s18555_s7 + $0x80] sm:$0xff]   ;;  %vm19229_vm14 = vnez %v19044_v42 }
 0x13c   : > { %v10537_v17 = vpop.f32.mrb[12].mxu0  ;;  %v11835_v33 = vpop.f32.mrb[13].mxu1  ;;  %v1910_v40 = vmax.f32 %v1794_v37, %v1884_v49  ;;  %v1885_v29 = vmul.f32 0.1, %v1797_v56  ;;  %v2242_v47 = vpack.c.bf16 %v2091_v15, %v2089_v30  ;;  %v14065_v37 = vsel %vm19229_vm14, 1.0, %v19069_v21 }
 0x13d   : > { %v10538_v2 = vpop.f32.mrb[13].mxu0  ;;  %v1804_v62 = vpop.f32.mrb[14].mxu1  ;;  %11890 = vmatmul.mubr.bf16.vlgmr.msra.gmra.mrb[52].mxu1 %v2243_v5  ;;  %19230 = vst [vmem:[#allocation136_spill] sm:$0xff] %v14065_v37  ;;  %v2093_v30 = vsel %vm19221_vm9, %v2090_v24, %v2092_v58  ;;  %v2170_v49 = vsel %vm19231_vm3, %v2167_v20, %v2169_v38  ;;  %vm19234_vm3 = vnez %v19047_v0  ;;  %vm19236_vm9 = vmmov %vm19232_vm1 }
 0x13e   : > { %v10539_v55 = vadd.f32 %v10538_v2, %v10537_v17  ;;  %v10540_v48 = vpop.f32.mrb[14].mxu0  ;;  %v11836_v33 = vpop.f32.mrb[15].mxu1  ;;  %v12384_v17 = vld [vmem:[%s18555_s7 + $0x48] sm:$0xff]   ;;  %v14072_v2 = vmul.f32 %v1968_v41, %v1910_v40  ;;  %v1911_v15 = vmax.f32 %v1797_v56, %v1885_v29  ;;  %2462 = vmatprep.mubr.bf16.mxu0 %v2242_v47  ;;  %11893 = vmatprep.mubr.msk.bf16.mxu1 %vm19070_vm2, %v19069_v21  ;;  %v14096_v56 = vsel %vm19234_vm3, 1.0, %v19069_v21 }
 0x13f   : > { %v10541_v60 = vpop.f32.mrb[15].mxu0  ;;  %v1972_v33 = vsel %vm19232_vm1, %v1969_v12, %v1971_v1  ;;  %2463 = vmatmul.mubr.bf16.vlgmr.msra.gmra.mrb[52].mxu0 %v2241_v59  ;;  %11942 = vmatpush3.bf16.msra.mxu1 %v12383_v13  ;;  %v12385_v29 = vld [vmem:[%s18555_s7 + $0x8] sm:$0xff]   ;;  %v1975_v12 = vrot.slane %v14065_v37, 1  ;;  %19235 = vst [vmem:[#allocation137_spill] sm:$0xff] %v14096_v56  ;;  %vm19241_vm3 = vcmask 1045504  }
 0x140   : > { %v1665_v5 = vadd.f32 %v10539_v55, %v13964_v31  ;;  %v10542_v3 = vadd.f32 %v10541_v60, %v10540_v48  ;;  %v14078_v24 = vmul.f32 %v1970_v28, %v1911_v15  ;;  %v2094_v42 = vrot.slane %v14072_v2, 1  ;;  %10734 = vmatpush3.bf16.msra.mxu0 %v12382_v50  ;;  %v12386_v59 = vld [vmem:[%s18555_s7 + $0x88] sm:$0xff]   ;;  %11943 = vmatprep.subr.bf16.mxu1 %v19069_v21 }
 0x141   : > { %v19233_v55 = vrot.slane %v14047_v51, 1  ;;  %v2171_v41 = vrot.slane %v14072_v2, 2  ;;  %10735 = vmatprep.subr.bf16.mxu0 %v12384_v17 }
 0x142   : > { %v1802_v20 = vadd.f32 %v1801_v18, %v1665_v5  ;;  %v1668_v45 = vadd.f32 %v10542_v3, %v13964_v31  ;;  %v12387_v18 = vld [vmem:[%s18555_s7 + $0x50] sm:$0xff]   ;;  %v2095_v47 = vsel %vm19236_vm9, %v2092_v58, %v2094_v42  ;;  %v2096_v50 = vrot.slane %v14078_v24, 1 }
 0x143   : > { %v1974_v28 = vsel %vm19232_vm1, %v1971_v1, %v19233_v55  ;;  %v1809_v1 = vpop.f32.mrb[16].mxu1  ;;  %v2245_v15 = vpack.c.bf16 %v2095_v47, %v2093_v30  ;;  %vm19237_vm1 = vcmask 1045504   ;;  %v2173_v17 = vrot.slane %v14078_v24, 2  ;;  %11944 = vmatpush3.bf16.msra.mxu1 %v12386_v59  ;;  %v12388_v58 = vld [vmem:[%s18555_s7 + $0x10] sm:$0xff]   ;;  %v12390_v59 = vld [vmem:[%s18555_s7 + $0x58] sm:$0xff]  }
 0x144   : > { %v1886_v3 = vmul.f32 0.1, %v1802_v20  ;;  %v1805_v40 = vadd.f32 %v1804_v62, %v1668_v45  ;;  %v10543_v48 = vpop.f32.mrb[16].mxu0  ;;  %v11839_v60 = vpop.f32.mrb[17].mxu1  ;;  %v2172_v5 = vsel %vm19237_vm1, %v2169_v38, %v2171_v41  ;;  %10736 = vmatpush3.bf16.msra.mxu0 %v12385_v29  ;;  %v18748_v38 = vrot.slane %v14096_v56, 1  ;;  %v12389_v29 = vld [vmem:[%s18555_s7 + $0x90] sm:$0xff]   ;;  %11945 = vmatprep.subr.bf16.mxu1 %v19069_v21 }
 0x145   : > { %v10544_v13 = vpop.f32.mrb[17].mxu0  ;;  %v2246_v45 = vpack.c.bf16 %v2172_v5, %v2170_v49  ;;  %v1812_v39 = vpop.f32.mrb[18].mxu1  ;;  %2470 = vmatprep.mubr.bf16.mxu0 %v2245_v15  ;;  %vm19238_vm9 = vnez %v19056_v10  ;;  %vm19240_vm1 = vcmask 1046528   ;;  %v2174_v49 = vsel %vm19241_vm3, %v2171_v41, %v2173_v17  ;;  %10737 = vmatprep.subr.bf16.mxu0 %v12387_v18 }
 0x146   : > { %v1912_v0 = vmax.f32 %v1802_v20, %v1886_v3  ;;  %v1887_v37 = vmul.f32 0.1, %v1805_v40  ;;  %v10545_v11 = vadd.f32 %v10544_v13, %v10543_v48  ;;  %v10546_v62 = vpop.f32.mrb[18].mxu0  ;;  %v11840_v47 = vpop.f32.mrb[19].mxu1  ;;  %v14115_v20 = vsel %vm19238_vm9, 1.0, %v19069_v21  ;;  %vm19244_vm3 = vmmov %vm19240_vm1 }
 0x147   : > { %v10547_v30 = vpop.f32.mrb[19].mxu0  ;;  %19239 = vst [vmem:[#allocation138_spill] sm:$0xff] %v14115_v20  ;;  %v2097_v3 = vsel %vm19240_vm1, %v2094_v42, %v2096_v50  ;;  %11894 = vmatmul.mubr.bf16.gmra.mrb[56].mxu1 %v2246_v45  ;;  %v19242_v42 = vmov %v19233_v55  ;;  %v19243_v18 = vpack.c.bf16 %v14038_v34, %v14033_v63  ;;  %v1978_v63 = vsel %vm19244_vm3, %v1975_v12, %v18748_v38 }
 0x148   : > { %v14125_v48 = vmul.f32 %v1972_v33, %v1912_v0  ;;  %v1913_v13 = vmax.f32 %v1805_v40, %v1887_v37  ;;  %v1673_v60 = vadd.f32 %v10545_v11, %v13964_v31  ;;  %v10548_v15 = vadd.f32 %v10547_v30, %v10546_v62  ;;  %11897 = vmatprep.mubr.msk.bf16.mxu1 %vm19070_vm2, %v19069_v21  ;;  %v12391_v33 = vld [vmem:[%s18555_s7 + $0x18] sm:$0xff]  }
 0x149   : > { %v1976_v41 = vsel %vm19240_vm1, %v19242_v42, %v1975_v12  ;;  %2471 = vmatmul.mubr.bf16.gmra.mrb[56].mxu0 %v19243_v18  ;;  %v1979_v34 = vrot.slane %v14115_v20, 1  ;;  %vm19245_vm1 = vnez %v19061_v25  ;;  %11946 = vmatpush3.bf16.msra.mxu1 %v12389_v29  ;;  %v12393_v25 = vld [vmem:[%s18555_s7 + $0x60] sm:$0xff]   ;;  %vm19250_vm9 = vcmask 1045504  }
 0x14a   : > { %v14136_v5 = vmul.f32 %v1974_v28, %v1913_v13  ;;  %v1810_v0 = vadd.f32 %v1809_v1, %v1673_v60  ;;  %v1676_v37 = vadd.f32 %v10548_v15, %v13964_v31  ;;  %v2098_v11 = vrot.slane %v14125_v48, 1  ;;  %10738 = vmatpush3.bf16.msra.mxu0 %v12388_v58  ;;  %v12392_v1 = vld [vmem:[%s18555_s7 + $0x98] sm:$0xff]   ;;  %11947 = vmatprep.subr.bf16.mxu1 %v19069_v21 }
 0x14b   : > { %v2175_v28 = vrot.slane %v14125_v48, 2  ;;  %v14152_v40 = vsel %vm19245_vm1, 1.0, %v19069_v21  ;;  %10739 = vmatprep.subr.bf16.mxu0 %v12390_v59  ;;  %v1817_v30 = vpop.f32.mrb[20].mxu1  ;;  %vm19247_vm1 = vcmask 1045504  }
 0x14c   : > { %19246 = vst [vmem:[#allocation139_spill] sm:$0xff] %v14152_v40  ;;  %v1888_v62 = vmul.f32 0.1, %v1810_v0  ;;  %v1813_v45 = vadd.f32 %v1812_v39, %v1676_v37  ;;  %v10549_v58 = vpop.f32.mrb[20].mxu0  ;;  %v2099_v12 = vsel %vm19244_vm3, %v2096_v50, %v2098_v11  ;;  %v2100_v47 = vrot.slane %v14136_v5, 1  ;;  %v11843_v60 = vpop.f32.mrb[21].mxu1 }
 0x14d   : > { %v10550_v13 = vpop.f32.mrb[21].mxu0  ;;  %v2248_v15 = vpack.c.bf16 %v2099_v12, %v2097_v3  ;;  %v2176_v29 = vsel %vm19247_vm1, %v2173_v17, %v2175_v28  ;;  %v2177_v59 = vrot.slane %v14136_v5, 2  ;;  %v1820_v50 = vpop.f32.mrb[22].mxu1  ;;  %v1981_v17 = vrot.slane %v14152_v40, 1  ;;  %11948 = vmatpush3.bf16.msra.mxu1 %v12392_v1 }
 0x14e   : > { %v1914_v18 = vmax.f32 %v1810_v0, %v1888_v62  ;;  %v1889_v39 = vmul.f32 0.1, %v1813_v45  ;;  %v10551_v37 = vadd.f32 %v10550_v13, %v10549_v58  ;;  %v10552_v55 = vpop.f32.mrb[22].mxu0  ;;  %v2249_v38 = vpack.c.bf16 %v2176_v29, %v2174_v49  ;;  %10740 = vmatpush3.bf16.msra.mxu0 %v12391_v33  ;;  %v11844_v3 = vpop.f32.mrb[23].mxu1  ;;  %v12394_v33 = vld [vmem:[%s18555_s7 + $0x20] sm:$0xff]   ;;  %11949 = vmatprep.subr.bf16.mxu1 %v19069_v21 }
 0x14f   : > { %v10553_v60 = vpop.f32.mrb[23].mxu0  ;;  %2478 = vmatprep.mubr.bf16.mxu0 %v2248_v15  ;;  %vm19248_vm1 = vnez %v19078_v6  ;;  %v2101_v0 = vsel %vm19244_vm3, %v2098_v11, %v2100_v47  ;;  %v2178_v49 = vsel %vm19250_vm9, %v2175_v28, %v2177_v59  ;;  %v12395_v62 = vld [vmem:[%s18555_s7 + $0xa0] sm:$0xff]   ;;  %v19251_v11 = vrot.slane %v14096_v56, 1  ;;  %10741 = vmatprep.subr.bf16.mxu0 %v12393_v25  ;;  %vm19253_vm9 = vmmov %vm19244_vm3 }
 0x150   : > { %v14171_v12 = vsel %vm19248_vm1, 1.0, %v19069_v21  ;;  %v14181_v58 = vmul.f32 %v1976_v41, %v1914_v18  ;;  %v1915_v13 = vmax.f32 %v1813_v45, %v1889_v39  ;;  %v1681_v15 = vadd.f32 %v10551_v37, %v13964_v31  ;;  %11898 = vmatmul.mubr.bf16.gmra.mrb[60].mxu1 %v2249_v38  ;;  %vm19256_vm1 = vmmov %vm19253_vm9 }
 0x151   : > { %19249 = vst [vmem:[#allocation140_spill] sm:$0xff] %v14171_v12  ;;  %v10554_v29 = vadd.f32 %v10553_v60, %v10552_v55  ;;  %v1980_v28 = vsel %vm19244_vm3, %v19251_v11, %v1979_v34  ;;  %v19252_v1 = vpack.c.bf16 %v14078_v24, %v14072_v2  ;;  %11901 = vmatprep.mubr.msk.bf16.mxu1 %vm19070_vm2, %v19069_v21  ;;  %v1983_v38 = vrot.slane %v14171_v12, 1 }
 0x152   : > { %v14192_v3 = vmul.f32 %v1978_v63, %v1915_v13  ;;  %v1818_v41 = vadd.f32 %v1817_v30, %v1681_v15  ;;  %v2102_v18 = vrot.slane %v14181_v58, 1  ;;  %v1982_v55 = vsel %vm19253_vm9, %v1979_v34, %v1981_v17  ;;  %10742 = vmatpush3.bf16.msra.mxu0 %v12394_v33  ;;  %11950 = vmatpush3.bf16.msra.mxu1 %v12395_v62 }
 0x153   : > { %2479 = vmatmul.mubr.bf16.gmra.mrb[60].mxu0 %v19252_v1  ;;  %v1684_v45 = vadd.f32 %v10554_v29, %v13964_v31  ;;  %v2179_v2 = vrot.slane %v14181_v58, 2  ;;  %vm19254_vm3 = vnez %v19082_v35  ;;  %v1825_v37 = vpop.f32.mrb[24].mxu1  ;;  %11951 = vmatprep.subr.bf16.mxu1 %v19069_v21  ;;  %vm19257_vm9 = vcmask 1045504  }
 0x154   : > { %v14203_v24 = vsel %vm19254_vm3, 1.0, %v19069_v21  ;;  %v1890_v63 = vmul.f32 0.1, %v1818_v41  ;;  %v10555_v39 = vpop.f32.mrb[24].mxu0  ;;  %v2103_v25 = vsel %vm19256_vm1, %v2100_v47, %v2102_v18  ;;  %v2104_v60 = vrot.slane %v14192_v3, 1  ;;  %v11847_v13 = vpop.f32.mrb[25].mxu1 }
 0x155   : > { %19255 = vst [vmem:[#allocation141_spill] sm:$0xff] %v14203_v24  ;;  %v1821_v30 = vadd.f32 %v1820_v50, %v1684_v45  ;;  %v10556_v34 = vpop.f32.mrb[25].mxu0  ;;  %v2251_v15 = vpack.c.bf16 %v2103_v25, %v2101_v0  ;;  %v2180_v29 = vsel %vm19257_vm9, %v2177_v59, %v2179_v2  ;;  %v2181_v11 = vrot.slane %v14192_v3, 2  ;;  %v1828_v47 = vpop.f32.mrb[26].mxu1 }
 0x156   : > { %v2253_v33 = vpack.c.bf16 %v14192_v3, %v14181_v58  ;;  %v1916_v62 = vmax.f32 %v1818_v41, %v1890_v63  ;;  %v10557_v1 = vadd.f32 %v10556_v34, %v10555_v39  ;;  %v10558_v45 = vpop.f32.mrb[26].mxu0  ;;  %v2252_v42 = vpack.c.bf16 %v2180_v29, %v2178_v49  ;;  %v11848_v10 = vpop.f32.mrb[27].mxu1 }
 0x157   : > { %v1891_v50 = vmul.f32 0.1, %v1821_v30  ;;  %v10559_v35 = vpop.f32.mrb[27].mxu0  ;;  %2486 = vmatprep.mubr.bf16.mxu0 %v2251_v15  ;;  %v1985_v6 = vrot.slane %v14203_v24, 1  ;;  %vm19258_vm1 = vnez %v19096_v19  ;;  %vm19260_vm9 = vcmask 1046528  }
 0x158   : > { %v14216_v59 = vsel %vm19258_vm1, 1.0, %v19069_v21  ;;  %v2105_v0 = vsel %vm19260_vm9, %v2102_v18, %v2104_v60  ;;  %vm19261_vm3 = vcmask 1045504   ;;  %v14220_v3 = vmul.f32 %v1980_v28, %v1916_v62  ;;  %11902 = vmatmul.mubr.bf16.gmra.mrb[64].mxu1 %v2252_v42  ;;  %vm19262_vm14 = vmmov %vm19260_vm9 }
 0x159   : > { %19259 = vst [vmem:[#allocation142_spill] sm:$0xff] %v14216_v59  ;;  %v2182_v58 = vsel %vm19261_vm3, %v2179_v2, %v2181_v11  ;;  %v1917_v41 = vmax.f32 %v1821_v30, %v1891_v50  ;;  %v1689_v49 = vadd.f32 %v10557_v1, %v13964_v31  ;;  %v10560_v63 = vadd.f32 %v10559_v35, %v10558_v45  ;;  %vm19264_vm3 = vmmov %vm19260_vm9 }
 0x15a   : > { %v1984_v39 = vsel %vm19262_vm14, %v1981_v17, %v1983_v38  ;;  %v19263_v10 = vpack.c.bf16 %v14136_v5, %v14125_v48  ;;  %11905 = vmatprep.mubr.msk.bf16.mxu1 %vm19070_vm2, %v19069_v21  ;;  %v2106_v2 = vrot.slane %v14220_v3, 1  ;;  %v1986_v30 = vsel %vm19264_vm3, %v1983_v38, %v1985_v6  ;;  %vm19266_vm14 = vmmov %vm19264_vm3 }
 0x15b   : > { %v14229_v25 = vmul.f32 %v1982_v55, %v1917_v41  ;;  %v1826_v18 = vadd.f32 %v1825_v37, %v1689_v49  ;;  %v1692_v28 = vadd.f32 %v10560_v63, %v13964_v31  ;;  %v1987_v35 = vrot.slane %v14216_v59, 1  ;;  %v1833_v34 = vpop.f32.mrb[28].mxu1 }
 0x15c   : > { %2487 = vmatmul.mubr.bf16.gmra.mrb[64].mxu0 %v19263_v10  ;;  %v2183_v42 = vrot.slane %v14220_v3, 2  ;;  %v14239_v48 = vsel %vm13571_vm6, 1.0, %v19069_v21  ;;  %v2107_v37 = vsel %vm19266_vm14, %v2104_v60, %v2106_v2  ;;  %v11851_v29 = vpop.f32.mrb[29].mxu1  ;;  %vm19267_vm9 = vcmask 1045504  }
 0x15d   : > { %19265 = vst [vmem:[#allocation143_spill] sm:$0xff] %v14239_v48  ;;  %v1892_v5 = vmul.f32 0.1, %v1826_v18  ;;  %v1829_v17 = vadd.f32 %v1828_v47, %v1692_v28  ;;  %v10561_v55 = vpop.f32.mrb[28].mxu0  ;;  %v2108_v13 = vrot.slane %v14229_v25, 1  ;;  %v2254_v38 = vpack.c.bf16 %v2107_v37, %v2105_v0  ;;  %v1836_v10 = vpop.f32.mrb[30].mxu1  ;;  %vm19269_vm14 = vmmov %vm19267_vm9 }
 0x15e   : > { %v10562_v15 = vpop.f32.mrb[29].mxu0  ;;  %v2184_v62 = vsel %vm19267_vm9, %v2181_v11, %v2183_v42  ;;  %v2185_v50 = vrot.slane %v14229_v25, 2  ;;  %v2256_v1 = vpack.c.bf16 %v14229_v25, %v14220_v3  ;;  %v1989_v60 = vrot.slane %v14239_v48, 1  ;;  %v11852_v9 = vpop.f32.mrb[31].mxu1  ;;  %vm19270_vm9 = vmmov %vm19264_vm3 }
 0x15f   : > { %v1918_v45 = vmax.f32 %v1826_v18, %v1892_v5  ;;  %v1893_v41 = vmul.f32 0.1, %v1829_v17  ;;  %v10563_v49 = vadd.f32 %v10562_v15, %v10561_v55  ;;  %v10564_v47 = vpop.f32.mrb[30].mxu0  ;;  %v2255_v63 = vpack.c.bf16 %v2184_v62, %v2182_v58  ;;  %2494 = vmatprep.mubr.bf16.mxu0 %v2254_v38 }
 0x160   : > { %v10565_v28 = vpop.f32.mrb[31].mxu0  ;;  %v14251_v11 = vsel %vm13597_vm10, 1.0, %v19069_v21  ;;  %v2109_v0 = vsel %vm19264_vm3, %v2106_v2, %v2108_v13  ;;  %v2186_v3 = vsel %vm19269_vm14, %v2183_v42, %v2185_v50  ;;  %v1988_v42 = vsel %vm19270_vm9, %v1985_v6, %v1987_v35  ;;  %vm19271_vm14 = vmmov %vm19264_vm3 }
 0x161   : > { %19268 = vst [vmem:[#allocation144_spill] sm:$0xff] %v14251_v11  ;;  %v14255_v25 = vmul.f32 %v1984_v39, %v1918_v45  ;;  %v1919_v18 = vmax.f32 %v1829_v17, %v1893_v41  ;;  %v1697_v58 = vadd.f32 %v10563_v49, %v13964_v31  ;;  %v10566_v5 = vadd.f32 %v10565_v28, %v10564_v47 }
 0x162   : > { %11906 = vmatmul.mubr.bf16.gmra.mrb[68].mxu1 %v2255_v63  ;;  %v1990_v39 = vsel %vm19264_vm3, %v1987_v35, %v1989_v60  ;;  %v1991_v17 = vrot.slane %v14251_v11, 1  ;;  %vm19272_vm10 = vcmask 1045504   ;;  %vm19276_vm9 = vcmask 1045504  }
 0x163   : > { %11909 = vmatprep.mubr.msk.bf16.mxu1 %vm19070_vm2, %v19069_v21  ;;  %v14260_v9 = vmul.f32 %v1986_v30, %v1919_v18  ;;  %v1834_v55 = vadd.f32 %v1833_v34, %v1697_v58  ;;  %v1700_v37 = vadd.f32 %v10566_v5, %v13964_v31  ;;  %v2110_v2 = vrot.slane %v14255_v25, 1 }
 0x164   : > { %2495 = vmatmul.mubr.bf16.gmra.mrb[68].mxu0 %v2253_v33  ;;  %v2187_v15 = vrot.slane %v14255_v25, 2 }
 0x165   : > { %v1894_v29 = vmul.f32 0.1, %v1834_v55  ;;  %v1837_v33 = vadd.f32 %v1836_v10, %v1700_v37  ;;  %v2111_v30 = vsel %vm19271_vm14, %v2108_v13, %v2110_v2  ;;  %v2112_v34 = vrot.slane %v14260_v9, 1  ;;  %vm19278_vm14 = vmmov %vm19264_vm3 }
 0x166   : > { %v1841_v62 = vpop.f32.mrb[32].mxu1  ;;  %v2257_v49 = vpack.c.bf16 %v2111_v30, %v2109_v0  ;;  %v2188_v47 = vsel %vm19272_vm10, %v2185_v50, %v2187_v15  ;;  %v2189_v6 = vrot.slane %v14260_v9, 2  ;;  %v2259_v35 = vpack.c.bf16 %v14260_v9, %v14255_v25  ;;  %vm19275_vm10 = vmmov %vm19264_vm3 }
 0x167   : > { %v10567_v38 = vpop.f32.mrb[32].mxu0  ;;  %v11855_v41 = vpop.f32.mrb[33].mxu1  ;;  %v1920_v63 = vmax.f32 %v1834_v55, %v1894_v29  ;;  %v1895_v28 = vmul.f32 0.1, %v1837_v33  ;;  %v2258_v58 = vpack.c.bf16 %v2188_v47, %v2186_v3  ;;  %v14277_v13 = vsel %vm13604_vm7, 1.0, %v19069_v21 }
 0x168   : > { %v10568_v45 = vpop.f32.mrb[33].mxu0  ;;  %v1844_v5 = vpop.f32.mrb[34].mxu1  ;;  %2502 = vmatprep.mubr.bf16.mxu0 %v2257_v49  ;;  %19273 = vst [vmem:[#allocation145_spill] sm:$0xff] %v14277_v13  ;;  %v14282_v50 = vsel %vm13648_vm5, 1.0, %v19069_v21  ;;  %v2113_v25 = vsel %vm19275_vm10, %v2110_v2, %v2112_v34  ;;  %v2190_v9 = vsel %vm19276_vm9, %v2187_v15, %v2189_v6  ;;  %v1992_v30 = vsel %vm19264_vm3, %v1989_v60, %v1991_v17  ;;  %vm19279_vm10 = vmmov %vm19276_vm9 }
 0x169   : > { %v10569_v18 = vadd.f32 %v10568_v45, %v10567_v38  ;;  %v10570_v10 = vpop.f32.mrb[34].mxu0  ;;  %v11856_v0 = vpop.f32.mrb[35].mxu1  ;;  %19274 = vst [vmem:[#allocation146_spill] sm:$0xff] %v14282_v50  ;;  %v14286_v55 = vmul.f32 %v1988_v42, %v1920_v63  ;;  %v1921_v3 = vmax.f32 %v1837_v33, %v1895_v28  ;;  %v1993_v42 = vrot.slane %v14277_v13, 1  ;;  %vm19280_vm9 = vmmov %vm19264_vm3 }
 0x16a   : > { %v10571_v37 = vpop.f32.mrb[35].mxu0  ;;  %11910 = vmatmul.mubr.bf16.gmra.mrb[72].mxu1 %v2258_v58  ;;  %v1995_v33 = vrot.slane %v14282_v50, 1 }
 0x16b   : > { %v1705_v29 = vadd.f32 %v10569_v18, %v13964_v31  ;;  %v10572_v38 = vadd.f32 %v10571_v37, %v10570_v10  ;;  %11913 = vmatprep.mubr.msk.bf16.mxu1 %vm19070_vm2, %v19069_v21  ;;  %v14292_v45 = vmul.f32 %v1990_v39, %v1921_v3  ;;  %v2114_v15 = vrot.slane %v14286_v55, 1 }
 0x16c   : > { %2503 = vmatmul.mubr.bf16.gmra.mrb[72].mxu0 %v2256_v1  ;;  %v2191_v49 = vrot.slane %v14286_v55, 2  ;;  %v14302_v1 = vsel %vm13667_vm13, 1.0, %v19069_v21 }
 0x16d   : > { %v1842_v41 = vadd.f32 %v1841_v62, %v1705_v29  ;;  %v1708_v2 = vadd.f32 %v10572_v38, %v13964_v31  ;;  %19277 = vst [vmem:[#allocation147_spill] sm:$0xff] %v14302_v1  ;;  %v2115_v62 = vsel %vm19278_vm14, %v2112_v34, %v2114_v15  ;;  %v2116_v28 = vrot.slane %v14292_v45, 1  ;;  %vm19281_vm14 = vmmov %vm19279_vm10 }
 0x16e   : > { %v1849_v63 = vpop.f32.mrb[36].mxu1  ;;  %v2260_v58 = vpack.c.bf16 %v2115_v62, %v2113_v25  ;;  %v2192_v37 = vsel %vm19279_vm10, %v2189_v6, %v2191_v49  ;;  %v2193_v0 = vrot.slane %v14292_v45, 2  ;;  %v2262_v3 = vpack.c.bf16 %v14292_v45, %v14286_v55  ;;  %vm19282_vm10 = vmmov %vm19264_vm3 }
 0x16f   : > { %v1896_v60 = vmul.f32 0.1, %v1842_v41  ;;  %v1845_v47 = vadd.f32 %v1844_v5, %v1708_v2  ;;  %v10573_v39 = vpop.f32.mrb[36].mxu0  ;;  %v11859_v10 = vpop.f32.mrb[37].mxu1  ;;  %v2261_v2 = vpack.c.bf16 %v2192_v37, %v2190_v9  ;;  %v1994_v34 = vsel %vm19280_vm9, %v1991_v17, %v1993_v42  ;;  %vm19283_vm9 = vmmov %vm19264_vm3 }
 0x170   : > { %v10574_v18 = vpop.f32.mrb[37].mxu0  ;;  %v1852_v8 = vpop.f32.mrb[38].mxu1  ;;  %2510 = vmatprep.mubr.bf16.mxu0 %v2260_v58  ;;  %v1997_v10 = vrot.slane %v14302_v1, 1  ;;  %v2117_v6 = vsel %vm19264_vm3, %v2114_v15, %v2116_v28  ;;  %v2194_v62 = vsel %vm19281_vm14, %v2191_v49, %v2193_v0  ;;  %v1996_v9 = vsel %vm19282_vm10, %v1993_v42, %v1995_v33  ;;  %vm19287_vm14 = vmmov %vm19283_vm9 }
 0x171   : > { %v1922_v29 = vmax.f32 %v1842_v41, %v1896_v60  ;;  %v1897_v38 = vmul.f32 0.1, %v1845_v47  ;;  %v10575_v52 = vadd.f32 %v10574_v18, %v10573_v39  ;;  %v10576_v5 = vpop.f32.mrb[38].mxu0  ;;  %v11860_v25 = vpop.f32.mrb[39].mxu1  ;;  %vm19284_vm3 = vnez %v19142_v22 }
 0x172   : > { %v10577_v44 = vpop.f32.mrb[39].mxu0  ;;  %11914 = vmatmul.mubr.bf16.gmra.mrb[76].mxu1 %v2261_v2  ;;  %vm19288_vm10 = vcmask 1045504  }
 0x173   : > { %v14314_v43 = vmul.f32 %v1992_v30, %v1922_v29  ;;  %v1923_v55 = vmax.f32 %v1845_v47, %v1897_v38  ;;  %v1713_v45 = vadd.f32 %v10575_v52, %v13964_v31  ;;  %v10578_v41 = vadd.f32 %v10577_v44, %v10576_v5  ;;  %11917 = vmatprep.mubr.msk.bf16.mxu1 %vm19070_vm2, %v19069_v21 }
 0x174   : > { %2511 = vmatmul.mubr.bf16.gmra.mrb[76].mxu0 %v2259_v35  ;;  %v1998_v30 = vsel %vm19283_vm9, %v1995_v33, %v1997_v10  ;;  %v14328_v44 = vsel %vm19284_vm3, 1.0, %v19069_v21  ;;  %v14334_v35 = vsel %vm13739_vm12, 1.0, %v19069_v21 }
 0x175   : > { %v14320_v17 = vmul.f32 %v1994_v34, %v1923_v55  ;;  %v1850_v60 = vadd.f32 %v1849_v63, %v1713_v45  ;;  %v1716_v15 = vadd.f32 %v10578_v41, %v13964_v31  ;;  %v2118_v49 = vrot.slane %v14314_v43, 1  ;;  %19285 = vst [vmem:[#allocation148_spill] sm:$0xff] %v14328_v44  ;;  %19286 = vst [vmem:[#allocation149_spill] sm:$0xff] %v14334_v35 }
 0x176   : > { %v2195_v52 = vrot.slane %v14314_v43, 2  ;;  %v1857_v63 = vpop.f32.mrb[40].mxu1 }
 0x177   : > { %v1898_v42 = vmul.f32 0.1, %v1850_v60  ;;  %v1853_v47 = vadd.f32 %v1852_v8, %v1716_v15  ;;  %v10579_v39 = vpop.f32.mrb[40].mxu0  ;;  %v2119_v18 = vsel %vm19287_vm14, %v2116_v28, %v2118_v49  ;;  %v2120_v33 = vrot.slane %v14320_v17, 1  ;;  %v11863_v37 = vpop.f32.mrb[41].mxu1  ;;  %vm19289_vm14 = vmmov %vm19288_vm10 }
 0x178   : > { %v10580_v58 = vpop.f32.mrb[41].mxu0  ;;  %v2263_v29 = vpack.c.bf16 %v2119_v18, %v2117_v6  ;;  %v2196_v38 = vsel %vm19288_vm10, %v2193_v0, %v2195_v52  ;;  %v2197_v5 = vrot.slane %v14320_v17, 2  ;;  %v2265_v2 = vpack.c.bf16 %v14320_v17, %v14314_v43  ;;  %v1860_v41 = vpop.f32.mrb[42].mxu1  ;;  %vm19290_vm10 = vmmov %vm19283_vm9 }
 0x179   : > { %v1924_v34 = vmax.f32 %v1850_v60, %v1898_v42  ;;  %v1899_v25 = vmul.f32 0.1, %v1853_v47  ;;  %v10581_v55 = vadd.f32 %v10580_v58, %v10579_v39  ;;  %v10582_v8 = vpop.f32.mrb[42].mxu0  ;;  %v2264_v45 = vpack.c.bf16 %v2196_v38, %v2194_v62  ;;  %v11864_v6 = vpop.f32.mrb[43].mxu1 }
 0x17a   : > { %v1999_v28 = vrot.slane %v14328_v44, 1  ;;  %v10583_v15 = vpop.f32.mrb[43].mxu0  ;;  %2518 = vmatprep.mubr.bf16.mxu0 %v2263_v29  ;;  %v2001_v37 = vrot.slane %v14334_v35, 1  ;;  %v2121_v0 = vsel %vm19283_vm9, %v2118_v49, %v2120_v33  ;;  %v2198_v18 = vsel %vm19289_vm14, %v2195_v52, %v2197_v5  ;;  %vm19292_vm14 = vmmov %vm19283_vm9 }
 0x17b   : > { %v14346_v14 = vmul.f32 %v1996_v9, %v1924_v34  ;;  %v1925_v43 = vmax.f32 %v1853_v47, %v1899_v25  ;;  %v1721_v17 = vadd.f32 %v10581_v55, %v13964_v31  ;;  %v10584_v60 = vadd.f32 %v10583_v15, %v10582_v8  ;;  %11918 = vmatmul.mubr.bf16.gmra.mrb[80].mxu1 %v2264_v45 }
 0x17c   : > { %2519 = vmatmul.mubr.bf16.gmra.mrb[80].mxu0 %v2262_v3  ;;  %11921 = vmatprep.mubr.msk.bf16.mxu1 %vm19070_vm2, %v19069_v21  ;;  %v2000_v52 = vsel %vm19290_vm10, %v1997_v10, %v1999_v28  ;;  %v2002_v9 = vsel %vm19283_vm9, %v1999_v28, %v2001_v37  ;;  %v14360_v47 = vsel %vm13776_vm11, 1.0, %v19069_v21  ;;  %vm19293_vm10 = vcmask 1045504  }
 0x17d   : > { %v14351_v62 = vmul.f32 %v1998_v30, %v1925_v43  ;;  %v1858_v42 = vadd.f32 %v1857_v63, %v1721_v17  ;;  %v1724_v39 = vadd.f32 %v10584_v60, %v13964_v31  ;;  %v2122_v49 = vrot.slane %v14346_v14, 1  ;;  %19291 = vst [vmem:[#allocation150_spill] sm:$0xff] %v14360_v47 }
 0x17e   : > { %v2199_v3 = vrot.slane %v14346_v14, 2  ;;  %v1865_v38 = vpop.f32.mrb[44].mxu1 }
 0x17f   : > { %v1900_v58 = vmul.f32 0.1, %v1858_v42  ;;  %v1861_v29 = vadd.f32 %v1860_v41, %v1724_v39  ;;  %v10585_v30 = vpop.f32.mrb[44].mxu0  ;;  %v2123_v63 = vsel %vm19292_vm14, %v2120_v33, %v2122_v49  ;;  %v2124_v34 = vrot.slane %v14351_v62, 1  ;;  %v11867_v55 = vpop.f32.mrb[45].mxu1  ;;  %vm19295_vm14 = vmmov %vm19293_vm10 }
 0x180   : > { %v10586_v25 = vpop.f32.mrb[45].mxu0  ;;  %v2266_v10 = vpack.c.bf16 %v2123_v63, %v2121_v0  ;;  %v2200_v8 = vsel %vm19293_vm10, %v2197_v5, %v2199_v3  ;;  %v2201_v45 = vrot.slane %v14351_v62, 2  ;;  %v2268_v28 = vpack.c.bf16 %v14351_v62, %v14346_v14  ;;  %v1868_v60 = vpop.f32.mrb[46].mxu1  ;;  %vm19296_vm10 = vmmov %vm19283_vm9 }
 0x181   : > { %v1926_v15 = vmax.f32 %v1858_v42, %v1900_v58  ;;  %v1901_v6 = vmul.f32 0.1, %v1861_v29  ;;  %v10587_v43 = vadd.f32 %v10586_v25, %v10585_v30  ;;  %v10588_v41 = vpop.f32.mrb[46].mxu0  ;;  %v2267_v17 = vpack.c.bf16 %v2200_v8, %v2198_v18  ;;  %v11868_v5 = vpop.f32.mrb[47].mxu1 }
 0x182   : > { %v2003_v33 = vrot.slane %v14360_v47, 1  ;;  %v10589_v39 = vpop.f32.mrb[47].mxu0  ;;  %2526 = vmatprep.mubr.bf16.mxu0 %v2266_v10  ;;  %v14373_v0 = vsel %vm13793_vm15, 1.0, %v19069_v21  ;;  %v2125_v63 = vsel %vm19283_vm9, %v2122_v49, %v2124_v34  ;;  %v2202_v14 = vsel %vm19295_vm14, %v2199_v3, %v2201_v45  ;;  %vm19301_vm15 = vmmov %vm19295_vm14 }
 0x183   : > { %19294 = vst [vmem:[#allocation151_spill] sm:$0xff] %v14373_v0  ;;  %v14377_v62 = vmul.f32 %v2000_v52, %v1926_v15  ;;  %v1927_v42 = vmax.f32 %v1861_v29, %v1901_v6  ;;  %v1729_v18 = vadd.f32 %v10587_v43, %v13964_v31  ;;  %v10590_v58 = vadd.f32 %v10589_v39, %v10588_v41 }
 0x184   : > { %11922 = vmatmul.mubr.bf16.gmra.mrb[84].mxu1 %v2267_v17  ;;  %2527 = vmatmul.mubr.bf16.gmra.mrb[84].mxu0 %v2265_v2  ;;  %v2004_v3 = vsel %vm19296_vm10, %v2001_v37, %v2003_v33  ;;  %v2005_v52 = vrot.slane %v14373_v0, 1  ;;  %v14391_v29 = vsel %vm13809_vm8, 1.0, %v19069_v21  ;;  %vm19298_vm10 = vmmov %vm19283_vm9 }
 0x185   : > { %11925 = vmatprep.mubr.msk.bf16.mxu1 %vm19070_vm2, %v19069_v21  ;;  %v14382_v30 = vmul.f32 %v2002_v9, %v1927_v42  ;;  %v1866_v25 = vadd.f32 %v1865_v38, %v1729_v18  ;;  %v1732_v55 = vadd.f32 %v10590_v58, %v13964_v31  ;;  %v2126_v49 = vrot.slane %v14377_v62, 1  ;;  %19297 = vst [vmem:[#allocation152_spill] sm:$0xff] %v14391_v29  ;;  %vm19300_vm8 = vmmov %vm19283_vm9 }
 0x186   : > { %v2203_v2 = vrot.slane %v14377_v62, 2  ;;  %v1873_v15 = vpop.f32.mrb[48].mxu1  ;;  %v2007_v36 = vrot.slane %v14391_v29, 1 }
 0x187   : > { %v1902_v10 = vmul.f32 0.1, %v1866_v25  ;;  %v1869_v8 = vadd.f32 %v1868_v60, %v1732_v55  ;;  %v10591_v9 = vpop.f32.mrb[48].mxu0  ;;  %v2127_v38 = vsel %vm19283_vm9, %v2124_v34, %v2126_v49  ;;  %v2128_v6 = vrot.slane %v14382_v30, 1  ;;  %v11871_v41 = vpop.f32.mrb[49].mxu1 }
 0x188   : > { %v10592_v43 = vpop.f32.mrb[49].mxu0  ;;  %v2269_v37 = vpack.c.bf16 %v2127_v38, %v2125_v63  ;;  %v2204_v17 = vsel %vm19295_vm14, %v2201_v45, %v2203_v2  ;;  %v2205_v39 = vrot.slane %v14382_v30, 2  ;;  %v2271_v5 = vpack.c.bf16 %v14382_v30, %v14377_v62  ;;  %v1876_v27 = vpop.f32.mrb[50].mxu1 }
 0x189   : > { %v1928_v42 = vmax.f32 %v1866_v25, %v1902_v10  ;;  %v1903_v18 = vmul.f32 0.1, %v1869_v8  ;;  %v10593_v58 = vadd.f32 %v10592_v43, %v10591_v9  ;;  %v10594_v60 = vpop.f32.mrb[50].mxu0  ;;  %v2270_v55 = vpack.c.bf16 %v2204_v17, %v2202_v14  ;;  %v11872_v63 = vpop.f32.mrb[51].mxu1  ;;  %v12603_v25 = vld [vmem:[%s18552_s4] ss:$0 sm:$0xff] }
 0x18a   : > { %v2006_v34 = vsel %vm19298_vm10, %v2003_v33, %v2005_v52  ;;  %v10595_v4 = vpop.f32.mrb[51].mxu0  ;;  %2534 = vmatprep.mubr.bf16.mxu0 %v2269_v37  ;;  %v2129_v45 = vsel %vm19283_vm9, %v2126_v49, %v2128_v6  ;;  %v2206_v38 = vsel %vm19295_vm14, %v2203_v2, %v2205_v39  ;;  %vm19299_vm10 = vmmov %vm19283_vm9 }
 0x18b   : > { %v2057_v41 = vmul.f32 %v2004_v3, %v1928_v42  ;;  %v1929_v22 = vmax.f32 %v1869_v8, %v1903_v18  ;;  %v1737_v62 = vadd.f32 %v10593_v58, %v13964_v31  ;;  %v10596_v30 = vadd.f32 %v10595_v4, %v10594_v60 }
 0x18c   : > { %11926 = vmatmul.mubr.bf16.gmra.mrb[88].mxu1 %v2270_v55  ;;  %2535 = vmatmul.mubr.bf16.gmra.mrb[88].mxu0 %v2268_v28  ;;  %v2008_v2 = vsel %vm19299_vm10, %v2005_v52, %v2007_v36  ;;  %vm19302_vm10 = vmmov %vm19300_vm8 }
 0x18d   : > { %11929 = vmatprep.mubr.msk.bf16.mxu1 %vm19070_vm2, %v19069_v21  ;;  %v2058_v33 = vmul.f32 %v2006_v34, %v1929_v22  ;;  %v1874_v14 = vadd.f32 %v1873_v15, %v1737_v62  ;;  %v1740_v10 = vadd.f32 %v12603_v25, %v10596_v30  ;;  %v2130_v49 = vrot.slane %v2057_v41, 1  ;;  %v12397_v25 = vld [vmem:[%s18555_s7 + $0x28] sm:$0xff]  }
 0x18e   : > { %v2207_v3 = vrot.slane %v2057_v41, 2 }
 0x18f   : > { %v1904_v8 = vmul.f32 0.1, %v1874_v14  ;;  %v1877_v9 = vadd.f32 %v1876_v27, %v1740_v10  ;;  %v2131_v4 = vsel %vm19283_vm9, %v2128_v6, %v2130_v49  ;;  %v2132_v31 = vrot.slane %v2058_v33, 1  ;;  %vm19303_vm9 = vmmov %vm19295_vm14  ;;  %v12398_v10 = vld [vmem:[%s18555_s7 + $0xa8] sm:$0xff]  }
 0x190   : > { %v2272_v28 = vpack.c.bf16 %v2131_v4, %v2129_v45  ;;  %v2208_v43 = vsel %vm19295_vm14, %v2205_v39, %v2207_v3  ;;  %v2209_v37 = vrot.slane %v2058_v33, 2  ;;  %v2274_v22 = vpack.c.bf16 %v2058_v33, %v2057_v41  ;;  %11952 = vmatpush3.bf16.msra.mxu1 %v12398_v10  ;;  %v12403_v4 = vld [vmem:[%s18555_s7 + $0x38] sm:$0xff]  }
 0x191   : > { %v1930_v15 = vmax.f32 %v1874_v14, %v1904_v8  ;;  %v1905_v17 = vmul.f32 0.1, %v1877_v9  ;;  %v2273_v42 = vpack.c.bf16 %v2208_v43, %v2206_v38  ;;  %v2133_v18 = vsel %vm19300_vm8, %v2130_v49, %v2132_v31  ;;  %11953 = vmatprep.subr.bf16.mxu1 %v19069_v21  ;;  %v12399_v49 = vld [vmem:[%s18555_s7 + $0x70] sm:$0xff]   ;;  %v12402_v8 = vld [vmem:[%s18555_s7 + $0x78] sm:$0xff]  }
 0x192   : > { %2542 = vmatprep.mubr.bf16.mxu0 %v2272_v28  ;;  %v2210_v58 = vsel %vm19301_vm15, %v2207_v3, %v2209_v37  ;;  %vm19304_vm15 = vmmov %vm19300_vm8  ;;  %v12401_v3 = vld [vmem:[%s18555_s7 + $0xb0] sm:$0xff]   ;;  %vm2782_vm14 = vcmask 1041408  }
 0x193   : > { %v2059_v52 = vmul.f32 %v2008_v2, %v1930_v15  ;;  %v1931_v60 = vmax.f32 %v1877_v9, %v1905_v17  ;;  %vm19305_vm8 = vmmov %vm19303_vm9  ;;  %v12400_v2 = vld [vmem:[%s18555_s7 + $0x30] sm:$0xff]   ;;  %v12404_v9 = vld [vmem:[%s18555_s7 + $0xb8] sm:$0xff]  }
 0x194   : > { %11930 = vmatmul.mubr.bf16.gmra.mrb[92].mxu1 %v2273_v42  ;;  %2543 = vmatmul.mubr.bf16.gmra.mrb[92].mxu0 %v2271_v5 }
 0x195   : > { %11933 = vmatprep.mubr.msk.bf16.mxu1 %vm19070_vm2, %v19069_v21  ;;  %v2060_v27 = vmul.f32 %v2007_v36, %v1931_v60  ;;  %v2134_v6 = vrot.slane %v2059_v52, 1  ;;  %v2211_v39 = vrot.slane %v2059_v52, 2  ;;  %v12396_v36 = vld [vmem:[%s18555_s7 + $0x68] sm:$0xff]   ;;  %11954 = vmatpush3.bf16.msra.mxu1 %v12401_v3 }
 0x196   : > { %10743 = vmatprep.subr.bf16.mxu0 %v12396_v36  ;;  %11955 = vmatprep.subr.bf16.mxu1 %v19069_v21 }
 0x197   : > { %v2135_v55 = vsel %vm19302_vm10, %v2132_v31, %v2134_v6  ;;  %v2212_v34 = vsel %vm19303_vm9, %v2209_v37, %v2211_v39  ;;  %v2136_v63 = vrot.slane %v2060_v27, 1  ;;  %v2213_v45 = vrot.slane %v2060_v27, 2  ;;  %10744 = vmatpush3.bf16.msra.mxu0 %v12397_v25  ;;  %vm19313_vm9 = vmmov %vm19304_vm15 }
 0x198   : > { %v2275_v38 = vpack.c.bf16 %v2135_v55, %v2133_v18  ;;  %v2276_v41 = vpack.c.bf16 %v2212_v34, %v2210_v58  ;;  %v2277_v62 = vpack.c.bf16 %v2060_v27, %v2059_v52  ;;  %10745 = vmatprep.subr.bf16.mxu0 %v12399_v49  ;;  %vm18798_vm10 = vcmask 1044480  }
 0x199   : > { %v2137_v30 = vsel %vm19304_vm15, %v2134_v6, %v2136_v63  ;;  %v2214_v33 = vsel %vm19305_vm8, %v2211_v39, %v2213_v45  ;;  %11956 = vmatpush3.bf16.msra.mxu1 %v12404_v9  ;;  %vm19320_vm15 = vmmov %vm19313_vm9 }
 0x19a   : > { %2550 = vmatprep.mubr.bf16.mxu0 %v2275_v38  ;;  %v2278_v5 = vpack.c.bf16 %v2136_v63, %v2137_v30  ;;  %v2279_v14 = vpack.c.bf16 %v2213_v45, %v2214_v33  ;;  %vm19321_vm8 = vmmov %vm19313_vm9 }
 0x19b   : > { %10746 = vmatpush3.bf16.msra.mxu0 %v12400_v2 }
 0x19c   : > { %11934 = vmatmul.mubr.bf16.gmra.mrb[96].mxu1 %v2276_v41  ;;  %2551 = vmatmul.mubr.bf16.gmra.mrb[96].mxu0 %v2274_v22  ;;  %v14457_v22 = vld [vmem:[%s18554_s6] ss:$0 sm:$0xff] }
 0x19d   : > { %11937 = vmatprep.mubr.msk.bf16.mxu1 %vm19070_vm2, %v19069_v21  ;;  %2558 = vmatprep.mubr.bf16.mxu0 %v2278_v5 }
 0x19e   : > { %10747 = vmatprep.subr.bf16.mxu0 %v12402_v8 }
 0x19f   : > { %10748 = vmatpush3.bf16.msra.mxu0 %v12403_v4 }
 0x1a4   : > { %11938 = vmatmul.mubr.bf16.gmra.mrb[100].mxu1 %v2279_v14  ;;  %2559 = vmatmul.mubr.bf16.gmra.mrb[100].mxu0 %v2277_v62 }
 0x1a5   : > { %11957 = vmatprep.mubr.msk.bf16.mxu1 %vm19070_vm2, %v19069_v21 }
 0x210   : > { %v2601_v31 = vpop.f32.mrb[52].mxu1 }
 0x211   : > { %v11891_v28 = vpop.f32.mrb[53].mxu1 }
 0x212   : > { %v10634_v43 = vpop.f32.mrb[52].mxu0  ;;  %v2604_v37 = vpop.f32.mrb[54].mxu1 }
 0x213   : > { %v10635_v15 = vpop.f32.mrb[53].mxu0  ;;  %v11892_v17 = vpop.f32.mrb[55].mxu1 }
 0x214   : > { %v10636_v42 = vadd.f32 %v10635_v15, %v10634_v43  ;;  %v10637_v18 = vpop.f32.mrb[54].mxu0 }
 0x215   : > { %v10638_v58 = vpop.f32.mrb[55].mxu0 }
 0x216   : > { %v2465_v52 = vadd.f32 %v10636_v42, %v14457_v22  ;;  %v10639_v60 = vadd.f32 %v10638_v58, %v10637_v18 }
 0x218   : > { %v2602_v27 = vadd.f32 %v2601_v31, %v2465_v52  ;;  %v2468_v6 = vadd.f32 %v10639_v60, %v14457_v22 }
 0x21a   : > { %v2609_v39 = vpop.f32.mrb[56].mxu1  ;;  %v2704_v55 = vmul.f32 0.1, %v2602_v27  ;;  %v2605_v34 = vadd.f32 %v2604_v37, %v2468_v6 }
 0x21b   : > { %v11895_v45 = vpop.f32.mrb[57].mxu1 }
 0x21c   : > { %v10640_v63 = vpop.f32.mrb[56].mxu0  ;;  %v2612_v41 = vpop.f32.mrb[58].mxu1  ;;  %v2730_v62 = vmax.f32 %v2602_v27, %v2704_v55  ;;  %v2705_v30 = vmul.f32 0.1, %v2605_v34 }
 0x21d   : > { %v10641_v38 = vpop.f32.mrb[57].mxu0  ;;  %v11896_v14 = vpop.f32.mrb[59].mxu1 }
 0x21e   : > { %v10642_v33 = vadd.f32 %v10641_v38, %v10640_v63  ;;  %v10643_v5 = vpop.f32.mrb[58].mxu0  ;;  %v2783_v25 = vrot.slane %v2730_v62, 6  ;;  %v2731_v10 = vmax.f32 %v2605_v34, %v2705_v30 }
 0x21f   : > { %v10644_v36 = vpop.f32.mrb[59].mxu0 }
 0x220   : > { %v2473_v49 = vadd.f32 %v10642_v33, %v14457_v22  ;;  %v10645_v2 = vadd.f32 %v10644_v36, %v10643_v5  ;;  %v2784_v3 = vrot.slane %v2731_v10, 6  ;;  %v2860_v4 = vadd.f32 %v2783_v25, %v13063_v53 }
 0x222   : > { %v2610_v8 = vadd.f32 %v2609_v39, %v2473_v49  ;;  %v2476_v9 = vadd.f32 %v10645_v2, %v14457_v22  ;;  %v2785_v28 = vsel %vm2782_vm14, %v2783_v25, %v2784_v3  ;;  %v2886_v55 = vmul.f32 %v13969_v7, %v2860_v4  ;;  %v14479_v2 = vld [vmem:[%s18557_s9 + $0x80] sm:$0xff]  }
 0x223   : > { %v2617_v31 = vpop.f32.mrb[60].mxu1  ;;  %v2861_v42 = vadd.f32 %v2785_v28, %v13067_v54  ;;  %12009 = vmatprep.subr.bf16.mxu1 %v14479_v2 }
 0x224   : > { %v2706_v43 = vmul.f32 0.1, %v2610_v8  ;;  %v2613_v37 = vadd.f32 %v2612_v41, %v2476_v9  ;;  %v11899_v17 = vpop.f32.mrb[61].mxu1 }
 0x225   : > { %v2620_v58 = vpop.f32.mrb[62].mxu1  ;;  %v14468_v34 = vmul.f32 %v13974_v16, %v2861_v42 }
 0x226   : > { %v10646_v15 = vpop.f32.mrb[60].mxu0  ;;  %v2732_v52 = vmax.f32 %v2610_v8, %v2706_v43  ;;  %v2707_v60 = vmul.f32 0.1, %v2613_v37  ;;  %v11900_v39 = vpop.f32.mrb[63].mxu1  ;;  %v12407_v8 = vld [vmem:[%s18557_s9 + $0x40] sm:$0xff]   ;;  %v3037_v43 = vrot.slane %v2886_v55, 3 }
 0x227   : > { %v10647_v18 = vpop.f32.mrb[61].mxu0  ;;  %19306 = vst [vmem:[#allocation153_spill] sm:$0xff] %v14468_v34  ;;  %v3038_v30 = vrot.slane %v14468_v34, 3  ;;  %v3187_v49 = vpack.c.bf16 %v14468_v34, %v2886_v55  ;;  %10848 = vmatprep.subr.bf16.mxu0 %v12407_v8 }
 0x228   : > { %v10648_v27 = vadd.f32 %v10647_v18, %v10646_v15  ;;  %v10649_v6 = vpop.f32.mrb[62].mxu0  ;;  %v2786_v45 = vrot.slane %v2732_v52, 6  ;;  %v2733_v38 = vmax.f32 %v2613_v37, %v2707_v60  ;;  %v3113_v18 = vrot.slane %v14468_v34, 6 }
 0x229   : > { %v10650_v63 = vpop.f32.mrb[63].mxu0  ;;  %v3039_v39 = vsel %vm18798_vm10, %v3037_v43, %v3038_v30 }
 0x22a   : > { %v2481_v41 = vadd.f32 %v10648_v27, %v14457_v22  ;;  %v10651_v62 = vadd.f32 %v10650_v63, %v10649_v6  ;;  %v2787_v33 = vsel %vm2782_vm14, %v2784_v3, %v2786_v45  ;;  %v2788_v5 = vrot.slane %v2733_v38, 6 }
 0x22b   : > { %v2862_v25 = vadd.f32 %v2787_v33, %v13080_v57  ;;  %v2625_v10 = vpop.f32.mrb[64].mxu1 }
 0x22c   : > { %v2618_v14 = vadd.f32 %v2617_v31, %v2481_v41  ;;  %v2484_v36 = vadd.f32 %v10651_v62, %v14457_v22  ;;  %v2789_v3 = vsel %vm2782_vm14, %v2786_v45, %v2788_v5  ;;  %v11903_v28 = vpop.f32.mrb[65].mxu1  ;;  %v3272_v41 = vrot.slane %v3187_v49, 1 }
 0x22d   : > { %v14486_v37 = vmul.f32 %v13980_v26, %v2862_v25  ;;  %v2863_v15 = vadd.f32 %v2789_v3, %v13087_v61  ;;  %v2628_v42 = vpop.f32.mrb[66].mxu1 }
 0x22e   : > { %v2708_v9 = vmul.f32 0.1, %v2618_v14  ;;  %v2621_v4 = vadd.f32 %v2620_v58, %v2484_v36  ;;  %v11904_v58 = vpop.f32.mrb[67].mxu1 }
 0x22f   : > { %v10652_v31 = vpop.f32.mrb[64].mxu0  ;;  %19307 = vst [vmem:[#allocation154_spill] sm:$0xff] %v14486_v37  ;;  %v14493_v55 = vmul.f32 %v13990_v23, %v2863_v15  ;;  %v3040_v45 = vrot.slane %v14486_v37, 3  ;;  %v3114_v38 = vrot.slane %v14486_v37, 6 }
 0x230   : > { %v10653_v17 = vpop.f32.mrb[65].mxu0  ;;  %v2734_v52 = vmax.f32 %v2618_v14, %v2708_v9  ;;  %v2709_v60 = vmul.f32 0.1, %v2621_v4 }
 0x231   : > { %v10654_v27 = vadd.f32 %v10653_v17, %v10652_v31  ;;  %v10655_v6 = vpop.f32.mrb[66].mxu0  ;;  %19308 = vst [vmem:[#allocation155_spill] sm:$0xff] %v14493_v55  ;;  %v3041_v25 = vsel %vm18798_vm10, %v3038_v30, %v3040_v45  ;;  %v3042_v8 = vrot.slane %v14493_v55, 3  ;;  %v3115_v3 = vsel %vm2782_vm14, %v3113_v18, %v3114_v38 }
 0x232   : > { %v10656_v63 = vpop.f32.mrb[67].mxu0  ;;  %v2790_v62 = vrot.slane %v2734_v52, 6  ;;  %v2735_v33 = vmax.f32 %v2621_v4, %v2709_v60  ;;  %v3116_v9 = vrot.slane %v14493_v55, 6  ;;  %v3188_v52 = vpack.c.bf16 %v3041_v25, %v3039_v39 }
 0x233   : > { %v2489_v36 = vadd.f32 %v10654_v27, %v14457_v22  ;;  %v10657_v14 = vadd.f32 %v10656_v63, %v10655_v6  ;;  %v3043_v17 = vsel %vm18798_vm10, %v3040_v45, %v3042_v8  ;;  %v3189_v34 = vpack.c.bf16 %v3115_v3, %v3113_v18 }
 0x234   : > { %v2791_v31 = vsel %vm2782_vm14, %v2788_v5, %v2790_v62  ;;  %v2792_v28 = vrot.slane %v2735_v33, 6  ;;  %v3117_v30 = vsel %vm2782_vm14, %v3114_v38, %v3116_v9  ;;  %v3190_v39 = vpack.c.bf16 %v14493_v55, %v14486_v37 }
 0x235   : > { %v2626_v43 = vadd.f32 %v2625_v10, %v2489_v36  ;;  %v2492_v15 = vadd.f32 %v10657_v14, %v14457_v22  ;;  %v2864_v49 = vadd.f32 %v2791_v31, %v13156_v32  ;;  %v2633_v4 = vpop.f32.mrb[68].mxu1  ;;  %v19310_v10 = vld [vmem:[#allocation43_spill] sm:$0xff]  ;;  %v3275_v31 = vrot.slane %v3188_v52, 1 }
 0x236   : > { %v2793_v60 = vsel %vm2782_vm14, %v2790_v62, %v2792_v28  ;;  %v11907_v63 = vpop.f32.mrb[69].mxu1 }
 0x237   : > { %v2710_v27 = vmul.f32 0.1, %v2626_v43  ;;  %v2629_v6 = vadd.f32 %v2628_v42, %v2492_v15  ;;  %v10658_v58 = vpop.f32.mrb[68].mxu0  ;;  %v14509_v5 = vmul.f32 %v13996_v46, %v2864_v49  ;;  %v2865_v33 = vadd.f32 %v2793_v60, %v19310_v10  ;;  %v2636_v14 = vpop.f32.mrb[70].mxu1  ;;  %v19311_v15 = vld [vmem:[#allocation132_spill] sm:$0xff] }
 0x238   : > { %v10659_v36 = vpop.f32.mrb[69].mxu0  ;;  %v11908_v19 = vpop.f32.mrb[71].mxu1  ;;  %v3278_v42 = vrot.slane %v3189_v34, 1  ;;  %v14519_v60 = vrot.slane %v3190_v39, 1 }
 0x239   : > { %19309 = vst [vmem:[#allocation156_spill] sm:$0xff] %v14509_v5  ;;  %v2736_v45 = vmax.f32 %v2626_v43, %v2710_v27  ;;  %v2711_v38 = vmul.f32 0.1, %v2629_v6  ;;  %v10660_v25 = vadd.f32 %v10659_v36, %v10658_v58  ;;  %v10661_v62 = vpop.f32.mrb[70].mxu0  ;;  %v14515_v63 = vmul.f32 %v19311_v15, %v2865_v33 }
 0x23a   : > { %v10662_v18 = vpop.f32.mrb[71].mxu0  ;;  %v3044_v3 = vrot.slane %v14509_v5, 3  ;;  %v3118_v49 = vrot.slane %v14509_v5, 6  ;;  %v3274_v34 = vsel %vm19313_vm9, %v3272_v41, %v14519_v60  ;;  %vm19325_vm9 = vmmov %vm19321_vm8 }
 0x23b   : > { %19312 = vst [vmem:[#allocation157_spill] sm:$0xff] %v14515_v63  ;;  %v2794_v52 = vrot.slane %v2736_v45, 6  ;;  %v2737_v10 = vmax.f32 %v2629_v6, %v2711_v38  ;;  %v2497_v55 = vadd.f32 %v10660_v25, %v14457_v22  ;;  %v10663_v43 = vadd.f32 %v10662_v18, %v10661_v62  ;;  %v19314_v45 = vld [vmem:[#allocation44_spill] sm:$0xff] }
 0x23c   : > { %v3045_v27 = vsel %vm18798_vm10, %v3042_v8, %v3044_v3  ;;  %v3119_v19 = vsel %vm2782_vm14, %v3116_v9, %v3118_v49  ;;  %v3046_v58 = vrot.slane %v14515_v63, 3  ;;  %v3120_v57 = vrot.slane %v14515_v63, 6 }
 0x23d   : > { %v2795_v33 = vsel %vm2782_vm14, %v2792_v28, %v2794_v52  ;;  %v2796_v36 = vrot.slane %v2737_v10, 6  ;;  %v2634_v37 = vadd.f32 %v2633_v4, %v2497_v55  ;;  %v2500_v39 = vadd.f32 %v10663_v43, %v14457_v22  ;;  %v2641_v38 = vpop.f32.mrb[72].mxu1  ;;  %v19315_v28 = vld [vmem:[#allocation133_spill] sm:$0xff] }
 0x23e   : > { %v2866_v6 = vadd.f32 %v2795_v33, %v19314_v45  ;;  %v3191_v25 = vpack.c.bf16 %v3045_v27, %v3043_v17  ;;  %v3192_v62 = vpack.c.bf16 %v3119_v19, %v3117_v30  ;;  %v3047_v8 = vsel %vm18798_vm10, %v3044_v3, %v3046_v58  ;;  %v11911_v61 = vpop.f32.mrb[73].mxu1  ;;  %v19317_v55 = vld [vmem:[#allocation49_spill] sm:$0xff] }
 0x23f   : > { %v2797_v9 = vsel %vm2782_vm14, %v2794_v52, %v2796_v36  ;;  %v2712_v18 = vmul.f32 0.1, %v2634_v37  ;;  %v2637_v32 = vadd.f32 %v2636_v14, %v2500_v39  ;;  %v10664_v41 = vpop.f32.mrb[72].mxu0  ;;  %v2644_v33 = vpop.f32.mrb[74].mxu1  ;;  %v3121_v14 = vsel %vm2782_vm14, %v3118_v49, %v3120_v57  ;;  %v12409_v61 = vld [vmem:[%s18557_s9] sm:$0xff]   ;;  %v19318_v39 = vld [vmem:[#allocation134_spill] sm:$0xff] }
 0x240   : > { %v14534_v10 = vmul.f32 %v19315_v28, %v2866_v6  ;;  %v2867_v4 = vadd.f32 %v2797_v9, %v19317_v55  ;;  %v10665_v43 = vpop.f32.mrb[73].mxu0  ;;  %v3276_v45 = vrot.slane %v3191_v25, 1  ;;  %v14537_v17 = vrot.slane %v3192_v62, 1  ;;  %v11912_v19 = vpop.f32.mrb[75].mxu1  ;;  %v12406_v62 = vld [vmem:[%s18557_s9 + $0x88] sm:$0xff]  }
 0x241   : > { %v2738_v30 = vmax.f32 %v2634_v37, %v2712_v18  ;;  %v2713_v3 = vmul.f32 0.1, %v2637_v32  ;;  %v10666_v27 = vadd.f32 %v10665_v43, %v10664_v41  ;;  %v10667_v52 = vpop.f32.mrb[74].mxu0 }
 0x242   : > { %19316 = vst [vmem:[#allocation158_spill] sm:$0xff] %v14534_v10  ;;  %v14544_v6 = vmul.f32 %v19318_v39, %v2867_v4  ;;  %v10668_v9 = vpop.f32.mrb[75].mxu0  ;;  %v3277_v55 = vsel %vm19320_vm15, %v3275_v31, %v3276_v45  ;;  %v3280_v25 = vsel %vm19321_vm8, %v3278_v42, %v14537_v17  ;;  %v3048_v37 = vrot.slane %v14534_v10, 3  ;;  %vm19328_vm15 = vmmov %vm19321_vm8 }
 0x243   : > { %v2798_v49 = vrot.slane %v2738_v30, 6  ;;  %v2739_v18 = vmax.f32 %v2637_v32, %v2713_v3  ;;  %v2505_v41 = vadd.f32 %v10666_v27, %v14457_v22  ;;  %v10669_v43 = vadd.f32 %v10668_v9, %v10667_v52  ;;  %3562 = vmatprep.mubr.bf16.mxu0 %v3277_v55  ;;  %11958 = vmatmul.mubr.bf16.vlgmr.msra.gmra.mrb[104].mxu1 %v3280_v25 }
 0x244   : > { %19319 = vst [vmem:[#allocation159_spill] sm:$0xff] %v14544_v6  ;;  %3563 = vmatmul.mubr.bf16.vlgmr.msra.gmra.mrb[104].mxu0 %v3274_v34  ;;  %11961 = vmatprep.mubr.msk.bf16.mxu1 %vm19070_vm2, %v19069_v21  ;;  %v3049_v31 = vsel %vm18798_vm10, %v3046_v58, %v3048_v37  ;;  %v3122_v42 = vrot.slane %v14534_v10, 6  ;;  %v3193_v4 = vpack.c.bf16 %v14515_v63, %v14509_v5  ;;  %v3050_v19 = vrot.slane %v14544_v6, 3  ;;  %v19322_v34 = vld [vmem:[#allocation52_spill] sm:$0xff] }
 0x245   : > { %v2799_v32 = vsel %vm2782_vm14, %v2796_v36, %v2798_v49  ;;  %v2800_v30 = vrot.slane %v2739_v18, 6  ;;  %v2642_v3 = vadd.f32 %v2641_v38, %v2505_v41  ;;  %v2508_v55 = vadd.f32 %v10669_v43, %v14457_v22  ;;  %12010 = vmatpush3.bf16.msra.mxu1 %v14479_v2  ;;  %10849 = vmatpush3.bf16.msra.mxu0 %v12409_v61  ;;  %v2649_v52 = vpop.f32.mrb[76].mxu1  ;;  %v12408_v36 = vld [vmem:[%s18557_s9 + $0x90] sm:$0xff]  }
 0x246   : > { %v2868_v27 = vadd.f32 %v2799_v32, %v19322_v34  ;;  %v3194_v58 = vpack.c.bf16 %v3049_v31, %v3047_v8  ;;  %v3123_v9 = vsel %vm2782_vm14, %v3120_v57, %v3122_v42  ;;  %v14566_v25 = vrot.slane %v3193_v4, 1  ;;  %12011 = vmatprep.subr.bf16.mxu1 %v12406_v62  ;;  %v11915_v2 = vpop.f32.mrb[77].mxu1  ;;  %v19324_v8 = vld [vmem:[#allocation59_spill] sm:$0xff] }
 0x247   : > { %v2801_v38 = vsel %vm2782_vm14, %v2798_v49, %v2800_v30  ;;  %v2714_v18 = vmul.f32 0.1, %v2642_v3  ;;  %v2645_v41 = vadd.f32 %v2644_v33, %v2508_v55  ;;  %v10670_v43 = vpop.f32.mrb[76].mxu0  ;;  %v3195_v61 = vpack.c.bf16 %v3123_v9, %v3121_v14  ;;  %v2652_v4 = vpop.f32.mrb[78].mxu1  ;;  %v19326_v14 = vld [vmem:[#allocation136_spill] sm:$0xff] }
 0x248   : > { %v14573_v32 = vmul.f32 %v14047_v51, %v2868_v27  ;;  %v2869_v31 = vadd.f32 %v2801_v38, %v19324_v8  ;;  %v10671_v57 = vpop.f32.mrb[77].mxu0  ;;  %v3283_v63 = vrot.slane %v3194_v58, 1  ;;  %v3282_v5 = vsel %vm19325_vm9, %v14519_v60, %v14566_v25  ;;  %v11916_v33 = vpop.f32.mrb[79].mxu1  ;;  %vm19333_vm9 = vmmov %vm19321_vm8 }
 0x249   : > { %v2740_v34 = vmax.f32 %v2642_v3, %v2714_v18  ;;  %v2715_v54 = vmul.f32 0.1, %v2645_v41  ;;  %v10672_v49 = vadd.f32 %v10671_v57, %v10670_v43  ;;  %v10673_v53 = vpop.f32.mrb[78].mxu0  ;;  %v3285_v55 = vrot.slane %v3195_v61, 1  ;;  %12012 = vmatpush3.bf16.msra.mxu1 %v12406_v62 }
 0x24a   : > { %19323 = vst [vmem:[#allocation160_spill] sm:$0xff] %v14573_v32  ;;  %v14580_v9 = vmul.f32 %v19326_v14, %v2869_v31  ;;  %v10674_v27 = vpop.f32.mrb[79].mxu0  ;;  %v3284_v38 = vsel %vm19328_vm15, %v3276_v45, %v3283_v63  ;;  %v3051_v2 = vsel %vm18798_vm10, %v3048_v37, %v3050_v19  ;;  %v3052_v58 = vrot.slane %v14573_v32, 3  ;;  %12013 = vmatprep.subr.bf16.mxu1 %v12408_v36  ;;  %vm19334_vm15 = vmmov %vm19321_vm8 }
 0x24b   : > { %v2802_v8 = vrot.slane %v2740_v34, 6  ;;  %v2741_v60 = vmax.f32 %v2645_v41, %v2715_v54  ;;  %v2513_v3 = vadd.f32 %v10672_v49, %v14457_v22  ;;  %v10675_v18 = vadd.f32 %v10674_v27, %v10673_v53  ;;  %3570 = vmatprep.mubr.bf16.mxu0 %v3284_v38  ;;  %v19329_v34 = vld [vmem:[#allocation60_spill] sm:$0xff] }
 0x24c   : > { %19327 = vst [vmem:[#allocation161_spill] sm:$0xff] %v14580_v9  ;;  %v3286_v62 = vsel %vm19321_vm8, %v14537_v17, %v3285_v55  ;;  %3571 = vmatmul.mubr.bf16.gmra.mrb[108].mxu0 %v3282_v5  ;;  %v3053_v43 = vsel %vm18798_vm10, %v3050_v19, %v3052_v58  ;;  %v3124_v61 = vrot.slane %v14544_v6, 6  ;;  %v18782_v45 = vrot.slane %v14573_v32, 6 }
 0x24d   : > { %v2803_v37 = vsel %vm2782_vm14, %v2800_v30, %v2802_v8  ;;  %v2804_v31 = vrot.slane %v2741_v60, 6  ;;  %v2650_v57 = vadd.f32 %v2649_v52, %v2513_v3  ;;  %v2516_v54 = vadd.f32 %v10675_v18, %v14457_v22  ;;  %11962 = vmatmul.mubr.bf16.gmra.mrb[108].mxu1 %v3286_v62  ;;  %v19331_v3 = vld [vmem:[#allocation65_spill] sm:$0xff] }
 0x24e   : > { %v2870_v53 = vadd.f32 %v2803_v37, %v19329_v34  ;;  %v2657_v41 = vpop.f32.mrb[80].mxu1  ;;  %11965 = vmatprep.mubr.msk.bf16.mxu1 %vm19070_vm2, %v19069_v21  ;;  %v3197_v5 = vpack.c.bf16 %v3053_v43, %v3051_v2  ;;  %v3125_v17 = vsel %vm2782_vm14, %v3122_v42, %v3124_v61  ;;  %v3127_v19 = vsel %vm2782_vm14, %v3124_v61, %v18782_v45 }
 0x24f   : > { %v2805_v30 = vsel %vm2782_vm14, %v2802_v8, %v2804_v31  ;;  %v2716_v49 = vmul.f32 0.1, %v2650_v57  ;;  %v2653_v52 = vadd.f32 %v2652_v4, %v2516_v54  ;;  %v10676_v33 = vpop.f32.mrb[80].mxu0  ;;  %v11919_v27 = vpop.f32.mrb[81].mxu1  ;;  %v3198_v38 = vpack.c.bf16 %v3127_v19, %v3125_v17  ;;  %12014 = vmatpush3.bf16.msra.mxu1 %v12408_v36 }
 0x250   : > { %v14602_v60 = vmul.f32 %v14096_v56, %v2870_v53  ;;  %v2871_v18 = vadd.f32 %v2805_v30, %v19331_v3  ;;  %v10677_v2 = vpop.f32.mrb[81].mxu0  ;;  %v2660_v62 = vpop.f32.mrb[82].mxu1  ;;  %v3289_v42 = vrot.slane %v3197_v5, 1  ;;  %v3196_v43 = vpack.c.bf16 %v14544_v6, %v14534_v10 }
 0x251   : > { %v2742_v61 = vmax.f32 %v2650_v57, %v2716_v49  ;;  %v2717_v37 = vmul.f32 0.1, %v2653_v52  ;;  %v10678_v8 = vadd.f32 %v10677_v2, %v10676_v33  ;;  %v10679_v45 = vpop.f32.mrb[82].mxu0  ;;  %v11920_v4 = vpop.f32.mrb[83].mxu1  ;;  %v14607_v54 = vrot.slane %v3198_v38, 1 }
 0x252   : > { %19330 = vst [vmem:[#allocation162_spill] sm:$0xff] %v14602_v60  ;;  %v14610_v36 = vmul.f32 %v14115_v20, %v2871_v18  ;;  %v10680_v53 = vpop.f32.mrb[83].mxu0  ;;  %v3290_v17 = vsel %vm19333_vm9, %v3283_v63, %v3289_v42  ;;  %v3287_v19 = vrot.slane %v3196_v43, 1  ;;  %v3054_v30 = vrot.slane %v14580_v9, 3  ;;  %vm19340_vm9 = vmmov %vm19321_vm8 }
 0x253   : > { %v2806_v5 = vrot.slane %v2742_v61, 6  ;;  %v2743_v27 = vmax.f32 %v2653_v52, %v2717_v37  ;;  %v2521_v6 = vadd.f32 %v10678_v8, %v14457_v22  ;;  %v10681_v57 = vadd.f32 %v10680_v53, %v10679_v45  ;;  %3578 = vmatprep.mubr.bf16.mxu0 %v3290_v17  ;;  %v19335_v45 = vld [vmem:[#allocation66_spill] sm:$0xff] }
 0x254   : > { %19332 = vst [vmem:[#allocation163_spill] sm:$0xff] %v14610_v36  ;;  %v3292_v49 = vsel %vm19334_vm15, %v3285_v55, %v14607_v54  ;;  %v3288_v33 = vsel %vm19321_vm8, %v14566_v25, %v3287_v19  ;;  %v3055_v38 = vsel %vm18798_vm10, %v3052_v58, %v3054_v30  ;;  %v3056_v18 = vrot.slane %v14602_v60, 3  ;;  %vm19342_vm15 = vmmov %vm19321_vm8 }
 0x255   : > { %v2807_v63 = vsel %vm2782_vm14, %v2804_v31, %v2806_v5  ;;  %v2808_v2 = vrot.slane %v2743_v27, 6  ;;  %v2658_v43 = vadd.f32 %v2657_v41, %v2521_v6  ;;  %v2524_v52 = vadd.f32 %v10681_v57, %v14457_v22  ;;  %11966 = vmatmul.mubr.bf16.gmra.mrb[112].mxu1 %v3292_v49  ;;  %3579 = vmatmul.mubr.bf16.gmra.mrb[112].mxu0 %v3288_v33  ;;  %v19337_v27 = vld [vmem:[#allocation73_spill] sm:$0xff] }
 0x256   : > { %v2872_v61 = vadd.f32 %v2807_v63, %v19335_v45  ;;  %11969 = vmatprep.mubr.msk.bf16.mxu1 %vm19070_vm2, %v19069_v21  ;;  %v3057_v25 = vsel %vm18798_vm10, %v3054_v30, %v3056_v18  ;;  %v3128_v55 = vrot.slane %v14580_v9, 6  ;;  %v18785_v58 = vrot.slane %v14602_v60, 6 }
 0x257   : > { %v2665_v37 = vpop.f32.mrb[84].mxu1  ;;  %v2809_v31 = vsel %vm2782_vm14, %v2806_v5, %v2808_v2  ;;  %v2718_v8 = vmul.f32 0.1, %v2658_v43  ;;  %v2661_v6 = vadd.f32 %v2660_v62, %v2524_v52  ;;  %v10682_v41 = vpop.f32.mrb[84].mxu0  ;;  %v3200_v53 = vpack.c.bf16 %v3057_v25, %v3055_v38 }
 0x258   : > { %v11923_v4 = vpop.f32.mrb[85].mxu1  ;;  %v14631_v17 = vmul.f32 %v14152_v40, %v2872_v61  ;;  %v2873_v57 = vadd.f32 %v2809_v31, %v19337_v27  ;;  %v10683_v49 = vpop.f32.mrb[85].mxu0  ;;  %v19338_v30 = vrot.slane %v14573_v32, 6  ;;  %v3131_v5 = vsel %vm2782_vm14, %v3128_v55, %v18785_v58 }
 0x259   : > { %v2668_v33 = vpop.f32.mrb[86].mxu1  ;;  %v2744_v10 = vmax.f32 %v2658_v43, %v2718_v8  ;;  %v2719_v62 = vmul.f32 0.1, %v2661_v6  ;;  %v10684_v52 = vadd.f32 %v10683_v49, %v10682_v41  ;;  %v10685_v4 = vpop.f32.mrb[86].mxu0  ;;  %v14640_v25 = vrot.slane %v3200_v53, 1 }
 0x25a   : > { %19336 = vst [vmem:[#allocation164_spill] sm:$0xff] %v14631_v17  ;;  %v3129_v63 = vsel %vm2782_vm14, %v19338_v30, %v3128_v55  ;;  %v11924_v38 = vpop.f32.mrb[87].mxu1  ;;  %v14643_v61 = vmul.f32 %v14171_v12, %v2873_v57  ;;  %v10686_v31 = vpop.f32.mrb[87].mxu0  ;;  %v3199_v45 = vpack.c.bf16 %v14580_v9, %v14573_v32  ;;  %v3058_v30 = vrot.slane %v14610_v36, 3 }
 0x25b   : > { %v3201_v27 = vpack.c.bf16 %v3131_v5, %v3129_v63  ;;  %v2810_v3 = vrot.slane %v2744_v10, 6  ;;  %v2745_v34 = vmax.f32 %v2661_v6, %v2719_v62  ;;  %v2529_v43 = vadd.f32 %v10684_v52, %v14457_v22  ;;  %v19341_v10 = vld [vmem:[#allocation75_spill] sm:$0xff] }
 0x25c   : > { %19339 = vst [vmem:[#allocation165_spill] sm:$0xff] %v14643_v61  ;;  %v10687_v55 = vadd.f32 %v10686_v31, %v10685_v4  ;;  %v3296_v8 = vsel %vm19340_vm9, %v3289_v42, %v14640_v25  ;;  %v3293_v53 = vrot.slane %v3199_v45, 1  ;;  %v3059_v57 = vsel %vm18798_vm10, %v3056_v18, %v3058_v30  ;;  %vm19348_vm9 = vmmov %vm19321_vm8 }
 0x25d   : > { %v14651_v41 = vrot.slane %v3201_v27, 1  ;;  %v2811_v49 = vsel %vm2782_vm14, %v2808_v2, %v2810_v3  ;;  %v2812_v63 = vrot.slane %v2745_v34, 6  ;;  %v2666_v5 = vadd.f32 %v2665_v37, %v2529_v43  ;;  %3586 = vmatprep.mubr.bf16.mxu0 %v3296_v8  ;;  %v19344_v43 = vld [vmem:[#allocation81_spill] sm:$0xff] }
 0x25e   : > { %v2532_v38 = vadd.f32 %v10687_v55, %v14457_v22  ;;  %v2874_v6 = vadd.f32 %v2811_v49, %v19341_v10  ;;  %v3294_v42 = vsel %vm19321_vm8, %v3287_v19, %v3293_v53  ;;  %v3060_v45 = vrot.slane %v14631_v17, 3 }
 0x25f   : > { %v3298_v62 = vsel %vm19342_vm15, %v14607_v54, %v14651_v41  ;;  %v2673_v27 = vpop.f32.mrb[88].mxu1  ;;  %v2813_v18 = vsel %vm2782_vm14, %v2810_v3, %v2812_v63  ;;  %v2720_v52 = vmul.f32 0.1, %v2666_v5  ;;  %3587 = vmatmul.mubr.bf16.gmra.mrb[116].mxu0 %v3294_v42  ;;  %v10688_v34 = vpop.f32.mrb[88].mxu0  ;;  %v3132_v4 = vrot.slane %v14610_v36, 6  ;;  %vm19349_vm15 = vmmov %vm19321_vm8 }
 0x260   : > { %v2669_v2 = vadd.f32 %v2668_v33, %v2532_v38  ;;  %11970 = vmatmul.mubr.bf16.gmra.mrb[116].mxu1 %v3298_v62  ;;  %v11927_v37 = vpop.f32.mrb[89].mxu1  ;;  %v14665_v31 = vmul.f32 %v14203_v24, %v2874_v6  ;;  %v2875_v54 = vadd.f32 %v2813_v18, %v19344_v43  ;;  %v10689_v55 = vpop.f32.mrb[89].mxu0  ;;  %v3061_v3 = vsel %vm18798_vm10, %v3058_v30, %v3060_v45 }
 0x261   : > { %v2676_v19 = vpop.f32.mrb[90].mxu1  ;;  %11973 = vmatprep.mubr.msk.bf16.mxu1 %vm19070_vm2, %v19069_v21  ;;  %v3134_v33 = vrot.slane %v14631_v17, 6  ;;  %v2746_v8 = vmax.f32 %v2666_v5, %v2720_v52  ;;  %v10690_v38 = vadd.f32 %v10689_v55, %v10688_v34  ;;  %v10691_v62 = vpop.f32.mrb[90].mxu0  ;;  %v3203_v37 = vpack.c.bf16 %v3061_v3, %v3059_v57 }
 0x262   : > { %19343 = vst [vmem:[#allocation166_spill] sm:$0xff] %v14665_v31  ;;  %v2721_v49 = vmul.f32 0.1, %v2669_v2  ;;  %v11928_v42 = vpop.f32.mrb[91].mxu1  ;;  %v14673_v6 = vmul.f32 %v14216_v59, %v2875_v54  ;;  %v10692_v58 = vpop.f32.mrb[91].mxu0  ;;  %v19346_v18 = vrot.slane %v14602_v60, 6  ;;  %v3202_v30 = vpack.c.bf16 %v14610_v36, %v14602_v60 }
 0x263   : > { %v3135_v32 = vsel %vm2782_vm14, %v3132_v4, %v3134_v33  ;;  %v2814_v43 = vrot.slane %v2746_v8, 6  ;;  %v2537_v52 = vadd.f32 %v10690_v38, %v14457_v22  ;;  %v10693_v34 = vadd.f32 %v10692_v58, %v10691_v62  ;;  %v19347_v59 = vld [vmem:[#allocation82_spill] sm:$0xff] }
 0x264   : > { %19345 = vst [vmem:[#allocation167_spill] sm:$0xff] %v14673_v6  ;;  %v3133_v9 = vsel %vm2782_vm14, %v19346_v18, %v3132_v4  ;;  %v2747_v5 = vmax.f32 %v2669_v2, %v2721_v49  ;;  %v14682_v55 = vrot.slane %v3203_v37, 1  ;;  %v3299_v54 = vrot.slane %v3202_v30, 1  ;;  %v19351_v30 = vld [vmem:[#allocation87_spill] sm:$0xff] }
 0x265   : > { %v3204_v57 = vpack.c.bf16 %v3135_v32, %v3133_v9  ;;  %v3062_v3 = vrot.slane %v14643_v61, 3  ;;  %v2815_v42 = vsel %vm2782_vm14, %v2812_v63, %v2814_v43  ;;  %v2674_v18 = vadd.f32 %v2673_v27, %v2537_v52 }
 0x266   : > { %v2816_v10 = vrot.slane %v2747_v5, 6  ;;  %v2540_v4 = vadd.f32 %v10693_v34, %v14457_v22  ;;  %v2876_v24 = vadd.f32 %v2815_v42, %v19347_v59  ;;  %v3302_v2 = vsel %vm19348_vm9, %v14640_v25, %v14682_v55  ;;  %v19353_v59 = vld [vmem:[#allocation90_spill] sm:$0xff]  ;;  %vm19354_vm9 = vmmov %vm19321_vm8 }
 0x267   : > { %v14691_v8 = vrot.slane %v3204_v57, 1  ;;  %v3300_v58 = vsel %vm19349_vm15, %v3293_v53, %v3299_v54  ;;  %v2681_v32 = vpop.f32.mrb[92].mxu1  ;;  %v2722_v49 = vmul.f32 0.1, %v2674_v18  ;;  %3594 = vmatprep.mubr.bf16.mxu0 %v3302_v2  ;;  %v10694_v63 = vpop.f32.mrb[92].mxu0  ;;  %v3063_v62 = vsel %vm18798_vm10, %v3060_v45, %v3062_v3  ;;  %vm19357_vm15 = vmmov %vm19321_vm8 }
 0x268   : > { %v2817_v9 = vsel %vm2782_vm14, %v2814_v43, %v2816_v10  ;;  %v2677_v38 = vadd.f32 %v2676_v19, %v2540_v4  ;;  %v11931_v27 = vpop.f32.mrb[93].mxu1  ;;  %v14697_v37 = vmul.f32 %v14239_v48, %v2876_v24  ;;  %3595 = vmatmul.mubr.bf16.gmra.mrb[120].mxu0 %v3300_v58  ;;  %v10695_v53 = vpop.f32.mrb[93].mxu0  ;;  %v3064_v43 = vrot.slane %v14665_v31, 3 }
 0x269   : > { %v2877_v5 = vadd.f32 %v2817_v9, %v19351_v30  ;;  %v3304_v25 = vsel %vm19321_vm8, %v14651_v41, %v14691_v8  ;;  %v2684_v52 = vpop.f32.mrb[94].mxu1  ;;  %v2748_v19 = vmax.f32 %v2674_v18, %v2722_v49  ;;  %v10696_v57 = vadd.f32 %v10695_v53, %v10694_v63  ;;  %v10697_v42 = vpop.f32.mrb[94].mxu0 }
 0x26a   : > { %19350 = vst [vmem:[#allocation168_spill] sm:$0xff] %v14697_v37  ;;  %v2723_v34 = vmul.f32 0.1, %v2677_v38  ;;  %11974 = vmatmul.mubr.bf16.gmra.mrb[120].mxu1 %v3304_v25  ;;  %v11932_v45 = vpop.f32.mrb[95].mxu1  ;;  %v3136_v24 = vrot.slane %v14643_v61, 6  ;;  %v10698_v41 = vpop.f32.mrb[95].mxu0  ;;  %v3065_v2 = vsel %vm18798_vm10, %v3062_v3, %v3064_v43  ;;  %v3205_v18 = vpack.c.bf16 %v14643_v61, %v14631_v17 }
 0x26b   : > { %v14706_v4 = vmul.f32 %v14251_v11, %v2877_v5  ;;  %11977 = vmatprep.mubr.msk.bf16.mxu1 %vm19070_vm2, %v19069_v21  ;;  %v3138_v58 = vrot.slane %v14665_v31, 6  ;;  %v2818_v9 = vrot.slane %v2748_v19, 6  ;;  %v2545_v63 = vadd.f32 %v10696_v57, %v14457_v22 }
 0x26c   : > { %v2749_v49 = vmax.f32 %v2677_v38, %v2723_v34  ;;  %v10699_v27 = vadd.f32 %v10698_v41, %v10697_v42  ;;  %v3206_v25 = vpack.c.bf16 %v3065_v2, %v3063_v62  ;;  %v3137_v5 = vsel %vm2782_vm14, %v3134_v33, %v3136_v24  ;;  %v19356_v2 = vld [vmem:[#allocation93_spill] sm:$0xff] }
 0x26d   : > { %19352 = vst [vmem:[#allocation169_spill] sm:$0xff] %v14706_v4  ;;  %v3139_v53 = vsel %vm2782_vm14, %v3136_v24, %v3138_v58  ;;  %v14717_v45 = vrot.slane %v3205_v18, 1  ;;  %v2819_v36 = vsel %vm2782_vm14, %v2816_v10, %v2818_v9  ;;  %v2682_v60 = vadd.f32 %v2681_v32, %v2545_v63 }
 0x26e   : > { %v2820_v3 = vrot.slane %v2749_v49, 6  ;;  %v2548_v30 = vadd.f32 %v10699_v27, %v14457_v22  ;;  %v2878_v61 = vadd.f32 %v2819_v36, %v19353_v59  ;;  %v14722_v19 = vrot.slane %v3206_v25, 1 }
 0x26f   : > { %v3207_v38 = vpack.c.bf16 %v3139_v53, %v3137_v5  ;;  %v3306_v62 = vsel %vm19354_vm9, %v3299_v54, %v14717_v45  ;;  %v2689_v34 = vpop.f32.mrb[96].mxu1  ;;  %v2724_v57 = vmul.f32 0.1, %v2682_v60  ;;  %v10700_v24 = vpop.f32.mrb[96].mxu0  ;;  %v3066_v10 = vrot.slane %v14673_v6, 3  ;;  %vm19362_vm9 = vmmov %vm19321_vm8 }
 0x270   : > { %v2821_v33 = vsel %vm2782_vm14, %v2818_v9, %v2820_v3  ;;  %v2685_v42 = vadd.f32 %v2684_v52, %v2548_v30  ;;  %v11935_v41 = vpop.f32.mrb[97].mxu1  ;;  %v14729_v32 = vmul.f32 %v14277_v13, %v2878_v61  ;;  %v3308_v18 = vsel %vm19357_vm15, %v14682_v55, %v14722_v19  ;;  %v10701_v54 = vpop.f32.mrb[97].mxu0  ;;  %vm19364_vm15 = vmmov %vm19321_vm8 }
 0x271   : > { %v2879_v36 = vadd.f32 %v2821_v33, %v19356_v2  ;;  %v3309_v49 = vrot.slane %v3207_v38, 1  ;;  %v2692_v63 = vpop.f32.mrb[98].mxu1  ;;  %v2750_v27 = vmax.f32 %v2682_v60, %v2724_v57  ;;  %3602 = vmatprep.mubr.bf16.mxu0 %v3308_v18  ;;  %v10702_v30 = vadd.f32 %v10701_v54, %v10700_v24  ;;  %v10703_v52 = vpop.f32.mrb[98].mxu0 }
 0x272   : > { %19355 = vst [vmem:[#allocation170_spill] sm:$0xff] %v14729_v32  ;;  %v2725_v9 = vmul.f32 0.1, %v2685_v42  ;;  %v11936_v25 = vpop.f32.mrb[99].mxu1  ;;  %v3067_v5 = vsel %vm18798_vm10, %v3064_v43, %v3066_v10  ;;  %3603 = vmatmul.mubr.bf16.gmra.mrb[124].mxu0 %v3306_v62  ;;  %v10704_v33 = vpop.f32.mrb[99].mxu0  ;;  %v3068_v55 = vrot.slane %v14697_v37, 3  ;;  %v3208_v62 = vpack.c.bf16 %v14673_v6, %v14665_v31 }
 0x273   : > { %v14737_v61 = vmul.f32 %v14282_v50, %v2879_v36  ;;  %v3310_v53 = vsel %vm19321_vm8, %v14691_v8, %v3309_v49  ;;  %v3140_v38 = vrot.slane %v14673_v6, 6  ;;  %v2822_v60 = vrot.slane %v2750_v27, 6 }
 0x274   : > { %v2751_v57 = vmax.f32 %v2685_v42, %v2725_v9  ;;  %11978 = vmatmul.mubr.bf16.gmra.mrb[124].mxu1 %v3310_v53  ;;  %v2553_v24 = vadd.f32 %v10702_v30, %v14457_v22  ;;  %v10705_v41 = vadd.f32 %v10704_v33, %v10703_v52  ;;  %v3069_v43 = vsel %vm18798_vm10, %v3066_v10, %v3068_v55  ;;  %v19359_v9 = vld [vmem:[#allocation94_spill] sm:$0xff] }
 0x275   : > { %19358 = vst [vmem:[#allocation171_spill] sm:$0xff] %v14737_v61  ;;  %11981 = vmatprep.mubr.msk.bf16.mxu1 %vm19070_vm2, %v19069_v21  ;;  %v3141_v36 = vsel %vm2782_vm14, %v3138_v58, %v3140_v38  ;;  %v3142_v8 = vrot.slane %v14697_v37, 6  ;;  %v2823_v18 = vsel %vm2782_vm14, %v2820_v3, %v2822_v60  ;;  %v3209_v52 = vpack.c.bf16 %v3069_v43, %v3067_v5 }
 0x276   : > { %v2824_v54 = vrot.slane %v2751_v57, 6  ;;  %v2690_v42 = vadd.f32 %v2689_v34, %v2553_v24  ;;  %v2556_v27 = vadd.f32 %v10705_v41, %v14457_v22  ;;  %v2880_v30 = vadd.f32 %v2823_v18, %v19359_v9  ;;  %v19361_v34 = vld [vmem:[#allocation101_spill] sm:$0xff] }
 0x277   : > { %v3143_v25 = vsel %vm2782_vm14, %v3140_v38, %v3142_v8  ;;  %v14755_v53 = vrot.slane %v3208_v62, 1  ;;  %v2697_v10 = vpop.f32.mrb[100].mxu1  ;;  %v10706_v6 = vpop.f32.mrb[100].mxu0  ;;  %v3313_v24 = vrot.slane %v3209_v52, 1  ;;  %v3070_v52 = vrot.slane %v14706_v4, 3 }
 0x278   : > { %v2825_v58 = vsel %vm2782_vm14, %v2822_v60, %v2824_v54  ;;  %v2726_v33 = vmul.f32 0.1, %v2690_v42  ;;  %v2693_v17 = vadd.f32 %v2692_v63, %v2556_v27  ;;  %v3210_v2 = vpack.c.bf16 %v3143_v25, %v3141_v36  ;;  %v11939_v31 = vpop.f32.mrb[101].mxu1  ;;  %v10707_v38 = vpop.f32.mrb[101].mxu0 }
 0x279   : > { %v14759_v3 = vmul.f32 %v14302_v1, %v2880_v30  ;;  %v2881_v57 = vadd.f32 %v2825_v58, %v19361_v34  ;;  %v3312_v5 = vsel %vm19362_vm9, %v14717_v45, %v14755_v53  ;;  %v2700_v41 = vpop.f32.mrb[102].mxu1  ;;  %v10708_v18 = vadd.f32 %v10707_v38, %v10706_v6  ;;  %v10709_v63 = vpop.f32.mrb[102].mxu0  ;;  %vm19368_vm9 = vmmov %vm19321_vm8 }
 0x27a   : > { %v2752_v43 = vmax.f32 %v2690_v42, %v2726_v33  ;;  %v2727_v62 = vmul.f32 0.1, %v2693_v17  ;;  %v3315_v60 = vrot.slane %v3210_v2, 1  ;;  %v11940_v36 = vpop.f32.mrb[103].mxu1  ;;  %v3314_v27 = vsel %vm19364_vm15, %v14722_v19, %v3313_v24  ;;  %v10710_v30 = vpop.f32.mrb[103].mxu0  ;;  %vm19370_vm15 = vmmov %vm19321_vm8 }
 0x27b   : > { %19360 = vst [vmem:[#allocation172_spill] sm:$0xff] %v14759_v3  ;;  %v14766_v31 = vmul.f32 %v14328_v44, %v2881_v57  ;;  %v3072_v25 = vrot.slane %v14729_v32, 3  ;;  %3610 = vmatprep.mubr.bf16.mxu0 %v3314_v27  ;;  %v2561_v6 = vadd.f32 %v10708_v18, %v14457_v22  ;;  %v10711_v2 = vadd.f32 %v10710_v30, %v10709_v63  ;;  %v19367_v30 = vld [vmem:[#allocation109_spill] sm:$0xff] }
 0x27c   : > { %v2826_v45 = vrot.slane %v2752_v43, 6  ;;  %v2753_v58 = vmax.f32 %v2693_v17, %v2727_v62  ;;  %v3316_v42 = vsel %vm19321_vm8, %v3309_v49, %v3315_v60  ;;  %3611 = vmatmul.mubr.bf16.gmra.mrb[128].mxu0 %v3312_v5  ;;  %v3071_v33 = vsel %vm18798_vm10, %v3068_v55, %v3070_v52  ;;  %v19365_v49 = vld [vmem:[#allocation102_spill] sm:$0xff] }
 0x27d   : > { %19363 = vst [vmem:[#allocation173_spill] sm:$0xff] %v14766_v31  ;;  %11982 = vmatmul.mubr.bf16.gmra.mrb[128].mxu1 %v3316_v42  ;;  %v3073_v57 = vsel %vm18798_vm10, %v3070_v52, %v3072_v25  ;;  %v3144_v19 = vrot.slane %v14706_v4, 6  ;;  %v2698_v34 = vadd.f32 %v2697_v10, %v2561_v6  ;;  %v2564_v62 = vadd.f32 %v10711_v2, %v14457_v22 }
 0x27e   : > { %v2827_v38 = vsel %vm2782_vm14, %v2824_v54, %v2826_v45  ;;  %v2828_v36 = vrot.slane %v2753_v58, 6  ;;  %11985 = vmatprep.mubr.msk.bf16.mxu1 %vm19070_vm2, %v19069_v21  ;;  %v3212_v17 = vpack.c.bf16 %v3073_v57, %v3071_v33  ;;  %v3146_v55 = vrot.slane %v14729_v32, 6 }
 0x27f   : > { %v2882_v43 = vadd.f32 %v2827_v38, %v19365_v49  ;;  %v3145_v5 = vsel %vm2782_vm14, %v3142_v8, %v3144_v19  ;;  %v2728_v63 = vmul.f32 0.1, %v2698_v34  ;;  %v3211_v54 = vpack.c.bf16 %v14706_v4, %v14697_v37 }
 0x280   : > { %v2829_v18 = vsel %vm2782_vm14, %v2826_v45, %v2828_v36  ;;  %v3319_v27 = vrot.slane %v3212_v17, 1  ;;  %v2701_v58 = vadd.f32 %v2700_v41, %v2564_v62  ;;  %v3147_v42 = vsel %vm2782_vm14, %v3144_v19, %v3146_v55 }
 0x281   : > { %v14788_v10 = vmul.f32 %v14334_v35, %v2882_v43  ;;  %v2883_v52 = vadd.f32 %v2829_v18, %v19367_v30  ;;  %v2754_v22 = vmax.f32 %v2698_v34, %v2728_v63  ;;  %v3213_v6 = vpack.c.bf16 %v3147_v42, %v3145_v5  ;;  %v19371_v42 = vld [vmem:[#allocation110_spill] sm:$0xff] }
 0x282   : > { %v3320_v8 = vsel %vm19368_vm9, %v3313_v24, %v3319_v27  ;;  %v3317_v2 = vrot.slane %v3211_v54, 1  ;;  %v2729_v33 = vmul.f32 0.1, %v2701_v58  ;;  %v3074_v57 = vrot.slane %v14737_v61, 3  ;;  %vm19373_vm9 = vmmov %vm19321_vm8 }
 0x283   : > { %19366 = vst [vmem:[#allocation174_spill] sm:$0xff] %v14788_v10  ;;  %v14794_v45 = vmul.f32 %v14360_v47, %v2883_v52  ;;  %3618 = vmatprep.mubr.bf16.mxu0 %v3320_v8  ;;  %v3076_v38 = vrot.slane %v14759_v3, 3  ;;  %v2830_v17 = vrot.slane %v2754_v22, 6  ;;  %v3321_v43 = vrot.slane %v3213_v6, 1 }
 0x284   : > { %v3318_v41 = vsel %vm19370_vm15, %v14755_v53, %v3317_v2  ;;  %v3148_v34 = vrot.slane %v14737_v61, 6  ;;  %v2755_v19 = vmax.f32 %v2701_v58, %v2729_v33  ;;  %v3075_v24 = vsel %vm18798_vm10, %v3072_v25, %v3074_v57  ;;  %vm19374_vm15 = vmmov %vm19321_vm8 }
 0x285   : > { %19369 = vst [vmem:[#allocation175_spill] sm:$0xff] %v14794_v45  ;;  %3619 = vmatmul.mubr.bf16.gmra.mrb[132].mxu0 %v3318_v41  ;;  %v3077_v62 = vsel %vm18798_vm10, %v3074_v57, %v3076_v38  ;;  %v3150_v5 = vrot.slane %v14759_v3, 6  ;;  %v2831_v18 = vsel %vm2782_vm14, %v2828_v36, %v2830_v17  ;;  %v3322_v63 = vsel %vm19321_vm8, %v3315_v60, %v3321_v43 }
 0x286   : > { %v3215_v54 = vpack.c.bf16 %v3077_v62, %v3075_v24  ;;  %v3149_v52 = vsel %vm2782_vm14, %v3146_v55, %v3148_v34  ;;  %v2884_v22 = vadd.f32 %v2831_v18, %v19371_v42  ;;  %v2832_v53 = vrot.slane %v2755_v19, 6  ;;  %11986 = vmatmul.mubr.bf16.gmra.mrb[132].mxu1 %v3322_v63 }
 0x287   : > { %v3151_v58 = vsel %vm2782_vm14, %v3148_v34, %v3150_v5  ;;  %v3214_v25 = vpack.c.bf16 %v14737_v61, %v14729_v32  ;;  %11989 = vmatprep.mubr.msk.bf16.mxu1 %vm19070_vm2, %v19069_v21  ;;  %v3078_v36 = vrot.slane %v14766_v31, 3  ;;  %v3080_v60 = vrot.slane %v14788_v10, 3  ;;  %v12448_v32 = vld [vmem:[%s18559_s11 + $0x98] sm:$0xff]  }
 0x288   : > { %v3325_v8 = vrot.slane %v3215_v54, 1  ;;  %v3216_v6 = vpack.c.bf16 %v3151_v58, %v3149_v52  ;;  %v14816_v55 = vmul.f32 %v14373_v0, %v2884_v22  ;;  %v2833_v33 = vsel %vm2782_vm14, %v2830_v17, %v2832_v53 }
 0x289   : > { %v3323_v57 = vrot.slane %v3214_v25, 1  ;;  %v3152_v41 = vrot.slane %v14766_v31, 6  ;;  %v3079_v24 = vsel %vm18798_vm10, %v3076_v38, %v3078_v36  ;;  %v3081_v62 = vsel %vm18798_vm10, %v3078_v36, %v3080_v60 }
 0x28a   : > { %19372 = vst [vmem:[#allocation176_spill] sm:$0xff] %v14816_v55  ;;  %v3326_v34 = vsel %vm19373_vm9, %v3319_v27, %v3325_v8  ;;  %v3327_v19 = vrot.slane %v3216_v6, 1  ;;  %v3218_v63 = vpack.c.bf16 %v3081_v62, %v3079_v24  ;;  %v3154_v54 = vrot.slane %v14788_v10, 6  ;;  %vm19375_vm9 = vmmov %vm19321_vm8 }
 0x28b   : > { %3626 = vmatprep.mubr.bf16.mxu0 %v3326_v34  ;;  %v3324_v18 = vsel %vm19374_vm15, %v3317_v2, %v3323_v57  ;;  %v3217_v17 = vpack.c.bf16 %v14766_v31, %v14759_v3  ;;  %v3082_v22 = vrot.slane %v14794_v45, 3  ;;  %v3084_v27 = vrot.slane %v14816_v55, 3  ;;  %vm19377_vm15 = vmmov %vm19321_vm8 }
 0x28c   : > { %v3328_v52 = vsel %vm19321_vm8, %v3321_v43, %v3327_v19  ;;  %v3331_v53 = vrot.slane %v3218_v63, 1  ;;  %v3153_v38 = vsel %vm2782_vm14, %v3150_v5, %v3152_v41  ;;  %v3155_v58 = vsel %vm2782_vm14, %v3152_v41, %v3154_v54  ;;  %v19376_v63 = vld [vmem:[#allocation112_spill] sm:$0xff] }
 0x28d   : > { %3627 = vmatmul.mubr.bf16.gmra.mrb[136].mxu0 %v3324_v18  ;;  %v3158_v2 = vrot.slane %v14816_v55, 6  ;;  %v3219_v25 = vpack.c.bf16 %v3155_v58, %v3153_v38  ;;  %v3083_v6 = vsel %vm18798_vm10, %v3080_v60, %v3082_v22  ;;  %v3085_v43 = vsel %vm18798_vm10, %v3082_v22, %v3084_v27 }
 0x28e   : > { %11990 = vmatmul.mubr.bf16.gmra.mrb[136].mxu1 %v3328_v52  ;;  %v3332_v36 = vsel %vm19375_vm9, %v3325_v8, %v3331_v53  ;;  %v3221_v34 = vpack.c.bf16 %v3085_v43, %v3083_v6  ;;  %v3156_v24 = vrot.slane %v14794_v45, 6  ;;  %v3329_v62 = vrot.slane %v3217_v17, 1  ;;  %vm19378_vm9 = vmmov %vm19321_vm8 }
 0x28f   : > { %11993 = vmatprep.mubr.msk.bf16.mxu1 %vm19070_vm2, %v19069_v21  ;;  %3634 = vmatprep.mubr.bf16.mxu0 %v3332_v36  ;;  %v3333_v5 = vrot.slane %v3219_v25, 1  ;;  %v2885_v38 = vadd.f32 %v2833_v33, %v19376_v63  ;;  %v3220_v25 = vpack.c.bf16 %v14794_v45, %v14788_v10 }
 0x290   : > { %v3337_v41 = vrot.slane %v3221_v34, 1  ;;  %v3159_v18 = vsel %vm2782_vm14, %v3156_v24, %v3158_v2  ;;  %v3157_v52 = vsel %vm2782_vm14, %v3154_v54, %v3156_v24  ;;  %v3330_v58 = vsel %vm19378_vm9, %v3323_v57, %v3329_v62  ;;  %v12410_v57 = vld [vmem:[%s18557_s9 + $0x48] sm:$0xff]   ;;  %vm19380_vm9 = vmmov %vm19321_vm8 }
 0x291   : > { %v2911_v8 = vmul.f32 %v14391_v29, %v2885_v38  ;;  %v3334_v22 = vsel %vm19321_vm8, %v3327_v19, %v3333_v5  ;;  %v3222_v6 = vpack.c.bf16 %v3159_v18, %v3157_v52  ;;  %10850 = vmatprep.subr.bf16.mxu0 %v12410_v57  ;;  %v3223_v38 = vpack.c.bf16 %v14816_v55, %v14816_v55  ;;  %v12424_v57 = vld [vmem:[%s18557_s9 + $0xa8] sm:$0xff]  }
 0x292   : > { %v3338_v60 = vsel %vm19377_vm15, %v3331_v53, %v3337_v41  ;;  %v3335_v53 = vrot.slane %v3220_v25, 1  ;;  %vm19379_vm15 = vmmov %vm19321_vm8  ;;  %v12416_v25 = vld [vmem:[%s18557_s9 + $0x98] sm:$0xff]  }
 0x293   : > { %v3086_v17 = vrot.slane %v2911_v8, 3  ;;  %v3160_v43 = vrot.slane %v2911_v8, 6  ;;  %v3339_v54 = vrot.slane %v3222_v6, 1  ;;  %v3341_v52 = vrot.slane %v3223_v38, 1  ;;  %v12415_v6 = vld [vmem:[%s18557_s9 + $0x18] sm:$0xff]   ;;  %12015 = vmatprep.subr.bf16.mxu1 %v12416_v25  ;;  %v12429_v38 = vld [vmem:[%s18559_s11 + $0x40] sm:$0xff]  }
 0x294   : > { %v3336_v18 = vsel %vm19321_vm8, %v3329_v62, %v3335_v53  ;;  %12016 = vmatpush3.bf16.msra.mxu1 %v12416_v25 }
 0x295   : > { %3635 = vmatmul.mubr.bf16.gmra.mrb[140].mxu0 %v3330_v58  ;;  %v3087_v33 = vsel %vm18798_vm10, %v3084_v27, %v3086_v17  ;;  %v3161_v34 = vsel %vm2782_vm14, %v3158_v2, %v3160_v43  ;;  %v3340_v24 = vsel %vm19379_vm15, %v3333_v5, %v3339_v54  ;;  %vm19381_vm10 = vmmov %vm19321_vm8  ;;  %v12411_v5 = vld [vmem:[%s18557_s9 + $0x8] sm:$0xff]   ;;  %v12414_v58 = vld [vmem:[%s18557_s9 + $0x58] sm:$0xff]  }
 0x296   : > { %3642 = vmatprep.mubr.bf16.mxu0 %v3338_v60  ;;  %11994 = vmatmul.mubr.bf16.gmra.mrb[140].mxu1 %v3334_v22  ;;  %v3224_v36 = vpack.c.bf16 %v3087_v33, %v3087_v33  ;;  %v3225_v60 = vpack.c.bf16 %v3161_v34, %v3161_v34  ;;  %v3342_v2 = vsel %vm19381_vm10, %v3335_v53, %v3341_v52  ;;  %vm19382_vm15 = vmmov %vm19321_vm8  ;;  %v12413_v22 = vld [vmem:[%s18557_s9 + $0x10] sm:$0xff]   ;;  %v12417_v17 = vld [vmem:[%s18557_s9 + $0x60] sm:$0xff]   ;;  %vm3852_vm10 = vcmask 1042432  }
 0x297   : > { %11997 = vmatprep.mubr.msk.bf16.mxu1 %vm19070_vm2, %v19069_v21  ;;  %10851 = vmatpush3.bf16.msra.mxu0 %v12411_v5  ;;  %v12418_v33 = vld [vmem:[%s18557_s9 + $0x20] sm:$0xff]   ;;  %v12419_v43 = vld [vmem:[%s18557_s9 + $0x68] sm:$0xff]   ;;  %v12425_v34 = vld [vmem:[%s18557_s9 + $0x78] sm:$0xff]   ;;  %vm19383_vm8 = vcmask 1044480  }
 0x298   : > { %v3343_v19 = vrot.slane %v3224_v36, 1  ;;  %v3345_v8 = vrot.slane %v3225_v60, 1  ;;  %v12421_v53 = vld [vmem:[%s18557_s9 + $0xa0] sm:$0xff]   ;;  %v12422_v36 = vld [vmem:[%s18557_s9 + $0x70] sm:$0xff]  }
 0x299   : > { %12017 = vmatprep.subr.bf16.mxu1 %v12421_v53  ;;  %v12437_v60 = vld [vmem:[%s18559_s11 + $0xc0] sm:$0xff]  }
 0x29a   : > { %v3344_v27 = vsel %vm19380_vm9, %v3337_v41, %v3343_v19  ;;  %v3346_v62 = vsel %vm19382_vm15, %v3339_v54, %v3345_v8  ;;  %v12412_v41 = vld [vmem:[%s18557_s9 + $0x50] sm:$0xff]   ;;  %v12420_v54 = vld [vmem:[%s18557_s9 + $0x28] sm:$0xff]   ;;  %12018 = vmatpush3.bf16.msra.mxu1 %v12421_v53  ;;  %v14929_v5 = vld [vmem:[%s18556_s8] ss:$0 sm:$0xff] }
 0x29b   : > { %10852 = vmatprep.subr.bf16.mxu0 %v12412_v41  ;;  %12019 = vmatprep.subr.bf16.mxu1 %v12424_v57  ;;  %vm19384_vm9 = vmmov %vm19383_vm8 }
 0x29c   : > { %10853 = vmatpush3.bf16.msra.mxu0 %v12413_v22  ;;  %vm19385_vm15 = vmmov %vm19383_vm8 }
 0x29d   : > { %3643 = vmatmul.mubr.bf16.gmra.mrb[144].mxu0 %v3336_v18  ;;  %10854 = vmatprep.subr.bf16.mxu0 %v12414_v58  ;;  %v12427_v18 = vld [vmem:[%s18557_s9 + $0xb0] sm:$0xff]  }
 0x29e   : > { %3650 = vmatprep.mubr.bf16.mxu0 %v3344_v27  ;;  %11998 = vmatmul.mubr.bf16.gmra.mrb[144].mxu1 %v3340_v24  ;;  %v12426_v24 = vld [vmem:[%s18557_s9 + $0x38] sm:$0xff]  }
 0x29f   : > { %12001 = vmatprep.mubr.msk.bf16.mxu1 %vm19070_vm2, %v19069_v21  ;;  %12020 = vmatpush3.bf16.msra.mxu1 %v12424_v57  ;;  %v12428_v27 = vld [vmem:[%s18557_s9 + $0xb8] sm:$0xff]   ;;  %v3856_v57 = vrot.slane %v13980_v26, 5 }
 0x2a0   : > { %10855 = vmatpush3.bf16.msra.mxu0 %v12415_v6  ;;  %12021 = vmatprep.subr.bf16.mxu1 %v12427_v18 }
 0x2a1   : > { %10856 = vmatprep.subr.bf16.mxu0 %v12417_v17 }
 0x2a3   : > { %12022 = vmatpush3.bf16.msra.mxu1 %v12427_v18 }
 0x2a4   : > { %10857 = vmatpush3.bf16.msra.mxu0 %v12418_v33  ;;  %12023 = vmatprep.subr.bf16.mxu1 %v12428_v27 }
 0x2a5   : > { %3651 = vmatmul.mubr.bf16.gmra.mrb[148].mxu0 %v3342_v2  ;;  %10858 = vmatprep.subr.bf16.mxu0 %v12419_v43  ;;  %v3853_v43 = vrot.slane %v13969_v7, 5 }
 0x2a6   : > { %3658 = vmatprep.mubr.bf16.mxu0 %v3343_v19  ;;  %12002 = vmatmul.mubr.bf16.gmra.mrb[148].mxu1 %v3346_v62  ;;  %v12423_v19 = vld [vmem:[%s18557_s9 + $0x30] sm:$0xff]  }
 0x2a7   : > { %12005 = vmatprep.mubr.msk.bf16.mxu1 %vm19070_vm2, %v19069_v21  ;;  %12024 = vmatpush3.bf16.msra.mxu1 %v12428_v27 }
 0x2a8   : > { %10859 = vmatpush3.bf16.msra.mxu0 %v12420_v54  ;;  %10956 = vmatprep.subr.bf16.mxu1 %v12429_v38  ;;  %v3854_v54 = vrot.slane %v13974_v16, 5 }
 0x2a9   : > { %10860 = vmatprep.subr.bf16.mxu0 %v12422_v36 }
 0x2aa   : > { %v3855_v18 = vsel %vm3852_vm10, %v3853_v43, %v3854_v54  ;;  %v3858_v43 = vrot.slane %v13990_v23, 5 }
 0x2ac   : > { %10861 = vmatpush3.bf16.msra.mxu0 %v12423_v19 }
 0x2ad   : > { %3659 = vmatmul.mubr.bf16.gmra.mrb[152].mxu0 %v3341_v52  ;;  %10862 = vmatprep.subr.bf16.mxu0 %v12425_v34 }
 0x2ae   : > { %12006 = vmatmul.mubr.bf16.gmra.mrb[152].mxu1 %v3345_v8 }
 0x2b0   : > { %10863 = vmatpush3.bf16.msra.mxu0 %v12426_v24 }
 0x2b1   : > { %11056 = vmatprep.subr.bf16.mxu0 %v12437_v60 }
 0x316   : > { %v3700_v52 = vpop.f32.mrb[104].mxu1 }
 0x317   : > { %v10749_v8 = vpop.f32.mrb[104].mxu0  ;;  %v11959_v2 = vpop.f32.mrb[105].mxu1 }
 0x318   : > { %v10750_v62 = vpop.f32.mrb[105].mxu0  ;;  %v3703_v41 = vpop.f32.mrb[106].mxu1 }
 0x319   : > { %v10751_v22 = vadd.f32 %v10750_v62, %v10749_v8  ;;  %v10752_v58 = vpop.f32.mrb[106].mxu0  ;;  %v11960_v6 = vpop.f32.mrb[107].mxu1 }
 0x31a   : > { %v10753_v25 = vpop.f32.mrb[107].mxu0 }
 0x31b   : > { %v3565_v17 = vadd.f32 %v10751_v22, %v14929_v5  ;;  %v10754_v33 = vadd.f32 %v10753_v25, %v10752_v58  ;;  %v3857_v58 = vsel %vm3852_vm10, %v3854_v54, %v3856_v57 }
 0x31d   : > { %v3701_v53 = vadd.f32 %v3700_v52, %v3565_v17  ;;  %v3568_v36 = vadd.f32 %v10754_v33, %v14929_v5 }
 0x31f   : > { %v3802_v19 = vmul.f32 0.1, %v3701_v53  ;;  %v3704_v34 = vadd.f32 %v3703_v41, %v3568_v36  ;;  %v10755_v24 = vpop.f32.mrb[108].mxu0 }
 0x320   : > { %v3708_v27 = vpop.f32.mrb[108].mxu1  ;;  %v10756_v38 = vpop.f32.mrb[109].mxu0 }
 0x321   : > { %v3827_v60 = vmax.f32 %v3701_v53, %v3802_v19  ;;  %v3803_v8 = vmul.f32 0.1, %v3704_v34  ;;  %v11963_v2 = vpop.f32.mrb[109].mxu1  ;;  %v10757_v62 = vadd.f32 %v10756_v38, %v10755_v24  ;;  %v10758_v22 = vpop.f32.mrb[110].mxu0  ;;  %v3860_v19 = vrot.slane %v13996_v46, 5 }
 0x322   : > { %v3711_v52 = vpop.f32.mrb[110].mxu1  ;;  %v10759_v6 = vpop.f32.mrb[111].mxu0 }
 0x323   : > { %v14938_v25 = vmul.f32 %v3855_v18, %v3827_v60  ;;  %v3828_v17 = vmax.f32 %v3704_v34, %v3803_v8  ;;  %v3573_v33 = vadd.f32 %v10757_v62, %v14929_v5  ;;  %v11964_v41 = vpop.f32.mrb[111].mxu1  ;;  %v10760_v36 = vadd.f32 %v10759_v6, %v10758_v22 }
 0x324   : > { %v3859_v8 = vsel %vm3852_vm10, %v3856_v57, %v3858_v43 }
 0x325   : > { %v3930_v10 = vmul.f32 %v3857_v58, %v3828_v17  ;;  %v3709_v55 = vadd.f32 %v3708_v27, %v3573_v33  ;;  %v3576_v53 = vadd.f32 %v10760_v36, %v14929_v5  ;;  %v3979_v24 = vrot.slane %v14938_v25, 3 }
 0x326   : > { %v4052_v54 = vrot.slane %v14938_v25, 6  ;;  %v3861_v36 = vsel %vm3852_vm10, %v3858_v43, %v3860_v19 }
 0x327   : > { %v3804_v38 = vmul.f32 0.1, %v3709_v55  ;;  %v3712_v18 = vadd.f32 %v3711_v52, %v3576_v53  ;;  %v3980_v60 = vrot.slane %v3930_v10, 3  ;;  %v4053_v34 = vrot.slane %v3930_v10, 6 }
 0x328   : > { %v3716_v2 = vpop.f32.mrb[112].mxu1  ;;  %v10761_v62 = vpop.f32.mrb[112].mxu0  ;;  %v4125_v22 = vpack.c.bf16 %v3930_v10, %v14938_v25 }
 0x329   : > { %v3829_v58 = vmax.f32 %v3709_v55, %v3804_v38  ;;  %v3805_v27 = vmul.f32 0.1, %v3712_v18  ;;  %v11967_v6 = vpop.f32.mrb[113].mxu1  ;;  %v10762_v17 = vpop.f32.mrb[113].mxu0  ;;  %v3981_v33 = vsel %vm19383_vm8, %v3979_v24, %v3980_v60  ;;  %v4054_v41 = vsel %vm2782_vm14, %v4052_v54, %v4053_v34 }
 0x32a   : > { %v10763_v31 = vadd.f32 %v10762_v17, %v10761_v62  ;;  %v3719_v52 = vpop.f32.mrb[114].mxu1  ;;  %v10764_v53 = vpop.f32.mrb[114].mxu0  ;;  %v3862_v38 = vrot.slane %v19311_v15, 5 }
 0x32b   : > { %v14951_v45 = vmul.f32 %v3859_v8, %v3829_v58  ;;  %v3830_v57 = vmax.f32 %v3712_v18, %v3805_v27  ;;  %v11968_v3 = vpop.f32.mrb[115].mxu1  ;;  %v10765_v61 = vpop.f32.mrb[115].mxu0  ;;  %v3864_v8 = vrot.slane %v19315_v28, 5 }
 0x32c   : > { %v3581_v10 = vadd.f32 %v10763_v31, %v14929_v5  ;;  %v10766_v55 = vadd.f32 %v10765_v61, %v10764_v53 }
 0x32d   : > { %v14954_v25 = vmul.f32 %v3861_v36, %v3830_v57  ;;  %v3982_v24 = vrot.slane %v14951_v45, 3  ;;  %v4055_v54 = vrot.slane %v14951_v45, 6  ;;  %v3863_v36 = vsel %vm3852_vm10, %v3860_v19, %v3862_v38 }
 0x32e   : > { %v3717_v43 = vadd.f32 %v3716_v2, %v3581_v10  ;;  %v3584_v62 = vadd.f32 %v10766_v55, %v14929_v5  ;;  %v12438_v2 = vld [vmem:[%s18559_s11 + $0x80] sm:$0xff]   ;;  %v3865_v55 = vsel %vm3852_vm10, %v3862_v38, %v3864_v8  ;;  %v12443_v38 = vld [vmem:[%s18559_s11 + $0xd0] sm:$0xff]  }
 0x32f   : > { %v4057_v18 = vrot.slane %v14954_v25, 6  ;;  %v3983_v3 = vsel %vm19384_vm9, %v3980_v60, %v3982_v24  ;;  %v4056_v31 = vsel %vm2782_vm14, %v4053_v34, %v4055_v54  ;;  %v3984_v61 = vrot.slane %v14954_v25, 3  ;;  %v12439_v34 = vld [vmem:[%s18559_s11 + $0xc8] sm:$0xff]   ;;  %vm19386_vm9 = vmmov %vm19383_vm8 }
 0x330   : > { %v3806_v58 = vmul.f32 0.1, %v3717_v43  ;;  %v3720_v27 = vadd.f32 %v3719_v52, %v3584_v62  ;;  %v4126_v6 = vpack.c.bf16 %v3983_v3, %v3981_v33  ;;  %v4127_v17 = vpack.c.bf16 %v4056_v31, %v4054_v41 }
 0x331   : > { %v3985_v53 = vsel %vm19385_vm15, %v3982_v24, %v3984_v61  ;;  %v4058_v57 = vsel %vm2782_vm14, %v4055_v54, %v4057_v18  ;;  %v4128_v60 = vpack.c.bf16 %v14954_v25, %v14951_v45  ;;  %vm19387_vm15 = vmmov %vm19383_vm8 }
 0x332   : > { %v3831_v52 = vmax.f32 %v3717_v43, %v3806_v58  ;;  %v3807_v33 = vmul.f32 0.1, %v3720_v27  ;;  %v10767_v10 = vpop.f32.mrb[116].mxu0  ;;  %4343 = vmatprep.mubr.bf16.mxu0 %v4126_v6  ;;  %12025 = vmatprep.mubr.bf16.mxu1 %v4127_v17  ;;  %v12441_v43 = vld [vmem:[%s18559_s11 + $0x88] sm:$0xff]  }
 0x333   : > { %v3724_v41 = vpop.f32.mrb[116].mxu1  ;;  %v10768_v62 = vpop.f32.mrb[117].mxu0  ;;  %4344 = vmatmul.mubr.bf16.vlgmr.msra.gmra.mrb[156].mxu0 %v4125_v22 }
 0x334   : > { %v11971_v19 = vpop.f32.mrb[117].mxu1  ;;  %v14977_v24 = vmul.f32 %v3863_v36, %v3831_v52  ;;  %v3832_v54 = vmax.f32 %v3720_v27, %v3807_v33  ;;  %v10769_v3 = vadd.f32 %v10768_v62, %v10767_v10  ;;  %v10770_v25 = vpop.f32.mrb[118].mxu0  ;;  %11057 = vmatpush3.bf16.msra.mxu0 %v12438_v2  ;;  %v3866_v2 = vrot.slane %v19318_v39, 5 }
 0x335   : > { %v3727_v45 = vpop.f32.mrb[118].mxu1  ;;  %v10771_v58 = vpop.f32.mrb[119].mxu0  ;;  %11058 = vmatprep.subr.bf16.mxu0 %v12439_v34  ;;  %v3868_v36 = vrot.slane %v14047_v51, 5 }
 0x336   : > { %v11972_v31 = vpop.f32.mrb[119].mxu1  ;;  %v4059_v22 = vrot.slane %v14977_v24, 6  ;;  %v14986_v6 = vmul.f32 %v3865_v55, %v3832_v54  ;;  %v3589_v27 = vadd.f32 %v10769_v3, %v14929_v5  ;;  %v10772_v17 = vadd.f32 %v10771_v58, %v10770_v25  ;;  %v12430_v55 = vld [vmem:[%s18559_s11] sm:$0xff]  }
 0x337   : > { %v3986_v52 = vrot.slane %v14977_v24, 3 }
 0x338   : > { %v3725_v33 = vadd.f32 %v3724_v41, %v3589_v27  ;;  %v3592_v34 = vadd.f32 %v10772_v17, %v14929_v5  ;;  %v4060_v10 = vsel %vm2782_vm14, %v4057_v18, %v4059_v22  ;;  %v3988_v19 = vrot.slane %v14986_v6, 3  ;;  %11059 = vmatpush3.bf16.msra.mxu0 %v12441_v43  ;;  %v12431_v41 = vld [vmem:[%s18559_s11 + $0x48] sm:$0xff]  }
 0x339   : > { %v3987_v62 = vsel %vm19383_vm8, %v3984_v61, %v3986_v52  ;;  %v4130_v54 = vpack.c.bf16 %v4060_v10, %v4058_v57  ;;  %v4061_v3 = vrot.slane %v14986_v6, 6  ;;  %11060 = vmatprep.subr.bf16.mxu0 %v12443_v38  ;;  %v12444_v61 = vld [vmem:[%s18559_s11 + $0x90] sm:$0xff]   ;;  %v3867_v57 = vsel %vm3852_vm10, %v3864_v8, %v3866_v2  ;;  %v12447_v38 = vld [vmem:[%s18559_s11 + $0xd8] sm:$0xff]  }
 0x33a   : > { %v3808_v18 = vmul.f32 0.1, %v3725_v33  ;;  %v3728_v31 = vadd.f32 %v3727_v45, %v3592_v34  ;;  %v4129_v58 = vpack.c.bf16 %v3987_v62, %v3985_v53  ;;  %v15006_v27 = vsel %vm19386_vm9, %v3986_v52, %v3988_v19  ;;  %v12432_v52 = vld [vmem:[%s18559_s11 + $0x8] sm:$0xff]   ;;  %vm19389_vm9 = vmmov %vm19383_vm8 }
 0x33b   : > { %v10773_v43 = vpop.f32.mrb[120].mxu0  ;;  %12026 = vmatmul.mubr.bf16.vlgmr.msra.gmra.mrb[156].mxu1 %v4130_v54  ;;  %v4062_v17 = vsel %vm2782_vm14, %v4059_v22, %v4061_v3  ;;  %v3869_v8 = vsel %vm3852_vm10, %v3866_v2, %v3868_v36 }
 0x33c   : > { %v3833_v10 = vmax.f32 %v3725_v33, %v3808_v18  ;;  %v3809_v45 = vmul.f32 0.1, %v3728_v31  ;;  %v10774_v34 = vpop.f32.mrb[121].mxu0  ;;  %4351 = vmatprep.mubr.bf16.mxu0 %v4129_v58  ;;  %10957 = vmatpush3.bf16.msra.mxu1 %v12430_v55  ;;  %v12433_v33 = vld [vmem:[%s18559_s11 + $0x50] sm:$0xff]  }
 0x33d   : > { %v3732_v53 = vpop.f32.mrb[120].mxu1  ;;  %v10775_v22 = vadd.f32 %v10774_v34, %v10773_v43  ;;  %v10776_v54 = vpop.f32.mrb[122].mxu0  ;;  %4352 = vmatmul.mubr.bf16.gmra.mrb[160].mxu0 %v4128_v60  ;;  %10958 = vmatprep.subr.bf16.mxu1 %v12431_v41  ;;  %v12449_v60 = vld [vmem:[%s18559_s11 + $0xe0] sm:$0xff]  }
 0x33e   : > { %v11975_v62 = vpop.f32.mrb[121].mxu1  ;;  %v15025_v18 = vmul.f32 %v3867_v57, %v3833_v10  ;;  %v3834_v55 = vmax.f32 %v3728_v31, %v3809_v45  ;;  %v10777_v25 = vpop.f32.mrb[123].mxu0  ;;  %11061 = vmatpush3.bf16.msra.mxu0 %v12444_v61  ;;  %v3870_v31 = vrot.slane %v19326_v14, 5  ;;  %v12434_v10 = vld [vmem:[%s18559_s11 + $0x10] sm:$0xff]  }
 0x33f   : > { %v3735_v58 = vpop.f32.mrb[122].mxu1  ;;  %v3597_v2 = vadd.f32 %v10775_v22, %v14929_v5  ;;  %v10778_v34 = vadd.f32 %v10777_v25, %v10776_v54  ;;  %11062 = vmatprep.subr.bf16.mxu0 %v12447_v38  ;;  %v3872_v38 = vrot.slane %v14096_v56, 5 }
 0x340   : > { %v11976_v43 = vpop.f32.mrb[123].mxu1  ;;  %v15034_v41 = vmul.f32 %v3869_v8, %v3834_v55  ;;  %v3990_v57 = vrot.slane %v15025_v18, 3  ;;  %v4063_v61 = vrot.slane %v15025_v18, 6  ;;  %10959 = vmatpush3.bf16.msra.mxu1 %v12432_v52  ;;  %v12435_v52 = vld [vmem:[%s18559_s11 + $0x58] sm:$0xff]  }
 0x341   : > { %v3733_v45 = vadd.f32 %v3732_v53, %v3597_v2  ;;  %v3600_v25 = vadd.f32 %v10778_v34, %v14929_v5  ;;  %10960 = vmatprep.subr.bf16.mxu1 %v12433_v33 }
 0x342   : > { %v3991_v8 = vsel %vm19387_vm15, %v3988_v19, %v3990_v57  ;;  %v4064_v62 = vsel %vm2782_vm14, %v4061_v3, %v4063_v61  ;;  %v3992_v22 = vrot.slane %v15034_v41, 3  ;;  %v4065_v54 = vrot.slane %v15034_v41, 6  ;;  %11063 = vmatpush3.bf16.msra.mxu0 %v12448_v32  ;;  %v12451_v19 = vld [vmem:[%s18559_s11 + $0xa0] sm:$0xff]   ;;  %v12454_v32 = vld [vmem:[%s18559_s11 + $0xa8] sm:$0xff]   ;;  %vm19390_vm15 = vmmov %vm19383_vm8 }
 0x343   : > { %v3810_v55 = vmul.f32 0.1, %v3733_v45  ;;  %v3736_v53 = vadd.f32 %v3735_v58, %v3600_v25  ;;  %v4132_v2 = vpack.c.bf16 %v3991_v8, %v15006_v27  ;;  %v4133_v43 = vpack.c.bf16 %v4064_v62, %v4062_v17  ;;  %11064 = vmatprep.subr.bf16.mxu0 %v12449_v60  ;;  %v12436_v27 = vld [vmem:[%s18559_s11 + $0x18] sm:$0xff]   ;;  %v12453_v17 = vld [vmem:[%s18559_s11 + $0xe8] sm:$0xff]  }
 0x344   : > { %v3871_v3 = vsel %vm3852_vm10, %v3868_v36, %v3870_v31  ;;  %v3993_v33 = vsel %vm19383_vm8, %v3990_v57, %v3992_v22  ;;  %v15060_v34 = vsel %vm2782_vm14, %v4063_v61, %v4065_v54  ;;  %10961 = vmatpush3.bf16.msra.mxu1 %v12434_v10  ;;  %v12440_v57 = vld [vmem:[%s18559_s11 + $0x60] sm:$0xff]   ;;  %v3873_v61 = vsel %vm3852_vm10, %v3870_v31, %v3872_v38 }
 0x345   : > { %v3835_v58 = vmax.f32 %v3733_v45, %v3810_v55  ;;  %v3811_v60 = vmul.f32 0.1, %v3736_v53  ;;  %v10779_v36 = vpop.f32.mrb[124].mxu0  ;;  %4359 = vmatprep.mubr.bf16.mxu0 %v4132_v2  ;;  %12029 = vmatprep.mubr.bf16.mxu1 %v4133_v43  ;;  %v19388_v8 = vpack.c.bf16 %v14986_v6, %v14977_v24  ;;  %v12442_v24 = vld [vmem:[%s18559_s11 + $0x20] sm:$0xff]   ;;  %v12457_v6 = vld [vmem:[%s18559_s11 + $0xf0] sm:$0xff]  }
 0x346   : > { %v10780_v25 = vpop.f32.mrb[125].mxu0  ;;  %10962 = vmatprep.subr.bf16.mxu1 %v12435_v52  ;;  %11065 = vmatpush3.bf16.msra.mxu0 %v12451_v19 }
 0x347   : > { %v3740_v10 = vpop.f32.mrb[124].mxu1  ;;  %4360 = vmatmul.mubr.bf16.gmra.mrb[164].mxu0 %v19388_v8  ;;  %v15079_v45 = vmul.f32 %v3871_v3, %v3835_v58  ;;  %v3836_v62 = vmax.f32 %v3736_v53, %v3811_v60  ;;  %v10781_v2 = vadd.f32 %v10780_v25, %v10779_v36  ;;  %v10782_v43 = vpop.f32.mrb[126].mxu0  ;;  %11066 = vmatprep.subr.bf16.mxu0 %v12453_v17  ;;  %v3874_v60 = vrot.slane %v14115_v20, 5 }
 0x348   : > { %v11979_v55 = vpop.f32.mrb[125].mxu1  ;;  %v10783_v31 = vpop.f32.mrb[127].mxu0  ;;  %10963 = vmatpush3.bf16.msra.mxu1 %v12436_v27  ;;  %v12445_v27 = vld [vmem:[%s18559_s11 + $0x68] sm:$0xff]   ;;  %v3876_v17 = vrot.slane %v14152_v40, 5 }
 0x349   : > { %v3743_v37 = vpop.f32.mrb[126].mxu1  ;;  %v15090_v52 = vmul.f32 %v3873_v61, %v3836_v62  ;;  %v3605_v53 = vadd.f32 %v10781_v2, %v14929_v5  ;;  %v10784_v3 = vadd.f32 %v10783_v31, %v10782_v43  ;;  %v3994_v58 = vrot.slane %v15079_v45, 3  ;;  %10964 = vmatprep.subr.bf16.mxu1 %v12440_v57 }
 0x34a   : > { %v11980_v19 = vpop.f32.mrb[127].mxu1  ;;  %v4067_v36 = vrot.slane %v15079_v45, 6  ;;  %11067 = vmatpush3.bf16.msra.mxu0 %v12454_v32 }
 0x34b   : > { %v3741_v25 = vadd.f32 %v3740_v10, %v3605_v53  ;;  %v3608_v61 = vadd.f32 %v10784_v3, %v14929_v5  ;;  %v3995_v8 = vsel %vm19389_vm9, %v3992_v22, %v3994_v58  ;;  %v3996_v62 = vrot.slane %v15090_v52, 3  ;;  %v12446_v10 = vld [vmem:[%s18559_s11 + $0x28] sm:$0xff]   ;;  %11068 = vmatprep.subr.bf16.mxu0 %v12457_v6  ;;  %v12458_v22 = vld [vmem:[%s18559_s11 + $0xb0] sm:$0xff]   ;;  %v12459_v53 = vld [vmem:[%s18559_s11 + $0xf8] sm:$0xff]  }
 0x34c   : > { %v4135_v55 = vpack.c.bf16 %v3995_v8, %v3993_v33  ;;  %v4068_v57 = vsel %vm2782_vm14, %v4065_v54, %v4067_v36  ;;  %v4069_v2 = vrot.slane %v15090_v52, 6  ;;  %10965 = vmatpush3.bf16.msra.mxu1 %v12442_v24  ;;  %v12450_v24 = vld [vmem:[%s18559_s11 + $0x70] sm:$0xff]   ;;  %v3875_v6 = vsel %vm3852_vm10, %v3872_v38, %v3874_v60  ;;  %vm19393_vm9 = vmmov %vm19383_vm8 }
 0x34d   : > { %v3812_v31 = vmul.f32 0.1, %v3741_v25  ;;  %v3744_v32 = vadd.f32 %v3743_v37, %v3608_v61  ;;  %v4136_v33 = vpack.c.bf16 %v4068_v57, %v15060_v34  ;;  %v3997_v54 = vsel %vm19390_vm15, %v3994_v58, %v3996_v62  ;;  %10966 = vmatprep.subr.bf16.mxu1 %v12445_v27  ;;  %v12452_v38 = vld [vmem:[%s18559_s11 + $0x30] sm:$0xff]   ;;  %vm19396_vm15 = vmmov %vm19383_vm8 }
 0x34e   : > { %4367 = vmatprep.mubr.bf16.mxu0 %v4135_v55  ;;  %v4070_v37 = vsel %vm2782_vm14, %v4067_v36, %v4069_v2  ;;  %v19391_v27 = vpack.c.bf16 %v15034_v41, %v15025_v18  ;;  %v3877_v61 = vsel %vm3852_vm10, %v3874_v60, %v3876_v17  ;;  %11069 = vmatpush3.bf16.msra.mxu0 %v12458_v22  ;;  %v12460_v36 = vld [vmem:[%s18559_s11 + $0xb8] sm:$0xff]  }
 0x34f   : > { %v3837_v19 = vmax.f32 %v3741_v25, %v3812_v31  ;;  %v3813_v34 = vmul.f32 0.1, %v3744_v32  ;;  %v10785_v58 = vpop.f32.mrb[128].mxu0  ;;  %12030 = vmatmul.mubr.bf16.gmra.mrb[160].mxu1 %v4136_v33  ;;  %v12455_v60 = vld [vmem:[%s18559_s11 + $0x78] sm:$0xff]   ;;  %11070 = vmatprep.subr.bf16.mxu0 %v12459_v53 }
 0x350   : > { %v3748_v3 = vpop.f32.mrb[128].mxu1  ;;  %4368 = vmatmul.mubr.bf16.gmra.mrb[168].mxu0 %v19391_v27  ;;  %v10786_v57 = vpop.f32.mrb[129].mxu0  ;;  %10967 = vmatpush3.bf16.msra.mxu1 %v12446_v10  ;;  %v12456_v53 = vld [vmem:[%s18559_s11 + $0x38] sm:$0xff]  }
 0x351   : > { %v11983_v8 = vpop.f32.mrb[129].mxu1  ;;  %v15137_v25 = vmul.f32 %v3875_v6, %v3837_v19  ;;  %v3838_v18 = vmax.f32 %v3744_v32, %v3813_v34  ;;  %v10787_v41 = vadd.f32 %v10786_v57, %v10785_v58  ;;  %v10788_v31 = vpop.f32.mrb[130].mxu0  ;;  %10968 = vmatprep.subr.bf16.mxu1 %v12450_v24  ;;  %v3878_v32 = vrot.slane %v14171_v12, 5  ;;  %v19392_v19 = vld [vmem:[#allocation141_spill] sm:$0xff] }
 0x352   : > { %v3751_v55 = vpop.f32.mrb[130].mxu1  ;;  %v10789_v33 = vpop.f32.mrb[131].mxu0  ;;  %v3880_v34 = vrot.slane %v19392_v19, 5  ;;  %11071 = vmatpush3.bf16.msra.mxu0 %v12460_v36  ;;  %v15162_v36 = vld [vmem:[%s18559_s11 + $0x100] sm:$0xff]  }
 0x353   : > { %v11984_v10 = vpop.f32.mrb[131].mxu1  ;;  %v15142_v27 = vmul.f32 %v3877_v61, %v3838_v18  ;;  %v3613_v22 = vadd.f32 %v10787_v41, %v14929_v5  ;;  %v10790_v8 = vadd.f32 %v10789_v33, %v10788_v31  ;;  %v3998_v6 = vrot.slane %v15137_v25, 3 }
 0x354   : > { %v4071_v24 = vrot.slane %v15137_v25, 6  ;;  %10969 = vmatpush3.bf16.msra.mxu1 %v12452_v38 }
 0x355   : > { %v3749_v58 = vadd.f32 %v3748_v3, %v3613_v22  ;;  %v3616_v61 = vadd.f32 %v10790_v8, %v14929_v5  ;;  %v3999_v57 = vsel %vm19383_vm8, %v3996_v62, %v3998_v6  ;;  %v4000_v18 = vrot.slane %v15142_v27, 3  ;;  %10970 = vmatprep.subr.bf16.mxu1 %v12455_v60 }
 0x356   : > { %v4138_v41 = vpack.c.bf16 %v3999_v57, %v3997_v54  ;;  %v4072_v31 = vsel %vm2782_vm14, %v4069_v2, %v4071_v24  ;;  %v4073_v10 = vrot.slane %v15142_v27, 6  ;;  %v3879_v2 = vsel %vm3852_vm10, %v3876_v17, %v3878_v32 }
 0x357   : > { %v3814_v3 = vmul.f32 0.1, %v3749_v58  ;;  %v3752_v33 = vadd.f32 %v3751_v55, %v3616_v61  ;;  %v4139_v62 = vpack.c.bf16 %v4072_v31, %v4070_v37  ;;  %v4001_v8 = vsel %vm19393_vm9, %v3998_v6, %v4000_v18  ;;  %v19395_v61 = vld [vmem:[#allocation142_spill] sm:$0xff]  ;;  %vm19398_vm9 = vmmov %vm19383_vm8 }
 0x358   : > { %v10791_v22 = vpop.f32.mrb[132].mxu0  ;;  %4375 = vmatprep.mubr.bf16.mxu0 %v4138_v41  ;;  %v4074_v60 = vsel %vm2782_vm14, %v4071_v24, %v4073_v10  ;;  %10971 = vmatpush3.bf16.msra.mxu1 %v12456_v53  ;;  %v19394_v37 = vpack.c.bf16 %v15090_v52, %v15079_v45  ;;  %v3881_v55 = vsel %vm3852_vm10, %v3878_v32, %v3880_v34  ;;  %v3882_v17 = vrot.slane %v19395_v61, 5 }
 0x359   : > { %v10792_v54 = vpop.f32.mrb[133].mxu0  ;;  %v3839_v57 = vmax.f32 %v3749_v58, %v3814_v3  ;;  %v3815_v38 = vmul.f32 0.1, %v3752_v33  ;;  %v3756_v43 = vpop.f32.mrb[132].mxu1  ;;  %12033 = vmatprep.mubr.bf16.mxu1 %v4139_v62  ;;  %12049 = vmatprep.subr.bf16.mxu1 %v15162_v36  ;;  %v3886_v61 = vrot.slane %v14251_v11, 5 }
 0x35a   : > { %v10793_v4 = vadd.f32 %v10792_v54, %v10791_v22  ;;  %v10794_v19 = vpop.f32.mrb[134].mxu0  ;;  %4376 = vmatmul.mubr.bf16.gmra.mrb[172].mxu0 %v19394_v37  ;;  %v11987_v6 = vpop.f32.mrb[133].mxu1  ;;  %v3883_v54 = vsel %vm3852_vm10, %v3880_v34, %v3882_v17  ;;  %v3884_v37 = vrot.slane %v14239_v48, 5 }
 0x35b   : > { %v10795_v31 = vpop.f32.mrb[135].mxu0  ;;  %v15175_v24 = vmul.f32 %v3879_v2, %v3839_v57  ;;  %v3840_v53 = vmax.f32 %v3752_v33, %v3815_v38  ;;  %v3759_v41 = vpop.f32.mrb[134].mxu1 }
 0x35c   : > { %v3621_v58 = vadd.f32 %v10793_v4, %v14929_v5  ;;  %v10796_v3 = vadd.f32 %v10795_v31, %v10794_v19  ;;  %v11988_v22 = vpop.f32.mrb[135].mxu1 }
 0x35d   : > { %v15178_v62 = vmul.f32 %v3881_v55, %v3840_v53  ;;  %v4002_v32 = vrot.slane %v15175_v24, 3  ;;  %v4075_v2 = vrot.slane %v15175_v24, 6 }
 0x35e   : > { %v3757_v45 = vadd.f32 %v3756_v43, %v3621_v58  ;;  %v3624_v52 = vadd.f32 %v10796_v3, %v14929_v5 }
 0x35f   : > { %v4003_v4 = vsel %vm19396_vm15, %v4000_v18, %v4002_v32  ;;  %v4004_v19 = vrot.slane %v15178_v62, 3  ;;  %v4076_v43 = vsel %vm2782_vm14, %v4073_v10, %v4075_v2  ;;  %v4077_v31 = vrot.slane %v15178_v62, 6  ;;  %vm19399_vm15 = vmmov %vm19383_vm8 }
 0x360   : > { %v3816_v57 = vmul.f32 0.1, %v3757_v45  ;;  %v3760_v38 = vadd.f32 %v3759_v41, %v3624_v52  ;;  %v10797_v33 = vpop.f32.mrb[136].mxu0  ;;  %v4141_v6 = vpack.c.bf16 %v4003_v4, %v4001_v8  ;;  %v4143_v34 = vpack.c.bf16 %v15178_v62, %v15175_v24 }
 0x361   : > { %v10798_v55 = vpop.f32.mrb[137].mxu0  ;;  %v3764_v3 = vpop.f32.mrb[136].mxu1  ;;  %v4142_v41 = vpack.c.bf16 %v4076_v43, %v4074_v60  ;;  %v3885_v52 = vsel %vm3852_vm10, %v3882_v17, %v3884_v37  ;;  %v4005_v10 = vsel %vm19383_vm8, %v4002_v32, %v4004_v19  ;;  %v4078_v8 = vsel %vm2782_vm14, %v4075_v2, %v4077_v31 }
 0x362   : > { %v3841_v53 = vmax.f32 %v3757_v45, %v3816_v57  ;;  %v3817_v58 = vmul.f32 0.1, %v3760_v38  ;;  %v10799_v22 = vadd.f32 %v10798_v55, %v10797_v33  ;;  %v10800_v48 = vpop.f32.mrb[138].mxu0  ;;  %v11991_v18 = vpop.f32.mrb[137].mxu1  ;;  %4383 = vmatprep.mubr.bf16.mxu0 %v4141_v6  ;;  %v19397_v17 = vpack.c.bf16 %v15142_v27, %v15137_v25 }
 0x363   : > { %v10801_v40 = vpop.f32.mrb[139].mxu0  ;;  %v3767_v45 = vpop.f32.mrb[138].mxu1  ;;  %12034 = vmatmul.mubr.bf16.gmra.mrb[164].mxu1 %v4142_v41 }
 0x364   : > { %v15195_v4 = vmul.f32 %v3883_v54, %v3841_v53  ;;  %v3842_v24 = vmax.f32 %v3760_v38, %v3817_v58  ;;  %v3629_v62 = vadd.f32 %v10799_v22, %v14929_v5  ;;  %v10802_v57 = vadd.f32 %v10801_v40, %v10800_v48  ;;  %v11992_v60 = vpop.f32.mrb[139].mxu1  ;;  %4384 = vmatmul.mubr.bf16.gmra.mrb[176].mxu0 %v19397_v17 }
 0x365   : > { %v3887_v54 = vsel %vm3852_vm10, %v3884_v37, %v3886_v61  ;;  %v3888_v38 = vrot.slane %v14277_v13, 5  ;;  %v3890_v60 = vrot.slane %v14282_v50, 5  ;;  %v15462_v50 = vld [vmem:[%s13725_s3 + $0x4] sm:$0xf] }
 0x366   : > { %v15201_v33 = vmul.f32 %v3885_v52, %v3842_v24  ;;  %v3765_v55 = vadd.f32 %v3764_v3, %v3629_v62  ;;  %v3632_v32 = vadd.f32 %v10802_v57, %v14929_v5  ;;  %v4006_v2 = vrot.slane %v15195_v4, 3 }
 0x367   : > { %v4079_v6 = vrot.slane %v15195_v4, 6  ;;  %v3889_v57 = vsel %vm3852_vm10, %v3886_v61, %v3888_v38 }
 0x368   : > { %v3818_v40 = vmul.f32 0.1, %v3765_v55  ;;  %v3768_v48 = vadd.f32 %v3767_v45, %v3632_v32  ;;  %v10803_v43 = vpop.f32.mrb[140].mxu0  ;;  %v4007_v53 = vsel %vm19398_vm9, %v4004_v19, %v4006_v2  ;;  %v4008_v25 = vrot.slane %v15201_v33, 3  ;;  %vm19400_vm9 = vmmov %vm19383_vm8 }
 0x369   : > { %v10804_v27 = vpop.f32.mrb[141].mxu0  ;;  %v4144_v58 = vpack.c.bf16 %v4007_v53, %v4005_v10  ;;  %v4080_v3 = vsel %vm2782_vm14, %v4077_v31, %v4079_v6  ;;  %v4081_v22 = vrot.slane %v15201_v33, 6  ;;  %v4146_v37 = vpack.c.bf16 %v15201_v33, %v15195_v4  ;;  %v3772_v18 = vpop.f32.mrb[140].mxu1 }
 0x36a   : > { %v3843_v41 = vmax.f32 %v3765_v55, %v3818_v40  ;;  %v3819_v52 = vmul.f32 0.1, %v3768_v48  ;;  %v10805_v24 = vadd.f32 %v10804_v27, %v10803_v43  ;;  %v10806_v62 = vpop.f32.mrb[142].mxu0  ;;  %v4145_v45 = vpack.c.bf16 %v4080_v3, %v4078_v8  ;;  %v11995_v19 = vpop.f32.mrb[141].mxu1 }
 0x36b   : > { %v10807_v17 = vpop.f32.mrb[143].mxu0  ;;  %4391 = vmatprep.mubr.bf16.mxu0 %v4144_v58  ;;  %v4009_v31 = vsel %vm19399_vm15, %v4006_v2, %v4008_v25  ;;  %v4082_v10 = vsel %vm2782_vm14, %v4079_v6, %v4081_v22  ;;  %v3775_v55 = vpop.f32.mrb[142].mxu1  ;;  %v3891_v2 = vsel %vm3852_vm10, %v3888_v38, %v3890_v60  ;;  %vm19401_vm15 = vmmov %vm19383_vm8 }
 0x36c   : > { %v15218_v32 = vmul.f32 %v3887_v54, %v3843_v41  ;;  %v3844_v4 = vmax.f32 %v3768_v48, %v3819_v52  ;;  %v3637_v33 = vadd.f32 %v10805_v24, %v14929_v5  ;;  %v10808_v40 = vadd.f32 %v10807_v17, %v10806_v62  ;;  %12037 = vmatprep.mubr.bf16.mxu1 %v4145_v45  ;;  %v11996_v8 = vpop.f32.mrb[143].mxu1 }
 0x36d   : > { %4392 = vmatmul.mubr.bf16.gmra.mrb[180].mxu0 %v4143_v34  ;;  %v3892_v54 = vrot.slane %v14302_v1, 5  ;;  %v4860_v1 = vrot.slane %v19359_v9, 3 }
 0x36e   : > { %v15221_v61 = vmul.f32 %v3889_v57, %v3844_v4  ;;  %v3773_v43 = vadd.f32 %v3772_v18, %v3637_v33  ;;  %v3640_v53 = vadd.f32 %v10808_v40, %v14929_v5  ;;  %v4010_v27 = vrot.slane %v15218_v32, 3 }
 0x36f   : > { %v4083_v6 = vrot.slane %v15218_v32, 6  ;;  %v3894_v40 = vrot.slane %v14328_v44, 5  ;;  %v12625_v44 = vld [vmem:[%s12984_s1 + $0x4c] sm:$0xf] }
 0x370   : > { %v3820_v48 = vmul.f32 0.1, %v3773_v43  ;;  %v3776_v58 = vadd.f32 %v3775_v55, %v3640_v53  ;;  %v10809_v3 = vpop.f32.mrb[144].mxu0  ;;  %v4011_v41 = vsel %vm19383_vm8, %v4008_v25, %v4010_v27  ;;  %v4012_v34 = vrot.slane %v15221_v61, 3 }
 0x371   : > { %v10810_v52 = vpop.f32.mrb[145].mxu0  ;;  %v4147_v24 = vpack.c.bf16 %v4011_v41, %v4009_v31  ;;  %v4084_v18 = vsel %vm2782_vm14, %v4081_v22, %v4083_v6  ;;  %v4085_v62 = vrot.slane %v15221_v61, 6  ;;  %v4149_v38 = vpack.c.bf16 %v15221_v61, %v15218_v32  ;;  %v3780_v19 = vpop.f32.mrb[144].mxu1 }
 0x372   : > { %v3845_v45 = vmax.f32 %v3773_v43, %v3820_v48  ;;  %v3821_v57 = vmul.f32 0.1, %v3776_v58  ;;  %v10811_v17 = vadd.f32 %v10810_v52, %v10809_v3  ;;  %v10812_v4 = vpop.f32.mrb[146].mxu0  ;;  %v4148_v33 = vpack.c.bf16 %v4084_v18, %v4082_v10  ;;  %v11999_v25 = vpop.f32.mrb[145].mxu1 }
 0x373   : > { %v3893_v55 = vsel %vm3852_vm10, %v3890_v60, %v3892_v54  ;;  %v10813_v8 = vpop.f32.mrb[147].mxu0  ;;  %4399 = vmatprep.mubr.bf16.mxu0 %v4147_v24  ;;  %v4013_v22 = vsel %vm19400_vm9, %v4010_v27, %v4012_v34  ;;  %v4086_v31 = vsel %vm2782_vm14, %v4083_v6, %v4085_v62  ;;  %v3783_v43 = vpop.f32.mrb[146].mxu1  ;;  %v3895_v27 = vsel %vm3852_vm10, %v3892_v54, %v3894_v40  ;;  %vm19402_vm9 = vmmov %vm19383_vm8 }
 0x374   : > { %v15238_v53 = vmul.f32 %v3891_v2, %v3845_v45  ;;  %v3846_v32 = vmax.f32 %v3776_v58, %v3821_v57  ;;  %v3645_v61 = vadd.f32 %v10811_v17, %v14929_v5  ;;  %v10814_v48 = vadd.f32 %v10813_v8, %v10812_v4  ;;  %12038 = vmatmul.mubr.bf16.gmra.mrb[168].mxu1 %v4148_v33  ;;  %v12000_v10 = vpop.f32.mrb[147].mxu1 }
 0x375   : > { %4400 = vmatmul.mubr.bf16.gmra.mrb[184].mxu0 %v4146_v37  ;;  %v3896_v2 = vrot.slane %v14334_v35, 5 }
 0x376   : > { %v15241_v60 = vmul.f32 %v3893_v55, %v3846_v32  ;;  %v3781_v3 = vadd.f32 %v3780_v19, %v3645_v61  ;;  %v3648_v41 = vadd.f32 %v10814_v48, %v14929_v5  ;;  %v4014_v52 = vrot.slane %v15238_v53, 3 }
 0x377   : > { %v4087_v6 = vrot.slane %v15238_v53, 6  ;;  %v3898_v48 = vrot.slane %v14360_v47, 5  ;;  %v4856_v47 = vrot.slane %v19353_v59, 3 }
 0x378   : > { %v3822_v58 = vmul.f32 0.1, %v3781_v3  ;;  %v3784_v24 = vadd.f32 %v3783_v43, %v3648_v41  ;;  %v10815_v18 = vpop.f32.mrb[148].mxu0  ;;  %v4015_v45 = vsel %vm19401_vm15, %v4012_v34, %v4014_v52  ;;  %v4016_v37 = vrot.slane %v15241_v60, 3  ;;  %vm19403_vm15 = vmmov %vm19383_vm8 }
 0x379   : > { %v10816_v57 = vpop.f32.mrb[149].mxu0  ;;  %v4150_v17 = vpack.c.bf16 %v4015_v45, %v4013_v22  ;;  %v4088_v19 = vsel %vm2782_vm14, %v4085_v62, %v4087_v6  ;;  %v4089_v4 = vrot.slane %v15241_v60, 6  ;;  %v4152_v54 = vpack.c.bf16 %v15241_v60, %v15238_v53  ;;  %v3788_v25 = vpop.f32.mrb[148].mxu1 }
 0x37a   : > { %v3847_v33 = vmax.f32 %v3781_v3, %v3822_v58  ;;  %v3823_v55 = vmul.f32 0.1, %v3784_v24  ;;  %v10817_v8 = vadd.f32 %v10816_v57, %v10815_v18  ;;  %v10818_v32 = vpop.f32.mrb[150].mxu0  ;;  %v4151_v61 = vpack.c.bf16 %v4088_v19, %v4086_v31  ;;  %v12003_v34 = vpop.f32.mrb[149].mxu1 }
 0x37b   : > { %v3897_v43 = vsel %vm3852_vm10, %v3894_v40, %v3896_v2  ;;  %v10819_v10 = vpop.f32.mrb[151].mxu0  ;;  %4407 = vmatprep.mubr.bf16.mxu0 %v4150_v17  ;;  %v4017_v62 = vsel %vm19383_vm8, %v4014_v52, %v4016_v37  ;;  %v4090_v22 = vsel %vm2782_vm14, %v4087_v6, %v4089_v4  ;;  %v3791_v3 = vpop.f32.mrb[150].mxu1  ;;  %v3899_v52 = vsel %vm3852_vm10, %v3896_v2, %v3898_v48 }
 0x37c   : > { %v15258_v41 = vmul.f32 %v3895_v27, %v3847_v33  ;;  %v3848_v53 = vmax.f32 %v3784_v24, %v3823_v55  ;;  %v3653_v60 = vadd.f32 %v10817_v8, %v14929_v5  ;;  %v10820_v58 = vadd.f32 %v10819_v10, %v10818_v32  ;;  %12041 = vmatprep.mubr.bf16.mxu1 %v4151_v61  ;;  %v12004_v31 = vpop.f32.mrb[151].mxu1 }
 0x37d   : > { %4408 = vmatmul.mubr.bf16.gmra.mrb[188].mxu0 %v4149_v38  ;;  %v3900_v6 = vrot.slane %v14373_v0, 5  ;;  %v19493_v0 = vld [vmem:[#allocation82_spill] sm:$0xff] }
 0x37e   : > { %v3950_v40 = vmul.f32 %v3897_v43, %v3848_v53  ;;  %v3789_v18 = vadd.f32 %v3788_v25, %v3653_v60  ;;  %v3656_v45 = vadd.f32 %v10820_v58, %v14929_v5  ;;  %v4018_v57 = vrot.slane %v15258_v41, 3 }
 0x37f   : > { %v4091_v27 = vrot.slane %v15258_v41, 6  ;;  %v3901_v58 = vsel %vm3852_vm10, %v3898_v48, %v3900_v6 }
 0x380   : > { %v3824_v24 = vmul.f32 0.1, %v3789_v18  ;;  %v3792_v17 = vadd.f32 %v3791_v3, %v3656_v45  ;;  %v10821_v19 = vpop.f32.mrb[152].mxu0  ;;  %v4019_v33 = vsel %vm19402_vm9, %v4016_v37, %v4018_v57  ;;  %v4020_v55 = vrot.slane %v3950_v40, 3  ;;  %vm19404_vm9 = vmmov %vm19383_vm8 }
 0x381   : > { %v10822_v8 = vpop.f32.mrb[153].mxu0  ;;  %v4153_v38 = vpack.c.bf16 %v4019_v33, %v4017_v62  ;;  %v4092_v25 = vsel %vm2782_vm14, %v4089_v4, %v4091_v27  ;;  %v4093_v32 = vrot.slane %v3950_v40, 6  ;;  %v4155_v61 = vpack.c.bf16 %v3950_v40, %v15258_v41  ;;  %v3796_v2 = vpop.f32.mrb[152].mxu1 }
 0x382   : > { %v3849_v43 = vmax.f32 %v3789_v18, %v3824_v24  ;;  %v3825_v34 = vmul.f32 0.1, %v3792_v17  ;;  %v10823_v10 = vadd.f32 %v10822_v8, %v10821_v19  ;;  %v10824_v53 = vpop.f32.mrb[154].mxu0  ;;  %v4154_v60 = vpack.c.bf16 %v4092_v25, %v4090_v22  ;;  %v12007_v3 = vpop.f32.mrb[153].mxu1 }
 0x383   : > { %v10825_v31 = vpop.f32.mrb[155].mxu0  ;;  %4415 = vmatprep.mubr.bf16.mxu0 %v4153_v38  ;;  %v4021_v37 = vsel %vm19403_vm15, %v4018_v57, %v4020_v55  ;;  %v4094_v62 = vsel %vm2782_vm14, %v4091_v27, %v4093_v32  ;;  %v3902_v4 = vrot.slane %v14391_v29, 5  ;;  %v3799_v40 = vpop.f32.mrb[154].mxu1  ;;  %vm19409_vm15 = vmmov %vm19383_vm8  ;;  %v4852_v29 = vrot.slane %v19493_v0, 3 }
 0x384   : > { %v3951_v45 = vmul.f32 %v3899_v52, %v3849_v43  ;;  %v3850_v33 = vmax.f32 %v3792_v17, %v3825_v34  ;;  %v3661_v41 = vadd.f32 %v10823_v10, %v14929_v5  ;;  %12042 = vmatmul.mubr.bf16.gmra.mrb[172].mxu1 %v4154_v60  ;;  %v12008_v18 = vpop.f32.mrb[155].mxu1 }
 0x385   : > { %4416 = vmatmul.mubr.bf16.gmra.mrb[192].mxu0 %v4152_v54  ;;  %v3903_v8 = vsel %vm3852_vm10, %v3900_v6, %v3902_v4  ;;  %v19406_v6 = vld [vmem:[#allocation24_spill] sm:$0xff]  ;;  %vm19408_vm10 = vmmov %vm19383_vm8  ;;  %v19410_v18 = vld [vmem:[#allocation27_spill] sm:$0xff] }
 0x386   : > { %v3952_v22 = vmul.f32 %v3901_v58, %v3850_v33  ;;  %v3797_v24 = vadd.f32 %v3796_v2, %v3661_v41  ;;  %v4022_v48 = vrot.slane %v3951_v45, 3  ;;  %v4095_v19 = vrot.slane %v3951_v45, 6  ;;  %v19405_v2 = vld [vmem:[#allocation23_spill] sm:$0xff]  ;;  %v19407_v58 = vld [vmem:[#allocation25_spill] sm:$0xff] }
 0x387   : > { %v4819_v53 = vrot.slane %v19405_v2, 3  ;;  %v4820_v60 = vrot.slane %v19406_v6, 3 }
 0x388   : > { %v3826_v38 = vmul.f32 0.1, %v3797_v24  ;;  %v4023_v57 = vsel %vm19383_vm8, %v4020_v55, %v4022_v48  ;;  %v4096_v27 = vsel %vm2782_vm14, %v4093_v32, %v4095_v19  ;;  %v4024_v25 = vrot.slane %v3952_v22, 3 }
 0x389   : > { %v4156_v52 = vpack.c.bf16 %v4023_v57, %v4021_v37  ;;  %v4157_v17 = vpack.c.bf16 %v4096_v27, %v4094_v62  ;;  %v4097_v43 = vrot.slane %v3952_v22, 6  ;;  %v4158_v5 = vpack.c.bf16 %v3952_v22, %v3951_v45  ;;  %v12605_v57 = vld [vmem:[%s12996_s23 + $0x4] sm:$0xf] }
 0x38a   : > { %v3851_v34 = vmax.f32 %v3797_v24, %v3826_v38  ;;  %v4025_v10 = vsel %vm19404_vm9, %v4022_v48, %v4024_v25  ;;  %v4822_v55 = vrot.slane %v19407_v58, 3  ;;  %v4821_v37 = vsel %vm19408_vm10, %v4819_v53, %v4820_v60  ;;  %v19412_v48 = vld [vmem:[#allocation29_spill] sm:$0xff]  ;;  %vm19415_vm9 = vmmov %vm19383_vm8  ;;  %v19421_v53 = vld [vmem:[#allocation43_spill] sm:$0xff] }
 0x38b   : > { %4423 = vmatprep.mubr.bf16.mxu0 %v4156_v52  ;;  %12045 = vmatprep.mubr.bf16.mxu1 %v4157_v17  ;;  %v4098_v54 = vsel %vm2782_vm14, %v4095_v19, %v4097_v43  ;;  %v4824_v22 = vrot.slane %v19410_v18, 3  ;;  %v19413_v19 = vld [vmem:[#allocation30_spill] sm:$0xff]  ;;  %v12604_v38 = vld [vmem:[%s12996_s23] sm:$0xf]  ;;  %vm19416_vm10 = vmmov %vm19383_vm8  ;;  %s9951_s23 = ssub.s32 (%p12883_p3), 25, %s12911_s27 }
 0x38c   : > { %v3953_v3 = vmul.f32 %v3903_v8, %v3851_v34  ;;  %v4823_v62 = vsel %vm19409_vm15, %v4820_v60, %v4822_v55  ;;  %v19414_v8 = vpack.c.bf16 %v19412_v48, %v19413_v19  ;;  %v10489_v27 = vcombine.low %v12604_v38, %v12605_v57  ;;  %v19417_v17 = vld [vmem:[#allocation19_spill] sm:$0xff]  ;;  %v12464_v34 = vld [vmem:[%s18559_s11 + $0x108] sm:$0xff]   ;;  %p9952_p5 = scmp.lt.s32.totalorder (%p12883_p3), %s9951_s23, 24 }
 0x38d   : > { %4424 = vmatmul.mubr.bf16.gmra.mrb[196].mxu0 %v4155_v61  ;;  %v4989_v40 = vpack.c.bf16 %v4823_v62, %v4821_v37  ;;  %v19411_v61 = vld [vmem:[#allocation28_spill] sm:$0xff]  ;;  %vm19418_vm15 = vnez %v19417_v17  ;;  %v4830_v60 = vrot.slane %v19421_v53, 3  ;;  %v19426_v37 = vld [vmem:[#allocation35_spill] sm:$0xff]  ;;  %v19431_v48 = vld [vmem:[#allocation22_spill] sm:$0xff] }
 0x38e   : > { %v4026_v32 = vrot.slane %v3953_v3, 3  ;;  %v4099_v31 = vrot.slane %v3953_v3, 6  ;;  %v4826_v24 = vrot.slane %v19411_v61, 3  ;;  %v19423_v3 = vld [vmem:[#allocation31_spill] sm:$0xff]  ;;  %v19435_v57 = vld [vmem:[#allocation34_spill] sm:$0xff] }
 0x38f   : > { %v19433_v19 = vld [vmem:[#allocation39_spill] sm:$0xff] }
 0x390   : > { %v4027_v4 = vsel %vm19383_vm8, %v4024_v25, %v4026_v32  ;;  %v4100_v45 = vsel %vm2782_vm14, %v4097_v43, %v4099_v31  ;;  %v4825_v25 = vsel %vm19415_vm9, %v4822_v55, %v4824_v22  ;;  %v4827_v52 = vsel %vm19416_vm10, %v4824_v22, %v4826_v24  ;;  %vm10304_vm8 = vmpackc.low %vm19203_vm4, %vm19418_vm15  ;;  %v19422_v55 = vld [vmem:[#allocation33_spill] sm:$0xff]  ;;  %v19425_v31 = vld [vmem:[#allocation32_spill] sm:$0xff] }
 0x391   : > { %v4159_v33 = vpack.c.bf16 %v4027_v4, %v4025_v10  ;;  %v4160_v41 = vpack.c.bf16 %v4100_v45, %v4098_v54  ;;  %v19420_v10 = vld [vmem:[#allocation37_spill] sm:$0xff]  ;;  %v19424_v32 = vpack.c.bf16 %v19422_v55, %v19423_v3  ;;  %v19427_v62 = vpack.c.bf16 %v19425_v31, %v19426_v37  ;;  %v12467_v4 = vld [vmem:[%s18559_s11 + $0x110] sm:$0xff]   ;;  %vm19428_vm4 = vmmov %vm19415_vm9 }
 0x392   : > { %v4828_v54 = vrot.slane %v19420_v10, 3  ;;  %v12606_v45 = vld [vmem:[%s12984_s1] sm:$0xf]  ;;  %vm19429_vm9 = vmmov %vm19428_vm4  ;;  %vm19432_vm10 = vnez %v19431_v48  ;;  %v19437_v43 = vld [vmem:[#allocation44_spill] sm:$0xff] }
 0x393   : > { %4431 = vmatprep.mubr.bf16.mxu0 %v4159_v33  ;;  %12046 = vmatmul.mubr.bf16.gmra.mrb[176].mxu1 %v4160_v41  ;;  %v12607_v33 = vld [vmem:[%s12984_s1 + $0x4] sm:$0xf]  ;;  %v12608_v3 = vld [vmem:[%s12984_s1 + $0x8] sm:$0xf]  ;;  %v19448_v22 = vld [vmem:[#allocation47_spill] sm:$0xff] }
 0x394   : > { %5334 = vmatprep.mubr.bf16.mxu1 %v19414_v8  ;;  %v10490_v41 = vcombine.low %v12606_v45, %v12607_v33  ;;  %v19434_v8 = vld [vmem:[#allocation46_spill] sm:$0xff]  ;;  %v19443_v33 = vld [vmem:[#allocation36_spill] sm:$0xff] }
 0x395   : > { %4432 = vmatmul.mubr.bf16.gmra.mrb[200].mxu0 %v4158_v5  ;;  %v4994_v5 = vpack.c.bf16 %v4827_v52, %v4825_v25  ;;  %v4997_v38 = vpack.c.bf16 %v19434_v8, %v19433_v19  ;;  %v19441_v45 = vld [vmem:[#allocation26_spill] sm:$0xff]  ;;  %v19449_v8 = vld [vmem:[#allocation52_spill] sm:$0xff] }
 0x396   : > { %5479 = vmatprep.mubr.bf16.mxu0 %v4989_v40  ;;  %v4829_v40 = vsel %vm19428_vm4, %v4826_v24, %v4828_v54  ;;  %v12470_v24 = vld [vmem:[%s18559_s11 + $0x118] sm:$0xff]  }
 0x39b   : > { %10306 = vmatmul.mubr.msk.bf16.vlgmr.msra.gmra.mrb[180].mxu1 %vm10304_vm8, %v10489_v27  ;;  %vm10307_vm8 = vmpackc.low %vm19432_vm10, %vm19205_vm0  ;;  %v19436_v27 = vld [vmem:[#allocation38_spill] sm:$0xff]  ;;  %vm19444_vm10 = vnez %v19443_v33  ;;  %v19458_v33 = vld [vmem:[#allocation51_spill] sm:$0xff] }
 0x39c   : > { %12050 = vmatpush3.bf16.msra.mxu1 %v15162_v36  ;;  %5342 = vmatprep.mubr.bf16.mxu1 %v19424_v32  ;;  %v4831_v36 = vsel %vm19429_vm9, %v4828_v54, %v4830_v60  ;;  %v4993_v25 = vpack.c.bf16 %v19436_v27, %v19435_v57  ;;  %v19438_v54 = vld [vmem:[#allocation49_spill] sm:$0xff]  ;;  %v12609_v32 = vld [vmem:[%s12984_s1 + $0xc] sm:$0xf]  ;;  %vm19439_vm0 = vmmov %vm19428_vm4  ;;  %vm19442_vm9 = vnez %v19441_v45 }
 0x39d   : > { %5480 = vmatmul.mubr.bf16.vlgmr.msra.gmra.mrb[204].mxu0 %v19427_v62  ;;  %12051 = vmatprep.subr.bf16.mxu1 %v12464_v34  ;;  %v4999_v52 = vpack.c.bf16 %v4831_v36, %v4829_v40  ;;  %v4834_v55 = vrot.slane %v19438_v54, 3  ;;  %v10491_v31 = vcombine.low %v12608_v3, %v12609_v32  ;;  %vm19440_vm4 = vmmov %vm19439_vm0  ;;  %v19447_v36 = vld [vmem:[#allocation40_spill] sm:$0xff]  ;;  %v19450_v57 = vld [vmem:[#allocation59_spill] sm:$0xff] }
 0x39e   : > { %5487 = vmatprep.mubr.bf16.mxu0 %v4994_v5  ;;  %v4832_v5 = vrot.slane %v19437_v43, 3  ;;  %v4998_v48 = vpack.c.bf16 %v19448_v22, %v19447_v36  ;;  %v4838_v27 = vrot.slane %v19450_v57, 3  ;;  %v19460_v36 = vld [vmem:[#allocation60_spill] sm:$0xff] }
 0x39f   : > { %v4840_v22 = vrot.slane %v19460_v36, 3 }
 0x3a0   : > { %12052 = vmatpush3.bf16.msra.mxu1 %v12464_v34  ;;  %v12472_v34 = vld [vmem:[%s18559_s11 + $0x120] sm:$0xff]   ;;  %v4833_v37 = vsel %vm19439_vm0, %v4830_v60, %v4832_v5  ;;  %v4835_v62 = vsel %vm19440_vm4, %v4832_v5, %v4834_v55  ;;  %v12475_v60 = vld [vmem:[%s18559_s11 + $0x128] sm:$0xff]   ;;  %vm19451_vm4 = vmmov %vm19439_vm0 }
 0x3a1   : > { %12053 = vmatprep.subr.bf16.mxu1 %v12467_v4  ;;  %v5004_v19 = vpack.c.bf16 %v4835_v62, %v4833_v37  ;;  %v19454_v37 = vld [vmem:[#allocation42_spill] sm:$0xff]  ;;  %v19457_v62 = vld [vmem:[#allocation61_spill] sm:$0xff] }
 0x3a3   : > { %10309 = vmatmul.mubr.msk.bf16.gmra.mrb[184].mxu1 %vm10307_vm8, %v10490_v41  ;;  %vm10310_vm8 = vmpackc.low %vm19444_vm10, %vm19442_vm9  ;;  %v19446_v41 = vld [vmem:[#allocation53_spill] sm:$0xff]  ;;  %vm19455_vm10 = vnez %v19454_v37 }
 0x3a4   : > { %5350 = vmatprep.mubr.bf16.mxu1 %v4997_v38  ;;  %12054 = vmatpush3.bf16.msra.mxu1 %v12467_v4  ;;  %v19445_v4 = vld [vmem:[#allocation50_spill] sm:$0xff]  ;;  %v4836_v38 = vrot.slane %v19449_v8, 3  ;;  %v19468_v37 = vld [vmem:[#allocation69_spill] sm:$0xff] }
 0x3a5   : > { %5488 = vmatmul.mubr.bf16.gmra.mrb[208].mxu0 %v4993_v25  ;;  %12055 = vmatprep.subr.bf16.mxu1 %v12470_v24  ;;  %v5002_v40 = vpack.c.bf16 %v19446_v41, %v19445_v4  ;;  %v12478_v25 = vld [vmem:[%s18559_s11 + $0x130] sm:$0xff]  }
 0x3a6   : > { %5495 = vmatprep.mubr.bf16.mxu0 %v4999_v52  ;;  %v12611_v52 = vld [vmem:[%s12984_s1 + $0x14] sm:$0xf]  ;;  %v4837_v3 = vsel %vm19439_vm0, %v4834_v55, %v4836_v38  ;;  %v4839_v32 = vsel %vm19451_vm4, %v4836_v38, %v4838_v27  ;;  %v12481_v55 = vld [vmem:[%s18559_s11 + $0x138] sm:$0xff]   ;;  %vm19462_vm4 = vmmov %vm19439_vm0 }
 0x3a7   : > { %v19459_v4 = vld [vmem:[#allocation55_spill] sm:$0xff]  ;;  %v12613_v38 = vld [vmem:[%s12984_s1 + $0x1c] sm:$0xf] }
 0x3a8   : > { %12056 = vmatpush3.bf16.msra.mxu1 %v12470_v24  ;;  %v12610_v24 = vld [vmem:[%s12984_s1 + $0x10] sm:$0xf]  ;;  %v5003_v41 = vpack.c.bf16 %v19459_v4, %v19458_v33  ;;  %v19471_v4 = vld [vmem:[#allocation66_spill] sm:$0xff] }
 0x3a9   : > { %12057 = vmatprep.subr.bf16.mxu1 %v12472_v34  ;;  %v10492_v5 = vcombine.low %v12610_v24, %v12611_v52  ;;  %v4841_v52 = vsel %vm19439_vm0, %v4838_v27, %v4840_v22 }
 0x3ab   : > { %10312 = vmatmul.mubr.msk.bf16.gmra.mrb[188].mxu1 %vm10310_vm8, %v10491_v31  ;;  %v19452_v31 = vld [vmem:[#allocation41_spill] sm:$0xff] }
 0x3ac   : > { %5358 = vmatprep.mubr.bf16.mxu1 %v5002_v40  ;;  %12058 = vmatpush3.bf16.msra.mxu1 %v12472_v34  ;;  %vm19453_vm9 = vnez %v19452_v31  ;;  %v19456_v34 = vld [vmem:[#allocation54_spill] sm:$0xff]  ;;  %v5009_v40 = vpack.c.bf16 %v4839_v32, %v4837_v3  ;;  %v19463_v3 = vld [vmem:[#allocation45_spill] sm:$0xff]  ;;  %v19467_v32 = vld [vmem:[#allocation63_spill] sm:$0xff] }
 0x3ad   : > { %5496 = vmatmul.mubr.bf16.gmra.mrb[212].mxu0 %v4998_v48  ;;  %12059 = vmatprep.subr.bf16.mxu1 %v12475_v60  ;;  %vm10313_vm8 = vmpackc.low %vm19455_vm10, %vm19453_vm9  ;;  %v5007_v45 = vpack.c.bf16 %v19457_v62, %v19456_v34  ;;  %v19461_v48 = vld [vmem:[#allocation65_spill] sm:$0xff]  ;;  %vm19464_vm9 = vnez %v19463_v3  ;;  %v19469_v34 = vld [vmem:[#allocation56_spill] sm:$0xff] }
 0x3ae   : > { %5503 = vmatprep.mubr.bf16.mxu0 %v5004_v19  ;;  %v4842_v19 = vrot.slane %v19461_v48, 3  ;;  %v19470_v62 = vld [vmem:[#allocation67_spill] sm:$0xff] }
 0x3b0   : > { %12060 = vmatpush3.bf16.msra.mxu1 %v12475_v60  ;;  %v12612_v60 = vld [vmem:[%s12984_s1 + $0x18] sm:$0xf]  ;;  %v4843_v31 = vsel %vm19462_vm4, %v4840_v22, %v4842_v19  ;;  %v12614_v22 = vld [vmem:[%s12984_s1 + $0x20] sm:$0xf]  ;;  %vm19473_vm4 = vmmov %vm19439_vm0 }
 0x3b1   : > { %12061 = vmatprep.subr.bf16.mxu1 %v12478_v25  ;;  %v10493_v24 = vcombine.low %v12612_v60, %v12613_v38  ;;  %v5014_v33 = vpack.c.bf16 %v4843_v31, %v4841_v52  ;;  %v12615_v60 = vld [vmem:[%s12984_s1 + $0x24] sm:$0xf]  ;;  %v19476_v52 = vld [vmem:[#allocation58_spill] sm:$0xff] }
 0x3b2   : > { %v10494_v38 = vcombine.low %v12614_v22, %v12615_v60  ;;  %v19479_v31 = vld [vmem:[#allocation77_spill] sm:$0xff] }
 0x3b3   : > { %10315 = vmatmul.mubr.msk.bf16.gmra.mrb[192].mxu1 %vm10313_vm8, %v10492_v5  ;;  %v19465_v5 = vld [vmem:[#allocation48_spill] sm:$0xff]  ;;  %v19483_v22 = vld [vmem:[#allocation81_spill] sm:$0xff] }
 0x3b4   : > { %5366 = vmatprep.mubr.bf16.mxu1 %v5007_v45  ;;  %12062 = vmatpush3.bf16.msra.mxu1 %v12478_v25  ;;  %vm19466_vm10 = vnez %v19465_v5  ;;  %v5012_v25 = vpack.c.bf16 %v19468_v37, %v19467_v32  ;;  %v5008_v45 = vpack.c.bf16 %v19470_v62, %v19469_v34  ;;  %v19474_v5 = vld [vmem:[#allocation57_spill] sm:$0xff]  ;;  %v19480_v37 = vld [vmem:[#allocation68_spill] sm:$0xff]  ;;  %v4850_v60 = vrot.slane %v19483_v22, 3 }
 0x3b5   : > { %5504 = vmatmul.mubr.bf16.gmra.mrb[216].mxu0 %v5003_v41  ;;  %12063 = vmatprep.subr.bf16.mxu1 %v12481_v55  ;;  %vm10316_vm8 = vmpackc.low %vm19466_vm10, %vm19464_vm9  ;;  %v4844_v41 = vrot.slane %v19471_v4, 3  ;;  %vm19475_vm9 = vnez %v19474_v5  ;;  %vm19477_vm10 = vnez %v19476_v52 }
 0x3b6   : > { %5511 = vmatprep.mubr.bf16.mxu0 %v5009_v40  ;;  %v19472_v40 = vld [vmem:[#allocation73_spill] sm:$0xff] }
 0x3b7   : > { %v4846_v27 = vrot.slane %v19472_v40, 3  ;;  %v4845_v3 = vsel %vm19439_vm0, %v4842_v19, %v4844_v41  ;;  %v12616_v19 = vld [vmem:[%s12984_s1 + $0x28] sm:$0xf] }
 0x3b8   : > { %12064 = vmatpush3.bf16.msra.mxu1 %v12481_v55 }
 0x3b9   : > { %v4847_v55 = vsel %vm19473_vm4, %v4844_v41, %v4846_v27  ;;  %v12617_v41 = vld [vmem:[%s12984_s1 + $0x2c] sm:$0xf]  ;;  %vm19484_vm4 = vmmov %vm19439_vm0 }
 0x3ba   : > { %v5019_v62 = vpack.c.bf16 %v4847_v55, %v4845_v3  ;;  %v10495_v5 = vcombine.low %v12616_v19, %v12617_v41  ;;  %v19487_v3 = vld [vmem:[#allocation64_spill] sm:$0xff]  ;;  %v19494_v19 = vld [vmem:[#allocation87_spill] sm:$0xff] }
 0x3bb   : > { %10318 = vmatmul.mubr.msk.bf16.gmra.mrb[196].mxu1 %vm10316_vm8, %v10493_v24  ;;  %vm10319_vm8 = vmpackc.low %vm19477_vm10, %vm19475_vm9  ;;  %v19478_v24 = vld [vmem:[#allocation70_spill] sm:$0xff]  ;;  %vm19488_vm10 = vnez %v19487_v3  ;;  %v19490_v55 = vld [vmem:[#allocation88_spill] sm:$0xff]  ;;  %v4854_v41 = vrot.slane %v19494_v19, 3  ;;  %v4853_v3 = vsel %vm19439_vm0, %v4850_v60, %v4852_v29 }
 0x3bc   : > { %5374 = vmatprep.mubr.bf16.mxu1 %v5012_v25  ;;  %v5017_v32 = vpack.c.bf16 %v19479_v31, %v19478_v24  ;;  %v19481_v25 = vld [vmem:[#allocation74_spill] sm:$0xff] }
 0x3bd   : > { %5512 = vmatmul.mubr.bf16.gmra.mrb[220].mxu0 %v5008_v45  ;;  %v5013_v34 = vpack.c.bf16 %v19481_v25, %v19480_v37  ;;  %v19482_v45 = vld [vmem:[#allocation75_spill] sm:$0xff]  ;;  %v19485_v31 = vld [vmem:[#allocation62_spill] sm:$0xff]  ;;  %v19492_v25 = vld [vmem:[#allocation85_spill] sm:$0xff] }
 0x3be   : > { %5519 = vmatprep.mubr.bf16.mxu0 %v5014_v33  ;;  %v4848_v33 = vrot.slane %v19482_v45, 3  ;;  %vm19486_vm9 = vnez %v19485_v31 }
 0x3c0   : > { %v4849_v52 = vsel %vm19439_vm0, %v4846_v27, %v4848_v33  ;;  %v4851_v24 = vsel %vm19484_vm4, %v4848_v33, %v4850_v60  ;;  %v12618_v27 = vld [vmem:[%s12984_s1 + $0x30] sm:$0xf]  ;;  %v12619_v33 = vld [vmem:[%s12984_s1 + $0x34] sm:$0xf]  ;;  %vm19495_vm4 = vmmov %vm19439_vm0 }
 0x3c1   : > { %v10496_v31 = vcombine.low %v12618_v27, %v12619_v33  ;;  %v19504_v27 = vld [vmem:[#allocation93_spill] sm:$0xff]  ;;  %v12621_v60 = vld [vmem:[%s12984_s1 + $0x3c] sm:$0xf] }
 0x3c2   : > { %v4858_v33 = vrot.slane %v19504_v27, 3 }
 0x3c3   : > { %10321 = vmatmul.mubr.msk.bf16.gmra.mrb[200].mxu1 %vm10319_vm8, %v10494_v38  ;;  %vm10322_vm8 = vmpackc.low %vm19488_vm10, %vm19486_vm9  ;;  %v19489_v38 = vld [vmem:[#allocation78_spill] sm:$0xff] }
 0x3c4   : > { %5382 = vmatprep.mubr.bf16.mxu1 %v5017_v32  ;;  %v5022_v37 = vpack.c.bf16 %v19490_v55, %v19489_v38  ;;  %v19491_v32 = vld [vmem:[#allocation76_spill] sm:$0xff]  ;;  %v4855_v38 = vsel %vm19495_vm4, %v4852_v29, %v4854_v41  ;;  %v19496_v55 = vld [vmem:[#allocation71_spill] sm:$0xff]  ;;  %vm19505_vm4 = vmmov %vm19439_vm0 }
 0x3c5   : > { %5520 = vmatmul.mubr.bf16.gmra.mrb[224].mxu0 %v5013_v34  ;;  %v5018_v34 = vpack.c.bf16 %v19492_v25, %v19491_v32  ;;  %vm19497_vm9 = vnez %v19496_v55  ;;  %v19503_v25 = vld [vmem:[#allocation95_spill] sm:$0xff]  ;;  %v12620_v29 = vld [vmem:[%s12984_s1 + $0x38] sm:$0xf] }
 0x3c6   : > { %5527 = vmatprep.mubr.bf16.mxu0 %v5019_v62  ;;  %v5024_v62 = vpack.c.bf16 %v4851_v24, %v4849_v52  ;;  %v19498_v52 = vld [vmem:[#allocation72_spill] sm:$0xff]  ;;  %v19501_v24 = vld [vmem:[#allocation97_spill] sm:$0xff]  ;;  %v10497_v55 = vcombine.low %v12620_v29, %v12621_v60 }
 0x3c7   : > { %vm19499_vm10 = vnez %v19498_v52  ;;  %v4857_v52 = vsel %vm19439_vm0, %v4854_v41, %v4856_v47  ;;  %v19512_v29 = vld [vmem:[#allocation101_spill] sm:$0xff] }
 0x3c8   : > { %v4862_v60 = vrot.slane %v19512_v29, 3  ;;  %v12623_v41 = vld [vmem:[%s12984_s1 + $0x44] sm:$0xf] }
 0x3cb   : > { %10324 = vmatmul.mubr.msk.bf16.gmra.mrb[204].mxu1 %vm10322_vm8, %v10495_v5  ;;  %vm10325_vm8 = vmpackc.low %vm19499_vm10, %vm19497_vm9  ;;  %v19500_v5 = vld [vmem:[#allocation89_spill] sm:$0xff] }
 0x3cc   : > { %5390 = vmatprep.mubr.bf16.mxu1 %v5022_v37  ;;  %v5027_v32 = vpack.c.bf16 %v19501_v24, %v19500_v5  ;;  %v19502_v37 = vld [vmem:[#allocation86_spill] sm:$0xff]  ;;  %v4859_v5 = vsel %vm19505_vm4, %v4856_v47, %v4858_v33  ;;  %vm10328_vm9 = vmpackc.low %vm13571_vm6, %vm19258_vm1  ;;  %v12622_v47 = vld [vmem:[%s12984_s1 + $0x40] sm:$0xf] }
 0x3cd   : > { %5528 = vmatmul.mubr.bf16.gmra.mrb[228].mxu0 %v5018_v34  ;;  %v5023_v34 = vpack.c.bf16 %v19503_v25, %v19502_v37  ;;  %v19511_v25 = vld [vmem:[#allocation103_spill] sm:$0xff]  ;;  %v10498_v24 = vcombine.low %v12622_v47, %v12623_v41  ;;  %vm19513_vm6 = vmmov %vm19439_vm0  ;;  %v19523_v41 = vld [vmem:[#allocation18_spill] sm:$0xff] }
 0x3ce   : > { %5535 = vmatprep.mubr.bf16.mxu0 %v5024_v62  ;;  %v5029_v62 = vpack.c.bf16 %v4855_v38, %v4853_v3  ;;  %v19509_v38 = vld [vmem:[#allocation106_spill] sm:$0xff]  ;;  %v4861_v3 = vsel %vm19513_vm6, %v4858_v33, %v4860_v1  ;;  %vm19514_vm1 = vmmov %vm19439_vm0  ;;  %v4864_v33 = vrot.slane %v19365_v49, 3 }
 0x3cf   : > { %vm10334_vm4 = vmpackc.low %vm13667_vm13, %vm13648_vm5 }
 0x3d0   : > { %vm19534_vm5 = vmmov %vm19439_vm0 }
 0x3d1   : > { %vm19535_vm13 = vmmov %vm19439_vm0 }
 0x3d3   : > { %10327 = vmatmul.mubr.msk.bf16.gmra.mrb[208].mxu1 %vm10325_vm8, %v10496_v31  ;;  %v19508_v31 = vld [vmem:[#allocation98_spill] sm:$0xff] }
 0x3d4   : > { %5398 = vmatprep.mubr.bf16.mxu1 %v5027_v32  ;;  %v5032_v37 = vpack.c.bf16 %v19509_v38, %v19508_v31  ;;  %v19510_v32 = vld [vmem:[#allocation96_spill] sm:$0xff]  ;;  %v4863_v31 = vsel %vm19514_vm1, %v4860_v1, %v4862_v60  ;;  %v19515_v38 = vld [vmem:[#allocation83_spill] sm:$0xff]  ;;  %v4866_v1 = vrot.slane %v19367_v30, 3 }
 0x3d5   : > { %5536 = vmatmul.mubr.bf16.gmra.mrb[232].mxu0 %v5023_v34  ;;  %v5028_v34 = vpack.c.bf16 %v19511_v25, %v19510_v32  ;;  %vm19516_vm10 = vnez %v19515_v38  ;;  %v5039_v47 = vpack.c.bf16 %v4863_v31, %v4861_v3  ;;  %v19527_v31 = vld [vmem:[#allocation117_spill] sm:$0xff] }
 0x3d6   : > { %5543 = vmatprep.mubr.bf16.mxu0 %v5029_v62  ;;  %v5034_v62 = vpack.c.bf16 %v4859_v5, %v4857_v52  ;;  %vm10331_vm8 = vmpackc.low %vm13604_vm7, %vm19516_vm10  ;;  %v19519_v5 = vld [vmem:[#allocation116_spill] sm:$0xff]  ;;  %v12624_v52 = vld [vmem:[%s12984_s1 + $0x48] sm:$0xf] }
 0x3d7   : > { %vm19524_vm7 = vmmov %vm19439_vm0 }
 0x3d8   : > { %vm10337_vm10 = vmpackc.low %vm13739_vm12, %vm19284_vm3 }
 0x3d9   : > { %vm19544_vm12 = vmmov %vm19439_vm0 }
 0x3db   : > { %10330 = vmatmul.mubr.msk.bf16.gmra.mrb[212].mxu1 %vm10328_vm9, %v10497_v55  ;;  %v19518_v55 = vld [vmem:[#allocation107_spill] sm:$0xff] }
 0x3dc   : > { %5406 = vmatprep.mubr.bf16.mxu1 %v5032_v37  ;;  %v5037_v32 = vpack.c.bf16 %v19519_v5, %v19518_v55  ;;  %v19520_v37 = vld [vmem:[#allocation17_spill] sm:$0xff]  ;;  %v10499_v55 = vcombine.low %v12624_v52, %v12625_v44  ;;  %v4865_v5 = vsel %vm19524_vm7, %v4862_v60, %v4864_v33  ;;  %v19530_v44 = vld [vmem:[#allocation118_spill] sm:$0xff]  ;;  %v12626_v52 = vld [vmem:[%s12984_s1 + $0x50] sm:$0xf] }
 0x3dd   : > { %5544 = vmatmul.mubr.bf16.gmra.mrb[236].mxu0 %v5028_v34  ;;  %v854_v25 = vadd.s32 216, %v19520_v37  ;;  %v19521_v34 = vld [vmem:[#allocation104_spill] sm:$0xff]  ;;  %v4867_v37 = vsel %vm19439_vm0, %v4864_v33, %v4866_v1  ;;  %v4870_v33 = vrot.slane %v19376_v63, 3  ;;  %vm4902_vm0 = vcmask 1043456  }
 0x3de   : > { %5551 = vmatprep.mubr.bf16.mxu0 %v5034_v62  ;;  %v19522_v62 = vld [vmem:[#allocation114_spill] sm:$0xff]  ;;  %v5044_v60 = vpack.c.bf16 %v4867_v37, %v4865_v5  ;;  %v12627_v5 = vld [vmem:[%s12984_s1 + $0x54] sm:$0xf] }
 0x3df   : > { %v5033_v35 = vpack.c.bf16 %v19522_v62, %v19521_v34  ;;  %v884_v38 = vadd.s32 %v19523_v41, %v854_v25  ;;  %v19529_v25 = vld [vmem:[#allocation115_spill] sm:$0xff]  ;;  %v1080_v62 = vunpack.c.l.bf16 %v15462_v50 }
 0x3e0   : > { %v5038_v34 = vpack.c.bf16 %v19530_v44, %v19529_v25  ;;  %v19540_v44 = vld [vmem:[#allocation119_spill] sm:$0xff] }
 0x3e1   : > { %vm912_vm9 = vcmp.ge.s32.totalorder %v884_v38, 0  ;;  %vm940_vm6 = vcmp.lt.s32.totalorder %v884_v38, 200 }
 0x3e2   : > { %vm15475_vm1 = vmand %vm912_vm9, %vm940_vm6 }
 0x3e3   : > { %10333 = vmatmul.mubr.msk.bf16.gmra.mrb[216].mxu1 %vm10331_vm8, %v10498_v24  ;;  %v15481_v38 = vsel %vm15475_vm1, %v1080_v62, 0.0  ;;  %vm19543_vm8 = vcmask 1046528   ;;  %v12629_v24 = vld [vmem:[%s12984_s1 + $0x5c] sm:$0xf] }
 0x3e4   : > { %5414 = vmatprep.mubr.bf16.mxu1 %v5037_v32  ;;  %v19528_v32 = vld [vmem:[#allocation120_spill] sm:$0xff]  ;;  %19533 = vst [vmem:[#allocation29_spill] sm:$0xff] %v15481_v38  ;;  %v4807_v62 = vrot.slane %v15481_v38, 1 }
 0x3e5   : > { %5552 = vmatmul.mubr.bf16.gmra.mrb[240].mxu0 %v5033_v35  ;;  %v5042_v35 = vpack.c.bf16 %v19528_v32, %v19527_v31  ;;  %v19538_v32 = vld [vmem:[#allocation121_spill] sm:$0xff] }
 0x3e6   : > { %5559 = vmatprep.mubr.bf16.mxu0 %v5039_v47  ;;  %v4868_v47 = vrot.slane %v19371_v42, 3 }
 0x3e8   : > { %v4869_v37 = vsel %vm19534_vm5, %v4866_v1, %v4868_v47  ;;  %v4871_v3 = vsel %vm19535_vm13, %v4868_v47, %v4870_v33  ;;  %v19542_v1 = vld [vmem:[#allocation113_spill] sm:$0xff] }
 0x3e9   : > { %v5049_v13 = vpack.c.bf16 %v4871_v3, %v4869_v37  ;;  %v4808_v47 = vsel %vm19543_vm8, %v19542_v1, %v4807_v62  ;;  %v19548_v37 = vld [vmem:[#allocation123_spill] sm:$0xff]  ;;  %v19549_v3 = vld [vmem:[#allocation126_spill] sm:$0xff]  ;;  %v4814_v1 = vrot.slane %v15481_v38, 2 }
 0x3eb   : > { %10336 = vmatmul.mubr.msk.bf16.gmra.mrb[220].mxu1 %vm10334_vm4, %v10499_v55  ;;  %v10500_v55 = vcombine.low %v12626_v52, %v12627_v5  ;;  %v4872_v52 = vrot.slane %v15481_v38, 3  ;;  %v12628_v5 = vld [vmem:[%s12984_s1 + $0x58] sm:$0xf]  ;;  %s18475_s1 = scalar_lea.sflag [#allocation3], %s746_s19 }
 0x3ec   : > { %5422 = vmatprep.mubr.bf16.mxu1 %v5042_v35  ;;  %v19539_v35 = vld [vmem:[#allocation124_spill] sm:$0xff]  ;;  %v10501_v31 = vcombine.low %v12628_v5, %v12629_v24 }
 0x3ed   : > { %5560 = vmatmul.mubr.bf16.gmra.mrb[244].mxu0 %v5038_v34  ;;  %v5047_v25 = vpack.c.bf16 %v19539_v35, %v19538_v32  ;;  %v19541_v34 = vld [vmem:[#allocation122_spill] sm:$0xff]  ;;  %v4873_v32 = vsel %vm19544_vm12, %v4870_v33, %v4872_v52  ;;  %v12630_v35 = vld [vmem:[%s13725_s3] sm:$0xf] }
 0x3ee   : > { %5567 = vmatprep.mubr.bf16.mxu0 %v5044_v60  ;;  %v5043_v60 = vpack.c.bf16 %v19541_v34, %v19540_v44  ;;  %v19546_v44 = vld [vmem:[#allocation108_spill] sm:$0xff]  ;;  %v4903_v34 = vrot.slane %v19405_v2, 4  ;;  %v5054_v5 = vpack.c.bf16 %v4872_v52, %v4873_v32  ;;  %v4910_v32 = vrot.slane %v19411_v61, 4  ;;  %v19589_v2 = vld [vmem:[#allocation141_spill] sm:$0xff] }
 0x3ef   : > { %vm19547_vm3 = vnez %v19546_v44  ;;  %v10502_v44 = vcombine.low %v12630_v35, %v15462_v50  ;;  %v4912_v50 = vrot.slane %v19420_v10, 4 }
 0x3f0   : > { %vm10340_vm7 = vmpackc.low %vm19547_vm3, %vm13776_vm11  ;;  %vm19551_vm11 = vcmask 1045504  }
 0x3f1   : > { %vm19586_vm6 = vmmov %vm19551_vm11 }
 0x3f2   : > { %vm19587_vm5 = vmmov %vm19586_vm6 }
 0x3f3   : > { %10339 = vmatmul.mubr.msk.bf16.gmra.mrb[224].mxu1 %vm10337_vm10, %v10500_v55  ;;  %v5052_v55 = vpack.c.bf16 %v4807_v62, %v4808_v47  ;;  %v19550_v47 = vld [vmem:[#allocation125_spill] sm:$0xff]  ;;  %vm19591_vm13 = vmmov %vm19587_vm5 }
 0x3f4   : > { %5430 = vmatprep.mubr.bf16.mxu1 %v5047_v25  ;;  %v5048_v25 = vpack.c.bf16 %v19549_v3, %v19548_v37  ;;  %v4815_v24 = vsel %vm19551_vm11, %v19550_v47, %v4814_v1  ;;  %v19552_v37 = vld [vmem:[#allocation111_spill] sm:$0xff]  ;;  %v12484_v3 = vld [vmem:[%s18561_s13] sm:$0xff]   ;;  %vm19593_vm10 = vmmov %vm19587_vm5 }
 0x3f5   : > { %5568 = vmatmul.mubr.bf16.gmra.mrb[248].mxu0 %v5043_v60  ;;  %v4904_v60 = vrot.slane %v19406_v6, 4  ;;  %vm19553_vm4 = vnez %v19552_v37  ;;  %v4916_v37 = vrot.slane %v19437_v43, 4  ;;  %v5812_v6 = vrot.slane %v14047_v51, 2  ;;  %vm19595_vm8 = vmmov %vm19587_vm5  ;;  %v19615_v51 = vld [vmem:[#allocation143_spill] sm:$0xff] }
 0x3f6   : > { %5575 = vmatprep.mubr.bf16.mxu0 %v5049_v13  ;;  %v4906_v13 = vrot.slane %v19407_v58, 4  ;;  %vm10343_vm9 = vmpackc.low %vm15475_vm1, %vm19553_vm4 }
 0x3f7   : > { %v4905_v33 = vsel %vm4902_vm0, %v4903_v34, %v4904_v60  ;;  %v4914_v34 = vrot.slane %v19421_v53, 4  ;;  %vm19597_vm12 = vmmov %vm19587_vm5 }
 0x3f8   : > { %v4907_v62 = vsel %vm4902_vm0, %v4904_v60, %v4906_v13  ;;  %vm19599_vm3 = vmmov %vm19587_vm5 }
 0x3f9   : > { %v4990_v52 = vpack.c.bf16 %v4907_v62, %v4905_v33  ;;  %v4913_v33 = vsel %vm4902_vm0, %v4910_v32, %v4912_v50  ;;  %v4915_v62 = vsel %vm4902_vm0, %v4912_v50, %v4914_v34  ;;  %vm19607_vm4 = vmmov %vm19599_vm3 }
 0x3fb   : > { %10342 = vmatmul.mubr.msk.bf16.gmra.mrb[228].mxu1 %vm10340_vm7, %v10501_v31  ;;  %v4908_v31 = vrot.slane %v19410_v18, 4  ;;  %vm19601_vm7 = vmmov %vm19599_vm3 }
 0x3fc   : > { %5438 = vmatprep.mubr.bf16.mxu1 %v5052_v55  ;;  %v12483_v55 = vld [vmem:[%s18561_s13 + $0x40] sm:$0xff]  }
 0x3fd   : > { %5576 = vmatmul.mubr.bf16.gmra.mrb[252].mxu0 %v5048_v25  ;;  %v5053_v25 = vpack.c.bf16 %v4814_v1, %v4815_v24  ;;  %11178 = vmatprep.subr.bf16.mxu0 %v12483_v55  ;;  %v4909_v60 = vsel %vm4902_vm0, %v4906_v13, %v4908_v31  ;;  %v5000_v24 = vpack.c.bf16 %v4915_v62, %v4913_v33  ;;  %v4918_v55 = vrot.slane %v19438_v54, 4 }
 0x3fe   : > { %5583 = vmatprep.mubr.bf16.mxu0 %v5054_v5  ;;  %11179 = vmatpush3.bf16.msra.mxu0 %v12484_v3  ;;  %v4911_v5 = vsel %vm4902_vm0, %v4908_v31, %v4910_v32  ;;  %v4922_v13 = vrot.slane %v19450_v57, 4  ;;  %v4917_v32 = vsel %vm4902_vm0, %v4914_v34, %v4916_v37  ;;  %v12486_v34 = vld [vmem:[%s18561_s13 + $0x8] sm:$0xff]  }
 0x3ff   : > { %v4995_v47 = vpack.c.bf16 %v4911_v5, %v4909_v60  ;;  %v4919_v50 = vsel %vm4902_vm0, %v4916_v37, %v4918_v55  ;;  %v15545_v60 = vld [vmem:[%s18558_s10] ss:$0 sm:$0xff]  ;;  %v12485_v5 = vld [vmem:[%s18561_s13 + $0x48] sm:$0xff]  }
 0x400   : > { %11180 = vmatprep.subr.bf16.mxu0 %v12485_v5 }
 0x402   : > { %11181 = vmatpush3.bf16.msra.mxu0 %v12486_v34 }
 0x403   : > { %10345 = vmatmul.mubr.msk.bf16.gmra.mrb[232].mxu1 %vm10343_vm9, %v10502_v44  ;;  %vm19609_vm9 = vmmov %vm19599_vm3 }
 0x404   : > { %12065 = vmatprep.mubr.bf16.mxu1 %v4990_v52  ;;  %v4920_v52 = vrot.slane %v19449_v8, 4  ;;  %v4928_v8 = vrot.slane %v19471_v4, 4 }
 0x405   : > { %5584 = vmatmul.mubr.bf16.gmra.mrb[0].mxu0 %v5053_v25 }
 0x406   : > { %v10864_v35 = vpop.f32.mrb[156].mxu0  ;;  %v4921_v33 = vsel %vm4902_vm0, %v4918_v55, %v4920_v52  ;;  %v4923_v62 = vsel %vm4902_vm0, %v4920_v52, %v4922_v13 }
 0x407   : > { %v10865_v1 = vpop.f32.mrb[157].mxu0  ;;  %v5010_v37 = vpack.c.bf16 %v4923_v62, %v4921_v33 }
 0x408   : > { %v10866_v44 = vadd.f32 %v10865_v1, %v10864_v35  ;;  %v10867_v3 = vpop.f32.mrb[158].mxu0 }
 0x409   : > { %v10868_v31 = vpop.f32.mrb[159].mxu0 }
 0x40a   : > { %v10869_v25 = vadd.f32 %v10868_v31, %v10867_v3  ;;  %v4346_v1 = vadd.f32 %v10866_v44, %v15545_v60  ;;  %v4924_v3 = vrot.slane %v19460_v36, 4  ;;  %v4926_v31 = vrot.slane %v19461_v48, 4 }
 0x40b   : > { %12066 = vmatmul.mubr.bf16.vlgmr.msra.gmra.mrb[236].mxu1 %v4995_v47  ;;  %v5005_v47 = vpack.c.bf16 %v4919_v50, %v4917_v32  ;;  %v4930_v32 = vrot.slane %v19472_v40, 4 }
 0x40c   : > { %12069 = vmatprep.mubr.bf16.mxu1 %v5000_v24  ;;  %v4349_v5 = vadd.f32 %v10869_v25, %v15545_v60  ;;  %v4925_v34 = vsel %vm4902_vm0, %v4922_v13, %v4924_v3 }
 0x40d   : > { %v4931_v40 = vsel %vm4902_vm0, %v4928_v8, %v4930_v32 }
 0x40e   : > { %v12027_v35 = vpop.f32.mrb[156].mxu1 }
 0x40f   : > { %v4474_v24 = vpop.f32.mrb[157].mxu1 }
 0x410   : > { %v10870_v57 = vpop.f32.mrb[160].mxu0  ;;  %v15558_v55 = vadd.f32 %v4474_v24, %v4346_v1  ;;  %v12028_v52 = vpop.f32.mrb[158].mxu1  ;;  %v4927_v1 = vsel %vm4902_vm0, %v4924_v3, %v4926_v31  ;;  %v4936_v3 = vrot.slane %v19493_v0, 4 }
 0x411   : > { %v10871_v50 = vpop.f32.mrb[161].mxu0  ;;  %v4477_v54 = vpop.f32.mrb[159].mxu1 }
 0x412   : > { %19554 = vst [vmem:[#allocation30_spill] sm:$0xff] %v15558_v55  ;;  %v10872_v44 = vadd.f32 %v10871_v50, %v10870_v57  ;;  %v10873_v33 = vpop.f32.mrb[162].mxu0  ;;  %v15563_v62 = vadd.f32 %v4477_v54, %v4349_v5  ;;  %v4929_v55 = vsel %vm4902_vm0, %v4926_v31, %v4928_v8  ;;  %v4932_v5 = vrot.slane %v19482_v45, 4 }
 0x413   : > { %12070 = vmatmul.mubr.bf16.gmra.mrb[240].mxu1 %v5005_v47  ;;  %v10874_v36 = vpop.f32.mrb[163].mxu0  ;;  %v5015_v47 = vpack.c.bf16 %v4927_v1, %v4925_v34  ;;  %v5020_v54 = vpack.c.bf16 %v4931_v40, %v4929_v55  ;;  %v12487_v55 = vld [vmem:[%s18561_s13 + $0x50] sm:$0xff]  }
 0x414   : > { %19555 = vst [vmem:[#allocation19_spill] sm:$0xff] %v15563_v62  ;;  %12073 = vmatprep.mubr.bf16.mxu1 %v5010_v37  ;;  %v4354_v24 = vadd.f32 %v10872_v44, %v15545_v60  ;;  %v10875_v25 = vadd.f32 %v10874_v36, %v10873_v33  ;;  %v4934_v37 = vrot.slane %v19483_v22, 4  ;;  %v4938_v36 = vrot.slane %v19494_v19, 4  ;;  %11182 = vmatprep.subr.bf16.mxu0 %v12487_v55 }
 0x415   : > { %v4933_v44 = vsel %vm4902_vm0, %v4930_v32, %v4932_v5 }
 0x416   : > { %v15570_v4 = vadd.f32 %v12027_v35, %v4354_v24  ;;  %v4357_v57 = vadd.f32 %v10875_v25, %v15545_v60  ;;  %v4935_v40 = vsel %vm4902_vm0, %v4932_v5, %v4934_v37  ;;  %v4937_v34 = vsel %vm4902_vm0, %v4934_v37, %v4936_v3 }
 0x417   : > { %v4939_v1 = vsel %vm4902_vm0, %v4936_v3, %v4938_v36  ;;  %v5025_v25 = vpack.c.bf16 %v4935_v40, %v4933_v44  ;;  %v4946_v5 = vrot.slane %v19512_v29, 4 }
 0x418   : > { %19556 = vst [vmem:[#allocation20_spill] sm:$0xff] %v15570_v4  ;;  %v15575_v13 = vadd.f32 %v12028_v52, %v4357_v57  ;;  %v12488_v52 = vld [vmem:[%s18561_s13 + $0x10] sm:$0xff]   ;;  %v5030_v32 = vpack.c.bf16 %v4939_v1, %v4937_v34  ;;  %v4940_v57 = vrot.slane %v19353_v59, 4 }
 0x419   : > { %11183 = vmatpush3.bf16.msra.mxu0 %v12488_v52 }
 0x41a   : > { %19557 = vst [vmem:[#allocation33_spill] sm:$0xff] %v15575_v13  ;;  %v10876_v50 = vpop.f32.mrb[164].mxu0 }
 0x41b   : > { %12074 = vmatmul.mubr.bf16.gmra.mrb[244].mxu1 %v5015_v47  ;;  %v10877_v31 = vpop.f32.mrb[165].mxu0  ;;  %v4942_v47 = vrot.slane %v19504_v27, 4 }
 0x41c   : > { %v10878_v8 = vadd.f32 %v10877_v31, %v10876_v50  ;;  %v10879_v35 = vpop.f32.mrb[166].mxu0  ;;  %12077 = vmatprep.mubr.bf16.mxu1 %v5020_v54  ;;  %v4944_v54 = vrot.slane %v19359_v9, 4 }
 0x41d   : > { %v10880_v33 = vpop.f32.mrb[167].mxu0  ;;  %v4943_v44 = vsel %vm4902_vm0, %v4940_v57, %v4942_v47 }
 0x41e   : > { %v10881_v24 = vadd.f32 %v10880_v33, %v10879_v35  ;;  %v4362_v37 = vadd.f32 %v10878_v8, %v15545_v60  ;;  %v4941_v35 = vsel %vm4902_vm0, %v4938_v36, %v4940_v57  ;;  %v4945_v40 = vsel %vm4902_vm0, %v4942_v47, %v4944_v54 }
 0x41f   : > { %v5035_v29 = vpack.c.bf16 %v4943_v44, %v4941_v35  ;;  %v4948_v57 = vrot.slane %v19365_v49, 4 }
 0x420   : > { %v4365_v1 = vadd.f32 %v10881_v24, %v15545_v60  ;;  %v4952_v24 = vrot.slane %v19371_v42, 4 }
 0x422   : > { %v12031_v50 = vpop.f32.mrb[160].mxu1 }
 0x423   : > { %12078 = vmatmul.mubr.bf16.gmra.mrb[248].mxu1 %v5025_v25  ;;  %v10882_v31 = vpop.f32.mrb[168].mxu0  ;;  %v4490_v13 = vpop.f32.mrb[161].mxu1  ;;  %v4947_v25 = vsel %vm4902_vm0, %v4944_v54, %v4946_v5  ;;  %v4954_v54 = vrot.slane %v19376_v63, 4 }
 0x424   : > { %v10883_v3 = vpop.f32.mrb[169].mxu0  ;;  %12081 = vmatprep.mubr.bf16.mxu1 %v5030_v32  ;;  %v15597_v55 = vadd.f32 %v4490_v13, %v4362_v37  ;;  %v12032_v33 = vpop.f32.mrb[162].mxu1  ;;  %v4950_v13 = vrot.slane %v19367_v30, 4  ;;  %v5040_v47 = vpack.c.bf16 %v4947_v25, %v4945_v40 }
 0x425   : > { %v10884_v52 = vadd.f32 %v10883_v3, %v10882_v31  ;;  %v10885_v34 = vpop.f32.mrb[170].mxu0  ;;  %v4493_v4 = vpop.f32.mrb[163].mxu1  ;;  %v12490_v3 = vld [vmem:[%s18561_s13 + $0x18] sm:$0xff]  }
 0x426   : > { %19558 = vst [vmem:[#allocation31_spill] sm:$0xff] %v15597_v55  ;;  %v10886_v8 = vpop.f32.mrb[171].mxu0  ;;  %v15602_v32 = vadd.f32 %v4493_v4, %v4365_v1  ;;  %v12489_v4 = vld [vmem:[%s18561_s13 + $0x58] sm:$0xff]   ;;  %v4953_v40 = vsel %vm4902_vm0, %v4950_v13, %v4952_v24 }
 0x427   : > { %v4370_v62 = vadd.f32 %v10884_v52, %v15545_v60  ;;  %v10887_v36 = vadd.f32 %v10886_v8, %v10885_v34  ;;  %11184 = vmatprep.subr.bf16.mxu0 %v12489_v4  ;;  %v4955_v52 = vsel %vm4902_vm0, %v4952_v24, %v4954_v54 }
 0x428   : > { %19559 = vst [vmem:[#allocation32_spill] sm:$0xff] %v15602_v32  ;;  %11185 = vmatpush3.bf16.msra.mxu0 %v12490_v3 }
 0x429   : > { %v15606_v31 = vadd.f32 %v12031_v50, %v4370_v62  ;;  %v4373_v37 = vadd.f32 %v10887_v36, %v15545_v60  ;;  %v4949_v62 = vsel %vm4902_vm0, %v4946_v5, %v4948_v57  ;;  %v4951_v50 = vsel %vm4902_vm0, %v4948_v57, %v4950_v13 }
 0x42a   : > { %v5045_v8 = vpack.c.bf16 %v4951_v50, %v4949_v62 }
 0x42b   : > { %19560 = vst [vmem:[#allocation35_spill] sm:$0xff] %v15606_v31  ;;  %v15617_v35 = vadd.f32 %v12032_v33, %v4373_v37  ;;  %12082 = vmatmul.mubr.bf16.gmra.mrb[252].mxu1 %v5035_v29  ;;  %v4956_v33 = vrot.slane %v15481_v38, 4  ;;  %v5050_v29 = vpack.c.bf16 %v4955_v52, %v4953_v40  ;;  %v12492_v52 = vld [vmem:[%s18561_s13 + $0x20] sm:$0xff]  }
 0x42c   : > { %12085 = vmatprep.mubr.bf16.mxu1 %v5040_v47 }
 0x42d   : > { %19561 = vst [vmem:[#allocation21_spill] sm:$0xff] %v15617_v35  ;;  %v10888_v44 = vpop.f32.mrb[172].mxu0  ;;  %v4957_v5 = vsel %vm4902_vm0, %v4954_v54, %v4956_v33  ;;  %v12491_v54 = vld [vmem:[%s18561_s13 + $0x60] sm:$0xff]  }
 0x42e   : > { %v10889_v34 = vpop.f32.mrb[173].mxu0  ;;  %v5055_v13 = vpack.c.bf16 %v4956_v33, %v4957_v5  ;;  %11186 = vmatprep.subr.bf16.mxu0 %v12491_v54 }
 0x42f   : > { %v10890_v1 = vadd.f32 %v10889_v34, %v10888_v44  ;;  %v10891_v25 = vpop.f32.mrb[174].mxu0  ;;  %11187 = vmatpush3.bf16.msra.mxu0 %v12492_v52 }
 0x430   : > { %v10892_v36 = vpop.f32.mrb[175].mxu0 }
 0x431   : > { %v10893_v37 = vadd.f32 %v10892_v36, %v10891_v25  ;;  %v4378_v47 = vadd.f32 %v10890_v1, %v15545_v60 }
 0x433   : > { %12086 = vmatmul.mubr.bf16.gmra.mrb[0].mxu1 %v5045_v8  ;;  %v4381_v62 = vadd.f32 %v10893_v37, %v15545_v60 }
 0x434   : > { %12089 = vmatprep.mubr.bf16.mxu1 %v5050_v29 }
 0x436   : > { %v12035_v57 = vpop.f32.mrb[164].mxu1 }
 0x437   : > { %v10894_v4 = vpop.f32.mrb[176].mxu0  ;;  %v4506_v24 = vpop.f32.mrb[165].mxu1 }
 0x438   : > { %v15626_v3 = vadd.f32 %v4506_v24, %v4378_v47  ;;  %v10895_v44 = vpop.f32.mrb[177].mxu0  ;;  %v12036_v34 = vpop.f32.mrb[166].mxu1 }
 0x439   : > { %v10896_v50 = vadd.f32 %v10895_v44, %v10894_v4  ;;  %v10897_v35 = vpop.f32.mrb[178].mxu0  ;;  %v4509_v40 = vpop.f32.mrb[167].mxu1 }
 0x43a   : > { %19562 = vst [vmem:[#allocation22_spill] sm:$0xff] %v15626_v3  ;;  %v15635_v1 = vadd.f32 %v4509_v40, %v4381_v62  ;;  %v10898_v25 = vpop.f32.mrb[179].mxu0 }
 0x43b   : > { %12090 = vmatmul.mubr.bf16.gmra.mrb[4].mxu1 %v5055_v13  ;;  %v4386_v8 = vadd.f32 %v10896_v50, %v15545_v60  ;;  %v10899_v36 = vadd.f32 %v10898_v25, %v10897_v35  ;;  %v12493_v13 = vld [vmem:[%s18561_s13 + $0x68] sm:$0xff]  }
 0x43c   : > { %19563 = vst [vmem:[#allocation39_spill] sm:$0xff] %v15635_v1  ;;  %11188 = vmatprep.subr.bf16.mxu0 %v12493_v13  ;;  %v12494_v35 = vld [vmem:[%s18561_s13 + $0x28] sm:$0xff]  }
 0x43d   : > { %v15638_v33 = vadd.f32 %v12035_v57, %v4386_v8  ;;  %v4389_v29 = vadd.f32 %v10899_v36, %v15545_v60  ;;  %11189 = vmatpush3.bf16.msra.mxu0 %v12494_v35 }
 0x43f   : > { %19564 = vst [vmem:[#allocation46_spill] sm:$0xff] %v15638_v33  ;;  %v15641_v37 = vadd.f32 %v12036_v34, %v4389_v29 }
 0x440   : > { %v10900_v5 = vpop.f32.mrb[180].mxu0 }
 0x441   : > { %19565 = vst [vmem:[#allocation34_spill] sm:$0xff] %v15641_v37  ;;  %v10901_v47 = vpop.f32.mrb[181].mxu0 }
 0x442   : > { %v10902_v4 = vadd.f32 %v10901_v47, %v10900_v5  ;;  %v10903_v24 = vpop.f32.mrb[182].mxu0 }
 0x443   : > { %v10904_v44 = vpop.f32.mrb[183].mxu0 }
 0x444   : > { %v10905_v62 = vadd.f32 %v10904_v44, %v10903_v24  ;;  %v4394_v50 = vadd.f32 %v10902_v4, %v15545_v60 }
 0x446   : > { %v4397_v8 = vadd.f32 %v10905_v62, %v15545_v60  ;;  %v12495_v62 = vld [vmem:[%s18561_s13 + $0xc0] sm:$0xff]  }
 0x447   : > { %v12039_v57 = vpop.f32.mrb[168].mxu1  ;;  %11278 = vmatprep.subr.bf16.mxu1 %v12495_v62 }
 0x448   : > { %v10906_v34 = vpop.f32.mrb[184].mxu0  ;;  %v4522_v40 = vpop.f32.mrb[169].mxu1 }
 0x449   : > { %v15650_v54 = vadd.f32 %v4522_v40, %v4394_v50  ;;  %v10907_v52 = vpop.f32.mrb[185].mxu0  ;;  %v12040_v25 = vpop.f32.mrb[170].mxu1 }
 0x44a   : > { %v10908_v36 = vadd.f32 %v10907_v52, %v10906_v34  ;;  %v10909_v29 = vpop.f32.mrb[186].mxu0  ;;  %v4525_v5 = vpop.f32.mrb[171].mxu1 }
 0x44b   : > { %19566 = vst [vmem:[#allocation38_spill] sm:$0xff] %v15650_v54  ;;  %v15653_v47 = vadd.f32 %v4525_v5, %v4397_v8  ;;  %v10910_v24 = vpop.f32.mrb[187].mxu0  ;;  %v12498_v8 = vld [vmem:[%s18561_s13 + $0x30] sm:$0xff]  }
 0x44c   : > { %v4402_v44 = vadd.f32 %v10908_v36, %v15545_v60  ;;  %v10911_v13 = vadd.f32 %v10910_v24, %v10909_v29  ;;  %v12499_v36 = vld [vmem:[%s18561_s13 + $0xc8] sm:$0xff]  }
 0x44d   : > { %19567 = vst [vmem:[#allocation26_spill] sm:$0xff] %v15653_v47 }
 0x44e   : > { %v15656_v37 = vadd.f32 %v12039_v57, %v4402_v44  ;;  %v4405_v4 = vadd.f32 %v10911_v13, %v15545_v60  ;;  %v12496_v57 = vld [vmem:[%s18561_s13 + $0x80] sm:$0xff]  }
 0x44f   : > { %11279 = vmatpush3.bf16.msra.mxu1 %v12496_v57 }
 0x450   : > { %19568 = vst [vmem:[#allocation36_spill] sm:$0xff] %v15656_v37  ;;  %v15659_v35 = vadd.f32 %v12040_v25, %v4405_v4  ;;  %v10912_v50 = vpop.f32.mrb[188].mxu0  ;;  %v12497_v25 = vld [vmem:[%s18561_s13 + $0x70] sm:$0xff]   ;;  %11280 = vmatprep.subr.bf16.mxu1 %v12499_v36 }
 0x451   : > { %v10913_v40 = vpop.f32.mrb[189].mxu0  ;;  %11190 = vmatprep.subr.bf16.mxu0 %v12497_v25  ;;  %v12501_v25 = vld [vmem:[%s18561_s13 + $0xd0] sm:$0xff]  }
 0x452   : > { %19569 = vst [vmem:[#allocation50_spill] sm:$0xff] %v15659_v35  ;;  %v10914_v54 = vadd.f32 %v10913_v40, %v10912_v50  ;;  %v10915_v33 = vpop.f32.mrb[190].mxu0  ;;  %11191 = vmatpush3.bf16.msra.mxu0 %v12498_v8 }
 0x453   : > { %v10916_v34 = vpop.f32.mrb[191].mxu0 }
 0x454   : > { %v10917_v52 = vadd.f32 %v10916_v34, %v10915_v33  ;;  %v12500_v33 = vld [vmem:[%s18561_s13 + $0x88] sm:$0xff]   ;;  %v4410_v5 = vadd.f32 %v10914_v54, %v15545_v60 }
 0x455   : > { %11281 = vmatpush3.bf16.msra.mxu1 %v12500_v33 }
 0x456   : > { %v4413_v40 = vadd.f32 %v10917_v52, %v15545_v60  ;;  %11282 = vmatprep.subr.bf16.mxu1 %v12501_v25  ;;  %v12503_v52 = vld [vmem:[%s18561_s13 + $0xd8] sm:$0xff]  }
 0x457   : > { %v12043_v29 = vpop.f32.mrb[172].mxu1 }
 0x458   : > { %v10918_v24 = vpop.f32.mrb[192].mxu0  ;;  %v4538_v44 = vpop.f32.mrb[173].mxu1 }
 0x459   : > { %v15680_v13 = vadd.f32 %v4538_v44, %v4410_v5  ;;  %v10919_v4 = vpop.f32.mrb[193].mxu0  ;;  %v12044_v50 = vpop.f32.mrb[174].mxu1  ;;  %v12502_v5 = vld [vmem:[%s18561_s13 + $0x90] sm:$0xff]   ;;  %v12504_v44 = vld [vmem:[%s18561_s13 + $0x98] sm:$0xff]  }
 0x45a   : > { %v10920_v62 = vadd.f32 %v10919_v4, %v10918_v24  ;;  %v10921_v34 = vpop.f32.mrb[194].mxu0  ;;  %v4541_v57 = vpop.f32.mrb[175].mxu1  ;;  %11283 = vmatpush3.bf16.msra.mxu1 %v12502_v5 }
 0x45b   : > { %19570 = vst [vmem:[#allocation53_spill] sm:$0xff] %v15680_v13  ;;  %v15686_v35 = vadd.f32 %v4541_v57, %v4413_v40  ;;  %v10922_v54 = vpop.f32.mrb[195].mxu0  ;;  %11284 = vmatprep.subr.bf16.mxu1 %v12503_v52 }
 0x45c   : > { %v4418_v8 = vadd.f32 %v10920_v62, %v15545_v60  ;;  %v10923_v36 = vadd.f32 %v10922_v54, %v10921_v34 }
 0x45d   : > { %19571 = vst [vmem:[#allocation40_spill] sm:$0xff] %v15686_v35 }
 0x45e   : > { %v15695_v33 = vadd.f32 %v12043_v29, %v4418_v8  ;;  %v4421_v24 = vadd.f32 %v10923_v36, %v15545_v60  ;;  %11285 = vmatpush3.bf16.msra.mxu1 %v12504_v44  ;;  %v12507_v44 = vld [vmem:[%s18561_s13 + $0xa0] sm:$0xff]  }
 0x460   : > { %19572 = vst [vmem:[#allocation47_spill] sm:$0xff] %v15695_v33  ;;  %v15701_v4 = vadd.f32 %v12044_v50, %v4421_v24  ;;  %v10924_v40 = vpop.f32.mrb[196].mxu0  ;;  %v12505_v50 = vld [vmem:[%s18561_s13 + $0xe0] sm:$0xff]  }
 0x461   : > { %v10925_v62 = vpop.f32.mrb[197].mxu0  ;;  %11286 = vmatprep.subr.bf16.mxu1 %v12505_v50 }
 0x462   : > { %19573 = vst [vmem:[#allocation41_spill] sm:$0xff] %v15701_v4  ;;  %v10926_v34 = vadd.f32 %v10925_v62, %v10924_v40  ;;  %v10927_v57 = vpop.f32.mrb[198].mxu0  ;;  %11287 = vmatpush3.bf16.msra.mxu1 %v12507_v44 }
 0x463   : > { %v10928_v25 = vpop.f32.mrb[199].mxu0 }
 0x464   : > { %v10929_v54 = vadd.f32 %v10928_v25, %v10927_v57  ;;  %v4426_v29 = vadd.f32 %v10926_v34, %v15545_v60 }
 0x466   : > { %v12047_v35 = vpop.f32.mrb[176].mxu1  ;;  %v4429_v13 = vadd.f32 %v10929_v54, %v15545_v60 }
 0x467   : > { %v4554_v8 = vpop.f32.mrb[177].mxu1 }
 0x468   : > { %v10930_v36 = vpop.f32.mrb[200].mxu0  ;;  %v15704_v5 = vadd.f32 %v4554_v8, %v4426_v29  ;;  %v12048_v33 = vpop.f32.mrb[178].mxu1  ;;  %v12509_v29 = vld [vmem:[%s18561_s13 + $0xe8] sm:$0xff]   ;;  %v12506_v8 = vld [vmem:[%s18561_s13 + $0x78] sm:$0xff]  }
 0x469   : > { %v10931_v52 = vpop.f32.mrb[201].mxu0  ;;  %v4557_v24 = vpop.f32.mrb[179].mxu1  ;;  %11288 = vmatprep.subr.bf16.mxu1 %v12509_v29  ;;  %11192 = vmatprep.subr.bf16.mxu0 %v12506_v8 }
 0x46a   : > { %19574 = vst [vmem:[#allocation42_spill] sm:$0xff] %v15704_v5  ;;  %v10932_v40 = vadd.f32 %v10931_v52, %v10930_v36  ;;  %v10933_v62 = vpop.f32.mrb[202].mxu0  ;;  %v15713_v34 = vadd.f32 %v4557_v24, %v4429_v13  ;;  %v12508_v36 = vld [vmem:[%s18561_s13 + $0x38] sm:$0xff]   ;;  %v12510_v13 = vld [vmem:[%s18561_s13 + $0xa8] sm:$0xff]   ;;  %v15736_v5 = vld [vmem:[%s18560_s12] ss:$0 sm:$0xff] }
 0x46b   : > { %v10934_v57 = vpop.f32.mrb[203].mxu0  ;;  %11289 = vmatpush3.bf16.msra.mxu1 %v12510_v13  ;;  %11193 = vmatpush3.bf16.msra.mxu0 %v12508_v36 }
 0x46c   : > { %19575 = vst [vmem:[#allocation54_spill] sm:$0xff] %v15713_v34  ;;  %v4434_v25 = vadd.f32 %v10932_v40, %v15545_v60  ;;  %v10935_v54 = vadd.f32 %v10934_v57, %v10933_v62 }
 0x46e   : > { %v15728_v50 = vadd.f32 %v12047_v35, %v4434_v25  ;;  %v4437_v52 = vadd.f32 %v10935_v54, %v15545_v60  ;;  %v10972_v24 = vpop.f32.mrb[180].mxu1  ;;  %v12511_v60 = vld [vmem:[%s18561_s13 + $0xf0] sm:$0xff]  }
 0x46f   : > { %v10973_v44 = vpop.f32.mrb[181].mxu1  ;;  %11290 = vmatprep.subr.bf16.mxu1 %v12511_v60 }
 0x470   : > { %19576 = vst [vmem:[#allocation61_spill] sm:$0xff] %v15728_v50  ;;  %v15731_v40 = vadd.f32 %v12048_v33, %v4437_v52  ;;  %v10974_v62 = vadd.f32 %v10973_v44, %v10972_v24  ;;  %v10975_v57 = vpop.f32.mrb[182].mxu1  ;;  %v11072_v34 = vpop.f32.mrb[204].mxu0  ;;  %v12512_v33 = vld [vmem:[%s18561_s13 + $0xb0] sm:$0xff]   ;;  %v12513_v44 = vld [vmem:[%s18561_s13 + $0xf8] sm:$0xff]  }
 0x471   : > { %v10976_v35 = vpop.f32.mrb[183].mxu1  ;;  %v11073_v25 = vpop.f32.mrb[205].mxu0  ;;  %11291 = vmatpush3.bf16.msra.mxu1 %v12512_v33 }
 0x472   : > { %19577 = vst [vmem:[#allocation51_spill] sm:$0xff] %v15731_v40  ;;  %v10977_v54 = vadd.f32 %v10976_v35, %v10975_v57  ;;  %v11074_v29 = vadd.f32 %v11073_v25, %v11072_v34  ;;  %v11075_v8 = vpop.f32.mrb[206].mxu0  ;;  %v5337_v52 = vadd.f32 %v10974_v62, %v15736_v5  ;;  %v12514_v57 = vld [vmem:[%s18561_s13 + $0xb8] sm:$0xff]   ;;  %11292 = vmatprep.subr.bf16.mxu1 %v12513_v44 }
 0x473   : > { %v11076_v13 = vpop.f32.mrb[207].mxu0 }
 0x474   : > { %v11077_v24 = vadd.f32 %v11076_v13, %v11075_v8  ;;  %v5340_v36 = vadd.f32 %v10977_v54, %v15736_v5  ;;  %v15749_v40 = vadd.f32 %v11074_v29, %v5337_v52 }
 0x475   : > { %11293 = vmatpush3.bf16.msra.mxu1 %v12514_v57 }
 0x476   : > { %v10978_v34 = vpop.f32.mrb[184].mxu1  ;;  %v15754_v35 = vadd.f32 %v11077_v24, %v5340_v36  ;;  %v15763_v36 = vld [vmem:[%s18561_s13 + $0x100] sm:$0xff]  }
 0x477   : > { %v10979_v60 = vpop.f32.mrb[185].mxu1  ;;  %12093 = vmatprep.subr.bf16.mxu0 %v15763_v36 }
 0x478   : > { %v10980_v62 = vadd.f32 %v10979_v60, %v10978_v34  ;;  %v10981_v25 = vpop.f32.mrb[186].mxu1  ;;  %v11078_v33 = vpop.f32.mrb[208].mxu0 }
 0x479   : > { %v10982_v54 = vpop.f32.mrb[187].mxu1  ;;  %v11079_v8 = vpop.f32.mrb[209].mxu0 }
 0x47a   : > { %v10983_v13 = vadd.f32 %v10982_v54, %v10981_v25  ;;  %v11080_v50 = vadd.f32 %v11079_v8, %v11078_v33  ;;  %v11081_v4 = vpop.f32.mrb[210].mxu0  ;;  %v5345_v29 = vadd.f32 %v10980_v62, %v15736_v5 }
 0x47b   : > { %v11082_v52 = vpop.f32.mrb[211].mxu0 }
 0x47c   : > { %v11083_v37 = vadd.f32 %v11082_v52, %v11081_v4  ;;  %v15757_v47 = vadd.f32 %v11080_v50, %v5345_v29  ;;  %v5348_v24 = vadd.f32 %v10983_v13, %v15736_v5 }
 0x47e   : > { %v10984_v44 = vpop.f32.mrb[188].mxu1  ;;  %v15765_v57 = vadd.f32 %v11083_v37, %v5348_v24 }
 0x47f   : > { %v10985_v34 = vpop.f32.mrb[189].mxu1 }
 0x480   : > { %v10986_v60 = vadd.f32 %v10985_v34, %v10984_v44  ;;  %v10987_v25 = vpop.f32.mrb[190].mxu1  ;;  %v11084_v62 = vpop.f32.mrb[212].mxu0 }
 0x481   : > { %v10988_v33 = vpop.f32.mrb[191].mxu1  ;;  %v11085_v4 = vpop.f32.mrb[213].mxu0 }
 0x482   : > { %v10989_v50 = vadd.f32 %v10988_v33, %v10987_v25  ;;  %v11086_v54 = vadd.f32 %v11085_v4, %v11084_v62  ;;  %v11087_v8 = vpop.f32.mrb[214].mxu0  ;;  %v5353_v13 = vadd.f32 %v10986_v60, %v15736_v5 }
 0x483   : > { %v11088_v29 = vpop.f32.mrb[215].mxu0 }
 0x484   : > { %v11089_v52 = vadd.f32 %v11088_v29, %v11087_v8  ;;  %v15769_v1 = vadd.f32 %v11086_v54, %v5353_v13  ;;  %v5356_v37 = vadd.f32 %v10989_v50, %v15736_v5 }
 0x486   : > { %v10990_v24 = vpop.f32.mrb[192].mxu1  ;;  %v15772_v3 = vadd.f32 %v11089_v52, %v5356_v37 }
 0x487   : > { %v10991_v31 = vpop.f32.mrb[193].mxu1 }
 0x488   : > { %v10992_v44 = vadd.f32 %v10991_v31, %v10990_v24  ;;  %v10993_v34 = vpop.f32.mrb[194].mxu1  ;;  %v11090_v32 = vpop.f32.mrb[216].mxu0 }
 0x489   : > { %v10994_v55 = vpop.f32.mrb[195].mxu1  ;;  %v11091_v63 = vpop.f32.mrb[217].mxu0 }
 0x48a   : > { %v10995_v25 = vadd.f32 %v10994_v55, %v10993_v34  ;;  %v11092_v62 = vadd.f32 %v11091_v63, %v11090_v32  ;;  %v11093_v33 = vpop.f32.mrb[218].mxu0  ;;  %v5361_v60 = vadd.f32 %v10992_v44, %v15736_v5 }
 0x48b   : > { %v11094_v4 = vpop.f32.mrb[219].mxu0 }
 0x48c   : > { %v11095_v8 = vadd.f32 %v11094_v4, %v11093_v33  ;;  %v15775_v54 = vadd.f32 %v11092_v62, %v5361_v60  ;;  %v5364_v50 = vadd.f32 %v10995_v25, %v15736_v5 }
 0x48e   : > { %v10996_v13 = vpop.f32.mrb[196].mxu1  ;;  %v15778_v29 = vadd.f32 %v11095_v8, %v5364_v50 }
 0x48f   : > { %v10997_v52 = vpop.f32.mrb[197].mxu1 }
 0x490   : > { %v10998_v31 = vadd.f32 %v10997_v52, %v10996_v13  ;;  %v10999_v37 = vpop.f32.mrb[198].mxu1  ;;  %v11096_v24 = vpop.f32.mrb[220].mxu0 }
 0x491   : > { %v11000_v38 = vpop.f32.mrb[199].mxu1  ;;  %v11097_v42 = vpop.f32.mrb[221].mxu0 }
 0x492   : > { %v11001_v55 = vadd.f32 %v11000_v38, %v10999_v37  ;;  %v11098_v63 = vadd.f32 %v11097_v42, %v11096_v24  ;;  %v11099_v32 = vpop.f32.mrb[222].mxu0  ;;  %v5369_v44 = vadd.f32 %v10998_v31, %v15736_v5 }
 0x493   : > { %v11100_v34 = vpop.f32.mrb[223].mxu0 }
 0x494   : > { %v11101_v33 = vadd.f32 %v11100_v34, %v11099_v32  ;;  %v15781_v62 = vadd.f32 %v11098_v63, %v5369_v44  ;;  %v5372_v25 = vadd.f32 %v11001_v55, %v15736_v5 }
 0x496   : > { %v11002_v60 = vpop.f32.mrb[200].mxu1  ;;  %v15784_v4 = vadd.f32 %v11101_v33, %v5372_v25 }
 0x497   : > { %v11003_v8 = vpop.f32.mrb[201].mxu1 }
 0x498   : > { %v11004_v50 = vadd.f32 %v11003_v8, %v11002_v60  ;;  %v11005_v13 = vpop.f32.mrb[202].mxu1  ;;  %v11102_v52 = vpop.f32.mrb[224].mxu0 }
 0x499   : > { %v11006_v30 = vpop.f32.mrb[203].mxu1  ;;  %v11103_v9 = vpop.f32.mrb[225].mxu0 }
 0x49a   : > { %v11007_v38 = vadd.f32 %v11006_v30, %v11005_v13  ;;  %v11104_v42 = vadd.f32 %v11103_v9, %v11102_v52  ;;  %v11105_v37 = vpop.f32.mrb[226].mxu0  ;;  %v5377_v31 = vadd.f32 %v11004_v50, %v15736_v5 }
 0x49b   : > { %v11106_v24 = vpop.f32.mrb[227].mxu0 }
 0x49c   : > { %v11107_v32 = vadd.f32 %v11106_v24, %v11105_v37  ;;  %v15787_v63 = vadd.f32 %v11104_v42, %v5377_v31  ;;  %v5380_v55 = vadd.f32 %v11007_v38, %v15736_v5 }
 0x49e   : > { %v11008_v44 = vpop.f32.mrb[204].mxu1  ;;  %v15790_v34 = vadd.f32 %v11107_v32, %v5380_v55 }
 0x49f   : > { %v11009_v33 = vpop.f32.mrb[205].mxu1 }
 0x4a0   : > { %v11010_v25 = vadd.f32 %v11009_v33, %v11008_v44  ;;  %v11011_v60 = vpop.f32.mrb[206].mxu1  ;;  %v11108_v8 = vpop.f32.mrb[228].mxu0 }
 0x4a1   : > { %v11012_v49 = vpop.f32.mrb[207].mxu1  ;;  %v11109_v27 = vpop.f32.mrb[229].mxu0 }
 0x4a2   : > { %v11013_v30 = vadd.f32 %v11012_v49, %v11011_v60  ;;  %v11110_v9 = vadd.f32 %v11109_v27, %v11108_v8  ;;  %v11111_v13 = vpop.f32.mrb[230].mxu0  ;;  %v5385_v50 = vadd.f32 %v11010_v25, %v15736_v5 }
 0x4a3   : > { %v11112_v52 = vpop.f32.mrb[231].mxu0 }
 0x4a4   : > { %v11113_v37 = vadd.f32 %v11112_v52, %v11111_v13  ;;  %v15793_v42 = vadd.f32 %v11110_v9, %v5385_v50  ;;  %v5388_v38 = vadd.f32 %v11013_v30, %v15736_v5 }
 0x4a6   : > { %v11014_v31 = vpop.f32.mrb[208].mxu1  ;;  %v15796_v24 = vadd.f32 %v11113_v37, %v5388_v38 }
 0x4a7   : > { %v11015_v32 = vpop.f32.mrb[209].mxu1 }
 0x4a8   : > { %v11016_v55 = vadd.f32 %v11015_v32, %v11014_v31  ;;  %v11017_v44 = vpop.f32.mrb[210].mxu1  ;;  %v11114_v33 = vpop.f32.mrb[232].mxu0 }
 0x4a9   : > { %v11018_v19 = vpop.f32.mrb[211].mxu1  ;;  %v11115_v0 = vpop.f32.mrb[233].mxu0 }
 0x4aa   : > { %v11019_v49 = vadd.f32 %v11018_v19, %v11017_v44  ;;  %v11116_v27 = vadd.f32 %v11115_v0, %v11114_v33  ;;  %v11117_v60 = vpop.f32.mrb[234].mxu0  ;;  %v5393_v25 = vadd.f32 %v11016_v55, %v15736_v5 }
 0x4ab   : > { %v11118_v8 = vpop.f32.mrb[235].mxu0 }
 0x4ac   : > { %v11119_v13 = vadd.f32 %v11118_v8, %v11117_v60  ;;  %v15799_v9 = vadd.f32 %v11116_v27, %v5393_v25  ;;  %v5396_v30 = vadd.f32 %v11019_v49, %v15736_v5 }
 0x4ae   : > { %v11020_v50 = vpop.f32.mrb[212].mxu1  ;;  %v15802_v52 = vadd.f32 %v11119_v13, %v5396_v30 }
 0x4af   : > { %v11021_v37 = vpop.f32.mrb[213].mxu1 }
 0x4b0   : > { %v11022_v38 = vadd.f32 %v11021_v37, %v11020_v50  ;;  %v11023_v31 = vpop.f32.mrb[214].mxu1  ;;  %v11120_v32 = vpop.f32.mrb[236].mxu0 }
 0x4b1   : > { %v11024_v59 = vpop.f32.mrb[215].mxu1  ;;  %v11121_v22 = vpop.f32.mrb[237].mxu0 }
 0x4b2   : > { %v11025_v19 = vadd.f32 %v11024_v59, %v11023_v31  ;;  %v11122_v0 = vadd.f32 %v11121_v22, %v11120_v32  ;;  %v11123_v44 = vpop.f32.mrb[238].mxu0  ;;  %v5401_v55 = vadd.f32 %v11022_v38, %v15736_v5 }
 0x4b3   : > { %v11124_v33 = vpop.f32.mrb[239].mxu0 }
 0x4b4   : > { %v11125_v60 = vadd.f32 %v11124_v33, %v11123_v44  ;;  %v15805_v27 = vadd.f32 %v11122_v0, %v5401_v55  ;;  %v5404_v49 = vadd.f32 %v11025_v19, %v15736_v5 }
 0x4b6   : > { %v11026_v25 = vpop.f32.mrb[216].mxu1  ;;  %v15808_v8 = vadd.f32 %v11125_v60, %v5404_v49 }
 0x4b7   : > { %v11027_v13 = vpop.f32.mrb[217].mxu1 }
 0x4b8   : > { %v11028_v30 = vadd.f32 %v11027_v13, %v11026_v25  ;;  %v11029_v50 = vpop.f32.mrb[218].mxu1  ;;  %v11126_v37 = vpop.f32.mrb[240].mxu0 }
 0x4b9   : > { %v11030_v45 = vpop.f32.mrb[219].mxu1  ;;  %v11127_v48 = vpop.f32.mrb[241].mxu0 }
 0x4ba   : > { %v5409_v59 = vadd.f32 %v11028_v30, %v15736_v5  ;;  %v11031_v22 = vadd.f32 %v11030_v45, %v11029_v50  ;;  %v11128_v31 = vadd.f32 %v11127_v48, %v11126_v37  ;;  %v11129_v38 = vpop.f32.mrb[242].mxu0 }
 0x4bb   : > { %v11130_v32 = vpop.f32.mrb[243].mxu0 }
 0x4bc   : > { %v5412_v0 = vadd.f32 %v11031_v22, %v15736_v5  ;;  %v11131_v44 = vadd.f32 %v11130_v32, %v11129_v38  ;;  %v15812_v55 = vadd.f32 %v11128_v31, %v5409_v59 }
 0x4be   : > { %v11032_v19 = vpop.f32.mrb[220].mxu1  ;;  %v15814_v33 = vadd.f32 %v11131_v44, %v5412_v0 }
 0x4bf   : > { %v11033_v60 = vpop.f32.mrb[221].mxu1 }
 0x4c0   : > { %v11034_v49 = vadd.f32 %v11033_v60, %v11032_v19  ;;  %v11035_v25 = vpop.f32.mrb[222].mxu1  ;;  %v11132_v13 = vpop.f32.mrb[244].mxu0 }
 0x4c1   : > { %v11036_v43 = vpop.f32.mrb[223].mxu1  ;;  %v11133_v53 = vpop.f32.mrb[245].mxu0 }
 0x4c2   : > { %v5417_v30 = vadd.f32 %v11034_v49, %v15736_v5  ;;  %v11037_v45 = vadd.f32 %v11036_v43, %v11035_v25  ;;  %v11134_v48 = vadd.f32 %v11133_v53, %v11132_v13  ;;  %v11135_v50 = vpop.f32.mrb[246].mxu0 }
 0x4c3   : > { %v11136_v37 = vpop.f32.mrb[247].mxu0 }
 0x4c4   : > { %v5420_v22 = vadd.f32 %v11037_v45, %v15736_v5  ;;  %v11137_v38 = vadd.f32 %v11136_v37, %v11135_v50  ;;  %v15818_v59 = vadd.f32 %v11134_v48, %v5417_v30 }
 0x4c6   : > { %19578 = vst [vmem:[#allocation55_spill] sm:$0xff] %v15818_v59  ;;  %v11038_v31 = vpop.f32.mrb[224].mxu1  ;;  %v15820_v32 = vadd.f32 %v11137_v38, %v5420_v22 }
 0x4c7   : > { %v11039_v0 = vpop.f32.mrb[225].mxu1 }
 0x4c8   : > { %19579 = vst [vmem:[#allocation45_spill] sm:$0xff] %v15820_v32  ;;  %v11040_v44 = vadd.f32 %v11039_v0, %v11038_v31  ;;  %v11041_v19 = vpop.f32.mrb[226].mxu1  ;;  %v11138_v60 = vpop.f32.mrb[248].mxu0 }
 0x4c9   : > { %v11042_v10 = vpop.f32.mrb[227].mxu1  ;;  %v11139_v61 = vpop.f32.mrb[249].mxu0 }
 0x4ca   : > { %v5425_v49 = vadd.f32 %v11040_v44, %v15736_v5  ;;  %v11043_v43 = vadd.f32 %v11042_v10, %v11041_v19  ;;  %v11140_v53 = vadd.f32 %v11139_v61, %v11138_v60  ;;  %v11141_v25 = vpop.f32.mrb[250].mxu0  ;;  %v15831_v61 = vsel %vm19418_vm15, 1.0, %v19069_v21  ;;  %vm19584_vm15 = vmmov %vm19551_vm11 }
 0x4cb   : > { %v11142_v13 = vpop.f32.mrb[251].mxu0  ;;  %19581 = vst [vmem:[#allocation63_spill] sm:$0xff] %v15831_v61  ;;  %vm19605_vm11 = vmmov %vm19599_vm3 }
 0x4cc   : > { %v5428_v45 = vadd.f32 %v11043_v43, %v15736_v5  ;;  %v11143_v50 = vadd.f32 %v11142_v13, %v11141_v25  ;;  %v15824_v30 = vadd.f32 %v11140_v53, %v5425_v49  ;;  %v5798_v43 = vrot.slane %v13974_v16, 2 }
 0x4cd   : > { %v5800_v53 = vrot.slane %v13980_v26, 2  ;;  %v5796_v25 = vrot.slane %v13969_v7, 2 }
 0x4ce   : > { %v11044_v48 = vpop.f32.mrb[228].mxu1  ;;  %v15826_v37 = vadd.f32 %v11143_v50, %v5428_v45  ;;  %v5795_v50 = vrot.slane %v15831_v61, 2 }
 0x4cf   : > { %v11045_v22 = vpop.f32.mrb[229].mxu1  ;;  %v15845_v26 = vsel %vm19584_vm15, %v5798_v43, %v5800_v53  ;;  %vm19611_vm15 = vmmov %vm19599_vm3 }
 0x4d0   : > { %19580 = vst [vmem:[#allocation48_spill] sm:$0xff] %v15826_v37  ;;  %v11046_v38 = vadd.f32 %v11045_v22, %v11044_v48  ;;  %v11047_v31 = vpop.f32.mrb[230].mxu1  ;;  %v11144_v0 = vpop.f32.mrb[252].mxu0  ;;  %19585 = vst [vmem:[#allocation67_spill] sm:$0xff] %v15845_v26  ;;  %v15848_v16 = vsel %vm19586_vm6, %v5795_v50, %v5796_v25  ;;  %v5816_v50 = vrot.slane %v14096_v56, 2  ;;  %v5828_v56 = vrot.slane %v19615_v51, 2 }
 0x4d1   : > { %v11048_v18 = vpop.f32.mrb[231].mxu1  ;;  %v11145_v58 = vpop.f32.mrb[253].mxu0  ;;  %vm19616_vm6 = vmmov %vm19599_vm3  ;;  %v19623_v51 = vld [vmem:[#allocation147_spill] sm:$0xff] }
 0x4d2   : > { %v5433_v10 = vadd.f32 %v11046_v38, %v15736_v5  ;;  %v11049_v44 = vadd.f32 %v11048_v18, %v11047_v31  ;;  %v11146_v19 = vadd.f32 %v11145_v58, %v11144_v0  ;;  %v11147_v60 = vpop.f32.mrb[254].mxu0  ;;  %v5802_v58 = vrot.slane %v13990_v23, 2 }
 0x4d3   : > { %v11148_v49 = vpop.f32.mrb[255].mxu0  ;;  %v5836_v37 = vrot.slane %v19623_v51, 2 }
 0x4d4   : > { %v5436_v13 = vadd.f32 %v11049_v44, %v15736_v5  ;;  %v11149_v45 = vadd.f32 %v11148_v49, %v11147_v60  ;;  %v15839_v17 = vadd.f32 %v11146_v19, %v5433_v10  ;;  %v5806_v44 = vrot.slane %v19311_v15, 2 }
 0x4d5   : > { %v5808_v19 = vrot.slane %v19315_v28, 2  ;;  %v5804_v49 = vrot.slane %v13996_v46, 2  ;;  %v15858_v15 = vsel %vm19587_vm5, %v5800_v53, %v5802_v58  ;;  %v5818_v28 = vrot.slane %v14115_v20, 2  ;;  %v19614_v20 = vld [vmem:[#allocation145_spill] sm:$0xff]  ;;  %vm19621_vm5 = vmmov %vm19599_vm3 }
 0x4d6   : > { %19582 = vst [vmem:[#allocation69_spill] sm:$0xff] %v15839_v17  ;;  %v11050_v48 = vpop.f32.mrb[232].mxu1  ;;  %v15841_v22 = vadd.f32 %v11149_v45, %v5436_v13  ;;  %v5810_v13 = vrot.slane %v19318_v39, 2  ;;  %v5814_v45 = vrot.slane %v19326_v14, 2  ;;  %19588 = vst [vmem:[#allocation57_spill] sm:$0xff] %v15858_v15  ;;  %v5822_v46 = vrot.slane %v14171_v12, 2 }
 0x4d7   : > { %v11051_v18 = vpop.f32.mrb[233].mxu1  ;;  %v15874_v53 = vsel %vm19595_vm8, %v5802_v58, %v5804_v49  ;;  %v19619_v17 = vld [vmem:[#allocation148_spill] sm:$0xff]  ;;  %vm19628_vm8 = vmmov %vm19599_vm3 }
 0x4d8   : > { %19583 = vst [vmem:[#allocation56_spill] sm:$0xff] %v15841_v22  ;;  %v11052_v38 = vadd.f32 %v11051_v18, %v11050_v48  ;;  %v11053_v31 = vpop.f32.mrb[234].mxu1  ;;  %v11150_v0 = vpop.f32.mrb[0].mxu0  ;;  %19596 = vst [vmem:[#allocation68_spill] sm:$0xff] %v15874_v53  ;;  %v15890_v58 = vsel %vm19605_vm11, %v5810_v13, %v5812_v6 }
 0x4d9   : > { %v11054_v60 = vpop.f32.mrb[235].mxu1  ;;  %v11151_v10 = vpop.f32.mrb[1].mxu0  ;;  %19606 = vst [vmem:[#allocation88_spill] sm:$0xff] %v15890_v58  ;;  %vm19638_vm11 = vmmov %vm19599_vm3 }
 0x4da   : > { %v5441_v48 = vadd.f32 %v11052_v38, %v15736_v5  ;;  %v11055_v18 = vadd.f32 %v11054_v60, %v11053_v31  ;;  %v11152_v23 = vadd.f32 %v11151_v10, %v11150_v0  ;;  %v11153_v7 = vpop.f32.mrb[2].mxu0  ;;  %v5824_v38 = vrot.slane %v19589_v2, 2 }
 0x4db   : > { %v11154_v61 = vpop.f32.mrb[3].mxu0  ;;  %v15868_v0 = vsel %vm19591_vm13, %v5796_v25, %v5798_v43  ;;  %v15871_v60 = vsel %vm19593_vm10, %v5806_v44, %v5808_v19  ;;  %v15877_v10 = vsel %vm19597_vm12, %v5804_v49, %v5806_v44  ;;  %v15893_v44 = vsel %vm19607_vm4, %v5816_v50, %v5818_v28  ;;  %vm19624_vm13 = vmmov %vm19599_vm3 }
 0x4dc   : > { %v5444_v39 = vadd.f32 %v11055_v18, %v15736_v5  ;;  %v11155_v14 = vadd.f32 %v11154_v61, %v11153_v7  ;;  %v15865_v31 = vadd.f32 %v11152_v23, %v5441_v48  ;;  %19592 = vst [vmem:[#allocation70_spill] sm:$0xff] %v15868_v0  ;;  %19594 = vst [vmem:[#allocation77_spill] sm:$0xff] %v15871_v60  ;;  %v19603_v23 = vld [vmem:[#allocation139_spill] sm:$0xff] }
 0x4dd   : > { %19598 = vst [vmem:[#allocation74_spill] sm:$0xff] %v15877_v10  ;;  %v15880_v5 = vsel %vm19599_vm3, %v5808_v19, %v5810_v13  ;;  %v15883_v7 = vsel %vm19601_vm7, %v5814_v45, %v5816_v50  ;;  %v5820_v61 = vrot.slane %v19603_v23, 2  ;;  %19608 = vst [vmem:[#allocation76_spill] sm:$0xff] %v15893_v44  ;;  %v15896_v49 = vsel %vm19609_vm9, %v5812_v6, %v5814_v45 }
 0x4de   : > { %19590 = vst [vmem:[#allocation58_spill] sm:$0xff] %v15865_v31  ;;  %v12067_v12 = vpop.f32.mrb[236].mxu1  ;;  %19600 = vst [vmem:[#allocation62_spill] sm:$0xff] %v15880_v5  ;;  %v15886_v43 = vadd.f32 %v11155_v14, %v5444_v39  ;;  %v15900_v2 = vsel %vm19611_vm15, %v5822_v46, %v5824_v38  ;;  %v19613_v39 = vld [vmem:[#allocation142_spill] sm:$0xff]  ;;  %v5832_v50 = vrot.slane %v19614_v20, 2  ;;  %v19620_v31 = vld [vmem:[#allocation149_spill] sm:$0xff] }
 0x4df   : > { %19602 = vst [vmem:[#allocation64_spill] sm:$0xff] %v15883_v7  ;;  %v5635_v25 = vadd.f32 %v12067_v12, %v15757_v47  ;;  %v5626_v48 = vpop.f32.mrb[237].mxu1  ;;  %19610 = vst [vmem:[#allocation85_spill] sm:$0xff] %v15896_v49  ;;  %v5826_v14 = vrot.slane %v19613_v39, 2  ;;  %v5830_v12 = vrot.slane %v14251_v11, 2  ;;  %v5838_v11 = vrot.slane %v19619_v17, 2 }
 0x4e0   : > { %19604 = vst [vmem:[#allocation78_spill] sm:$0xff] %v15886_v43  ;;  %v5627_v19 = vadd.f32 %v5626_v48, %v15749_v40  ;;  %v12068_v18 = vpop.f32.mrb[238].mxu1  ;;  %19612 = vst [vmem:[#allocation71_spill] sm:$0xff] %v15900_v2  ;;  %v15909_v40 = vsel %vm19616_vm6, %v5818_v28, %v5820_v61  ;;  %v19618_v48 = vld [vmem:[#allocation146_spill] sm:$0xff]  ;;  %v18895_v32 = vrot.slane %v19620_v31, 2  ;;  %v15915_v20 = vsel %vm19621_vm5, %v5820_v61, %v5822_v46 }
 0x4e1   : > { %v5739_v47 = vmul.f32 0.1, %v5635_v25  ;;  %v5638_v13 = vadd.f32 %v12068_v18, %v15765_v57  ;;  %v5629_v23 = vpop.f32.mrb[239].mxu1  ;;  %19617 = vst [vmem:[#allocation72_spill] sm:$0xff] %v15909_v40  ;;  %v5834_v22 = vrot.slane %v19618_v48, 2  ;;  %19622 = vst [vmem:[#allocation89_spill] sm:$0xff] %v15915_v20  ;;  %v15934_v61 = vsel %vm19599_vm3, %v5828_v56, %v5830_v12 }
 0x4e2   : > { %v5737_v6 = vmul.f32 0.1, %v5627_v19  ;;  %v5630_v45 = vadd.f32 %v5629_v23, %v15754_v35  ;;  %v15919_v35 = vsel %vm19624_vm13, %v5824_v38, %v5826_v14  ;;  %vm19626_vm10 = vmmov %vm19599_vm3  ;;  %v15925_v23 = vsel %vm19628_vm8, %v5826_v14, %v5828_v56  ;;  %19633 = vst [vmem:[#allocation98_spill] sm:$0xff] %v15934_v61 }
 0x4e3   : > { %v5767_v43 = vmax.f32 %v5635_v25, %v5739_v47  ;;  %v5740_v39 = vmul.f32 0.1, %v5638_v13  ;;  %19625 = vst [vmem:[#allocation97_spill] sm:$0xff] %v15919_v35  ;;  %v15922_v28 = vsel %vm19626_vm10, %v5830_v12, %v5832_v50  ;;  %19629 = vst [vmem:[#allocation95_spill] sm:$0xff] %v15925_v23  ;;  %vm19659_vm8 = vcmask 1044480  }
 0x4e4   : > { %v5765_v57 = vmax.f32 %v5627_v19, %v5737_v6  ;;  %v5738_v18 = vmul.f32 0.1, %v5630_v45  ;;  %19627 = vst [vmem:[#allocation86_spill] sm:$0xff] %v15922_v28  ;;  %vm19631_vm12 = vmmov %vm19599_vm3  ;;  %v19640_v6 = vld [vmem:[#allocation150_spill] sm:$0xff] }
 0x4e5   : > { %v5768_v59 = vmax.f32 %v5638_v13, %v5740_v39  ;;  %v15928_v25 = vmul.f32 %v15845_v26, %v5767_v43  ;;  %v15931_v46 = vsel %vm19631_vm12, %v5832_v50, %v5834_v22  ;;  %vm19635_vm7 = vmmov %vm19599_vm3 }
 0x4e6   : > { %v5766_v19 = vmax.f32 %v5630_v45, %v5738_v18  ;;  %v12071_v47 = vpop.f32.mrb[240].mxu1  ;;  %19632 = vst [vmem:[#allocation80_spill] sm:$0xff] %v15931_v46  ;;  %v15937_v38 = vmul.f32 %v15848_v16, %v5765_v57  ;;  %v15946_v43 = vsel %vm19635_vm7, %v5838_v11, %v18895_v32  ;;  %v15953_v16 = vsel %vm19638_vm11, %v5834_v22, %v5836_v37  ;;  %vm19641_vm4 = vmmov %vm19599_vm3 }
 0x4e7   : > { %19630 = vst [vmem:[#allocation79_spill] sm:$0xff] %v15928_v25  ;;  %v15940_v39 = vmul.f32 %v15858_v15, %v5768_v59  ;;  %v5651_v14 = vadd.f32 %v12071_v47, %v15775_v54  ;;  %v5642_v13 = vpop.f32.mrb[241].mxu1  ;;  %19636 = vst [vmem:[#allocation96_spill] sm:$0xff] %v15946_v43  ;;  %v15957_v54 = vsel %vm19641_vm4, %v5836_v37, %v5838_v11  ;;  %v15962_v18 = vsel %vm15475_vm1, 1.0, %v19069_v21 }
 0x4e8   : > { %19634 = vst [vmem:[#allocation106_spill] sm:$0xff] %v15937_v38  ;;  %v15949_v50 = vmul.f32 %v15868_v0, %v5766_v19  ;;  %v5643_v56 = vadd.f32 %v5642_v13, %v15769_v1  ;;  %v12072_v12 = vpop.f32.mrb[242].mxu1  ;;  %19639 = vst [vmem:[#allocation83_spill] sm:$0xff] %v15953_v16  ;;  %v19644_v19 = vld [vmem:[#allocation152_spill] sm:$0xff]  ;;  %v6019_v1 = vrot.slane %v15928_v25, 2  ;;  %v5934_v11 = vrot.slane %v15937_v38, 1 }
 0x4e9   : > { %v5743_v45 = vmul.f32 0.1, %v5651_v14  ;;  %v5645_v57 = vpop.f32.mrb[243].mxu1  ;;  %19642 = vst [vmem:[#allocation84_spill] sm:$0xff] %v15957_v54  ;;  %19643 = vst [vmem:[#allocation107_spill] sm:$0xff] %v15962_v18  ;;  %v15965_v47 = vrot.slane %v19644_v19, 2  ;;  %v5654_v32 = vadd.f32 %v12072_v12, %v15778_v29 }
 0x4ea   : > { %19637 = vst [vmem:[#allocation103_spill] sm:$0xff] %v15949_v50  ;;  %v6021_v22 = vrot.slane %v15940_v39, 2  ;;  %v5741_v13 = vmul.f32 0.1, %v5643_v56  ;;  %v5646_v15 = vadd.f32 %v5645_v57, %v15772_v3  ;;  %v5935_v37 = vrot.slane %v15949_v50, 1  ;;  %vm19647_vm9 = vmmov %vm19599_vm3 }
 0x4eb   : > { %19645 = vst [vmem:[#allocation116_spill] sm:$0xff] %v15965_v47  ;;  %v5771_v59 = vmax.f32 %v5651_v14, %v5743_v45  ;;  %v6017_v41 = vrot.slane %v15949_v50, 2  ;;  %v5744_v0 = vmul.f32 0.1, %v5654_v32  ;;  %v18903_v19 = vrot.slane %v15928_v25, 1  ;;  %vm19651_vm6 = vmmov %vm19599_vm3 }
 0x4ec   : > { %v5769_v26 = vmax.f32 %v5643_v56, %v5741_v13  ;;  %v6016_v17 = vrot.slane %v15937_v38, 2  ;;  %v6262_v51 = vpack.c.bf16 %v15949_v50, %v15937_v38  ;;  %v5742_v48 = vmul.f32 0.1, %v5646_v15  ;;  %vm19652_vm5 = vmmov %vm19599_vm3 }
 0x4ed   : > { %vm19646_vm1 = vcmask 1046528   ;;  %v15980_v3 = vsel %vm19647_vm9, %v6019_v1, %v6021_v22  ;;  %v5772_v12 = vmax.f32 %v5654_v32, %v5744_v0  ;;  %v15989_v57 = vmul.f32 %v15871_v60, %v5771_v59  ;;  %v12516_v59 = vld [vmem:[%s18561_s13 + $0x108] sm:$0xff]   ;;  %vm19654_vm13 = vmmov %vm19599_vm3 }
 0x4ee   : > { %v5936_v29 = vsel %vm19646_vm1, %v5934_v11, %v5935_v37  ;;  %v15983_v14 = vmul.f32 %v15874_v53, %v5769_v26  ;;  %v12075_v45 = vpop.f32.mrb[244].mxu1  ;;  %vm19649_vm15 = vmmov %vm19646_vm1  ;;  %v5770_v13 = vmax.f32 %v5646_v15, %v5742_v48  ;;  %v6018_v16 = vsel %vm19651_vm6, %v6016_v17, %v6017_v41 }
 0x4ef   : > { %v5938_v56 = vsel %vm19649_vm15, %v5935_v37, %v18903_v19  ;;  %19650 = vst [vmem:[#allocation104_spill] sm:$0xff] %v15989_v57  ;;  %v5667_v21 = vadd.f32 %v12075_v45, %v15787_v63  ;;  %v5658_v54 = vpop.f32.mrb[245].mxu1  ;;  %v15995_v26 = vmul.f32 %v15880_v5, %v5772_v12  ;;  %v6020_v15 = vsel %vm19652_vm5, %v6017_v41, %v6019_v1  ;;  %vm19657_vm10 = vmmov %vm19599_vm3  ;;  %v12517_v41 = vld [vmem:[%s18561_s13 + $0x110] sm:$0xff]  }
 0x4f0   : > { %19648 = vst [vmem:[#allocation17_spill] sm:$0xff] %v15983_v14  ;;  %v6263_v11 = vpack.c.bf16 %v5938_v56, %v5936_v29  ;;  %v6023_v43 = vrot.slane %v15983_v14, 2  ;;  %v5659_v32 = vadd.f32 %v5658_v54, %v15781_v62  ;;  %v12076_v0 = vpop.f32.mrb[246].mxu1  ;;  %v16003_v63 = vmul.f32 %v15877_v10, %v5770_v13  ;;  %vm19660_vm12 = vmmov %vm19659_vm8 }
 0x4f1   : > { %v5747_v48 = vmul.f32 0.1, %v5667_v21  ;;  %v6099_v17 = vrot.slane %v15949_v50, 3  ;;  %v5661_v37 = vpop.f32.mrb[247].mxu1  ;;  %v6029_v62 = vrot.slane %v15995_v26, 2  ;;  %v6098_v54 = vrot.slane %v15937_v38, 3  ;;  %vm19661_vm7 = vmmov %vm19599_vm3 }
 0x4f2   : > { %19653 = vst [vmem:[#allocation114_spill] sm:$0xff] %v16003_v63  ;;  %6610 = vmatprep.mubr.bf16.mxu0 %v6263_v11  ;;  %v16007_v29 = vsel %vm19654_vm13, %v6021_v22, %v6023_v43  ;;  %v6101_v12 = vrot.slane %v15928_v25, 3  ;;  %v6027_v1 = vrot.slane %v15989_v57, 2  ;;  %v6025_v45 = vrot.slane %v16003_v63, 2  ;;  %vm19662_vm11 = vmmov %vm19599_vm3 }
 0x4f3   : > { %6611 = vmatmul.mubr.bf16.vlgmr.msra.gmra.mrb[4].mxu0 %v6262_v51  ;;  %v19655_v56 = vrot.slane %v19640_v6, 2  ;;  %v19656_v22 = vrot.slane %v19620_v31, 2  ;;  %v6264_v11 = vpack.c.bf16 %v6020_v15, %v6018_v16  ;;  %v5745_v19 = vmul.f32 0.1, %v5659_v32  ;;  %vm19664_vm4 = vmmov %vm19646_vm1 }
 0x4f4   : > { %12094 = vmatpush3.bf16.msra.mxu0 %v15763_v36  ;;  %v6100_v51 = vsel %vm19659_vm8, %v6098_v54, %v6099_v17  ;;  %v6102_v5 = vsel %vm19660_vm12, %v6099_v17, %v6101_v12  ;;  %v6267_v36 = vpack.c.bf16 %v15940_v39, %v15928_v25  ;;  %v16032_v60 = vsel %vm19599_vm3, %v6027_v1, %v6029_v62  ;;  %vm19665_vm9 = vmmov %vm19659_vm8 }
 0x4f5   : > { %v16022_v13 = vsel %vm19657_vm10, %v19656_v22, %v19655_v56  ;;  %12095 = vmatprep.subr.bf16.mxu0 %v12516_v59  ;;  %v5775_v10 = vmax.f32 %v5667_v21, %v5747_v48  ;;  %v6265_v56 = vpack.c.bf16 %v6102_v5, %v6100_v51  ;;  %v16035_v16 = vsel %vm19661_vm7, %v6023_v43, %v6025_v45  ;;  %v12518_v43 = vld [vmem:[%s18561_s13 + $0x118] sm:$0xff]   ;;  %vm19667_vm15 = vmmov %vm19659_vm8 }
 0x4f6   : > { %19658 = vst [vmem:[#allocation18_spill] sm:$0xff] %v16022_v13  ;;  %v5773_v15 = vmax.f32 %v5659_v32, %v5745_v19  ;;  %v5670_v54 = vadd.f32 %v12076_v0, %v15790_v34  ;;  %v5662_v17 = vadd.f32 %v5661_v37, %v15784_v4  ;;  %v12079_v22 = vpop.f32.mrb[248].mxu1  ;;  %v16040_v53 = vsel %vm19662_vm11, %v6025_v45, %v6027_v1  ;;  %vm19668_vm6 = vmmov %vm19599_vm3 }
 0x4f7   : > { %6754 = vmatprep.mubr.bf16.mxu1 %v6265_v56  ;;  %v5939_v31 = vrot.slane %v15940_v39, 1  ;;  %v5941_v38 = vrot.slane %v15983_v14, 1  ;;  %v6103_v21 = vrot.slane %v15940_v39, 3  ;;  %v5674_v5 = vpop.f32.mrb[249].mxu1  ;;  %v16053_v48 = vmul.f32 %v15883_v7, %v5775_v10  ;;  %vm19669_vm5 = vmmov %vm19599_vm3 }
 0x4f8   : > { %12096 = vmatpush3.bf16.msra.mxu0 %v12516_v59  ;;  %v16049_v34 = vmul.f32 %v15890_v58, %v5773_v15  ;;  %v5748_v4 = vmul.f32 0.1, %v5670_v54  ;;  %6755 = vmatmul.mubr.bf16.vlgmr.msra.gmra.mrb[8].mxu1 %v6264_v11  ;;  %v5746_v19 = vmul.f32 0.1, %v5662_v17  ;;  %v12080_v0 = vpop.f32.mrb[250].mxu1  ;;  %v19663_v37 = vrot.slane %v15928_v25, 1  ;;  %vm19670_vm13 = vmmov %vm19599_vm3 }
 0x4f9   : > { %12097 = vmatprep.subr.bf16.mxu0 %v12517_v41  ;;  %v5942_v1 = vsel %vm19646_vm1, %v5939_v31, %v5941_v38  ;;  %v5683_v45 = vadd.f32 %v12079_v22, %v15799_v9  ;;  %v5677_v51 = vpop.f32.mrb[251].mxu1  ;;  %v6104_v32 = vsel %vm19665_vm9, %v6101_v12, %v6103_v21  ;;  %v19666_v10 = vrot.slane %v15983_v14, 3  ;;  %vm19672_vm10 = vmmov %vm19599_vm3 }
 0x4fa   : > { %v5940_v59 = vsel %vm19664_vm4, %v19663_v37, %v5939_v31  ;;  %v6031_v11 = vrot.slane %v16049_v34, 2  ;;  %v5776_v56 = vmax.f32 %v5670_v54, %v5748_v4  ;;  %v5774_v15 = vmax.f32 %v5662_v17, %v5746_v19  ;;  %vm19673_vm8 = vmmov %vm19646_vm1 }
 0x4fb   : > { %v6268_v58 = vpack.c.bf16 %v5942_v1, %v5940_v59  ;;  %v6106_v7 = vsel %vm19667_vm15, %v6103_v21, %v19666_v10  ;;  %v5751_v50 = vmul.f32 0.1, %v5683_v45  ;;  %v5675_v37 = vadd.f32 %v5674_v5, %v15793_v42  ;;  %vm19674_vm12 = vmmov %vm19646_vm1 }
 0x4fc   : > { %12098 = vmatpush3.bf16.msra.mxu0 %v12517_v41  ;;  %v16069_v31 = vsel %vm19668_vm6, %v6029_v62, %v6031_v11  ;;  %v16072_v9 = vmul.f32 %v15893_v44, %v5776_v56  ;;  %v16075_v54 = vmul.f32 %v15896_v49, %v5774_v15  ;;  %v6270_v17 = vpack.c.bf16 %v6106_v7, %v6104_v32  ;;  %v12519_v62 = vld [vmem:[%s18561_s13 + $0x120] sm:$0xff]   ;;  %vm19676_vm3 = vmmov %vm19665_vm9  ;;  %v19710_v49 = vld [vmem:[#allocation58_spill] sm:$0xff] }
 0x4fd   : > { %12099 = vmatprep.subr.bf16.mxu0 %v12518_v43  ;;  %6618 = vmatprep.mubr.bf16.mxu0 %v6268_v58  ;;  %v5779_v22 = vmax.f32 %v5683_v45, %v5751_v50  ;;  %v5749_v21 = vmul.f32 0.1, %v5675_v37  ;;  %v5686_v42 = vadd.f32 %v12080_v0, %v15802_v52  ;;  %v6035_v5 = vrot.slane %v16053_v48, 2  ;;  %vm19677_vm7 = vmmov %vm19669_vm5 }
 0x4fe   : > { %v6033_v7 = vrot.slane %v16075_v54, 2  ;;  %6762 = vmatprep.mubr.bf16.mxu1 %v6270_v17  ;;  %6619 = vmatmul.mubr.bf16.gmra.mrb[8].mxu0 %v6267_v36  ;;  %v12083_v4 = vpop.f32.mrb[252].mxu1  ;;  %v6037_v50 = vrot.slane %v16072_v9, 2  ;;  %v6274_v59 = vpack.c.bf16 %v16040_v53, %v16035_v16  ;;  %v19671_v45 = vpack.c.bf16 %v16007_v29, %v15980_v3  ;;  %vm19678_vm11 = vmmov %vm19676_vm3 }
 0x4ff   : > { %v5777_v19 = vmax.f32 %v5675_v37, %v5749_v21  ;;  %v5752_v32 = vmul.f32 0.1, %v5686_v42  ;;  %v5690_v0 = vpop.f32.mrb[253].mxu1  ;;  %v5678_v56 = vadd.f32 %v5677_v51, %v15796_v24  ;;  %v16109_v16 = vmul.f32 %v15900_v2, %v5779_v22  ;;  %vm19679_vm4 = vmmov %vm19669_vm5 }
 0x500   : > { %12100 = vmatpush3.bf16.msra.mxu0 %v12518_v43  ;;  %v16094_v1 = vsel %vm19669_vm5, %v6031_v11, %v6033_v7  ;;  %v16097_v36 = vsel %vm19670_vm13, %v6033_v7, %v6035_v5  ;;  %6763 = vmatmul.mubr.bf16.gmra.mrb[12].mxu1 %v19671_v45  ;;  %v12084_v15 = vpop.f32.mrb[254].mxu1  ;;  %v12520_v43 = vld [vmem:[%s18561_s13 + $0x128] sm:$0xff]   ;;  %v5943_v24 = vrot.slane %v16003_v63, 1  ;;  %v5945_v29 = vrot.slane %v15989_v57, 1  ;;  %vm19681_vm1 = vmmov %vm19679_vm4 }
 0x501   : > { %v16112_v11 = vmul.f32 %v15909_v40, %v5777_v19  ;;  %v5780_v10 = vmax.f32 %v5686_v42, %v5752_v32  ;;  %v5693_v37 = vpop.f32.mrb[255].mxu1  ;;  %12101 = vmatprep.subr.bf16.mxu0 %v12519_v62  ;;  %v5750_v3 = vmul.f32 0.1, %v5678_v56  ;;  %v6107_v51 = vrot.slane %v16003_v63, 3  ;;  %vm19682_vm9 = vmmov %vm19681_vm1 }
 0x502   : > { %v16118_v17 = vsel %vm19672_vm10, %v6035_v5, %v6037_v50  ;;  %v18914_v7 = vrot.slane %v15989_v57, 3  ;;  %v5944_v19 = vsel %vm19673_vm8, %v5941_v38, %v5943_v24  ;;  %v5946_v32 = vsel %vm19674_vm12, %v5943_v24, %v5945_v29  ;;  %vm19683_vm15 = vmmov %vm19673_vm8 }
 0x503   : > { %v6039_v21 = vrot.slane %v16112_v11, 2  ;;  %v16122_v22 = vmul.f32 %v15919_v35, %v5780_v10  ;;  %v5778_v42 = vmax.f32 %v5678_v56, %v5750_v3  ;;  %v19675_v45 = vrot.slane %v15983_v14, 3  ;;  %v12521_v10 = vld [vmem:[%s18561_s13 + $0x130] sm:$0xff]   ;;  %vm19685_vm6 = vmmov %vm19673_vm8 }
 0x504   : > { %12102 = vmatpush3.bf16.msra.mxu0 %v12519_v62  ;;  %v6043_v53 = vrot.slane %v16109_v16, 2  ;;  %v6110_v52 = vsel %vm19678_vm11, %v6107_v51, %v18914_v7  ;;  %v5699_v38 = vadd.f32 %v12083_v4, %v15812_v55  ;;  %v5691_v41 = vadd.f32 %v5690_v0, %v15805_v27  ;;  %v12522_v55 = vld [vmem:[%s18561_s13 + $0x138] sm:$0xff]   ;;  %vm19688_vm5 = vmmov %vm19676_vm3 }
 0x505   : > { %v6108_v5 = vsel %vm19676_vm3, %v19675_v45, %v6107_v51  ;;  %12103 = vmatprep.subr.bf16.mxu0 %v12520_v43  ;;  %v16137_v62 = vsel %vm19677_vm7, %v6037_v50, %v6039_v21  ;;  %v18913_v56 = vrot.slane %v16122_v22, 2  ;;  %v16145_v24 = vmul.f32 %v15915_v20, %v5778_v42  ;;  %vm19689_vm13 = vmmov %vm19676_vm3 }
 0x506   : > { %v6273_v45 = vpack.c.bf16 %v5946_v32, %v5944_v19  ;;  %v12087_v58 = vpop.f32.mrb[0].mxu1  ;;  %v6275_v12 = vpack.c.bf16 %v6110_v52, %v6108_v5  ;;  %v5702_v51 = vadd.f32 %v12084_v15, %v15814_v33  ;;  %v5694_v32 = vadd.f32 %v5693_v37, %v15808_v8  ;;  %vm19691_vm10 = vmmov %vm19681_vm1 }
 0x507   : > { %v16153_v50 = vsel %vm19679_vm4, %v6043_v53, %v18913_v56  ;;  %v16157_v3 = vpop.f32.mrb[1].mxu1  ;;  %v6041_v42 = vrot.slane %v16145_v24, 2  ;;  %v5755_v27 = vmul.f32 0.1, %v5699_v38  ;;  %v5753_v4 = vmul.f32 0.1, %v5691_v41  ;;  %vm19692_vm8 = vmmov %vm19681_vm1 }
 0x508   : > { %12104 = vmatpush3.bf16.msra.mxu0 %v12520_v43  ;;  %6626 = vmatprep.mubr.bf16.mxu0 %v6273_v45  ;;  %v12088_v56 = vpop.f32.mrb[2].mxu1  ;;  %v19680_v52 = vpack.c.bf16 %v16003_v63, %v15983_v14  ;;  %v5947_v0 = vrot.slane %v15995_v26, 1  ;;  %v5756_v15 = vmul.f32 0.1, %v5702_v51  ;;  %v5754_v37 = vmul.f32 0.1, %v5694_v32  ;;  %vm19693_vm12 = vmmov %vm19681_vm1 }
 0x509   : > { %12105 = vmatprep.subr.bf16.mxu0 %v12521_v10  ;;  %6770 = vmatprep.mubr.bf16.mxu1 %v6275_v12  ;;  %v16173_v33 = vsel %vm19681_vm1, %v6039_v21, %v6041_v42  ;;  %v16176_v8 = vsel %vm19682_vm9, %v6041_v42, %v6043_v53  ;;  %v5709_v12 = vpop.f32.mrb[3].mxu1  ;;  %v5783_v45 = vmax.f32 %v5699_v38, %v5755_v27  ;;  %v19684_v21 = vrot.slane %v16049_v34, 1  ;;  %v19686_v27 = vld [vmem:[#allocation151_spill] sm:$0xff]  ;;  %vm19695_vm3 = vmmov %vm19681_vm1 }
 0x50a   : > { %6627 = vmatmul.mubr.bf16.gmra.mrb[12].mxu0 %v19680_v52  ;;  %6771 = vmatmul.mubr.bf16.gmra.mrb[16].mxu1 %v6274_v59  ;;  %v5781_v19 = vmax.f32 %v5691_v41, %v5753_v4  ;;  %v5948_v52 = vsel %vm19683_vm15, %v5945_v29, %v5947_v0  ;;  %v5784_v7 = vmax.f32 %v5702_v51, %v5756_v15  ;;  %v6111_v53 = vrot.slane %v15995_v26, 3  ;;  %vm19702_vm7 = vmmov %vm19681_vm1 }
 0x50b   : > { %v5782_v43 = vmax.f32 %v5694_v32, %v5754_v37  ;;  %v5950_v35 = vsel %vm19685_vm6, %v5947_v0, %v19684_v21  ;;  %v16186_v59 = vmul.f32 %v15922_v28, %v5783_v45  ;;  %v6113_v41 = vrot.slane %v16049_v34, 3  ;;  %vm19704_vm11 = vmmov %vm19685_vm6 }
 0x50c   : > { %12106 = vmatpush3.bf16.msra.mxu0 %v12521_v10  ;;  %v16189_v42 = vmul.f32 %v15925_v23, %v5781_v19  ;;  %v6278_v38 = vpack.c.bf16 %v5950_v35, %v5948_v52  ;;  %v16193_v29 = vmul.f32 %v15931_v46, %v5784_v7  ;;  %v5715_v51 = vadd.f32 %v12087_v58, %v15824_v30  ;;  %v19700_v23 = vld [vmem:[#allocation45_spill] sm:$0xff]  ;;  %vm19705_vm4 = vmmov %vm19685_vm6 }
 0x50d   : > { %12107 = vmatprep.subr.bf16.mxu0 %v12522_v55  ;;  %v16196_v10 = vmul.f32 %v15934_v61, %v5782_v43  ;;  %v6277_v0 = vpack.c.bf16 %v15995_v26, %v15989_v57  ;;  %v19687_v35 = vrot.slane %v15989_v57, 3  ;;  %v6114_v7 = vsel %vm19689_vm13, %v6111_v53, %v6113_v41  ;;  %vm19706_vm1 = vmmov %vm19688_vm5 }
 0x50e   : > { %v12091_v32 = vpop.f32.mrb[4].mxu1  ;;  %v6047_v19 = vrot.slane %v16189_v42, 2  ;;  %6634 = vmatprep.mubr.bf16.mxu0 %v6278_v38  ;;  %v6051_v43 = vrot.slane %v16186_v59, 2  ;;  %v6053_v30 = vrot.slane %v16193_v29, 2  ;;  %v19690_v21 = vrot.slane %v16122_v22, 2  ;;  %vm19709_vm9 = vmmov %vm19706_vm1 }
 0x50f   : > { %v6112_v15 = vsel %vm19688_vm5, %v19687_v35, %v6111_v53  ;;  %v5722_v37 = vpop.f32.mrb[5].mxu1  ;;  %v6049_v45 = vrot.slane %v16196_v10, 2  ;;  %v19698_v53 = vld [vmem:[#allocation48_spill] sm:$0xff]  ;;  %v19699_v4 = vpack.c.bf16 %v16069_v31, %v16032_v60  ;;  %v5951_v2 = vrot.slane %v16075_v54, 1  ;;  %vm19719_vm15 = vmmov %vm19695_vm3 }
 0x510   : > { %12108 = vmatpush3.bf16.msra.mxu0 %v12522_v55  ;;  %v12092_v52 = vpop.f32.mrb[6].mxu1  ;;  %v16215_v38 = vsel %vm19691_vm10, %v19690_v21, %v6047_v19  ;;  %v6280_v35 = vpack.c.bf16 %v6114_v7, %v6112_v15  ;;  %v5759_v55 = vmul.f32 0.1, %v5715_v51  ;;  %v16222_v58 = vsel %vm19692_vm8, %v6051_v43, %v6053_v30  ;;  %v19697_v7 = vld [vmem:[#allocation55_spill] sm:$0xff]  ;;  %vm19722_vm6 = vmmov %vm19695_vm3 }
 0x511   : > { %v5725_v5 = vpop.f32.mrb[7].mxu1  ;;  %v16225_v46 = vsel %vm19693_vm12, %v6047_v19, %v6049_v45  ;;  %v16228_v28 = vsel %vm19695_vm3, %v6049_v45, %v6051_v43  ;;  %v5718_v61 = vadd.f32 %v12088_v56, %v19698_v53  ;;  %v5710_v19 = vadd.f32 %v5709_v12, %v19700_v23  ;;  %vm19723_vm5 = vmmov %vm19695_vm3 }
 0x512   : > { %6635 = vmatmul.mubr.bf16.gmra.mrb[16].mxu0 %v6277_v0  ;;  %19694 = vst [vmem:[#allocation91_spill] sm:$0xff] %v16225_v46  ;;  %19696 = vst [vmem:[#allocation92_spill] sm:$0xff] %v16228_v28  ;;  %6778 = vmatprep.mubr.bf16.mxu1 %v6280_v35  ;;  %v5787_v15 = vmax.f32 %v5715_v51, %v5759_v55  ;;  %v5707_v0 = vadd.f32 %v16157_v3, %v19697_v7  ;;  %v5953_v43 = vrot.slane %v16053_v48, 1  ;;  %v19712_v28 = vld [vmem:[#allocation83_spill] sm:$0xff] }
 0x513   : > { %6779 = vmatmul.mubr.bf16.gmra.mrb[20].mxu1 %v19699_v4  ;;  %v6115_v45 = vrot.slane %v16075_v54, 3  ;;  %v5760_v35 = vmul.f32 0.1, %v5718_v61  ;;  %v19701_v3 = vrot.slane %v15962_v18, 2  ;;  %v5758_v53 = vmul.f32 0.1, %v5710_v19  ;;  %vm19724_vm13 = vmmov %vm19695_vm3 }
 0x514   : > { %v5757_v21 = vmul.f32 0.1, %v5707_v0  ;;  %v19703_v60 = vrot.slane %v16049_v34, 1  ;;  %v5954_v31 = vsel %vm19705_vm4, %v5951_v2, %v5953_v43  ;;  %v19707_v4 = vld [vmem:[#allocation96_spill] sm:$0xff]  ;;  %v5731_v63 = vadd.f32 %v12091_v32, %v19710_v49  ;;  %vm19725_vm10 = vmmov %vm19695_vm3 }
 0x515   : > { %v5849_v56 = vsel %vm19702_vm7, %v15965_v47, %v19701_v3  ;;  %v6116_v12 = vsel %vm19706_vm1, %v6113_v41, %v6115_v45  ;;  %v16255_v55 = vmul.f32 %v19707_v4, %v5787_v15  ;;  %v5788_v51 = vmax.f32 %v5718_v61, %v5760_v35  ;;  %v19714_v15 = vld [vmem:[#allocation84_spill] sm:$0xff]  ;;  %vm19727_vm8 = vmmov %vm19695_vm3 }
 0x516   : > { %v5952_v23 = vsel %vm19704_vm11, %v19703_v60, %v5951_v2  ;;  %v5785_v7 = vmax.f32 %v5707_v0, %v5757_v21  ;;  %v5786_v40 = vmax.f32 %v5710_v19, %v5758_v53  ;;  %v19708_v3 = vrot.slane %v16053_v48, 3  ;;  %v19711_v60 = vld [vmem:[#allocation69_spill] sm:$0xff]  ;;  %v19713_v21 = vld [vmem:[#allocation78_spill] sm:$0xff]  ;;  %v19716_v32 = vld [vmem:[#allocation56_spill] sm:$0xff] }
 0x517   : > { %v6283_v20 = vpack.c.bf16 %v5954_v31, %v5952_v23  ;;  %v5723_v46 = vadd.f32 %v5722_v37, %v19711_v60  ;;  %v16266_v2 = vmul.f32 %v16022_v13, %v5788_v51  ;;  %v5734_v61 = vadd.f32 %v12092_v52, %v19713_v21  ;;  %vm19730_vm12 = vmmov %vm19705_vm4 }
 0x518   : > { %v6118_v44 = vsel %vm19709_vm9, %v6115_v45, %v19708_v3  ;;  %v16263_v57 = vmul.f32 %v19712_v28, %v5785_v7  ;;  %v16270_v0 = vmul.f32 %v19714_v15, %v5786_v40  ;;  %v5763_v19 = vmul.f32 0.1, %v5731_v63  ;;  %vm19731_vm7 = vmmov %vm19705_vm4 }
 0x519   : > { %6642 = vmatprep.mubr.bf16.mxu0 %v6283_v20  ;;  %v6285_v41 = vpack.c.bf16 %v6118_v44, %v6116_v12  ;;  %v5761_v35 = vmul.f32 0.1, %v5723_v46  ;;  %v19715_v49 = vpack.c.bf16 %v16075_v54, %v16049_v34  ;;  %v5726_v37 = vadd.f32 %v5725_v5, %v19716_v32  ;;  %vm19733_vm11 = vmmov %vm19706_vm1 }
 0x51a   : > { %v6059_v45 = vrot.slane %v16255_v55, 2  ;;  %v6055_v51 = vrot.slane %v16263_v57, 2  ;;  %v6061_v20 = vrot.slane %v16266_v2, 2  ;;  %v19717_v44 = vrot.slane %v19686_v27, 2  ;;  %vm19734_vm4 = vmmov %vm19706_vm1 }
 0x51b   : > { %6643 = vmatmul.mubr.bf16.gmra.mrb[20].mxu0 %v19715_v49  ;;  %6786 = vmatprep.mubr.bf16.mxu1 %v6285_v41  ;;  %v19718_v40 = vrot.slane %v19640_v6, 2  ;;  %v6057_v23 = vrot.slane %v16270_v0, 2  ;;  %v5791_v31 = vmax.f32 %v5731_v63, %v5763_v19  ;;  %v19721_v12 = vpack.c.bf16 %v16097_v36, %v16094_v1  ;;  %vm19735_vm1 = vmmov %vm19695_vm3  ;;  %v19775_v6 = vld [vmem:[#allocation104_spill] sm:$0xff] }
 0x51c   : > { %v16295_v7 = vsel %vm19722_vm6, %v6053_v30, %v6055_v51  ;;  %v16298_v3 = vsel %vm19723_vm5, %v6059_v45, %v6061_v20  ;;  %v5789_v60 = vmax.f32 %v5723_v46, %v5761_v35  ;;  %v5764_v41 = vmul.f32 0.1, %v5734_v61  ;;  %vm19737_vm9 = vmmov %vm19735_vm1 }
 0x51d   : > { %v16284_v52 = vsel %vm19719_vm15, %v19718_v40, %v19717_v44  ;;  %6787 = vmatmul.mubr.bf16.gmra.mrb[24].mxu1 %v19721_v12  ;;  %v16303_v49 = vsel %vm19724_vm13, %v6055_v51, %v6057_v23  ;;  %v16306_v63 = vsel %vm19725_vm10, %v6057_v23, %v6059_v45  ;;  %v16308_v19 = vmul.f32 %v5849_v56, %v5791_v31  ;;  %vm19738_vm15 = vmmov %vm19735_vm1 }
 0x51e   : > { %19720 = vst [vmem:[#allocation117_spill] sm:$0xff] %v16284_v52  ;;  %v16313_v36 = vmul.f32 %v16284_v52, %v5789_v60  ;;  %v5792_v30 = vmax.f32 %v5734_v61, %v5764_v41  ;;  %v5762_v46 = vmul.f32 0.1, %v5726_v37  ;;  %v19726_v32 = vmov %v19717_v44  ;;  %vm19740_vm6 = vmmov %vm19731_vm7 }
 0x51f   : > { %v16320_v51 = vsel %vm19727_vm8, %v19726_v32, %v15965_v47  ;;  %v5955_v45 = vrot.slane %v16072_v9, 1  ;;  %v5957_v56 = vrot.slane %v16112_v11, 1  ;;  %v6287_v44 = vpack.c.bf16 %v16072_v9, %v16053_v48  ;;  %vm19741_vm5 = vmmov %vm19740_vm6 }
 0x520   : > { %19728 = vst [vmem:[#allocation120_spill] sm:$0xff] %v16320_v51  ;;  %v6063_v40 = vrot.slane %v16313_v36, 2  ;;  %v19729_v61 = vrot.slane %v15962_v18, 2  ;;  %v5790_v31 = vmax.f32 %v5726_v37, %v5762_v46  ;;  %v6067_v12 = vrot.slane %v16308_v19, 2  ;;  %vm19742_vm13 = vmmov %vm19734_vm4 }
 0x521   : > { %v5958_v60 = vsel %vm19730_vm12, %v5955_v45, %v5957_v56  ;;  %v6119_v41 = vrot.slane %v16072_v9, 3  ;;  %v6121_v32 = vrot.slane %v16112_v11, 3  ;;  %v5956_v37 = vsel %vm19731_vm7, %v5953_v43, %v5955_v45  ;;  %vm19743_vm10 = vmmov %vm19734_vm4 }
 0x522   : > { %v16329_v23 = vmul.f32 %v19729_v61, %v5792_v30  ;;  %v16336_v53 = vsel %vm19695_vm3, %v6061_v20, %v6063_v40  ;;  %v16340_v5 = vmul.f32 %v16320_v51, %v5790_v31  ;;  %v6288_v46 = vpack.c.bf16 %v5958_v60, %v5956_v37  ;;  %vm19744_vm8 = vmmov %vm19741_vm5 }
 0x523   : > { %v19732_v61 = vrot.slane %v16053_v48, 3  ;;  %v6122_v20 = vsel %vm19734_vm4, %v6119_v41, %v6121_v32  ;;  %v5959_v45 = vrot.slane %v16145_v24, 1  ;;  %v5961_v60 = vrot.slane %v16109_v16, 1  ;;  %vm19745_vm12 = vmmov %vm19741_vm5 }
 0x524   : > { %v6069_v1 = vrot.slane %v16329_v23, 2  ;;  %v6065_v31 = vrot.slane %v16340_v5, 2  ;;  %6650 = vmatprep.mubr.bf16.mxu0 %v6288_v46  ;;  %v6123_v37 = vrot.slane %v16145_v24, 3  ;;  %v5965_v30 = vrot.slane %v16189_v42, 1  ;;  %vm19746_vm3 = vmmov %vm19734_vm4 }
 0x525   : > { %v6120_v21 = vsel %vm19733_vm11, %v19732_v61, %v6119_v41  ;;  %6651 = vmatmul.mubr.bf16.gmra.mrb[24].mxu0 %v6287_v44  ;;  %v6125_v61 = vrot.slane %v16109_v16, 3  ;;  %v5960_v47 = vsel %vm19740_vm6, %v5957_v56, %v5959_v45  ;;  %v6127_v46 = vrot.slane %v16122_v22, 3  ;;  %vm19747_vm7 = vmmov %vm19746_vm3 }
 0x526   : > { %v16352_v35 = vsel %vm19735_vm1, %v6067_v12, %v6069_v1  ;;  %v6290_v51 = vpack.c.bf16 %v6122_v20, %v6120_v21  ;;  %v16362_v41 = vsel %vm19737_vm9, %v6063_v40, %v6065_v31  ;;  %v16365_v1 = vsel %vm19738_vm15, %v6065_v31, %v6067_v12  ;;  %vm19748_vm11 = vmmov %vm19741_vm5 }
 0x527   : > { %19736 = vst [vmem:[#allocation115_spill] sm:$0xff] %v16352_v35  ;;  %v5963_v21 = vrot.slane %v16122_v22, 1  ;;  %v19739_v20 = vpack.c.bf16 %v16137_v62, %v16118_v17  ;;  %v5962_v40 = vsel %vm19741_vm5, %v5959_v45, %v5961_v60  ;;  %v6124_v12 = vsel %vm19742_vm13, %v6121_v32, %v6123_v37  ;;  %vm19749_vm4 = vmmov %vm19741_vm5 }
 0x528   : > { %6794 = vmatprep.mubr.bf16.mxu1 %v6290_v51  ;;  %v6293_v31 = vpack.c.bf16 %v5962_v40, %v5960_v47  ;;  %v6126_v51 = vsel %vm19743_vm10, %v6123_v37, %v6125_v61  ;;  %v6129_v52 = vrot.slane %v16189_v42, 3  ;;  %v5967_v17 = vrot.slane %v16196_v10, 1  ;;  %vm19750_vm1 = vmmov %vm19746_vm3 }
 0x529   : > { %6795 = vmatmul.mubr.bf16.gmra.mrb[28].mxu1 %v19739_v20  ;;  %v5964_v44 = vsel %vm19744_vm8, %v5961_v60, %v5963_v21  ;;  %v6295_v43 = vpack.c.bf16 %v6126_v51, %v6124_v12  ;;  %v5966_v62 = vsel %vm19745_vm12, %v5963_v21, %v5965_v30  ;;  %v5969_v56 = vrot.slane %v16186_v59, 1  ;;  %vm19751_vm9 = vmmov %vm19750_vm1 }
 0x52a   : > { %6658 = vmatprep.mubr.bf16.mxu0 %v6293_v31  ;;  %v6131_v47 = vrot.slane %v16196_v10, 3  ;;  %v6133_v32 = vrot.slane %v16186_v59, 3  ;;  %v6298_v45 = vpack.c.bf16 %v5966_v62, %v5964_v44  ;;  %v6128_v60 = vsel %vm19746_vm3, %v6125_v61, %v6127_v46  ;;  %vm19754_vm15 = vmmov %vm19749_vm4 }
 0x52b   : > { %6802 = vmatprep.mubr.bf16.mxu1 %v6295_v43  ;;  %v6130_v37 = vsel %vm19747_vm7, %v6127_v46, %v6129_v52  ;;  %v5968_v20 = vsel %vm19748_vm11, %v5965_v30, %v5967_v17  ;;  %v5970_v12 = vsel %vm19749_vm4, %v5967_v17, %v5969_v56  ;;  %v5971_v4 = vrot.slane %v16193_v29, 1  ;;  %vm19755_vm6 = vmmov %vm19749_vm4 }
 0x52c   : > { %v6300_v40 = vpack.c.bf16 %v6130_v37, %v6128_v60  ;;  %v6132_v31 = vsel %vm19750_vm1, %v6129_v52, %v6131_v47  ;;  %v6134_v21 = vsel %vm19751_vm9, %v6131_v47, %v6133_v32  ;;  %v6303_v51 = vpack.c.bf16 %v5970_v12, %v5968_v20  ;;  %vm19756_vm5 = vmmov %vm19750_vm1 }
 0x52d   : > { %v6305_v13 = vpack.c.bf16 %v6134_v21, %v6132_v31  ;;  %v5973_v43 = vrot.slane %v16263_v57, 1  ;;  %v19752_v61 = vpack.c.bf16 %v16145_v24, %v16112_v11  ;;  %v6135_v46 = vrot.slane %v16193_v29, 3  ;;  %vm19757_vm13 = vmmov %vm19750_vm1 }
 0x52e   : > { %v6137_v30 = vrot.slane %v16263_v57, 3  ;;  %v5975_v44 = vrot.slane %v16270_v0, 1  ;;  %v5977_v52 = vrot.slane %v16255_v55, 1  ;;  %v19753_v17 = vpack.c.bf16 %v16176_v8, %v16173_v33  ;;  %vm19758_vm10 = vmmov %vm19749_vm4 }
 0x52f   : > { %6659 = vmatmul.mubr.bf16.gmra.mrb[28].mxu0 %v19752_v61  ;;  %v16406_v62 = vsel %vm19754_vm15, %v5969_v56, %v5971_v4  ;;  %v16409_v47 = vsel %vm19755_vm6, %v5971_v4, %v5973_v43  ;;  %v6139_v60 = vrot.slane %v16270_v0, 3  ;;  %v6141_v37 = vrot.slane %v16255_v55, 3  ;;  %vm19759_vm8 = vmmov %vm19749_vm4 }
 0x530   : > { %6666 = vmatprep.mubr.bf16.mxu0 %v6298_v45  ;;  %v16416_v12 = vsel %vm19756_vm5, %v6133_v32, %v6135_v46  ;;  %v16419_v33 = vsel %vm19757_vm13, %v6135_v46, %v6137_v30  ;;  %v16422_v8 = vsel %vm19758_vm10, %v5973_v43, %v5975_v44  ;;  %v16427_v56 = vsel %vm19759_vm8, %v5975_v44, %v5977_v52  ;;  %vm19760_vm12 = vmmov %vm19750_vm1 }
 0x531   : > { %6803 = vmatmul.mubr.bf16.gmra.mrb[32].mxu1 %v19753_v17  ;;  %v16430_v45 = vsel %vm19760_vm12, %v6137_v30, %v6139_v60  ;;  %vm19761_vm3 = vmmov %vm19750_vm1  ;;  %v5979_v21 = vrot.slane %v16266_v2, 1  ;;  %v5981_v43 = vrot.slane %v16313_v36, 1  ;;  %v6143_v61 = vrot.slane %v16266_v2, 3 }
 0x532   : > { %6810 = vmatprep.mubr.bf16.mxu1 %v6300_v40  ;;  %v16433_v40 = vsel %vm19761_vm3, %v6139_v60, %v6141_v37  ;;  %v6145_v46 = vrot.slane %v16313_v36, 3  ;;  %v5983_v30 = vrot.slane %v16340_v5, 1  ;;  %v5985_v44 = vrot.slane %v16308_v19, 1  ;;  %vm19762_vm7 = vmmov %vm19749_vm4 }
 0x533   : > { %v16446_v17 = vsel %vm19762_vm7, %v5977_v52, %v5979_v21  ;;  %vm19763_vm11 = vmmov %vm19749_vm4  ;;  %v6147_v31 = vrot.slane %v16340_v5, 3  ;;  %v6149_v32 = vrot.slane %v16308_v19, 3  ;;  %v19766_v52 = vpack.c.bf16 %v16122_v22, %v16109_v16 }
 0x534   : > { %v16449_v60 = vsel %vm19763_vm11, %v5979_v21, %v5981_v43  ;;  %vm19764_vm4 = vmmov %vm19750_vm1  ;;  %v16459_v15 = vsel %vm19750_vm1, %v6143_v61, %v6145_v46  ;;  %v6151_v21 = vrot.slane %v16329_v23, 3  ;;  %v6201_v27 = vrot.slane %v16072_v9, 4 }
 0x535   : > { %v16456_v20 = vsel %vm19764_vm4, %v6141_v37, %v6143_v61  ;;  %vm19765_vm9 = vmmov %vm19755_vm6  ;;  %v6217_v9 = vrot.slane %v16193_v29, 4 }
 0x536   : > { %v16462_v28 = vsel %vm19765_vm9, %v5981_v43, %v5983_v30  ;;  %vm19767_vm15 = vmmov %vm19755_vm6  ;;  %v19770_v43 = vpack.c.bf16 %v16215_v38, %v16153_v50  ;;  %v19771_v50 = vrot.slane %v15983_v14, 4  ;;  %v19772_v38 = vrot.slane %v15940_v39, 4 }
 0x537   : > { %6667 = vmatmul.mubr.bf16.gmra.mrb[32].mxu0 %v19766_v52  ;;  %v16470_v18 = vsel %vm19767_vm15, %v5983_v30, %v5985_v44  ;;  %vm19768_vm6 = vmmov %vm19750_vm1  ;;  %v5987_v30 = vrot.slane %v16329_v23, 1  ;;  %v18939_v14 = vrot.slane %v19775_v6, 4  ;;  %v6213_v39 = vrot.slane %v16196_v10, 4 }
 0x538   : > { %v16473_v4 = vsel %vm19768_vm6, %v6145_v46, %v6147_v31  ;;  %vm19769_vm5 = vmmov %vm19750_vm1  ;;  %6674 = vmatprep.mubr.bf16.mxu0 %v6303_v51  ;;  %v6193_v46 = vrot.slane %v15995_v26, 4  ;;  %v16495_v51 = vsel %vm4902_vm0, %v19772_v38, %v19771_v50  ;;  %v18940_v26 = vrot.slane %v15928_v25, 4 }
 0x539   : > { %v16476_v37 = vsel %vm19769_vm5, %v6147_v31, %v6149_v32  ;;  %6811 = vmatmul.mubr.bf16.gmra.mrb[36].mxu1 %v19770_v43  ;;  %v6195_v31 = vrot.slane %v16049_v34, 4  ;;  %v6203_v43 = vrot.slane %v16112_v11, 4  ;;  %vm19773_vm13 = vmmov %vm19762_vm7  ;;  %v6209_v34 = vrot.slane %v16122_v22, 4 }
 0x53a   : > { %6818 = vmatprep.mubr.bf16.mxu1 %v6305_v13  ;;  %v16499_v52 = vsel %vm19773_vm13, %v5985_v44, %v5987_v30  ;;  %vm19774_vm10 = vmmov %vm19750_vm1  ;;  %v6211_v13 = vrot.slane %v16189_v42, 4  ;;  %v6219_v50 = vrot.slane %v16263_v57, 4  ;;  %v6225_v11 = vrot.slane %v16266_v2, 4 }
 0x53b   : > { %v16502_v61 = vsel %vm19774_vm10, %v6149_v32, %v6151_v21  ;;  %v6227_v44 = vrot.slane %v16313_v36, 4  ;;  %v19776_v30 = vmov %v19772_v38  ;;  %v6233_v22 = vrot.slane %v16329_v23, 4  ;;  %vm19822_vm8 = vmmov %vm19750_vm1 }
 0x53c   : > { %v16517_v32 = vsel %vm4902_vm0, %v18940_v26, %v19776_v30  ;;  %v16525_v38 = vsel %vm4902_vm0, %v18939_v14, %v6193_v46  ;;  %v16528_v35 = vsel %vm4902_vm0, %v6193_v46, %v6195_v31  ;;  %v6197_v25 = vrot.slane %v16075_v54, 4  ;;  %v19781_v54 = vld [vmem:[#allocation91_spill] sm:$0xff]  ;;  %vm19827_vm12 = vmmov %vm19750_vm1 }
 0x53d   : > { %19777 = vst [vmem:[#allocation118_spill] sm:$0xff] %v16525_v38  ;;  %19778 = vst [vmem:[#allocation99_spill] sm:$0xff] %v16528_v35  ;;  %v6199_v30 = vrot.slane %v16053_v48, 4  ;;  %v16535_v23 = vsel %vm4902_vm0, %v6201_v27, %v6203_v43  ;;  %v19779_v21 = vpack.c.bf16 %v16196_v10, %v16189_v42  ;;  %v6205_v14 = vrot.slane %v16145_v24, 4  ;;  %v19780_v38 = vld [vmem:[#allocation92_spill] sm:$0xff] }
 0x53e   : > { %v6207_v26 = vrot.slane %v16109_v16, 4  ;;  %v16543_v46 = vsel %vm4902_vm0, %v6209_v34, %v6211_v13  ;;  %v19782_v35 = vpack.c.bf16 %v19780_v38, %v19781_v54  ;;  %v19783_v48 = vpack.c.bf16 %v16409_v47, %v16406_v62  ;;  %vm19832_vm3 = vmmov %vm19750_vm1 }
 0x53f   : > { %6675 = vmatmul.mubr.bf16.gmra.mrb[36].mxu0 %v19779_v21  ;;  %v16553_v42 = vsel %vm4902_vm0, %v6195_v31, %v6197_v25  ;;  %v16556_v24 = vsel %vm4902_vm0, %v6197_v25, %v6199_v30  ;;  %v16559_v16 = vsel %vm4902_vm0, %v6199_v30, %v6201_v27  ;;  %v6215_v21 = vrot.slane %v16186_v59, 4  ;;  %vm19833_vm7 = vmmov %vm19750_vm1 }
 0x540   : > { %6682 = vmatprep.mubr.bf16.mxu0 %v19783_v48  ;;  %v19784_v10 = vpack.c.bf16 %v16419_v33, %v16416_v12  ;;  %v6291_v62 = vpack.c.bf16 %v16535_v23, %v16559_v16  ;;  %v16570_v47 = vsel %vm4902_vm0, %v6203_v43, %v6205_v14  ;;  %v16573_v25 = vsel %vm4902_vm0, %v6205_v14, %v6207_v26  ;;  %v12527_v23 = vld [vmem:[%s18563_s15 + $0x50] sm:$0xff]   ;;  %v12530_v16 = vld [vmem:[%s18563_s15 + $0x18] sm:$0xff]   ;;  %vm19836_vm11 = vmmov %vm19750_vm1 }
 0x541   : > { %6819 = vmatmul.mubr.bf16.gmra.mrb[40].mxu1 %v19782_v35  ;;  %v6286_v35 = vpack.c.bf16 %v16556_v24, %v16553_v42  ;;  %v16576_v27 = vsel %vm4902_vm0, %v6207_v26, %v6209_v34  ;;  %v6296_v31 = vpack.c.bf16 %v16573_v25, %v16570_v47  ;;  %v16581_v12 = vsel %vm4902_vm0, %v6211_v13, %v6213_v39  ;;  %v12528_v42 = vld [vmem:[%s18563_s15 + $0x10] sm:$0xff]   ;;  %vm19837_vm4 = vmmov %vm19750_vm1 }
 0x542   : > { %6826 = vmatprep.mubr.bf16.mxu1 %v19784_v10  ;;  %v16584_v33 = vsel %vm4902_vm0, %v6213_v39, %v6215_v21  ;;  %v6301_v38 = vpack.c.bf16 %v16543_v46, %v16576_v27  ;;  %v16589_v43 = vsel %vm4902_vm0, %v6215_v21, %v6217_v9  ;;  %v16592_v14 = vsel %vm4902_vm0, %v6217_v9, %v6219_v50  ;;  %v12529_v46 = vld [vmem:[%s18563_s15 + $0x58] sm:$0xff]   ;;  %v12533_v27 = vld [vmem:[%s18563_s15 + $0x68] sm:$0xff]   ;;  %vm19840_vm15 = vmmov %vm19773_vm13 }
 0x543   : > { %v6306_v26 = vpack.c.bf16 %v16584_v33, %v16581_v12  ;;  %v6311_v34 = vpack.c.bf16 %v16592_v14, %v16589_v43  ;;  %v6221_v13 = vrot.slane %v16270_v0, 4  ;;  %v6223_v39 = vrot.slane %v16255_v55, 4  ;;  %vm19841_vm6 = vmmov %vm19773_vm13 }
 0x544   : > { %v16601_v30 = vsel %vm4902_vm0, %v6225_v11, %v6227_v44  ;;  %v6229_v54 = vrot.slane %v16340_v5, 4  ;;  %v6231_v48 = vrot.slane %v16308_v19, 4  ;;  %v19785_v47 = vpack.c.bf16 %v16193_v29, %v16186_v59  ;;  %vm19842_vm5 = vmmov %vm19841_vm6 }
 0x545   : > { %v6222_v9 = vsel %vm4902_vm0, %v6219_v50, %v6221_v13  ;;  %v6224_v21 = vsel %vm4902_vm0, %v6221_v13, %v6223_v39  ;;  %v6226_v10 = vsel %vm4902_vm0, %v6223_v39, %v6225_v11  ;;  %v19786_v14 = vpack.c.bf16 %v16295_v7, %v16222_v58  ;;  %vm19843_vm13 = vmmov %vm19842_vm5 }
 0x546   : > { %v6316_v25 = vpack.c.bf16 %v6224_v21, %v6222_v9  ;;  %v6321_v12 = vpack.c.bf16 %v16601_v30, %v6226_v10  ;;  %v6230_v33 = vsel %vm4902_vm0, %v6227_v44, %v6229_v54  ;;  %v6232_v43 = vsel %vm4902_vm0, %v6229_v54, %v6231_v48  ;;  %v12524_v54 = vld [vmem:[%s18563_s15] sm:$0xff]  }
 0x547   : > { %6683 = vmatmul.mubr.bf16.gmra.mrb[40].mxu0 %v19785_v47  ;;  %v19787_v50 = vpack.c.bf16 %v16427_v56, %v16422_v8  ;;  %v6234_v11 = vsel %vm4902_vm0, %v6231_v48, %v6233_v22  ;;  %v6326_v13 = vpack.c.bf16 %v6232_v43, %v6230_v33  ;;  %v19788_v59 = vpack.c.bf16 %v16433_v40, %v16430_v45  ;;  %v19803_v45 = vld [vmem:[#allocation115_spill] sm:$0xff]  ;;  %v16729_v10 = vld [vmem:[%s18562_s14] ss:$0 sm:$0xff] }
 0x548   : > { %v19789_v29 = vpack.c.bf16 %v16270_v0, %v16263_v57  ;;  %v19790_v44 = vpack.c.bf16 %v16306_v63, %v16303_v49  ;;  %v19791_v58 = vpack.c.bf16 %v16449_v60, %v16446_v17  ;;  %v19792_v7 = vpack.c.bf16 %v16459_v15, %v16456_v20  ;;  %v19805_v60 = vld [vmem:[#allocation17_spill] sm:$0xff]  ;;  %v19809_v48 = vld [vmem:[#allocation99_spill] sm:$0xff] }
 0x549   : > { %6827 = vmatmul.mubr.bf16.gmra.mrb[44].mxu1 %v19786_v14  ;;  %6690 = vmatprep.mubr.bf16.mxu0 %v19787_v50  ;;  %v19793_v8 = vpack.c.bf16 %v16266_v2, %v16255_v55  ;;  %v19794_v57 = vpack.c.bf16 %v16336_v53, %v16298_v3  ;;  %v19795_v0 = vpack.c.bf16 %v16470_v18, %v16462_v28  ;;  %v19798_v2 = vld [vmem:[#allocation103_spill] sm:$0xff]  ;;  %v19800_v18 = vld [vmem:[#allocation106_spill] sm:$0xff]  ;;  %vm19838_vm1 = vcmask 1045504  }
 0x54a   : > { %6834 = vmatprep.mubr.bf16.mxu1 %v19788_v59  ;;  %v19796_v49 = vpack.c.bf16 %v16476_v37, %v16473_v4  ;;  %v6328_v15 = vpack.c.bf16 %v16499_v52, %v16499_v52  ;;  %v19797_v63 = vpack.c.bf16 %v16340_v5, %v16313_v36  ;;  %v6330_v55 = vpack.c.bf16 %v16502_v61, %v16502_v61  ;;  %v19801_v4 = vld [vmem:[#allocation79_spill] sm:$0xff]  ;;  %vm19839_vm9 = vmmov %vm19838_vm1 }
 0x54b   : > { %v6181_v53 = vrot.slane %v19798_v2, 4  ;;  %v19799_v28 = vpack.c.bf16 %v16365_v1, %v16362_v41  ;;  %v6180_v3 = vrot.slane %v19800_v18, 4  ;;  %v19802_v56 = vrot.slane %v19801_v4, 4  ;;  %v19804_v41 = vld [vmem:[#allocation114_spill] sm:$0xff]  ;;  %vm19844_vm10 = vmmov %vm19838_vm1 }
 0x54c   : > { %v6327_v36 = vpack.c.bf16 %v16308_v19, %v16308_v19  ;;  %v6329_v40 = vpack.c.bf16 %v19803_v45, %v19803_v45  ;;  %v6189_v1 = vrot.slane %v19804_v41, 4  ;;  %v19806_v37 = vrot.slane %v19805_v60, 4  ;;  %v12523_v19 = vld [vmem:[%s18563_s15 + $0x40] sm:$0xff]   ;;  %v12541_v41 = vld [vmem:[%s18563_s15 + $0xd0] sm:$0xff]  }
 0x54d   : > { %v6182_v20 = vsel %vm4902_vm0, %v6180_v3, %v6181_v53  ;;  %v6184_v5 = vsel %vm4902_vm0, %v6181_v53, %v19802_v56  ;;  %v19807_v52 = vrot.slane %v19775_v6, 4  ;;  %11400 = vmatprep.subr.bf16.mxu1 %v12523_v19  ;;  %v19808_v30 = vpack.c.bf16 %v16495_v51, %v16517_v32  ;;  %v19810_v6 = vld [vmem:[#allocation118_spill] sm:$0xff]  ;;  %v12536_v56 = vld [vmem:[%s18563_s15 + $0x70] sm:$0xff]  }
 0x54e   : > { %v6266_v17 = vpack.c.bf16 %v6184_v5, %v6182_v20  ;;  %v6190_v61 = vsel %vm4902_vm0, %v19806_v37, %v6189_v1  ;;  %11401 = vmatpush3.bf16.msra.mxu1 %v12524_v54  ;;  %v19811_v9 = vpack.c.bf16 %v19809_v48, %v19810_v6  ;;  %v12525_v51 = vld [vmem:[%s18563_s15 + $0x48] sm:$0xff]   ;;  %v6331_v24 = vpack.c.bf16 %v6234_v11, %v6234_v11  ;;  %v12537_v5 = vld [vmem:[%s18563_s15 + $0x80] sm:$0xff]   ;;  %v12542_v19 = vld [vmem:[%s18563_s15 + $0x90] sm:$0xff]  }
 0x54f   : > { %6691 = vmatmul.mubr.bf16.gmra.mrb[44].mxu0 %v19789_v29  ;;  %v6192_v22 = vsel %vm4902_vm0, %v6189_v1, %v19807_v52  ;;  %v12526_v32 = vld [vmem:[%s18563_s15 + $0x8] sm:$0xff]   ;;  %11402 = vmatprep.subr.bf16.mxu1 %v12525_v51  ;;  %v12543_v48 = vld [vmem:[%s18563_s15 + $0xd8] sm:$0xff]  }
 0x550   : > { %6698 = vmatprep.mubr.bf16.mxu0 %v19791_v58  ;;  %v6276_v39 = vpack.c.bf16 %v6192_v22, %v6190_v61 }
 0x551   : > { %6835 = vmatmul.mubr.bf16.gmra.mrb[48].mxu1 %v19790_v44 }
 0x552   : > { %6842 = vmatprep.mubr.bf16.mxu1 %v19792_v7  ;;  %11403 = vmatpush3.bf16.msra.mxu1 %v12526_v32 }
 0x553   : > { %11404 = vmatprep.subr.bf16.mxu1 %v12527_v23  ;;  %v12545_v23 = vld [vmem:[%s18563_s15 + $0x78] sm:$0xff]  }
 0x556   : > { %11405 = vmatpush3.bf16.msra.mxu1 %v12528_v42  ;;  %v12546_v42 = vld [vmem:[%s18563_s15 + $0x38] sm:$0xff]  }
 0x557   : > { %6699 = vmatmul.mubr.bf16.gmra.mrb[48].mxu0 %v19793_v8  ;;  %11406 = vmatprep.subr.bf16.mxu1 %v12529_v46  ;;  %v12535_v8 = vld [vmem:[%s18563_s15 + $0xc0] sm:$0xff]  }
 0x558   : > { %6706 = vmatprep.mubr.bf16.mxu0 %v19795_v0  ;;  %11494 = vmatprep.subr.bf16.mxu0 %v12535_v8 }
 0x559   : > { %6843 = vmatmul.mubr.bf16.gmra.mrb[52].mxu1 %v19794_v57 }
 0x55a   : > { %6850 = vmatprep.mubr.bf16.mxu1 %v19796_v49  ;;  %11407 = vmatpush3.bf16.msra.mxu1 %v12530_v16  ;;  %v12544_v16 = vld [vmem:[%s18563_s15 + $0x98] sm:$0xff]  }
 0x55f   : > { %6707 = vmatmul.mubr.bf16.gmra.mrb[52].mxu0 %v19797_v63 }
 0x560   : > { %6714 = vmatprep.mubr.bf16.mxu0 %v6328_v15 }
 0x561   : > { %6851 = vmatmul.mubr.bf16.gmra.mrb[56].mxu1 %v19799_v28 }
 0x562   : > { %6858 = vmatprep.mubr.bf16.mxu1 %v6330_v55 }
 0x567   : > { %6715 = vmatmul.mubr.bf16.gmra.mrb[56].mxu0 %v6327_v36  ;;  %v12538_v36 = vld [vmem:[%s18563_s15 + $0x30] sm:$0xff]  }
 0x568   : > { %12109 = vmatprep.mubr.bf16.mxu0 %v6266_v17  ;;  %v12540_v17 = vld [vmem:[%s18563_s15 + $0x88] sm:$0xff]  }
 0x569   : > { %6859 = vmatmul.mubr.bf16.gmra.mrb[60].mxu1 %v6329_v40  ;;  %v12539_v40 = vld [vmem:[%s18563_s15 + $0xc8] sm:$0xff]  }
 0x56f   : > { %12110 = vmatmul.mubr.bf16.vlgmr.msra.gmra.mrb[60].mxu0 %v19808_v30 }
 0x570   : > { %12113 = vmatprep.mubr.bf16.mxu0 %v6276_v39  ;;  %11495 = vmatpush3.bf16.msra.mxu0 %v12537_v5 }
 0x571   : > { %11496 = vmatprep.subr.bf16.mxu0 %v12539_v40 }
 0x574   : > { %11497 = vmatpush3.bf16.msra.mxu0 %v12540_v17  ;;  %v12554_v17 = vld [vmem:[%s18563_s15 + $0xb8] sm:$0xff]  }
 0x575   : > { %11498 = vmatprep.subr.bf16.mxu0 %v12541_v41 }
 0x577   : > { %12114 = vmatmul.mubr.bf16.gmra.mrb[64].mxu0 %v19811_v9 }
 0x578   : > { %12117 = vmatprep.mubr.bf16.mxu0 %v6286_v35  ;;  %v12531_v35 = vld [vmem:[%s18563_s15 + $0x60] sm:$0xff]   ;;  %11499 = vmatpush3.bf16.msra.mxu0 %v12542_v19 }
 0x579   : > { %11408 = vmatprep.subr.bf16.mxu1 %v12531_v35  ;;  %11500 = vmatprep.subr.bf16.mxu0 %v12543_v48  ;;  %v12547_v35 = vld [vmem:[%s18563_s15 + $0xe0] sm:$0xff]  }
 0x57c   : > { %11501 = vmatpush3.bf16.msra.mxu0 %v12544_v16 }
 0x57d   : > { %11502 = vmatprep.subr.bf16.mxu0 %v12547_v35 }
 0x57f   : > { %12118 = vmatmul.mubr.bf16.gmra.mrb[68].mxu0 %v6291_v62  ;;  %v12532_v62 = vld [vmem:[%s18563_s15 + $0x20] sm:$0xff]  }
 0x580   : > { %12121 = vmatprep.mubr.bf16.mxu0 %v6296_v31  ;;  %11409 = vmatpush3.bf16.msra.mxu1 %v12532_v62  ;;  %v12534_v31 = vld [vmem:[%s18563_s15 + $0x28] sm:$0xff]  }
 0x581   : > { %11410 = vmatprep.subr.bf16.mxu1 %v12533_v27 }
 0x584   : > { %11411 = vmatpush3.bf16.msra.mxu1 %v12534_v31 }
 0x585   : > { %11412 = vmatprep.subr.bf16.mxu1 %v12536_v56 }
 0x587   : > { %12122 = vmatmul.mubr.bf16.gmra.mrb[72].mxu0 %v6301_v38 }
 0x588   : > { %12125 = vmatprep.mubr.bf16.mxu0 %v6306_v26  ;;  %11413 = vmatpush3.bf16.msra.mxu1 %v12538_v36 }
 0x589   : > { %11414 = vmatprep.subr.bf16.mxu1 %v12545_v23 }
 0x58c   : > { %11415 = vmatpush3.bf16.msra.mxu1 %v12546_v42 }
 0x58f   : > { %12126 = vmatmul.mubr.bf16.gmra.mrb[76].mxu0 %v6311_v34 }
 0x590   : > { %12129 = vmatprep.mubr.bf16.mxu0 %v6316_v25 }
 0x597   : > { %12130 = vmatmul.mubr.bf16.gmra.mrb[80].mxu0 %v6321_v12 }
 0x598   : > { %12133 = vmatprep.mubr.bf16.mxu0 %v6326_v13 }
 0x59f   : > { %12134 = vmatmul.mubr.bf16.gmra.mrb[84].mxu0 %v6331_v24 }
 0x5c6   : > { %v11194_v38 = vpop.f32.mrb[4].mxu0 }
 0x5c7   : > { %v11195_v26 = vpop.f32.mrb[5].mxu0 }
 0x5c8   : > { %v11196_v34 = vadd.f32 %v11195_v26, %v11194_v38  ;;  %v11197_v21 = vpop.f32.mrb[6].mxu0  ;;  %v19812_v38 = vmov 0.0  }
 0x5c9   : > { %v11198_v47 = vpop.f32.mrb[7].mxu0  ;;  %12137 = vmatprep.subr.bf16.mxu1 %v19812_v38 }
 0x5ca   : > { %v11199_v25 = vadd.f32 %v11198_v47, %v11197_v21  ;;  %v6613_v33 = vadd.f32 %v11196_v34, %v16729_v10  ;;  %v12548_v21 = vld [vmem:[%s18563_s15 + $0xa0] sm:$0xff]  }
 0x5cb   : > { %v11294_v12 = vpop.f32.mrb[8].mxu1  ;;  %11503 = vmatpush3.bf16.msra.mxu0 %v12548_v21 }
 0x5cc   : > { %v11295_v43 = vpop.f32.mrb[9].mxu1  ;;  %v6616_v11 = vadd.f32 %v11199_v25, %v16729_v10 }
 0x5cd   : > { %v11296_v14 = vadd.f32 %v11295_v43, %v11294_v12  ;;  %v11297_v50 = vpop.f32.mrb[10].mxu1  ;;  %v12549_v12 = vld [vmem:[%s18563_s15 + $0xe8] sm:$0xff]  }
 0x5ce   : > { %v11298_v13 = vpop.f32.mrb[11].mxu1  ;;  %11504 = vmatprep.subr.bf16.mxu0 %v12549_v12 }
 0x5cf   : > { %v11299_v59 = vadd.f32 %v11298_v13, %v11297_v50  ;;  %v16733_v29 = vadd.f32 %v11296_v14, %v6613_v33 }
 0x5d1   : > { %v11200_v44 = vpop.f32.mrb[8].mxu0  ;;  %v16735_v58 = vadd.f32 %v11299_v59, %v6616_v11 }
 0x5d2   : > { %v11201_v7 = vpop.f32.mrb[9].mxu0 }
 0x5d3   : > { %v11300_v57 = vpop.f32.mrb[12].mxu1  ;;  %v11202_v0 = vadd.f32 %v11201_v7, %v11200_v44  ;;  %v11203_v49 = vpop.f32.mrb[10].mxu0  ;;  %v12550_v44 = vld [vmem:[%s18563_s15 + $0xa8] sm:$0xff]  }
 0x5d4   : > { %v11301_v15 = vpop.f32.mrb[13].mxu1  ;;  %v11204_v63 = vpop.f32.mrb[11].mxu0  ;;  %11505 = vmatpush3.bf16.msra.mxu0 %v12550_v44 }
 0x5d5   : > { %v6621_v55 = vadd.f32 %v11202_v0, %v16729_v10  ;;  %v11302_v2 = vadd.f32 %v11301_v15, %v11300_v57  ;;  %v11303_v53 = vpop.f32.mrb[14].mxu1  ;;  %v11205_v28 = vadd.f32 %v11204_v63, %v11203_v49  ;;  %v12551_v57 = vld [vmem:[%s18563_s15 + $0xf0] sm:$0xff]  }
 0x5d6   : > { %v11304_v18 = vpop.f32.mrb[15].mxu1  ;;  %v12552_v63 = vld [vmem:[%s18563_s15 + $0xb0] sm:$0xff]   ;;  %11506 = vmatprep.subr.bf16.mxu0 %v12551_v57 }
 0x5d7   : > { %v6624_v3 = vadd.f32 %v11205_v28, %v16729_v10  ;;  %v11305_v20 = vadd.f32 %v11304_v18, %v11303_v53  ;;  %v16742_v4 = vadd.f32 %v11302_v2, %v6621_v55  ;;  %v12553_v28 = vld [vmem:[%s18563_s15 + $0xf8] sm:$0xff]  }
 0x5d8   : > { %11507 = vmatpush3.bf16.msra.mxu0 %v12552_v63 }
 0x5d9   : > { %v16753_v45 = vadd.f32 %v11305_v20, %v6624_v3  ;;  %11508 = vmatprep.subr.bf16.mxu0 %v12553_v28 }
 0x5dc   : > { %11509 = vmatpush3.bf16.msra.mxu0 %v12554_v17 }
 0x5dd   : > { %v11206_v1 = vpop.f32.mrb[12].mxu0  ;;  %v11306_v60 = vpop.f32.mrb[16].mxu1 }
 0x5de   : > { %v11207_v37 = vpop.f32.mrb[13].mxu0  ;;  %v11307_v52 = vpop.f32.mrb[17].mxu1 }
 0x5df   : > { %v11208_v61 = vadd.f32 %v11207_v37, %v11206_v1  ;;  %v11209_v22 = vpop.f32.mrb[14].mxu0  ;;  %v11308_v39 = vadd.f32 %v11307_v52, %v11306_v60  ;;  %v11309_v30 = vpop.f32.mrb[18].mxu1 }
 0x5e0   : > { %v11210_v54 = vpop.f32.mrb[15].mxu0  ;;  %v11310_v51 = vpop.f32.mrb[19].mxu1 }
 0x5e1   : > { %v6629_v6 = vadd.f32 %v11208_v61, %v16729_v10  ;;  %v11211_v9 = vadd.f32 %v11210_v54, %v11209_v22  ;;  %v11311_v32 = vadd.f32 %v11310_v51, %v11309_v30 }
 0x5e3   : > { %v6632_v24 = vadd.f32 %v11211_v9, %v16729_v10  ;;  %v16778_v46 = vadd.f32 %v11308_v39, %v6629_v6 }
 0x5e5   : > { %v11212_v62 = vpop.f32.mrb[16].mxu0  ;;  %v16786_v27 = vadd.f32 %v11311_v32, %v6632_v24 }
 0x5e6   : > { %v11213_v31 = vpop.f32.mrb[17].mxu0  ;;  %v11312_v47 = vpop.f32.mrb[20].mxu1 }
 0x5e7   : > { %v11214_v26 = vadd.f32 %v11213_v31, %v11212_v62  ;;  %v11215_v34 = vpop.f32.mrb[18].mxu0  ;;  %v11313_v43 = vpop.f32.mrb[21].mxu1 }
 0x5e8   : > { %v11216_v25 = vpop.f32.mrb[19].mxu0  ;;  %v11314_v50 = vadd.f32 %v11313_v43, %v11312_v47  ;;  %v11315_v11 = vpop.f32.mrb[22].mxu1 }
 0x5e9   : > { %v6637_v33 = vadd.f32 %v11214_v26, %v16729_v10  ;;  %v11217_v14 = vadd.f32 %v11216_v25, %v11215_v34  ;;  %v11316_v59 = vpop.f32.mrb[23].mxu1 }
 0x5ea   : > { %v11317_v7 = vadd.f32 %v11316_v59, %v11315_v11 }
 0x5eb   : > { %v6640_v13 = vadd.f32 %v11217_v14, %v16729_v10  ;;  %v16800_v8 = vadd.f32 %v11314_v50, %v6637_v33 }
 0x5ed   : > { %v16805_v49 = vadd.f32 %v11317_v7, %v6640_v13 }
 0x5ee   : > { %v11218_v0 = vpop.f32.mrb[20].mxu0 }
 0x5ef   : > { %v11219_v15 = vpop.f32.mrb[21].mxu0 }
 0x5f0   : > { %v11318_v55 = vpop.f32.mrb[24].mxu1  ;;  %v11220_v2 = vadd.f32 %v11219_v15, %v11218_v0  ;;  %v11221_v53 = vpop.f32.mrb[22].mxu0 }
 0x5f1   : > { %v11319_v18 = vpop.f32.mrb[25].mxu1  ;;  %v11222_v3 = vpop.f32.mrb[23].mxu0 }
 0x5f2   : > { %v6645_v20 = vadd.f32 %v11220_v2, %v16729_v10  ;;  %v11320_v56 = vadd.f32 %v11319_v18, %v11318_v55  ;;  %v11321_v5 = vpop.f32.mrb[26].mxu1  ;;  %v11223_v36 = vadd.f32 %v11222_v3, %v11221_v53 }
 0x5f3   : > { %v11322_v40 = vpop.f32.mrb[27].mxu1 }
 0x5f4   : > { %v6648_v41 = vadd.f32 %v11223_v36, %v16729_v10  ;;  %v11323_v1 = vadd.f32 %v11322_v40, %v11321_v5  ;;  %v16818_v60 = vadd.f32 %v11320_v56, %v6645_v20 }
 0x5f6   : > { %v16820_v37 = vadd.f32 %v11323_v1, %v6648_v41 }
 0x5f8   : > { %v11224_v61 = vpop.f32.mrb[24].mxu0 }
 0x5f9   : > { %v11225_v22 = vpop.f32.mrb[25].mxu0 }
 0x5fa   : > { %v11226_v19 = vadd.f32 %v11225_v22, %v11224_v61  ;;  %v11227_v30 = vpop.f32.mrb[26].mxu0 }
 0x5fb   : > { %v11228_v6 = vpop.f32.mrb[27].mxu0 }
 0x5fc   : > { %v11324_v52 = vpop.f32.mrb[28].mxu1  ;;  %v6653_v9 = vadd.f32 %v11226_v19, %v16729_v10  ;;  %v11229_v51 = vadd.f32 %v11228_v6, %v11227_v30 }
 0x5fd   : > { %v11325_v39 = vpop.f32.mrb[29].mxu1 }
 0x5fe   : > { %v11326_v54 = vadd.f32 %v11325_v39, %v11324_v52  ;;  %v11327_v48 = vpop.f32.mrb[30].mxu1  ;;  %v6656_v42 = vadd.f32 %v11229_v51, %v16729_v10 }
 0x5ff   : > { %v11328_v32 = vpop.f32.mrb[31].mxu1 }
 0x600   : > { %v11329_v23 = vadd.f32 %v11328_v32, %v11327_v48  ;;  %v16824_v24 = vadd.f32 %v11326_v54, %v6653_v9 }
 0x602   : > { %v11230_v16 = vpop.f32.mrb[28].mxu0  ;;  %v16826_v35 = vadd.f32 %v11329_v23, %v6656_v42 }
 0x603   : > { %v11231_v31 = vpop.f32.mrb[29].mxu0 }
 0x604   : > { %v11330_v62 = vpop.f32.mrb[32].mxu1  ;;  %v11232_v26 = vadd.f32 %v11231_v31, %v11230_v16  ;;  %v11233_v21 = vpop.f32.mrb[30].mxu0 }
 0x605   : > { %v11331_v34 = vpop.f32.mrb[33].mxu1  ;;  %v11234_v12 = vpop.f32.mrb[31].mxu0 }
 0x606   : > { %v11332_v47 = vadd.f32 %v11331_v34, %v11330_v62  ;;  %v11333_v25 = vpop.f32.mrb[34].mxu1  ;;  %v6661_v33 = vadd.f32 %v11232_v26, %v16729_v10  ;;  %v11235_v43 = vadd.f32 %v11234_v12, %v11233_v21 }
 0x607   : > { %v11334_v14 = vpop.f32.mrb[35].mxu1 }
 0x608   : > { %v11335_v50 = vadd.f32 %v11334_v14, %v11333_v25  ;;  %v6664_v11 = vadd.f32 %v11235_v43, %v16729_v10  ;;  %v16830_v13 = vadd.f32 %v11332_v47, %v6661_v33 }
 0x60a   : > { %v11236_v59 = vpop.f32.mrb[32].mxu0  ;;  %v16832_v44 = vadd.f32 %v11335_v50, %v6664_v11 }
 0x60b   : > { %v11237_v57 = vpop.f32.mrb[33].mxu0 }
 0x60c   : > { %v11336_v7 = vpop.f32.mrb[36].mxu1  ;;  %v11238_v0 = vadd.f32 %v11237_v57, %v11236_v59  ;;  %v11239_v63 = vpop.f32.mrb[34].mxu0 }
 0x60d   : > { %v11337_v15 = vpop.f32.mrb[37].mxu1  ;;  %v11240_v53 = vpop.f32.mrb[35].mxu0 }
 0x60e   : > { %v11338_v55 = vadd.f32 %v11337_v15, %v11336_v7  ;;  %v11339_v2 = vpop.f32.mrb[38].mxu1  ;;  %v6669_v28 = vadd.f32 %v11238_v0, %v16729_v10  ;;  %v11241_v18 = vadd.f32 %v11240_v53, %v11239_v63 }
 0x60f   : > { %v11340_v3 = vpop.f32.mrb[39].mxu1 }
 0x610   : > { %v11341_v20 = vadd.f32 %v11340_v3, %v11339_v2  ;;  %v6672_v56 = vadd.f32 %v11241_v18, %v16729_v10  ;;  %v16836_v5 = vadd.f32 %v11338_v55, %v6669_v28 }
 0x612   : > { %v11242_v36 = vpop.f32.mrb[36].mxu0  ;;  %v16838_v40 = vadd.f32 %v11341_v20, %v6672_v56 }
 0x613   : > { %v11243_v41 = vpop.f32.mrb[37].mxu0 }
 0x614   : > { %v11342_v17 = vpop.f32.mrb[40].mxu1  ;;  %v11244_v1 = vadd.f32 %v11243_v41, %v11242_v36  ;;  %v11245_v52 = vpop.f32.mrb[38].mxu0 }
 0x615   : > { %v11343_v61 = vpop.f32.mrb[41].mxu1  ;;  %v11246_v39 = vpop.f32.mrb[39].mxu0 }
 0x616   : > { %v11344_v22 = vadd.f32 %v11343_v61, %v11342_v17  ;;  %v11345_v19 = vpop.f32.mrb[42].mxu1  ;;  %v6677_v30 = vadd.f32 %v11244_v1, %v16729_v10  ;;  %v11247_v54 = vadd.f32 %v11246_v39, %v11245_v52 }
 0x617   : > { %v11346_v48 = vpop.f32.mrb[43].mxu1 }
 0x618   : > { %v11347_v6 = vadd.f32 %v11346_v48, %v11345_v19  ;;  %v6680_v9 = vadd.f32 %v11247_v54, %v16729_v10  ;;  %v16842_v51 = vadd.f32 %v11344_v22, %v6677_v30 }
 0x61a   : > { %v11248_v32 = vpop.f32.mrb[40].mxu0  ;;  %v16844_v23 = vadd.f32 %v11347_v6, %v6680_v9 }
 0x61b   : > { %v11249_v16 = vpop.f32.mrb[41].mxu0 }
 0x61c   : > { %v11348_v42 = vpop.f32.mrb[44].mxu1  ;;  %v11250_v62 = vadd.f32 %v11249_v16, %v11248_v32  ;;  %v11251_v26 = vpop.f32.mrb[42].mxu0 }
 0x61d   : > { %v11349_v31 = vpop.f32.mrb[45].mxu1  ;;  %v11252_v47 = vpop.f32.mrb[43].mxu0 }
 0x61e   : > { %v11350_v34 = vadd.f32 %v11349_v31, %v11348_v42  ;;  %v11351_v21 = vpop.f32.mrb[46].mxu1  ;;  %v6685_v25 = vadd.f32 %v11250_v62, %v16729_v10  ;;  %v11253_v12 = vadd.f32 %v11252_v47, %v11251_v26 }
 0x61f   : > { %v11352_v33 = vpop.f32.mrb[47].mxu1 }
 0x620   : > { %v11353_v43 = vadd.f32 %v11352_v33, %v11351_v21  ;;  %v6688_v14 = vadd.f32 %v11253_v12, %v16729_v10  ;;  %v16848_v50 = vadd.f32 %v11350_v34, %v6685_v25 }
 0x622   : > { %v11254_v11 = vpop.f32.mrb[44].mxu0  ;;  %v16850_v59 = vadd.f32 %v11353_v43, %v6688_v14 }
 0x623   : > { %v11255_v57 = vpop.f32.mrb[45].mxu0 }
 0x624   : > { %v11354_v7 = vpop.f32.mrb[48].mxu1  ;;  %v11256_v0 = vadd.f32 %v11255_v57, %v11254_v11  ;;  %v11257_v63 = vpop.f32.mrb[46].mxu0 }
 0x625   : > { %v11355_v15 = vpop.f32.mrb[49].mxu1  ;;  %v11258_v53 = vpop.f32.mrb[47].mxu0 }
 0x626   : > { %v11356_v55 = vadd.f32 %v11355_v15, %v11354_v7  ;;  %v11357_v2 = vpop.f32.mrb[50].mxu1  ;;  %v6693_v28 = vadd.f32 %v11256_v0, %v16729_v10  ;;  %v11259_v18 = vadd.f32 %v11258_v53, %v11257_v63 }
 0x627   : > { %v11358_v3 = vpop.f32.mrb[51].mxu1 }
 0x628   : > { %v11359_v20 = vadd.f32 %v11358_v3, %v11357_v2  ;;  %v6696_v56 = vadd.f32 %v11259_v18, %v16729_v10  ;;  %v16854_v36 = vadd.f32 %v11356_v55, %v6693_v28 }
 0x62a   : > { %v11260_v17 = vpop.f32.mrb[48].mxu0  ;;  %v16856_v41 = vadd.f32 %v11359_v20, %v6696_v56 }
 0x62b   : > { %v11261_v61 = vpop.f32.mrb[49].mxu0 }
 0x62c   : > { %v11360_v1 = vpop.f32.mrb[52].mxu1  ;;  %v11262_v52 = vadd.f32 %v11261_v61, %v11260_v17  ;;  %v11263_v19 = vpop.f32.mrb[50].mxu0 }
 0x62d   : > { %v11361_v22 = vpop.f32.mrb[53].mxu1  ;;  %v11264_v54 = vpop.f32.mrb[51].mxu0 }
 0x62e   : > { %v11362_v39 = vadd.f32 %v11361_v22, %v11360_v1  ;;  %v11363_v30 = vpop.f32.mrb[54].mxu1  ;;  %v6701_v48 = vadd.f32 %v11262_v52, %v16729_v10  ;;  %v11265_v6 = vadd.f32 %v11264_v54, %v11263_v19 }
 0x62f   : > { %v11364_v9 = vpop.f32.mrb[55].mxu1 }
 0x630   : > { %v11365_v32 = vadd.f32 %v11364_v9, %v11363_v30  ;;  %v6704_v42 = vadd.f32 %v11265_v6, %v16729_v10  ;;  %v16860_v16 = vadd.f32 %v11362_v39, %v6701_v48 }
 0x632   : > { %v11266_v62 = vpop.f32.mrb[52].mxu0  ;;  %v16862_v31 = vadd.f32 %v11365_v32, %v6704_v42 }
 0x633   : > { %v11267_v34 = vpop.f32.mrb[53].mxu0 }
 0x634   : > { %v11366_v26 = vpop.f32.mrb[56].mxu1  ;;  %v11268_v21 = vadd.f32 %v11267_v34, %v11266_v62  ;;  %v11269_v25 = vpop.f32.mrb[54].mxu0 }
 0x635   : > { %v11367_v47 = vpop.f32.mrb[57].mxu1  ;;  %v11270_v43 = vpop.f32.mrb[55].mxu0 }
 0x636   : > { %v11368_v12 = vadd.f32 %v11367_v47, %v11366_v26  ;;  %v11369_v33 = vpop.f32.mrb[58].mxu1  ;;  %v6709_v14 = vadd.f32 %v11268_v21, %v16729_v10  ;;  %v11271_v11 = vadd.f32 %v11270_v43, %v11269_v25 }
 0x637   : > { %v11370_v7 = vpop.f32.mrb[59].mxu1 }
 0x638   : > { %v11371_v57 = vadd.f32 %v11370_v7, %v11369_v33  ;;  %v6712_v0 = vadd.f32 %v11271_v11, %v16729_v10  ;;  %v16866_v15 = vadd.f32 %v11368_v12, %v6709_v14  ;;  %v19813_v7 = vld [vmem:[#allocation23_spill] sm:$0xff] }
 0x63a   : > { %v11272_v63 = vpop.f32.mrb[56].mxu0  ;;  %v16868_v55 = vadd.f32 %v11371_v57, %v6712_v0 }
 0x63b   : > { %v11273_v53 = vpop.f32.mrb[57].mxu0 }
 0x63c   : > { %v11372_v2 = vpop.f32.mrb[60].mxu1  ;;  %v11274_v28 = vadd.f32 %v11273_v53, %v11272_v63  ;;  %v11275_v3 = vpop.f32.mrb[58].mxu0 }
 0x63d   : > { %v11373_v18 = vpop.f32.mrb[61].mxu1  ;;  %v11276_v17 = vpop.f32.mrb[59].mxu0 }
 0x63e   : > { %v11374_v20 = vadd.f32 %v11373_v18, %v11372_v2  ;;  %v11375_v56 = vpop.f32.mrb[62].mxu1  ;;  %v6717_v1 = vadd.f32 %v11274_v28, %v16729_v10  ;;  %v19814_v18 = vld [vmem:[#allocation24_spill] sm:$0xff]  ;;  %v19815_v17 = vld [vmem:[#allocation63_spill] sm:$0xff] }
 0x63f   : > { %v11376_v61 = vpop.f32.mrb[63].mxu1 }
 0x640   : > { %v16871_v52 = vadd.f32 %v11374_v20, %v6717_v1  ;;  %v19816_v61 = vld [vmem:[#allocation127_spill] sm:$0xff] }
 0x642   : > { %v12111_v22 = vpop.f32.mrb[60].mxu0 }
 0x643   : > { %v6909_v19 = vadd.f32 %v12111_v22, %v16742_v4  ;;  %v6900_v39 = vpop.f32.mrb[61].mxu0 }
 0x644   : > { %v6901_v30 = vadd.f32 %v6900_v39, %v16733_v29  ;;  %v12112_v54 = vpop.f32.mrb[62].mxu0 }
 0x645   : > { %v7012_v48 = vmul.f32 0.1, %v6909_v19  ;;  %v6912_v6 = vadd.f32 %v12112_v54, %v16753_v45  ;;  %v6903_v9 = vpop.f32.mrb[63].mxu0  ;;  %v19817_v54 = vld [vmem:[#allocation25_spill] sm:$0xff] }
 0x646   : > { %v7010_v32 = vmul.f32 0.1, %v6901_v30  ;;  %v6904_v42 = vadd.f32 %v6903_v9, %v16735_v58 }
 0x647   : > { %v7039_v62 = vmax.f32 %v6909_v19, %v7012_v48  ;;  %v7013_v26 = vmul.f32 0.1, %v6912_v6 }
 0x648   : > { %v7037_v10 = vmax.f32 %v6901_v30, %v7010_v32  ;;  %v7011_v34 = vmul.f32 0.1, %v6904_v42 }
 0x649   : > { %v7040_v21 = vmax.f32 %v6912_v6, %v7013_v26  ;;  %v7094_v4 = vrot.slane %v7039_v62, 4 }
 0x64a   : > { %v7091_v47 = vrot.slane %v7037_v10, 4  ;;  %v7038_v25 = vmax.f32 %v6904_v42, %v7011_v34  ;;  %v12115_v12 = vpop.f32.mrb[64].mxu0 }
 0x64b   : > { %v7096_v33 = vrot.slane %v7040_v21, 4  ;;  %v6925_v29 = vadd.f32 %v12115_v12, %v16800_v8  ;;  %v6916_v43 = vpop.f32.mrb[65].mxu0 }
 0x64c   : > { %v7092_v14 = vrot.slane %v7038_v25, 4  ;;  %v6917_v45 = vadd.f32 %v6916_v43, %v16778_v46  ;;  %v12116_v11 = vpop.f32.mrb[66].mxu0  ;;  %v7172_v57 = vadd.f32 %v7091_v47, %v19813_v7 }
 0x64d   : > { %v7097_v58 = vsel %vm4902_vm0, %v7094_v4, %v7096_v33  ;;  %v7016_v0 = vmul.f32 0.1, %v6925_v29  ;;  %v6928_v63 = vadd.f32 %v12116_v11, %v16805_v49  ;;  %v6919_v2 = vpop.f32.mrb[67].mxu0 }
 0x64e   : > { %v7093_v53 = vsel %vm4902_vm0, %v7091_v47, %v7092_v14  ;;  %v7095_v28 = vsel %vm4902_vm0, %v7092_v14, %v7094_v4  ;;  %v7014_v20 = vmul.f32 0.1, %v6917_v45  ;;  %v6920_v46 = vadd.f32 %v6919_v2, %v16786_v27 }
 0x64f   : > { %v7173_v3 = vadd.f32 %v7093_v53, %v19814_v18  ;;  %v7043_v8 = vmax.f32 %v6925_v29, %v7016_v0  ;;  %v7017_v56 = vmul.f32 0.1, %v6928_v63  ;;  %v16887_v1 = vmul.f32 %v19815_v17, %v7172_v57  ;;  %v19818_v29 = vld [vmem:[#allocation128_spill] sm:$0xff] }
 0x650   : > { %v7041_v19 = vmax.f32 %v6917_v45, %v7014_v20  ;;  %v7015_v39 = vmul.f32 0.1, %v6920_v46  ;;  %v7174_v48 = vadd.f32 %v7095_v28, %v19817_v54 }
 0x651   : > { %v16890_v22 = vmul.f32 %v19816_v61, %v7173_v3  ;;  %v7044_v49 = vmax.f32 %v6928_v63, %v7017_v56  ;;  %v7102_v9 = vrot.slane %v7043_v8, 4  ;;  %v7417_v57 = vrot.slane %v16887_v1, 3 }
 0x652   : > { %v12119_v30 = vpop.f32.mrb[68].mxu0  ;;  %v7098_v32 = vrot.slane %v7041_v19, 4  ;;  %v7042_v27 = vmax.f32 %v6920_v46, %v7015_v39  ;;  %v16901_v43 = vmul.f32 %v19818_v29, %v7174_v48  ;;  %v19820_v19 = vld [vmem:[#allocation28_spill] sm:$0xff] }
 0x653   : > { %v7730_v6 = vpack.c.bf16 %v16890_v22, %v16887_v1  ;;  %v6932_v42 = vpop.f32.mrb[69].mxu0  ;;  %v7104_v62 = vrot.slane %v7044_v49, 4  ;;  %v6941_v26 = vadd.f32 %v12119_v30, %v16824_v24  ;;  %v7496_v53 = vrot.slane %v16890_v22, 6 }
 0x654   : > { %v6933_v10 = vadd.f32 %v6932_v42, %v16818_v60  ;;  %v12120_v34 = vpop.f32.mrb[70].mxu0  ;;  %v7099_v21 = vsel %vm4902_vm0, %v7096_v33, %v7098_v32  ;;  %v7100_v4 = vrot.slane %v7042_v27, 4  ;;  %v19819_v33 = vld [vmem:[#allocation27_spill] sm:$0xff]  ;;  %v7497_v28 = vrot.slane %v16901_v43, 6  ;;  %v19821_v42 = vld [vmem:[#allocation129_spill] sm:$0xff] }
 0x655   : > { %v6944_v47 = vadd.f32 %v12120_v34, %v16826_v35  ;;  %v6935_v25 = vpop.f32.mrb[71].mxu0  ;;  %v7105_v12 = vsel %vm4902_vm0, %v7102_v9, %v7104_v62  ;;  %v7020_v14 = vmul.f32 0.1, %v6941_v26  ;;  %v7175_v0 = vadd.f32 %v7097_v58, %v19819_v33 }
 0x656   : > { %v7018_v45 = vmul.f32 0.1, %v6933_v10  ;;  %v7101_v7 = vsel %vm4902_vm0, %v7098_v32, %v7100_v4  ;;  %v7103_v24 = vsel %vm4902_vm0, %v7100_v4, %v7102_v9  ;;  %v6936_v3 = vadd.f32 %v6935_v25, %v16820_v37  ;;  %v19824_v25 = vld [vmem:[#allocation37_spill] sm:$0xff] }
 0x657   : > { %v7021_v11 = vmul.f32 0.1, %v6944_v47  ;;  %v7047_v60 = vmax.f32 %v6941_v26, %v7020_v14  ;;  %v7176_v58 = vadd.f32 %v7099_v21, %v19820_v19  ;;  %v7418_v54 = vrot.slane %v16890_v22, 3 }
 0x658   : > { %v7045_v35 = vmax.f32 %v6933_v10, %v7018_v45  ;;  %v7019_v49 = vmul.f32 0.1, %v6936_v3  ;;  %v16918_v27 = vmul.f32 %v19821_v42, %v7175_v0  ;;  %v7177_v4 = vadd.f32 %v7101_v7, %v19824_v25  ;;  %v19825_v45 = vld [vmem:[#allocation43_spill] sm:$0xff] }
 0x659   : > { %v7048_v63 = vmax.f32 %v6944_v47, %v7021_v11  ;;  %v7110_v18 = vrot.slane %v7047_v60, 4  ;;  %v7419_v21 = vsel %vm19822_vm8, %v7417_v57, %v7418_v54  ;;  %v7178_v11 = vadd.f32 %v7103_v24, %v19825_v45  ;;  %v19834_v45 = vld [vmem:[#allocation134_spill] sm:$0xff]  ;;  %vm19846_vm8 = vmmov %vm19838_vm1 }
 0x65a   : > { %v12123_v2 = vpop.f32.mrb[72].mxu0  ;;  %v7106_v20 = vrot.slane %v7045_v35, 4  ;;  %v7420_v0 = vrot.slane %v16901_v43, 3  ;;  %v7499_v7 = vrot.slane %v16918_v27, 6 }
 0x65b   : > { %v6948_v8 = vpop.f32.mrb[73].mxu0  ;;  %v7112_v56 = vrot.slane %v7048_v63, 4  ;;  %v6957_v46 = vadd.f32 %v12123_v2, %v16836_v5  ;;  %v7046_v5 = vmax.f32 %v6936_v3, %v7019_v49 }
 0x65c   : > { %v6949_v17 = vadd.f32 %v6948_v8, %v16830_v13  ;;  %v12124_v61 = vpop.f32.mrb[74].mxu0  ;;  %v7107_v48 = vsel %vm4902_vm0, %v7104_v62, %v7106_v20  ;;  %v7498_v13 = vsel %vm2782_vm14, %v7496_v53, %v7497_v28  ;;  %v19823_v62 = vld [vmem:[#allocation130_spill] sm:$0xff] }
 0x65d   : > { %v6960_v39 = vadd.f32 %v12124_v61, %v16838_v40  ;;  %v6951_v30 = vpop.f32.mrb[75].mxu0  ;;  %v7113_v37 = vsel %vm4902_vm0, %v7110_v18, %v7112_v56  ;;  %v7024_v9 = vmul.f32 0.1, %v6957_v46  ;;  %v16926_v47 = vmul.f32 %v19823_v62, %v7176_v58  ;;  %v19826_v61 = vld [vmem:[#allocation44_spill] sm:$0xff] }
 0x65e   : > { %v7022_v32 = vmul.f32 0.1, %v6949_v17  ;;  %v6952_v34 = vadd.f32 %v6951_v30, %v16832_v44  ;;  %v7108_v29 = vrot.slane %v7046_v5, 4  ;;  %v16940_v8 = vpack.c.bf16 %v7498_v13, %v7496_v53  ;;  %v19829_v30 = vld [vmem:[#allocation132_spill] sm:$0xff] }
 0x65f   : > { %v7025_v26 = vmul.f32 0.1, %v6960_v39  ;;  %v7051_v10 = vmax.f32 %v6957_v46, %v7024_v9  ;;  %v7179_v19 = vadd.f32 %v7105_v12, %v19826_v61  ;;  %v7422_v58 = vrot.slane %v16918_v27, 3 }
 0x660   : > { %v7049_v40 = vmax.f32 %v6949_v17, %v7022_v32  ;;  %v7023_v33 = vmul.f32 0.1, %v6952_v34  ;;  %v16932_v63 = vsel %vm4902_vm0, %v7106_v20, %v7108_v29  ;;  %v16935_v44 = vsel %vm4902_vm0, %v7108_v29, %v7110_v18  ;;  %v19830_v32 = vld [vmem:[#allocation49_spill] sm:$0xff] }
 0x661   : > { %v7052_v14 = vmax.f32 %v6960_v39, %v7025_v26  ;;  %v7118_v57 = vrot.slane %v7051_v10, 4  ;;  %v7421_v18 = vsel %vm19827_vm12, %v7418_v54, %v7420_v0  ;;  %v7867_v53 = vrot.slane %v7730_v6, 2  ;;  %vm19847_vm12 = vmmov %vm19842_vm5 }
 0x662   : > { %v7114_v60 = vrot.slane %v7049_v40, 4  ;;  %v12127_v35 = vpop.f32.mrb[76].mxu0  ;;  %v7050_v46 = vmax.f32 %v6952_v34, %v7023_v33  ;;  %v16961_v9 = vmul.f32 %v19829_v30, %v7178_v11  ;;  %v7180_v42 = vadd.f32 %v7107_v48, %v19830_v32  ;;  %v19831_v48 = vld [vmem:[#allocation133_spill] sm:$0xff] }
 0x663   : > { %v16937_v2 = vrot.slane %v7052_v14, 4  ;;  %v6964_v3 = vpop.f32.mrb[77].mxu0  ;;  %v7424_v13 = vrot.slane %v16926_v47, 3  ;;  %v7731_v54 = vpack.c.bf16 %v7421_v18, %v7419_v21  ;;  %v16966_v5 = vadd.f32 %v12127_v35, %v16848_v50 }
 0x664   : > { %v16943_v24 = vsel %vm4902_vm0, %v7112_v56, %v7114_v60  ;;  %v12128_v17 = vpop.f32.mrb[78].mxu0  ;;  %v19828_v56 = vld [vmem:[#allocation131_spill] sm:$0xff]  ;;  %v7116_v12 = vrot.slane %v7050_v46, 4  ;;  %v7873_v26 = vrot.slane %v16940_v8, 2  ;;  %v7735_v10 = vpack.c.bf16 %v16918_v27, %v16901_v43 }
 0x665   : > { %v16948_v20 = vsel %vm4902_vm0, %v7118_v57, %v16937_v2  ;;  %v16952_v49 = vpop.f32.mrb[79].mxu0  ;;  %v16958_v39 = vmul.f32 %v19828_v56, %v7177_v4  ;;  %v7501_v40 = vrot.slane %v16926_v47, 6  ;;  %v16979_v34 = vmul.f32 %v19831_v48, %v7179_v19 }
 0x666   : > { %v16970_v1 = vsel %vm4902_vm0, %v7114_v60, %v7116_v12  ;;  %v16973_v6 = vsel %vm4902_vm0, %v7116_v12, %v7118_v57  ;;  %v7423_v21 = vsel %vm19832_vm3, %v7420_v0, %v7422_v58  ;;  %v7425_v50 = vsel %vm19833_vm7, %v7422_v58, %v7424_v13  ;;  %v19835_v60 = vld [vmem:[#allocation60_spill] sm:$0xff]  ;;  %vm19848_vm3 = vmmov %vm19842_vm5 }
 0x667   : > { %v7736_v62 = vpack.c.bf16 %v7425_v50, %v7423_v21  ;;  %v7028_v25 = vmul.f32 0.1, %v16966_v5  ;;  %v16984_v4 = vrot.slane %v7735_v10, 2  ;;  %v6965_v29 = vadd.f32 %v6964_v3, %v16842_v51  ;;  %v12555_v3 = vld [vmem:[%s18563_s15 + $0x100] sm:$0xff]   ;;  %vm19849_vm7 = vmmov %vm19838_vm1 }
 0x668   : > { %v16990_v11 = vmul.f32 %v19834_v45, %v7180_v42  ;;  %v16993_v33 = vadd.f32 %v7113_v37, %v19835_v60  ;;  %v7426_v35 = vrot.slane %v16958_v39, 3  ;;  %v7428_v0 = vrot.slane %v16961_v9, 3 }
 0x669   : > { %v7870_v46 = vrot.slane %v7731_v54, 2  ;;  %v7871_v61 = vrot.slane %v7736_v62, 2  ;;  %v7055_v19 = vmax.f32 %v16966_v5, %v7028_v25  ;;  %v7026_v18 = vmul.f32 0.1, %v6965_v29 }
 0x66a   : > { %v16987_v14 = vpop.f32.mrb[80].mxu0  ;;  %v7427_v37 = vsel %vm19836_vm11, %v7424_v13, %v7426_v35  ;;  %v7429_v58 = vsel %vm19837_vm4, %v7426_v35, %v7428_v0  ;;  %v7574_v56 = vrot.slane %v16890_v22, 1  ;;  %v7575_v30 = vrot.slane %v16901_v43, 1  ;;  %vm19853_vm11 = vmmov %vm19838_vm1 }
 0x66b   : > { %v16997_v57 = vpop.f32.mrb[81].mxu0  ;;  %v7872_v32 = vsel %vm19838_vm1, %v7870_v46, %v7871_v61  ;;  %v7869_v42 = vsel %vm19839_vm9, %v7867_v53, %v16984_v4  ;;  %v7053_v54 = vmax.f32 %v6965_v29, %v7026_v18  ;;  %v7741_v5 = vpack.c.bf16 %v7429_v58, %v7427_v37  ;;  %vm19857_vm9 = vmmov %vm19837_vm4 }
 0x66c   : > { %v17000_v51 = vpop.f32.mrb[82].mxu0  ;;  %8329 = vmatprep.mubr.bf16.mxu1 %v7872_v32  ;;  %v7576_v13 = vsel %vm19840_vm15, %v7574_v56, %v7575_v30  ;;  %v7577_v10 = vrot.slane %v16918_v27, 1  ;;  %v7579_v48 = vrot.slane %v16926_v47, 1  ;;  %v7581_v22 = vrot.slane %v16958_v39, 1  ;;  %vm19859_vm15 = vmmov %vm19838_vm1 }
 0x66d   : > { %v17011_v12 = vpop.f32.mrb[83].mxu0  ;;  %8330 = vmatmul.mubr.bf16.vlgmr.msra.gmra.mrb[64].mxu1 %v7869_v42  ;;  %v7122_v21 = vrot.slane %v7053_v54, 4  ;;  %v17020_v50 = vrot.slane %v7741_v5, 2  ;;  %v6976_v62 = vadd.f32 %v12128_v17, %v16850_v59  ;;  %v7500_v53 = vsel %vm2782_vm14, %v7497_v28, %v7499_v7  ;;  %v12556_v59 = vld [vmem:[%s18563_s15 + $0x108] sm:$0xff]  }
 0x66e   : > { %12138 = vmatpush3.bf16.msra.mxu1 %v12555_v3  ;;  %v7578_v25 = vsel %vm19841_vm6, %v7575_v30, %v7577_v10  ;;  %v7580_v29 = vsel %vm19842_vm5, %v7577_v10, %v7579_v48  ;;  %v7582_v45 = vsel %vm19843_vm13, %v7579_v48, %v7581_v22  ;;  %v7502_v60 = vsel %vm2782_vm14, %v7499_v7, %v7501_v40  ;;  %v19845_v3 = vld [vmem:[#allocation52_spill] sm:$0xff]  ;;  %vm19860_vm6 = vmmov %vm19848_vm3 }
 0x66f   : > { %v17041_v28 = vsel %vm4902_vm0, %v16937_v2, %v7122_v21  ;;  %v7885_v17 = vsel %vm19844_vm10, %v7871_v61, %v17020_v50  ;;  %v7733_v35 = vpack.c.bf16 %v7578_v25, %v7576_v13  ;;  %v7738_v46 = vpack.c.bf16 %v7582_v45, %v7580_v29  ;;  %12139 = vmatprep.subr.bf16.mxu1 %v19812_v38  ;;  %vm19861_vm5 = vmmov %vm19848_vm3 }
 0x670   : > { %v7181_v7 = vadd.f32 %v16932_v63, %v19845_v3  ;;  %8337 = vmatprep.mubr.bf16.mxu1 %v7885_v17  ;;  %v7029_v37 = vmul.f32 0.1, %v6976_v62  ;;  %v7737_v58 = vpack.c.bf16 %v7502_v60, %v7500_v53  ;;  %v6968_v56 = vadd.f32 %v16952_v49, %v16844_v23  ;;  %v12557_v23 = vld [vmem:[%s18563_s15 + $0x110] sm:$0xff]   ;;  %vm19865_vm13 = vmmov %vm19838_vm1 }
 0x671   : > { %v7876_v30 = vrot.slane %v7733_v35, 2  ;;  %v7877_v32 = vrot.slane %v7738_v46, 2  ;;  %v7583_v61 = vrot.slane %v16961_v9, 1  ;;  %v7585_v42 = vrot.slane %v16979_v34, 1  ;;  %vm19870_vm10 = vmmov %vm19838_vm1 }
 0x672   : > { %v17046_v18 = vpop.f32.mrb[84].mxu0  ;;  %v7126_v5 = vrot.slane %v7055_v19, 4  ;;  %v7056_v13 = vmax.f32 %v6976_v62, %v7029_v37  ;;  %v17056_v10 = vrot.slane %v7737_v58, 2  ;;  %v7027_v63 = vmul.f32 0.1, %v6968_v56  ;;  %12140 = vmatpush3.bf16.msra.mxu1 %v12556_v59  ;;  %v19850_v59 = vld [vmem:[#allocation59_spill] sm:$0xff] }
 0x673   : > { %v17052_v2 = vpop.f32.mrb[85].mxu0  ;;  %v7878_v49 = vsel %vm19846_vm8, %v7876_v30, %v7877_v32  ;;  %v7584_v53 = vsel %vm19847_vm12, %v7581_v22, %v7583_v61  ;;  %v7586_v25 = vsel %vm19848_vm3, %v7583_v61, %v7585_v42  ;;  %v6989_v19 = vadd.f32 %v16987_v14, %v16860_v16  ;;  %12141 = vmatprep.subr.bf16.mxu1 %v19812_v38  ;;  %vm19872_vm8 = vmmov %vm19838_vm1 }
 0x674   : > { %v12136_v54 = vpop.f32.mrb[86].mxu0  ;;  %8466 = vmatprep.mubr.bf16.mxu0 %v7878_v49  ;;  %v7128_v62 = vrot.slane %v7056_v13, 4  ;;  %v7875_v29 = vsel %vm19849_vm7, %v7873_v26, %v17056_v10  ;;  %v7054_v45 = vmax.f32 %v6968_v56, %v7027_v63  ;;  %v7743_v60 = vpack.c.bf16 %v7586_v25, %v7584_v53  ;;  %v19855_v63 = vld [vmem:[#allocation136_spill] sm:$0xff]  ;;  %v19856_v49 = vld [vmem:[#allocation65_spill] sm:$0xff]  ;;  %v19858_v25 = vld [vmem:[#allocation75_spill] sm:$0xff] }
 0x675   : > { %v17058_v48 = vpop.f32.mrb[87].mxu0  ;;  %v7182_v22 = vadd.f32 %v16935_v44, %v19850_v59  ;;  %8467 = vmatmul.mubr.bf16.vlgmr.msra.gmra.mrb[88].mxu0 %v7875_v29  ;;  %v7740_v17 = vpack.c.bf16 %v16958_v39, %v16926_v47  ;;  %v6981_v16 = vadd.f32 %v16997_v57, %v16854_v36  ;;  %v7430_v14 = vrot.slane %v16979_v34, 3  ;;  %v12558_v44 = vld [vmem:[%s18563_s15 + $0x118] sm:$0xff]   ;;  %v19851_v36 = vld [vmem:[#allocation137_spill] sm:$0xff]  ;;  %v19854_v54 = vld [vmem:[#allocation135_spill] sm:$0xff] }
 0x676   : > { %v17083_v35 = vsel %vm4902_vm0, %v7126_v5, %v7128_v62  ;;  %v7124_v8 = vrot.slane %v7054_v45, 4  ;;  %v17085_v46 = vrot.slane %v7743_v60, 2  ;;  %v7432_v26 = vrot.slane %v16990_v11, 3  ;;  %12142 = vmatpush3.bf16.msra.mxu1 %v12557_v23  ;;  %vm19879_vm12 = vmmov %vm19837_vm4 }
 0x677   : > { %v7032_v3 = vmul.f32 0.1, %v6989_v19  ;;  %v17091_v37 = vrot.slane %v7740_v17, 2  ;;  %v7030_v58 = vmul.f32 0.1, %v6981_v16  ;;  %12143 = vmatprep.subr.bf16.mxu1 %v19812_v38  ;;  %v17096_v57 = vmul.f32 %v19851_v36, %v16993_v33  ;;  %vm19880_vm3 = vmmov %vm19837_vm4 }
 0x678   : > { %v17099_v56 = vsel %vm4902_vm0, %v7122_v21, %v7124_v8  ;;  %v17102_v30 = vsel %vm4902_vm0, %v7124_v8, %v7126_v5  ;;  %v7889_v61 = vsel %vm19853_vm11, %v7877_v32, %v17085_v46  ;;  %v17107_v13 = vmul.f32 %v19854_v54, %v7181_v7  ;;  %vm19884_vm7 = vmmov %vm19861_vm5 }
 0x679   : > { %19852 = vst [vmem:[#allocation100_spill] sm:$0xff] %v17096_v57  ;;  %v17110_v23 = vmul.f32 %v19855_v63, %v7182_v22  ;;  %v7184_v53 = vadd.f32 %v16943_v24, %v19856_v49  ;;  %8474 = vmatprep.mubr.bf16.mxu0 %v7889_v61  ;;  %v7431_v33 = vsel %vm19837_vm4, %v7428_v0, %v7430_v14  ;;  %v12559_v24 = vld [vmem:[%s18563_s15 + $0x120] sm:$0xff]   ;;  %v7505_v22 = vrot.slane %v16961_v9, 6  ;;  %v19862_v63 = vld [vmem:[#allocation66_spill] sm:$0xff]  ;;  %vm19885_vm11 = vmmov %vm19838_vm1 }
 0x67a   : > { %v7883_v21 = vsel %vm19838_vm1, %v16984_v4, %v17091_v37  ;;  %v7057_v5 = vmax.f32 %v6981_v16, %v7030_v58  ;;  %v7433_v7 = vsel %vm19857_vm9, %v7430_v14, %v7432_v26  ;;  %v6992_v32 = vadd.f32 %v17000_v51, %v16862_v31  ;;  %12144 = vmatpush3.bf16.msra.mxu1 %v12558_v44  ;;  %vm19886_vm4 = vmmov %vm19861_vm5 }
 0x67b   : > { %v7187_v0 = vadd.f32 %v16948_v20, %v19858_v25  ;;  %v7059_v29 = vmax.f32 %v6989_v19, %v7032_v3  ;;  %8338 = vmatmul.mubr.bf16.gmra.mrb[68].mxu1 %v7883_v21  ;;  %v7746_v45 = vpack.c.bf16 %v7433_v7, %v7431_v33  ;;  %v7503_v4 = vrot.slane %v16958_v39, 6  ;;  %12145 = vmatprep.subr.bf16.mxu1 %v19812_v38  ;;  %v19863_v21 = vld [vmem:[#allocation73_spill] sm:$0xff]  ;;  %vm19887_vm9 = vmmov %vm19880_vm3 }
 0x67c   : > { %v7130_v60 = vrot.slane %v7057_v5, 4  ;;  %v7033_v59 = vmul.f32 0.1, %v6992_v32  ;;  %v6984_v31 = vadd.f32 %v17011_v12, %v16856_v41  ;;  %v7587_v19 = vrot.slane %v16990_v11, 1  ;;  %v12560_v41 = vld [vmem:[%s18563_s15 + $0x128] sm:$0xff]  }
 0x67d   : > { %v17135_v51 = vrot.slane %v7746_v45, 2  ;;  %v7504_v20 = vsel %vm2782_vm14, %v7501_v40, %v7503_v4  ;;  %v7589_v17 = vrot.slane %v17107_v13, 1  ;;  %v7506_v8 = vsel %vm2782_vm14, %v7503_v4, %v7505_v22  ;;  %v19866_v45 = vld [vmem:[#allocation90_spill] sm:$0xff] }
 0x67e   : > { %v17143_v16 = vsel %vm4902_vm0, %v7128_v62, %v7130_v60  ;;  %v7060_v14 = vmax.f32 %v6992_v32, %v7033_v59  ;;  %v7031_v44 = vmul.f32 0.1, %v6984_v31  ;;  %12146 = vmatpush3.bf16.msra.mxu1 %v12559_v24  ;;  %v7134_v12 = vrot.slane %v7059_v29, 4  ;;  %v19867_v59 = vld [vmem:[#allocation138_spill] sm:$0xff] }
 0x67f   : > { %v7895_v40 = vsel %vm19859_vm15, %v17020_v50, %v17135_v51  ;;  %v7742_v3 = vpack.c.bf16 %v7506_v8, %v7504_v20  ;;  %v7588_v62 = vsel %vm19860_vm6, %v7585_v42, %v7587_v19  ;;  %12147 = vmatprep.subr.bf16.mxu1 %v19812_v38  ;;  %v7590_v61 = vsel %vm19861_vm5, %v7587_v19, %v7589_v17  ;;  %vm19888_vm15 = vmmov %vm19880_vm3 }
 0x680   : > { %8345 = vmatprep.mubr.bf16.mxu1 %v7895_v40  ;;  %v7136_v58 = vrot.slane %v7060_v14, 4  ;;  %v7058_v36 = vmax.f32 %v6984_v31, %v7031_v44  ;;  %v7005_v54 = vadd.f32 %v17046_v18, %v16871_v52  ;;  %v7185_v50 = vadd.f32 %v16970_v1, %v19862_v63  ;;  %v12561_v52 = vld [vmem:[%s18563_s15 + $0x130] sm:$0xff]   ;;  %v19864_v1 = vld [vmem:[#allocation81_spill] sm:$0xff]  ;;  %vm19889_vm6 = vmmov %vm19838_vm1 }
 0x681   : > { %v17165_v49 = vrot.slane %v7742_v3, 2  ;;  %v7748_v33 = vpack.c.bf16 %v7590_v61, %v7588_v62  ;;  %v7745_v42 = vpack.c.bf16 %v16979_v34, %v16961_v9  ;;  %v7186_v5 = vadd.f32 %v16973_v6, %v19863_v21  ;;  %vm19894_vm5 = vmmov %vm19838_vm1 }
 0x682   : > { %v17172_v7 = vsel %vm4902_vm0, %v7134_v12, %v7136_v58  ;;  %v7132_v32 = vrot.slane %v7058_v36, 4  ;;  %v6997_v24 = vadd.f32 %v17052_v2, %v16866_v15  ;;  %12148 = vmatpush3.bf16.msra.mxu1 %v12560_v41  ;;  %v7188_v18 = vadd.f32 %v17041_v28, %v19864_v1  ;;  %v19873_v41 = vld [vmem:[#allocation140_spill] sm:$0xff]  ;;  %v19881_v1 = vld [vmem:[#allocation82_spill] sm:$0xff] }
 0x683   : > { %v7887_v25 = vsel %vm19865_vm13, %v17056_v10, %v17165_v49  ;;  %v17184_v6 = vrot.slane %v7748_v33, 2  ;;  %v17186_v29 = vrot.slane %v7745_v42, 2  ;;  %12149 = vmatprep.subr.bf16.mxu1 %v19812_v38  ;;  %v7191_v15 = vadd.f32 %v17083_v35, %v19866_v45  ;;  %v19868_v10 = vld [vmem:[#allocation141_spill] sm:$0xff]  ;;  %v19871_v35 = vld [vmem:[#allocation139_spill] sm:$0xff]  ;;  %vm19899_vm13 = vmmov %vm19886_vm4 }
 0x684   : > { %8475 = vmatmul.mubr.bf16.gmra.mrb[92].mxu0 %v7887_v25  ;;  %v17192_v2 = vsel %vm4902_vm0, %v7130_v60, %v7132_v32  ;;  %v17195_v4 = vsel %vm4902_vm0, %v7132_v32, %v7134_v12  ;;  %v7034_v28 = vmul.f32 0.1, %v6997_v24  ;;  %v17198_v31 = vmul.f32 %v19867_v59, %v7184_v53  ;;  %v19883_v45 = vld [vmem:[#allocation93_spill] sm:$0xff] }
 0x685   : > { %v17201_v20 = vmul.f32 %v19868_v10, %v7187_v0  ;;  %v7899_v19 = vsel %vm19870_vm10, %v17085_v46, %v17184_v6  ;;  %v7036_v14 = vmul.f32 0.1, %v7005_v54  ;;  %v17207_v8 = vmul.f32 %v19871_v35, %v7185_v50  ;;  %v12562_v0 = vld [vmem:[%s18563_s15 + $0x138] sm:$0xff]   ;;  %v19875_v46 = vld [vmem:[#allocation142_spill] sm:$0xff]  ;;  %vm19901_vm10 = vmmov %vm19838_vm1 }
 0x686   : > { %8482 = vmatprep.mubr.bf16.mxu0 %v7899_v19  ;;  %v7893_v60 = vsel %vm19872_vm8, %v17091_v37, %v17186_v29  ;;  %v7061_v44 = vmax.f32 %v6997_v24, %v7034_v28  ;;  %v7434_v53 = vrot.slane %v17107_v13, 3  ;;  %12150 = vmatpush3.bf16.msra.mxu1 %v12561_v52  ;;  %v17217_v12 = vmul.f32 %v19873_v41, %v7186_v5  ;;  %v19877_v37 = vld [vmem:[#allocation145_spill] sm:$0xff]  ;;  %vm19902_vm8 = vmmov %vm19886_vm4 }
 0x687   : > { %19869 = vst [vmem:[#allocation121_spill] sm:$0xff] %v17201_v20  ;;  %v17220_v40 = vmul.f32 %v19875_v46, %v7188_v18  ;;  %8346 = vmatmul.mubr.bf16.gmra.mrb[72].mxu1 %v7893_v60  ;;  %v7436_v3 = vrot.slane %v17110_v23, 3  ;;  %v7507_v62 = vrot.slane %v16979_v34, 6  ;;  %12151 = vmatprep.subr.bf16.mxu1 %v19812_v38  ;;  %v17226_v36 = vmul.f32 %v19877_v37, %v7191_v15  ;;  %v19882_v18 = vld [vmem:[#allocation87_spill] sm:$0xff] }
 0x688   : > { %19874 = vst [vmem:[#allocation124_spill] sm:$0xff] %v17217_v12  ;;  %v7138_v61 = vrot.slane %v7061_v44, 4  ;;  %v7435_v63 = vsel %vm19879_vm12, %v7432_v26, %v7434_v53  ;;  %v7509_v50 = vrot.slane %v16990_v11, 6  ;;  %v7063_v33 = vmax.f32 %v7005_v54, %v7036_v14  ;;  %vm19903_vm12 = vmmov %vm19880_vm3 }
 0x689   : > { %19876 = vst [vmem:[#allocation119_spill] sm:$0xff] %v17220_v40  ;;  %19878 = vst [vmem:[#allocation122_spill] sm:$0xff] %v17226_v36  ;;  %v7437_v42 = vsel %vm19880_vm3, %v7434_v53, %v7436_v3  ;;  %v7000_v21 = vadd.f32 %v17058_v48, %v16868_v55  ;;  %v7591_v5 = vrot.slane %v17110_v23, 1  ;;  %v7508_v52 = vsel %vm2782_vm14, %v7505_v22, %v7507_v62 }
 0x68a   : > { %v17237_v32 = vsel %vm4902_vm0, %v7136_v58, %v7138_v61  ;;  %v7751_v24 = vpack.c.bf16 %v7437_v42, %v7435_v63  ;;  %v7510_v26 = vsel %vm2782_vm14, %v7507_v62, %v7509_v50  ;;  %12152 = vmatpush3.bf16.msra.mxu1 %v12562_v0  ;;  %v7189_v54 = vadd.f32 %v17099_v56, %v19881_v1  ;;  %vm19904_vm3 = vmmov %vm19838_vm1 }
 0x68b   : > { %v7190_v25 = vadd.f32 %v17102_v30, %v19882_v18  ;;  %v7747_v55 = vpack.c.bf16 %v7510_v26, %v7508_v52  ;;  %v7035_v48 = vmul.f32 0.1, %v7000_v21  ;;  %v7192_v58 = vadd.f32 %v17143_v16, %v19883_v45 }
 0x68c   : > { %v7904_v15 = vrot.slane %v7751_v24, 2  ;;  %v7592_v28 = vsel %vm19884_vm7, %v7589_v17, %v7591_v5  ;;  %v7593_v22 = vrot.slane %v17096_v57, 1  ;;  %v17253_v59 = vrot.slane %v7063_v33, 4  ;;  %v19890_v33 = vld [vmem:[#allocation143_spill] sm:$0xff]  ;;  %vm19905_vm7 = vmmov %vm19838_vm1 }
 0x68d   : > { %v7896_v10 = vrot.slane %v7747_v55, 2  ;;  %v7062_v19 = vmax.f32 %v7000_v21, %v7035_v48  ;;  %v7750_v56 = vpack.c.bf16 %v17107_v13, %v16990_v11  ;;  %v7438_v16 = vrot.slane %v17096_v57, 3 }
 0x68e   : > { %v7905_v30 = vsel %vm19885_vm11, %v17135_v51, %v7904_v15  ;;  %v7594_v14 = vsel %vm19886_vm4, %v7591_v5, %v7593_v22  ;;  %v7440_v35 = vrot.slane %v17198_v31, 3  ;;  %v7511_v51 = vrot.slane %v17107_v13, 6  ;;  %vm19906_vm11 = vmmov %vm19887_vm9 }
 0x68f   : > { %8353 = vmatprep.mubr.bf16.mxu1 %v7905_v30  ;;  %v7897_v17 = vsel %vm19838_vm1, %v17165_v49, %v7896_v10  ;;  %v7140_v60 = vrot.slane %v7062_v19, 4  ;;  %v7753_v44 = vpack.c.bf16 %v7594_v14, %v7592_v28  ;;  %v7902_v53 = vrot.slane %v7750_v56, 2 }
 0x690   : > { %8483 = vmatmul.mubr.bf16.gmra.mrb[96].mxu0 %v7897_v17  ;;  %v7439_v0 = vsel %vm19887_vm9, %v7436_v3, %v7438_v16  ;;  %v7441_v41 = vsel %vm19888_vm15, %v7438_v16, %v7440_v35  ;;  %v7513_v46 = vrot.slane %v17110_v23, 6  ;;  %v17278_v42 = vmul.f32 %v19890_v33, %v7189_v54  ;;  %v19892_v3 = vld [vmem:[#allocation144_spill] sm:$0xff]  ;;  %v19897_v54 = vld [vmem:[#allocation102_spill] sm:$0xff]  ;;  %vm19907_vm9 = vmmov %vm19886_vm4 }
 0x691   : > { %v17269_v62 = vsel %vm4902_vm0, %v7138_v61, %v7140_v60  ;;  %v17273_v37 = vsel %vm4902_vm0, %v7140_v60, %v17253_v59  ;;  %v7908_v49 = vrot.slane %v7753_v44, 2  ;;  %v7903_v63 = vsel %vm19889_vm6, %v17186_v29, %v7902_v53  ;;  %v19895_v29 = vld [vmem:[#allocation146_spill] sm:$0xff]  ;;  %vm19908_vm15 = vmmov %vm19838_vm1 }
 0x692   : > { %19891 = vst [vmem:[#allocation113_spill] sm:$0xff] %v17278_v42  ;;  %v17281_v21 = vmul.f32 %v19892_v3, %v7190_v25  ;;  %8354 = vmatmul.mubr.bf16.gmra.mrb[76].mxu1 %v7903_v63  ;;  %v7756_v5 = vpack.c.bf16 %v7441_v41, %v7439_v0  ;;  %v7512_v24 = vsel %vm2782_vm14, %v7509_v50, %v7511_v51  ;;  %v7595_v26 = vrot.slane %v17198_v31, 1  ;;  %v19898_v50 = vld [vmem:[#allocation94_spill] sm:$0xff]  ;;  %vm19909_vm6 = vmmov %vm19906_vm11 }
 0x693   : > { %v7909_v61 = vsel %vm19894_vm5, %v17184_v6, %v7908_v49  ;;  %v7514_v52 = vsel %vm2782_vm14, %v7511_v51, %v7513_v46  ;;  %v7597_v1 = vrot.slane %v17207_v8, 1  ;;  %v17290_v18 = vmul.f32 %v19895_v29, %v7192_v58  ;;  %v19900_v58 = vld [vmem:[#allocation101_spill] sm:$0xff]  ;;  %vm19910_vm5 = vmmov %vm19909_vm6 }
 0x694   : > { %19893 = vst [vmem:[#allocation105_spill] sm:$0xff] %v17281_v21  ;;  %v17294_v25 = vadd.f32 %v17172_v7, %v19897_v54  ;;  %8490 = vmatprep.mubr.bf16.mxu0 %v7909_v61  ;;  %v7914_v55 = vrot.slane %v7756_v5, 2  ;;  %v7752_v48 = vpack.c.bf16 %v7514_v52, %v7512_v24  ;;  %v17298_v45 = vadd.f32 %v17192_v2, %v19898_v50 }
 0x695   : > { %19896 = vst [vmem:[#allocation108_spill] sm:$0xff] %v17290_v18  ;;  %v7598_v6 = vsel %vm19899_vm13, %v7595_v26, %v7597_v1  ;;  %v7755_v28 = vpack.c.bf16 %v17096_v57, %v17110_v23  ;;  %v7442_v19 = vrot.slane %v17207_v8, 3  ;;  %v17306_v56 = vadd.f32 %v17195_v4, %v19900_v58  ;;  %vm19911_vm13 = vmmov %vm19838_vm1 }
 0x696   : > { %v7915_v7 = vsel %vm19901_vm10, %v7904_v15, %v7914_v55  ;;  %v7906_v30 = vrot.slane %v7752_v48, 2  ;;  %v7596_v14 = vsel %vm19902_vm8, %v7593_v22, %v7595_v26  ;;  %v7444_v60 = vrot.slane %v17217_v12, 3  ;;  %vm19912_vm10 = vmmov %vm19838_vm1 }
 0x697   : > { %8361 = vmatprep.mubr.bf16.mxu1 %v7915_v7  ;;  %v7758_v16 = vpack.c.bf16 %v7598_v6, %v7596_v14  ;;  %v7912_v2 = vrot.slane %v7755_v28, 2  ;;  %v7443_v17 = vsel %vm19903_vm12, %v7440_v35, %v7442_v19  ;;  %v7515_v0 = vrot.slane %v17096_v57, 6  ;;  %vm19913_vm8 = vmmov %vm19838_vm1 }
 0x698   : > { %v7907_v44 = vsel %vm19904_vm3, %v7896_v10, %v7906_v30  ;;  %v7517_v41 = vrot.slane %v17198_v31, 6  ;;  %v7599_v4 = vrot.slane %v17217_v12, 1  ;;  %v7445_v22 = vsel %vm19906_vm11, %v7442_v19, %v7444_v60  ;;  %vm19914_vm12 = vmmov %vm19886_vm4 }
 0x699   : > { %8491 = vmatmul.mubr.bf16.gmra.mrb[100].mxu0 %v7907_v44  ;;  %v7918_v15 = vrot.slane %v7758_v16, 2  ;;  %v7913_v51 = vsel %vm19905_vm7, %v7902_v53, %v7912_v2  ;;  %v7601_v63 = vrot.slane %v17201_v20, 1  ;;  %v7761_v35 = vpack.c.bf16 %v7445_v22, %v7443_v17  ;;  %vm19915_vm3 = vmmov %vm19886_vm4 }
 0x69a   : > { %8362 = vmatmul.mubr.bf16.gmra.mrb[80].mxu1 %v7913_v51  ;;  %v7516_v33 = vsel %vm2782_vm14, %v7513_v46, %v7515_v0  ;;  %v7518_v10 = vsel %vm2782_vm14, %v7515_v0, %v7517_v41  ;;  %v7600_v3 = vsel %vm19886_vm4, %v7597_v1, %v7599_v4  ;;  %v7760_v53 = vpack.c.bf16 %v17207_v8, %v17198_v31  ;;  %vm19918_vm7 = vmmov %vm19838_vm1 }
 0x69b   : > { %v7919_v5 = vsel %vm19838_vm1, %v7908_v49, %v7918_v15  ;;  %v7757_v24 = vpack.c.bf16 %v7518_v10, %v7516_v33  ;;  %v7602_v61 = vsel %vm19907_vm9, %v7599_v4, %v7601_v63  ;;  %v7924_v52 = vrot.slane %v7761_v35, 2  ;;  %v19916_v35 = vld [vmem:[#allocation147_spill] sm:$0xff]  ;;  %vm19919_vm11 = vmmov %vm19910_vm5 }
 0x69c   : > { %8498 = vmatprep.mubr.bf16.mxu0 %v7919_v5  ;;  %v7763_v26 = vpack.c.bf16 %v7602_v61, %v7600_v3  ;;  %v7446_v29 = vrot.slane %v17201_v20, 3  ;;  %v7448_v54 = vrot.slane %v17220_v40, 3  ;;  %v7922_v48 = vrot.slane %v7760_v53, 2  ;;  %vm19920_vm4 = vmmov %vm19910_vm5 }
 0x69d   : > { %v7916_v46 = vrot.slane %v7757_v24, 2  ;;  %v7519_v50 = vrot.slane %v17207_v8, 6  ;;  %v7521_v1 = vrot.slane %v17217_v12, 6  ;;  %v7925_v49 = vsel %vm19908_vm15, %v7914_v55, %v7924_v52  ;;  %vm19924_vm9 = vmmov %vm19838_vm1 }
 0x69e   : > { %v7928_v6 = vrot.slane %v7763_v26, 2  ;;  %v7447_v28 = vsel %vm19909_vm6, %v7444_v60, %v7446_v29  ;;  %v7449_v19 = vsel %vm19910_vm5, %v7446_v29, %v7448_v54  ;;  %8369 = vmatprep.mubr.bf16.mxu1 %v7925_v49  ;;  %v7923_v7 = vsel %vm19912_vm10, %v7912_v2, %v7922_v48  ;;  %v19921_v26 = vld [vmem:[#allocation148_spill] sm:$0xff]  ;;  %vm19925_vm15 = vmmov %vm19915_vm3 }
 0x69f   : > { %v7917_v58 = vsel %vm19911_vm13, %v7906_v30, %v7916_v46  ;;  %v7766_v14 = vpack.c.bf16 %v7449_v19, %v7447_v28  ;;  %v7520_v16 = vsel %vm2782_vm14, %v7517_v41, %v7519_v50  ;;  %v7522_v44 = vsel %vm2782_vm14, %v7519_v50, %v7521_v1  ;;  %v19923_v50 = vld [vmem:[#allocation109_spill] sm:$0xff]  ;;  %vm19926_vm6 = vmmov %vm19915_vm3 }
 0x6a0   : > { %v7929_v17 = vsel %vm19913_vm8, %v7918_v15, %v7928_v6  ;;  %v7603_v0 = vrot.slane %v17220_v40, 1  ;;  %v7605_v55 = vrot.slane %v17278_v42, 1  ;;  %v7762_v4 = vpack.c.bf16 %v7522_v44, %v7520_v16  ;;  %vm19927_vm5 = vmmov %vm19838_vm1 }
 0x6a1   : > { %8499 = vmatmul.mubr.bf16.gmra.mrb[104].mxu0 %v7917_v58  ;;  %v7934_v60 = vrot.slane %v7766_v14, 2  ;;  %v7765_v51 = vpack.c.bf16 %v17201_v20, %v17217_v12  ;;  %v7450_v30 = vrot.slane %v17278_v42, 3  ;;  %v7452_v15 = vrot.slane %v17281_v21, 3  ;;  %vm19928_vm13 = vmmov %vm19838_vm1 }
 0x6a2   : > { %8506 = vmatprep.mubr.bf16.mxu0 %v7929_v17  ;;  %8370 = vmatmul.mubr.bf16.gmra.mrb[84].mxu1 %v7923_v7  ;;  %v7604_v2 = vsel %vm19914_vm12, %v7601_v63, %v7603_v0  ;;  %v7606_v41 = vsel %vm19915_vm3, %v7603_v0, %v7605_v55  ;;  %v7523_v22 = vrot.slane %v17201_v20, 6  ;;  %v17349_v33 = vmul.f32 %v19916_v35, %v17298_v45  ;;  %vm19929_vm10 = vmmov %vm19920_vm4 }
 0x6a3   : > { %v7935_v10 = vsel %vm19918_vm7, %v7924_v52, %v7934_v60  ;;  %v7926_v3 = vrot.slane %v7762_v4, 2  ;;  %v7768_v5 = vpack.c.bf16 %v7606_v41, %v7604_v2  ;;  %v7932_v24 = vrot.slane %v7765_v51, 2  ;;  %vm19930_vm8 = vmmov %vm19920_vm4 }
 0x6a4   : > { %19917 = vst [vmem:[#allocation123_spill] sm:$0xff] %v17349_v33  ;;  %8377 = vmatprep.mubr.bf16.mxu1 %v7935_v10  ;;  %v7451_v61 = vsel %vm19919_vm11, %v7448_v54, %v7450_v30  ;;  %v7453_v63 = vsel %vm19920_vm4, %v7450_v30, %v7452_v15  ;;  %v7525_v53 = vrot.slane %v17220_v40, 6  ;;  %v17357_v29 = vmul.f32 %v19921_v26, %v17306_v56  ;;  %vm19935_vm12 = vmmov %vm19915_vm3 }
 0x6a5   : > { %v7196_v45 = vadd.f32 %v17237_v32, %v19923_v50  ;;  %v7938_v49 = vrot.slane %v7768_v5, 2  ;;  %v7771_v28 = vpack.c.bf16 %v7453_v63, %v7451_v61  ;;  %v7524_v52 = vsel %vm2782_vm14, %v7521_v1, %v7523_v22  ;;  %v19931_v5 = vld [vmem:[#allocation149_spill] sm:$0xff]  ;;  %v19933_v61 = vld [vmem:[#allocation150_spill] sm:$0xff]  ;;  %vm19936_vm3 = vmmov %vm19838_vm1 }
 0x6a6   : > { %19922 = vst [vmem:[#allocation126_spill] sm:$0xff] %v17357_v29  ;;  %v7526_v19 = vsel %vm2782_vm14, %v7523_v22, %v7525_v53  ;;  %v7607_v58 = vrot.slane %v17281_v21, 1  ;;  %v7609_v54 = vrot.slane %v17226_v36, 1  ;;  %v7927_v7 = vsel %vm19838_vm1, %v7916_v46, %v7926_v3  ;;  %vm19937_vm7 = vmmov %vm19926_vm6 }
 0x6a7   : > { %v7944_v14 = vrot.slane %v7771_v28, 2  ;;  %v7767_v16 = vpack.c.bf16 %v7526_v19, %v7524_v52  ;;  %v7454_v56 = vrot.slane %v17226_v36, 3  ;;  %v7933_v17 = vsel %vm19924_vm9, %v7922_v48, %v7932_v24  ;;  %vm19938_vm11 = vmmov %vm19920_vm4 }
 0x6a8   : > { %v7608_v32 = vsel %vm19925_vm15, %v7605_v55, %v7607_v58  ;;  %v7610_v44 = vsel %vm19926_vm6, %v7607_v58, %v7609_v54  ;;  %v7456_v1 = vrot.slane %v17290_v18, 3  ;;  %v7939_v0 = vsel %vm19927_vm5, %v7928_v6, %v7938_v49  ;;  %vm19940_vm9 = vmmov %vm19838_vm1 }
 0x6a9   : > { %8507 = vmatmul.mubr.bf16.gmra.mrb[108].mxu0 %v7927_v7  ;;  %v7945_v4 = vsel %vm19928_vm13, %v7934_v60, %v7944_v14  ;;  %v7773_v51 = vpack.c.bf16 %v7610_v44, %v7608_v32  ;;  %v7770_v46 = vpack.c.bf16 %v17278_v42, %v17220_v40  ;;  %v7455_v30 = vsel %vm19929_vm10, %v7452_v15, %v7454_v56  ;;  %v19939_v44 = vld [vmem:[#allocation110_spill] sm:$0xff]  ;;  %vm19941_vm15 = vmmov %vm19838_vm1 }
 0x6aa   : > { %8514 = vmatprep.mubr.bf16.mxu0 %v7939_v0  ;;  %8378 = vmatmul.mubr.bf16.gmra.mrb[88].mxu1 %v7933_v17  ;;  %v7457_v48 = vsel %vm19930_vm8, %v7454_v56, %v7456_v1  ;;  %v7527_v55 = vrot.slane %v17278_v42, 6  ;;  %v7529_v2 = vrot.slane %v17281_v21, 6  ;;  %v7936_v41 = vrot.slane %v7767_v16, 2  ;;  %vm19946_vm5 = vmmov %vm19926_vm6 }
 0x6ab   : > { %8385 = vmatprep.mubr.bf16.mxu1 %v7945_v4  ;;  %v7776_v22 = vpack.c.bf16 %v7457_v48, %v7455_v30  ;;  %v7611_v6 = vrot.slane %v17290_v18, 1  ;;  %v7613_v10 = vrot.slane %v17349_v33, 1  ;;  %v17385_v15 = vmul.f32 %v19931_v5, %v17294_v25  ;;  %v19942_v48 = vld [vmem:[#allocation29_spill] sm:$0xff]  ;;  %vm19948_vm13 = vmmov %vm19920_vm4 }
 0x6ac   : > { %v7528_v60 = vsel %vm2782_vm14, %v7525_v53, %v7527_v55  ;;  %v7530_v35 = vsel %vm2782_vm14, %v7527_v55, %v7529_v2  ;;  %v17388_v63 = vmul.f32 %v19933_v61, %v7196_v45  ;;  %v7948_v26 = vrot.slane %v7773_v51, 2  ;;  %vm19950_vm10 = vmmov %vm19838_vm1 }
 0x6ad   : > { %19932 = vst [vmem:[#allocation125_spill] sm:$0xff] %v17385_v15  ;;  %v7942_v50 = vrot.slane %v7770_v46, 2  ;;  %v7954_v28 = vrot.slane %v7776_v22, 2  ;;  %v7614_v52 = vsel %vm19935_vm12, %v7611_v6, %v7613_v10  ;;  %v7458_v19 = vrot.slane %v17349_v33, 3  ;;  %vm19951_vm8 = vmmov %vm19838_vm1 }
 0x6ae   : > { %19934 = vst [vmem:[#allocation111_spill] sm:$0xff] %v17388_v63  ;;  %v7460_v53 = vrot.slane %v17357_v29, 3  ;;  %v7937_v58 = vsel %vm19936_vm3, %v7926_v3, %v7936_v41  ;;  %v7772_v7 = vpack.c.bf16 %v7530_v35, %v7528_v60  ;;  %v7612_v16 = vsel %vm19937_vm7, %v7609_v54, %v7611_v6  ;;  %vm19952_vm12 = vmmov %vm19838_vm1 }
 0x6af   : > { %v7775_v25 = vpack.c.bf16 %v17226_v36, %v17281_v21  ;;  %v7778_v56 = vpack.c.bf16 %v7614_v52, %v7612_v16  ;;  %v7459_v45 = vsel %vm19938_vm11, %v7456_v1, %v7458_v19  ;;  %v7533_v32 = vrot.slane %v17290_v18, 6  ;;  %vm19953_vm3 = vmmov %vm19920_vm4 }
 0x6b0   : > { %v7461_v17 = vsel %vm19920_vm4, %v7458_v19, %v7460_v53  ;;  %v7197_v0 = vadd.f32 %v17269_v62, %v19939_v44  ;;  %v7949_v4 = vsel %vm19838_vm1, %v7938_v49, %v7948_v26  ;;  %v7943_v3 = vsel %vm19940_vm9, %v7932_v24, %v7942_v50  ;;  %v19943_v62 = vld [vmem:[#allocation112_spill] sm:$0xff]  ;;  %vm19954_vm7 = vmmov %vm19838_vm1 }
 0x6b1   : > { %8515 = vmatmul.mubr.bf16.gmra.mrb[112].mxu0 %v7937_v58  ;;  %v7531_v54 = vrot.slane %v17226_v36, 6  ;;  %v7955_v51 = vsel %vm19941_vm15, %v7944_v14, %v7954_v28  ;;  %v7781_v46 = vpack.c.bf16 %v7461_v17, %v7459_v45  ;;  %v7615_v1 = vrot.slane %v17357_v29, 1  ;;  %v19944_v14 = vld [vmem:[#allocation151_spill] sm:$0xff]  ;;  %vm19955_vm11 = vmmov %vm19838_vm1 }
 0x6b2   : > { %8522 = vmatprep.mubr.bf16.mxu0 %v7949_v4  ;;  %8386 = vmatmul.mubr.bf16.gmra.mrb[92].mxu1 %v7943_v3  ;;  %v7617_v30 = vrot.slane %v17385_v15, 1  ;;  %v7199_v55 = vadd.f32 %v17253_v59, %v19942_v48  ;;  %v7198_v22 = vadd.f32 %v17273_v37, %v19943_v62  ;;  %v7952_v49 = vrot.slane %v7775_v25, 2  ;;  %v19949_v45 = vld [vmem:[#allocation107_spill] sm:$0xff]  ;;  %vm19956_vm4 = vmmov %vm19946_vm5 }
 0x6b3   : > { %8393 = vmatprep.mubr.bf16.mxu1 %v7955_v51  ;;  %v7946_v24 = vrot.slane %v7772_v7, 2  ;;  %v7958_v6 = vrot.slane %v7778_v56, 2  ;;  %v7534_v60 = vsel %vm2782_vm14, %v7531_v54, %v7533_v32  ;;  %v7464_v35 = vrot.slane %v17388_v63, 3  ;;  %v19947_v7 = vld [vmem:[#allocation152_spill] sm:$0xff]  ;;  %vm19957_vm9 = vmmov %vm19953_vm3 }
 0x6b4   : > { %v17415_v5 = vmul.f32 %v19944_v14, %v7197_v0  ;;  %v7532_v61 = vsel %vm2782_vm14, %v7529_v2, %v7531_v54  ;;  %v7462_v52 = vrot.slane %v17385_v15, 3  ;;  %v7964_v19 = vrot.slane %v7781_v46, 2  ;;  %vm19958_vm15 = vmmov %vm19953_vm3 }
 0x6b5   : > { %v7616_v59 = vsel %vm19926_vm6, %v7613_v10, %v7615_v1  ;;  %v7618_v37 = vsel %vm19946_vm5, %v7615_v1, %v7617_v30  ;;  %v7780_v58 = vpack.c.bf16 %v17349_v33, %v17290_v18  ;;  %v17424_v16 = vmul.f32 %v19947_v7, %v7198_v22  ;;  %vm19959_vm6 = vmmov %vm19956_vm4 }
 0x6b6   : > { %19945 = vst [vmem:[#allocation55_spill] sm:$0xff] %v17415_v5  ;;  %v7777_v25 = vpack.c.bf16 %v7534_v60, %v7532_v61  ;;  %v7465_v56 = vsel %vm19948_vm13, %v7462_v52, %v7464_v35  ;;  %v17428_v17 = vmul.f32 %v19949_v45, %v7199_v55  ;;  %v7947_v2 = vsel %vm19950_vm10, %v7936_v41, %v7946_v24  ;;  %vm19960_vm5 = vmmov %vm19956_vm4 }
 0x6b7   : > { %v7959_v44 = vsel %vm19951_vm8, %v7948_v26, %v7958_v6  ;;  %v7953_v10 = vsel %vm19952_vm12, %v7942_v50, %v7952_v49  ;;  %v7783_v0 = vpack.c.bf16 %v7618_v37, %v7616_v59  ;;  %v7463_v4 = vsel %vm19953_vm3, %v7460_v53, %v7462_v52  ;;  %vm19961_vm13 = vmmov %vm19956_vm4 }
 0x6b8   : > { %v7535_v3 = vrot.slane %v17349_v33, 6  ;;  %v7537_v54 = vrot.slane %v17357_v29, 6  ;;  %v7965_v51 = vsel %vm19954_vm7, %v7954_v28, %v7964_v19  ;;  %v7962_v46 = vrot.slane %v7780_v58, 2  ;;  %vm19962_vm10 = vmmov %vm19838_vm1 }
 0x6b9   : > { %8523 = vmatmul.mubr.bf16.gmra.mrb[116].mxu0 %v7947_v2  ;;  %v7786_v1 = vpack.c.bf16 %v7465_v56, %v7463_v4  ;;  %v7621_v41 = vrot.slane %v17415_v5, 1  ;;  %v7956_v26 = vrot.slane %v7777_v25, 2  ;;  %v7466_v50 = vrot.slane %v17415_v5, 3  ;;  %vm19963_vm8 = vmmov %vm19838_vm1 }
 0x6ba   : > { %8530 = vmatprep.mubr.bf16.mxu0 %v7959_v44  ;;  %8394 = vmatmul.mubr.bf16.gmra.mrb[96].mxu1 %v7953_v10  ;;  %v7468_v48 = vrot.slane %v17424_v16, 3  ;;  %v7619_v53 = vrot.slane %v17388_v63, 1  ;;  %v7625_v55 = vrot.slane %v17428_v17, 1  ;;  %v7968_v62 = vrot.slane %v7783_v0, 2  ;;  %vm19964_vm12 = vmmov %vm19838_vm1 }
 0x6bb   : > { %8401 = vmatprep.mubr.bf16.mxu1 %v7965_v51  ;;  %v7536_v22 = vsel %vm2782_vm14, %v7533_v32, %v7535_v3  ;;  %v7538_v60 = vsel %vm2782_vm14, %v7535_v3, %v7537_v54  ;;  %v7963_v28 = vsel %vm19955_vm11, %v7952_v49, %v7962_v46  ;;  %v7974_v14 = vrot.slane %v7786_v1, 2  ;;  %vm19965_vm3 = vmmov %vm19838_vm1 }
 0x6bc   : > { %v7622_v61 = vsel %vm19956_vm4, %v7619_v53, %v7621_v41  ;;  %v7623_v52 = vrot.slane %v17424_v16, 1  ;;  %v7957_v59 = vsel %vm19838_vm1, %v7946_v24, %v7956_v26  ;;  %v7785_v37 = vpack.c.bf16 %v17385_v15, %v17357_v29  ;;  %vm19966_vm7 = vmmov %vm19838_vm1 }
 0x6bd   : > { %v7467_v58 = vsel %vm19957_vm9, %v7464_v35, %v7466_v50  ;;  %v7469_v7 = vsel %vm19958_vm15, %v7466_v50, %v7468_v48  ;;  %v7782_v25 = vpack.c.bf16 %v7538_v60, %v7536_v22  ;;  %v7620_v32 = vsel %vm19959_vm6, %v7617_v30, %v7619_v53  ;;  %vm19967_vm11 = vmmov %vm19838_vm1 }
 0x6be   : > { %v7624_v56 = vsel %vm19960_vm5, %v7621_v41, %v7623_v52  ;;  %v7626_v49 = vsel %vm19961_vm13, %v7623_v52, %v7625_v55  ;;  %v7969_v45 = vsel %vm19962_vm10, %v7958_v6, %v7968_v62  ;;  %v7788_v2 = vpack.c.bf16 %v7622_v61, %v7620_v32  ;;  %vm19968_vm4 = vmmov %vm19838_vm1 }
 0x6bf   : > { %v7541_v24 = vrot.slane %v17388_v63, 6  ;;  %v7793_v44 = vpack.c.bf16 %v7626_v49, %v7624_v56  ;;  %v7975_v35 = vsel %vm19963_vm8, %v7964_v19, %v7974_v14  ;;  %v7791_v10 = vpack.c.bf16 %v7469_v7, %v7467_v58  ;;  %vm19969_vm9 = vmmov %vm19838_vm1 }
 0x6c0   : > { %v7539_v0 = vrot.slane %v17385_v15, 6  ;;  %v7966_v30 = vrot.slane %v7782_v25, 2  ;;  %v7978_v4 = vrot.slane %v7788_v2, 2  ;;  %v7972_v3 = vrot.slane %v7785_v37, 2  ;;  %vm19970_vm15 = vmmov %vm19838_vm1 }
 0x6c1   : > { %8531 = vmatmul.mubr.bf16.gmra.mrb[120].mxu0 %v7957_v59  ;;  %v7984_v1 = vrot.slane %v7791_v10, 2  ;;  %v7545_v41 = vrot.slane %v17424_v16, 6  ;;  %v7790_v55 = vpack.c.bf16 %v17415_v5, %v17388_v63  ;;  %v7543_v22 = vrot.slane %v17415_v5, 6  ;;  %vm19971_vm6 = vmmov %vm19838_vm1 }
 0x6c2   : > { %8538 = vmatprep.mubr.bf16.mxu0 %v7969_v45  ;;  %8402 = vmatmul.mubr.bf16.gmra.mrb[100].mxu1 %v7963_v28  ;;  %v7542_v51 = vsel %vm2782_vm14, %v7539_v0, %v7541_v24  ;;  %v7540_v6 = vsel %vm2782_vm14, %v7537_v54, %v7539_v0  ;;  %v7967_v50 = vsel %vm19964_vm12, %v7956_v26, %v7966_v30  ;;  %v7988_v28 = vrot.slane %v7793_v44, 2  ;;  %vm19972_vm5 = vmmov %vm19838_vm1 }
 0x6c3   : > { %8409 = vmatprep.mubr.bf16.mxu1 %v7975_v35  ;;  %v7787_v48 = vpack.c.bf16 %v7542_v51, %v7540_v6  ;;  %v7979_v19 = vsel %vm19965_vm3, %v7968_v62, %v7978_v4  ;;  %v7973_v53 = vsel %vm19966_vm7, %v7962_v46, %v7972_v3  ;;  %v7985_v60 = vsel %vm19967_vm11, %v7974_v14, %v7984_v1  ;;  %vm19973_vm13 = vmmov %vm19838_vm1 }
 0x6c4   : > { %v7982_v61 = vrot.slane %v7790_v55, 2  ;;  %v7544_v26 = vsel %vm2782_vm14, %v7541_v24, %v7543_v22  ;;  %v7546_v52 = vsel %vm2782_vm14, %v7543_v22, %v7545_v41  ;;  %v7700_v62 = vrot.slane %v17424_v16, 4  ;;  %vm19974_vm10 = vmmov %vm19838_vm1 }
 0x6c5   : > { %v7976_v54 = vrot.slane %v7787_v48, 2  ;;  %v7792_v59 = vpack.c.bf16 %v7546_v52, %v7544_v26  ;;  %v7989_v37 = vsel %vm19838_vm1, %v7978_v4, %v7988_v28  ;;  %v7658_v14 = vrot.slane %v16958_v39, 4  ;;  %vm19975_vm8 = vmmov %vm19838_vm1 }
 0x6c6   : > { %v7983_v58 = vsel %vm19969_vm9, %v7972_v3, %v7982_v61  ;;  %v7702_v7 = vrot.slane %v17428_v17, 4  ;;  %v7654_v25 = vrot.slane %v16918_v27, 4  ;;  %v7698_v32 = vrot.slane %v17415_v5, 4  ;;  %vm19976_vm12 = vmmov %vm19838_vm1 }
 0x6c7   : > { %v7977_v46 = vsel %vm19968_vm4, %v7966_v30, %v7976_v54  ;;  %v7656_v16 = vrot.slane %v16926_v47, 4  ;;  %v7986_v56 = vrot.slane %v7792_v59, 2  ;;  %v7653_v49 = vrot.slane %v16901_v43, 4  ;;  %vm19977_vm3 = vmmov %vm19838_vm1 }
 0x6c8   : > { %v17482_v45 = vsel %vm4902_vm0, %v7700_v62, %v7702_v7  ;;  %v17488_v17 = vsel %vm4902_vm0, %v7698_v32, %v7700_v62  ;;  %v7660_v30 = vrot.slane %v16961_v9, 4  ;;  %v7662_v4 = vrot.slane %v16979_v34, 4  ;;  %vm19978_vm7 = vmmov %vm19838_vm1 }
 0x6c9   : > { %8539 = vmatmul.mubr.bf16.gmra.mrb[124].mxu0 %v7967_v50  ;;  %v7659_v2 = vsel %vm4902_vm0, %v7656_v16, %v7658_v14  ;;  %v7794_v24 = vpack.c.bf16 %v17482_v45, %v17488_v17  ;;  %v7987_v44 = vsel %vm19970_vm15, %v7976_v54, %v7986_v56  ;;  %v7655_v35 = vsel %vm4902_vm0, %v7653_v49, %v7654_v25  ;;  %v12564_v54 = vld [vmem:[%s18565_s17] sm:$0xff]   ;;  %vm19979_vm11 = vmmov %vm19838_vm1  ;;  %v12583_v45 = vld [vmem:[%s18565_s17 + $0xd8] sm:$0xff]  }
 0x6ca   : > { %8546 = vmatprep.mubr.bf16.mxu0 %v7979_v19  ;;  %8410 = vmatmul.mubr.bf16.gmra.mrb[104].mxu1 %v7973_v53  ;;  %v7657_v10 = vsel %vm4902_vm0, %v7654_v25, %v7656_v16  ;;  %v7734_v3 = vpack.c.bf16 %v7655_v35, %v7653_v49  ;;  %v7663_v6 = vsel %vm4902_vm0, %v7660_v30, %v7662_v4  ;;  %v7666_v19 = vrot.slane %v17107_v13, 4  ;;  %v12565_v49 = vld [vmem:[%s18565_s17 + $0x48] sm:$0xff]   ;;  %vm19980_vm4 = vmmov %vm19838_vm1 }
 0x6cb   : > { %8417 = vmatprep.mubr.bf16.mxu1 %v7985_v60  ;;  %v7739_v0 = vpack.c.bf16 %v7659_v2, %v7657_v10  ;;  %v7664_v53 = vrot.slane %v16990_v11, 4  ;;  %v12563_v60 = vld [vmem:[%s18565_s17 + $0x40] sm:$0xff]   ;;  %v7668_v52 = vrot.slane %v17110_v23, 4  ;;  %v7670_v62 = vrot.slane %v17096_v57, 4  ;;  %v12566_v2 = vld [vmem:[%s18565_s17 + $0x8] sm:$0xff]   ;;  %vm19981_vm9 = vmmov %vm19838_vm1 }
 0x6cc   : > { %v7879_v41 = vrot.slane %v7734_v3, 2  ;;  %11609 = vmatprep.subr.bf16.mxu0 %v12563_v60  ;;  %v7674_v7 = vrot.slane %v17207_v8, 4  ;;  %v7672_v25 = vrot.slane %v17198_v31, 4 }
 0x6cd   : > { %v7880_v51 = vrot.slane %v7739_v0, 2  ;;  %v7667_v22 = vsel %vm4902_vm0, %v7664_v53, %v7666_v19  ;;  %11610 = vmatpush3.bf16.msra.mxu0 %v12564_v54  ;;  %v7669_v59 = vsel %vm4902_vm0, %v7666_v19, %v7668_v52  ;;  %v7676_v0 = vrot.slane %v17217_v12, 4 }
 0x6ce   : > { %11611 = vmatprep.subr.bf16.mxu0 %v12565_v49  ;;  %v7680_v19 = vrot.slane %v17220_v40, 4  ;;  %v12572_v49 = vld [vmem:[%s18565_s17 + $0x80] sm:$0xff]  }
 0x6cf   : > { %v7881_v50 = vsel %vm19971_vm6, %v7879_v41, %v7880_v51  ;;  %v7677_v3 = vsel %vm4902_vm0, %v7674_v7, %v7676_v0  ;;  %vm19988_vm6 = vcmask 1046528  }
 0x6d1   : > { %8547 = vmatmul.mubr.bf16.gmra.mrb[128].mxu0 %v7977_v46 }
 0x6d2   : > { %8554 = vmatprep.mubr.bf16.mxu0 %v7989_v37  ;;  %8418 = vmatmul.mubr.bf16.gmra.mrb[108].mxu1 %v7983_v58  ;;  %v7671_v37 = vsel %vm4902_vm0, %v7668_v52, %v7670_v62 }
 0x6d3   : > { %8425 = vmatprep.mubr.bf16.mxu1 %v7984_v1  ;;  %v7661_v1 = vsel %vm4902_vm0, %v7658_v14, %v7660_v30  ;;  %v7754_v14 = vpack.c.bf16 %v7671_v37, %v7669_v59  ;;  %11612 = vmatpush3.bf16.msra.mxu0 %v12566_v2  ;;  %v7678_v30 = vrot.slane %v17201_v20, 4  ;;  %v12570_v59 = vld [vmem:[%s18565_s17 + $0x18] sm:$0xff]  }
 0x6d4   : > { %v7744_v48 = vpack.c.bf16 %v7663_v6, %v7661_v1  ;;  %v12567_v1 = vld [vmem:[%s18565_s17 + $0x50] sm:$0xff]  }
 0x6d5   : > { %v7910_v16 = vrot.slane %v7754_v14, 2  ;;  %11613 = vmatprep.subr.bf16.mxu0 %v12567_v1  ;;  %v7690_v14 = vrot.slane %v17349_v33, 4  ;;  %v12574_v1 = vld [vmem:[%s18565_s17 + $0x20] sm:$0xff]  }
 0x6d6   : > { %v7890_v55 = vrot.slane %v7744_v48, 2  ;;  %v7682_v48 = vrot.slane %v17278_v42, 4 }
 0x6d9   : > { %8555 = vmatmul.mubr.bf16.gmra.mrb[132].mxu0 %v7987_v44  ;;  %v7673_v44 = vsel %vm4902_vm0, %v7670_v62, %v7672_v25 }
 0x6da   : > { %8562 = vmatprep.mubr.bf16.mxu0 %v7988_v28  ;;  %8426 = vmatmul.mubr.bf16.gmra.mrb[112].mxu1 %v7982_v61  ;;  %v7665_v28 = vsel %vm4902_vm0, %v7662_v4, %v7664_v53  ;;  %v7891_v61 = vsel %vm19972_vm5, %v7880_v51, %v7890_v55  ;;  %v7679_v51 = vsel %vm4902_vm0, %v7676_v0, %v7678_v30  ;;  %v7694_v0 = vrot.slane %v17385_v15, 4  ;;  %vm19990_vm5 = vmmov %vm19988_vm6 }
 0x6db   : > { %12153 = vmatprep.mubr.msk.bf16.mxu1 %vm19070_vm2, %v19812_v38  ;;  %v7749_v26 = vpack.c.bf16 %v7667_v22, %v7665_v28  ;;  %v7764_v41 = vpack.c.bf16 %v7679_v51, %v7677_v3  ;;  %v7681_v22 = vsel %vm4902_vm0, %v7678_v30, %v7680_v19  ;;  %v7684_v28 = vrot.slane %v17281_v21, 4  ;;  %v12573_v30 = vld [vmem:[%s18565_s17 + $0x60] sm:$0xff]   ;;  %v19982_v21 = vld [vmem:[#allocation70_spill] sm:$0xff] }
 0x6dd   : > { %v7900_v46 = vrot.slane %v7749_v26, 2  ;;  %v7930_v53 = vrot.slane %v7764_v41, 2  ;;  %v7685_v52 = vsel %vm4902_vm0, %v7682_v48, %v7684_v28  ;;  %v12576_v41 = vld [vmem:[%s18565_s17 + $0x88] sm:$0xff]  }
 0x6df   : > { %v7901_v58 = vsel %vm19973_vm13, %v7890_v55, %v7900_v46  ;;  %v7911_v35 = vsel %vm19974_vm10, %v7900_v46, %v7910_v16  ;;  %v7683_v55 = vsel %vm4902_vm0, %v7680_v19, %v7682_v48  ;;  %v12569_v46 = vld [vmem:[%s18565_s17 + $0x58] sm:$0xff]   ;;  %v7696_v19 = vrot.slane %v17388_v63, 4 }
 0x6e0   : > { %v7769_v54 = vpack.c.bf16 %v7683_v55, %v7681_v22 }
 0x6e1   : > { %8563 = vmatmul.mubr.bf16.gmra.mrb[136].mxu0 %v7986_v56  ;;  %v7675_v56 = vsel %vm4902_vm0, %v7672_v25, %v7674_v7  ;;  %v7688_v7 = vrot.slane %v17290_v18, 4  ;;  %v12571_v25 = vld [vmem:[%s18565_s17 + $0xc0] sm:$0xff]   ;;  %v7699_v55 = vsel %vm4902_vm0, %v7696_v19, %v7698_v32  ;;  %v7697_v22 = vsel %vm4902_vm0, %v7694_v0, %v7696_v19 }
 0x6e2   : > { %12154 = vmatmul.mubr.bf16.vlgmr.msra.gmra.mrb[116].mxu1 %v7881_v50  ;;  %v7759_v10 = vpack.c.bf16 %v7675_v56, %v7673_v44  ;;  %v12568_v50 = vld [vmem:[%s18565_s17 + $0x10] sm:$0xff]   ;;  %v7940_v26 = vrot.slane %v7769_v54, 2  ;;  %11697 = vmatprep.subr.bf16.mxu1 %v12571_v25  ;;  %v12578_v54 = vld [vmem:[%s18565_s17 + $0x28] sm:$0xff]   ;;  %v12584_v25 = vld [vmem:[%s18565_s17 + $0x98] sm:$0xff]  }
 0x6e3   : > { %12157 = vmatprep.mubr.msk.bf16.mxu1 %vm19070_vm2, %v19812_v38  ;;  %11614 = vmatpush3.bf16.msra.mxu0 %v12568_v50  ;;  %v7691_v56 = vsel %vm4902_vm0, %v7688_v7, %v7690_v14 }
 0x6e4   : > { %v7920_v4 = vrot.slane %v7759_v10, 2  ;;  %v7941_v37 = vsel %vm19977_vm3, %v7930_v53, %v7940_v26  ;;  %11615 = vmatprep.subr.bf16.mxu0 %v12569_v46  ;;  %11698 = vmatpush3.bf16.msra.mxu1 %v12572_v49  ;;  %v7692_v10 = vrot.slane %v17357_v29, 4  ;;  %v7990_v46 = vrot.slane %v7794_v24, 2 }
 0x6e6   : > { %v7921_v6 = vsel %vm19975_vm8, %v7910_v16, %v7920_v4  ;;  %v7931_v60 = vsel %vm19976_vm12, %v7920_v4, %v7930_v53  ;;  %v7693_v3 = vsel %vm4902_vm0, %v7690_v14, %v7692_v10  ;;  %v7695_v51 = vsel %vm4902_vm0, %v7692_v10, %v7694_v0  ;;  %v12586_v10 = vld [vmem:[%s18565_s17 + $0xe0] sm:$0xff]   ;;  %vm19994_vm8 = vmmov %vm19990_vm5 }
 0x6e7   : > { %11616 = vmatpush3.bf16.msra.mxu0 %v12570_v59  ;;  %v7784_v48 = vpack.c.bf16 %v7695_v51, %v7693_v3  ;;  %v12581_v59 = vld [vmem:[%s18565_s17 + $0x70] sm:$0xff]   ;;  %v12587_v3 = vld [vmem:[%s18565_s17 + $0x38] sm:$0xff]   ;;  %v12588_v51 = vld [vmem:[%s18565_s17 + $0xa0] sm:$0xff]  }
 0x6e8   : > { %11617 = vmatprep.subr.bf16.mxu0 %v12573_v30  ;;  %vm19997_vm12 = vmmov %vm19990_vm5 }
 0x6e9   : > { %v7970_v53 = vrot.slane %v7784_v48, 2  ;;  %v12590_v48 = vld [vmem:[%s18565_s17 + $0xa8] sm:$0xff]  }
 0x6ea   : > { %12158 = vmatmul.mubr.bf16.gmra.mrb[120].mxu1 %v7891_v61  ;;  %v7686_v61 = vrot.slane %v17226_v36, 4 }
 0x6eb   : > { %12161 = vmatprep.mubr.msk.bf16.mxu1 %vm19070_vm2, %v19812_v38  ;;  %11618 = vmatpush3.bf16.msra.mxu0 %v12574_v1  ;;  %v12589_v1 = vld [vmem:[%s18565_s17 + $0xe8] sm:$0xff]  }
 0x6ec   : > { %v7687_v62 = vsel %vm4902_vm0, %v7684_v28, %v7686_v61  ;;  %v7689_v2 = vsel %vm4902_vm0, %v7686_v61, %v7688_v7  ;;  %v7789_v61 = vpack.c.bf16 %v7699_v55, %v7697_v22 }
 0x6ee   : > { %v7980_v32 = vrot.slane %v7789_v61, 2 }
 0x6f2   : > { %12162 = vmatmul.mubr.bf16.gmra.mrb[124].mxu1 %v7901_v58  ;;  %v7774_v58 = vpack.c.bf16 %v7687_v62, %v7685_v52  ;;  %v12580_v52 = vld [vmem:[%s18565_s17 + $0x90] sm:$0xff]   ;;  %v7981_v62 = vsel %vm19838_vm1, %v7970_v53, %v7980_v32 }
 0x6f3   : > { %12165 = vmatprep.mubr.msk.bf16.mxu1 %vm19070_vm2, %v19812_v38 }
 0x6f4   : > { %v7950_v16 = vrot.slane %v7774_v58, 2  ;;  %v7991_v58 = vsel %vm19981_vm9, %v7980_v32, %v7990_v46  ;;  %v12592_v32 = vld [vmem:[%s18565_s17 + $0xb0] sm:$0xff]  }
 0x6f6   : > { %v7951_v44 = vsel %vm19978_vm7, %v7940_v26, %v7950_v16  ;;  %v12579_v26 = vld [vmem:[%s18565_s17 + $0xd0] sm:$0xff]  }
 0x6fa   : > { %12166 = vmatmul.mubr.bf16.gmra.mrb[128].mxu1 %v7911_v35  ;;  %v7779_v35 = vpack.c.bf16 %v7691_v56, %v7689_v2 }
 0x6fb   : > { %12169 = vmatprep.mubr.msk.bf16.mxu1 %vm19070_vm2, %v19812_v38 }
 0x6fc   : > { %v7960_v4 = vrot.slane %v7779_v35, 2  ;;  %v12585_v35 = vld [vmem:[%s18565_s17 + $0x78] sm:$0xff]  }
 0x6fe   : > { %v7961_v50 = vsel %vm19979_vm11, %v7950_v16, %v7960_v4  ;;  %v7971_v28 = vsel %vm19980_vm4, %v7960_v4, %v7970_v53  ;;  %vm20001_vm11 = vmmov %vm19990_vm5 }
 0x6ff   : > { %vm20003_vm4 = vmmov %vm19990_vm5 }
 0x702   : > { %12170 = vmatmul.mubr.bf16.gmra.mrb[132].mxu1 %v7921_v6  ;;  %v12575_v6 = vld [vmem:[%s18565_s17 + $0xc8] sm:$0xff]  }
 0x703   : > { %12173 = vmatprep.mubr.msk.bf16.mxu1 %vm19070_vm2, %v19812_v38  ;;  %11699 = vmatprep.subr.bf16.mxu1 %v12575_v6 }
 0x704   : > { %11700 = vmatpush3.bf16.msra.mxu1 %v12576_v41 }
 0x705   : > { %11701 = vmatprep.subr.bf16.mxu1 %v12579_v26  ;;  %v12593_v26 = vld [vmem:[%s18565_s17 + $0xf8] sm:$0xff]  }
 0x708   : > { %11702 = vmatpush3.bf16.msra.mxu1 %v12580_v52  ;;  %v17684_v52 = vld [vmem:[%s18565_s17 + $0x100] sm:$0xff]  }
 0x709   : > { %11703 = vmatprep.subr.bf16.mxu1 %v12583_v45 }
 0x70a   : > { %12174 = vmatmul.mubr.bf16.gmra.mrb[136].mxu1 %v7931_v60  ;;  %v12577_v60 = vld [vmem:[%s18565_s17 + $0x68] sm:$0xff]  }
 0x70b   : > { %12177 = vmatprep.mubr.msk.bf16.mxu1 %vm19070_vm2, %v19812_v38  ;;  %11619 = vmatprep.subr.bf16.mxu0 %v12577_v60 }
 0x70c   : > { %11620 = vmatpush3.bf16.msra.mxu0 %v12578_v54  ;;  %11704 = vmatpush3.bf16.msra.mxu1 %v12584_v25 }
 0x70d   : > { %11621 = vmatprep.subr.bf16.mxu0 %v12581_v59  ;;  %11705 = vmatprep.subr.bf16.mxu1 %v12586_v10 }
 0x710   : > { %11706 = vmatpush3.bf16.msra.mxu1 %v12588_v51 }
 0x711   : > { %11707 = vmatprep.subr.bf16.mxu1 %v12589_v1 }
 0x712   : > { %12178 = vmatmul.mubr.bf16.gmra.mrb[140].mxu1 %v7941_v37  ;;  %v12582_v37 = vld [vmem:[%s18565_s17 + $0x30] sm:$0xff]  }
 0x713   : > { %12181 = vmatprep.mubr.msk.bf16.mxu1 %vm19070_vm2, %v19812_v38  ;;  %11622 = vmatpush3.bf16.msra.mxu0 %v12582_v37 }
 0x714   : > { %11623 = vmatprep.subr.bf16.mxu0 %v12585_v35  ;;  %11708 = vmatpush3.bf16.msra.mxu1 %v12590_v48 }
 0x717   : > { %11624 = vmatpush3.bf16.msra.mxu0 %v12587_v3 }
 0x718   : > { %12205 = vmatprep.subr.bf16.mxu0 %v17684_v52 }
 0x71a   : > { %12182 = vmatmul.mubr.bf16.gmra.mrb[144].mxu1 %v7951_v44 }
 0x71b   : > { %12185 = vmatprep.mubr.msk.bf16.mxu1 %vm19070_vm2, %v19812_v38 }
 0x722   : > { %12186 = vmatmul.mubr.bf16.gmra.mrb[148].mxu1 %v7961_v50 }
 0x723   : > { %12189 = vmatprep.mubr.msk.bf16.mxu1 %vm19070_vm2, %v19812_v38 }
 0x72a   : > { %12190 = vmatmul.mubr.bf16.gmra.mrb[152].mxu1 %v7971_v28  ;;  %v12591_v28 = vld [vmem:[%s18565_s17 + $0xf0] sm:$0xff]  }
 0x72b   : > { %12193 = vmatprep.mubr.msk.bf16.mxu1 %vm19070_vm2, %v19812_v38  ;;  %11709 = vmatprep.subr.bf16.mxu1 %v12591_v28 }
 0x72c   : > { %11710 = vmatpush3.bf16.msra.mxu1 %v12592_v32 }
 0x72d   : > { %11711 = vmatprep.subr.bf16.mxu1 %v12593_v26 }
 0x732   : > { %12194 = vmatmul.mubr.bf16.gmra.mrb[156].mxu1 %v7981_v62  ;;  %v12594_v62 = vld [vmem:[%s18565_s17 + $0xb8] sm:$0xff]  }
 0x733   : > { %12197 = vmatprep.mubr.msk.bf16.mxu1 %vm19070_vm2, %v19812_v38  ;;  %11712 = vmatpush3.bf16.msra.mxu1 %v12594_v62 }
 0x73a   : > { %12198 = vmatmul.mubr.bf16.gmra.mrb[160].mxu1 %v7991_v58 }
 0x73b   : > { %12201 = vmatprep.mubr.msk.bf16.mxu1 %vm19070_vm2, %v19812_v38  ;;  %v17646_v38 = vld [vmem:[%s18564_s16] ss:$0 sm:$0xff]  ;;  %vm19984_vm2 = vcmask 1044480  }
 0x73c   : > { %vm19987_vm15 = vmmov %vm19984_vm2 }
 0x73d   : > { %vm19991_vm13 = vmmov %vm19984_vm2 }
 0x73e   : > { %vm19993_vm10 = vmmov %vm19984_vm2 }
 0x73f   : > { %vm19998_vm3 = vmmov %vm19984_vm2 }
 0x740   : > { %v11416_v17 = vpop.f32.mrb[64].mxu1  ;;  %vm20000_vm7 = vmmov %vm19984_vm2 }
 0x741   : > { %v11417_v24 = vpop.f32.mrb[65].mxu1  ;;  %vm20004_vm1 = vmmov %vm19984_vm2 }
 0x742   : > { %12202 = vmatmul.mubr.bf16.gmra.mrb[164].mxu1 %v7990_v46  ;;  %v11418_v14 = vadd.f32 %v11417_v24, %v11416_v17  ;;  %v11419_v7 = vpop.f32.mrb[66].mxu1  ;;  %vm20006_vm9 = vmmov %vm20004_vm1 }
 0x743   : > { %v11420_v16 = vpop.f32.mrb[67].mxu1 }
 0x744   : > { %v11421_v56 = vadd.f32 %v11420_v16, %v11419_v7  ;;  %v8332_v49 = vadd.f32 %v11418_v14, %v17646_v38 }
 0x746   : > { %v8335_v0 = vadd.f32 %v11421_v56, %v17646_v38 }
 0x748   : > { %v11510_v2 = vpop.f32.mrb[88].mxu0 }
 0x749   : > { %v11511_v44 = vpop.f32.mrb[89].mxu0 }
 0x74a   : > { %v11512_v30 = vadd.f32 %v11511_v44, %v11510_v2  ;;  %v11513_v4 = vpop.f32.mrb[90].mxu0 }
 0x74b   : > { %v11514_v6 = vpop.f32.mrb[91].mxu0 }
 0x74c   : > { %v11515_v41 = vadd.f32 %v11514_v6, %v11513_v4  ;;  %v17665_v50 = vadd.f32 %v11512_v30, %v8332_v49 }
 0x74e   : > { %v11422_v19 = vpop.f32.mrb[68].mxu1  ;;  %v17670_v53 = vadd.f32 %v11515_v41, %v8335_v0 }
 0x74f   : > { %v11423_v55 = vpop.f32.mrb[69].mxu1 }
 0x750   : > { %v11424_v22 = vadd.f32 %v11423_v55, %v11422_v19  ;;  %v11425_v60 = vpop.f32.mrb[70].mxu1 }
 0x751   : > { %v11426_v54 = vpop.f32.mrb[71].mxu1 }
 0x752   : > { %v11427_v61 = vadd.f32 %v11426_v54, %v11425_v60  ;;  %v8340_v46 = vadd.f32 %v11424_v22, %v17646_v38 }
 0x754   : > { %v8343_v58 = vadd.f32 %v11427_v61, %v17646_v38 }
 0x757   : > { %v11516_v59 = vpop.f32.mrb[92].mxu0 }
 0x758   : > { %v11517_v37 = vpop.f32.mrb[93].mxu0 }
 0x759   : > { %v11518_v45 = vadd.f32 %v11517_v37, %v11516_v59  ;;  %v11519_v17 = vpop.f32.mrb[94].mxu0 }
 0x75a   : > { %v11520_v24 = vpop.f32.mrb[95].mxu0  ;;  %v11428_v14 = vpop.f32.mrb[72].mxu1 }
 0x75b   : > { %v11521_v7 = vadd.f32 %v11520_v24, %v11519_v17  ;;  %v11429_v25 = vpop.f32.mrb[73].mxu1  ;;  %v17692_v16 = vadd.f32 %v11518_v45, %v8340_v46 }
 0x75c   : > { %v11430_v56 = vadd.f32 %v11429_v25, %v11428_v14  ;;  %v11431_v49 = vpop.f32.mrb[74].mxu1 }
 0x75d   : > { %v11432_v2 = vpop.f32.mrb[75].mxu1  ;;  %v17694_v44 = vadd.f32 %v11521_v7, %v8343_v58 }
 0x75e   : > { %v11433_v35 = vadd.f32 %v11432_v2, %v11431_v49  ;;  %v8348_v10 = vadd.f32 %v11430_v56, %v17646_v38 }
 0x760   : > { %v8351_v4 = vadd.f32 %v11433_v35, %v17646_v38 }
 0x763   : > { %v11522_v0 = vpop.f32.mrb[96].mxu0 }
 0x764   : > { %v11523_v30 = vpop.f32.mrb[97].mxu0 }
 0x765   : > { %v11524_v3 = vadd.f32 %v11523_v30, %v11522_v0  ;;  %v11525_v51 = vpop.f32.mrb[98].mxu0  ;;  %v11434_v1 = vpop.f32.mrb[76].mxu1 }
 0x766   : > { %v11526_v6 = vpop.f32.mrb[99].mxu0  ;;  %v11435_v41 = vpop.f32.mrb[77].mxu1 }
 0x767   : > { %v11527_v48 = vadd.f32 %v11526_v6, %v11525_v51  ;;  %v11436_v19 = vadd.f32 %v11435_v41, %v11434_v1  ;;  %v11437_v55 = vpop.f32.mrb[78].mxu1  ;;  %v17698_v22 = vadd.f32 %v11524_v3, %v8348_v10 }
 0x768   : > { %v11438_v60 = vpop.f32.mrb[79].mxu1 }
 0x769   : > { %v11439_v54 = vadd.f32 %v11438_v60, %v11437_v55  ;;  %v17700_v28 = vadd.f32 %v11527_v48, %v8351_v4  ;;  %v8356_v61 = vadd.f32 %v11436_v19, %v17646_v38 }
 0x76b   : > { %v8359_v46 = vadd.f32 %v11439_v54, %v17646_v38 }
 0x76c   : > { %v11528_v32 = vpop.f32.mrb[100].mxu0 }
 0x76d   : > { %v11529_v26 = vpop.f32.mrb[101].mxu0  ;;  %v11440_v62 = vpop.f32.mrb[80].mxu1 }
 0x76e   : > { %v11530_v59 = vadd.f32 %v11529_v26, %v11528_v32  ;;  %v11531_v37 = vpop.f32.mrb[102].mxu0  ;;  %v11441_v58 = vpop.f32.mrb[81].mxu1 }
 0x76f   : > { %v11532_v45 = vpop.f32.mrb[103].mxu0  ;;  %v11442_v17 = vadd.f32 %v11441_v58, %v11440_v62  ;;  %v11443_v24 = vpop.f32.mrb[82].mxu1 }
 0x770   : > { %v11533_v14 = vadd.f32 %v11532_v45, %v11531_v37  ;;  %v11444_v7 = vpop.f32.mrb[83].mxu1  ;;  %v17704_v25 = vadd.f32 %v11530_v59, %v8356_v61 }
 0x771   : > { %v11445_v56 = vadd.f32 %v11444_v7, %v11443_v24  ;;  %v8364_v2 = vadd.f32 %v11442_v17, %v17646_v38 }
 0x772   : > { %v17706_v49 = vadd.f32 %v11533_v14, %v8359_v46 }
 0x773   : > { %v8367_v30 = vadd.f32 %v11445_v56, %v17646_v38 }
 0x774   : > { %v11534_v35 = vpop.f32.mrb[104].mxu0 }
 0x775   : > { %v11535_v10 = vpop.f32.mrb[105].mxu0  ;;  %v11446_v0 = vpop.f32.mrb[84].mxu1 }
 0x776   : > { %v11536_v4 = vadd.f32 %v11535_v10, %v11534_v35  ;;  %v11537_v3 = vpop.f32.mrb[106].mxu0  ;;  %v11447_v51 = vpop.f32.mrb[85].mxu1 }
 0x777   : > { %v11538_v1 = vpop.f32.mrb[107].mxu0  ;;  %v11448_v6 = vadd.f32 %v11447_v51, %v11446_v0  ;;  %v11449_v41 = vpop.f32.mrb[86].mxu1 }
 0x778   : > { %v11539_v48 = vadd.f32 %v11538_v1, %v11537_v3  ;;  %v11450_v19 = vpop.f32.mrb[87].mxu1  ;;  %v17710_v55 = vadd.f32 %v11536_v4, %v8364_v2 }
 0x779   : > { %v11451_v60 = vadd.f32 %v11450_v19, %v11449_v41  ;;  %v8372_v61 = vadd.f32 %v11448_v6, %v17646_v38 }
 0x77a   : > { %v17712_v54 = vadd.f32 %v11539_v48, %v8367_v30 }
 0x77b   : > { %v8375_v46 = vadd.f32 %v11451_v60, %v17646_v38 }
 0x77c   : > { %v11540_v32 = vpop.f32.mrb[108].mxu0 }
 0x77d   : > { %v11541_v26 = vpop.f32.mrb[109].mxu0  ;;  %v11452_v62 = vpop.f32.mrb[88].mxu1 }
 0x77e   : > { %v11542_v59 = vadd.f32 %v11541_v26, %v11540_v32  ;;  %v11543_v37 = vpop.f32.mrb[110].mxu0  ;;  %v11453_v58 = vpop.f32.mrb[89].mxu1 }
 0x77f   : > { %v11544_v45 = vpop.f32.mrb[111].mxu0  ;;  %v11454_v17 = vadd.f32 %v11453_v58, %v11452_v62  ;;  %v11455_v24 = vpop.f32.mrb[90].mxu1 }
 0x780   : > { %v11545_v14 = vadd.f32 %v11544_v45, %v11543_v37  ;;  %v11456_v7 = vpop.f32.mrb[91].mxu1  ;;  %v17716_v56 = vadd.f32 %v11542_v59, %v8372_v61 }
 0x781   : > { %v11457_v2 = vadd.f32 %v11456_v7, %v11455_v24  ;;  %v8380_v10 = vadd.f32 %v11454_v17, %v17646_v38 }
 0x782   : > { %v17718_v35 = vadd.f32 %v11545_v14, %v8375_v46 }
 0x783   : > { %v8383_v3 = vadd.f32 %v11457_v2, %v17646_v38 }
 0x784   : > { %v11546_v0 = vpop.f32.mrb[112].mxu0 }
 0x785   : > { %v11547_v30 = vpop.f32.mrb[113].mxu0  ;;  %v11458_v4 = vpop.f32.mrb[92].mxu1 }
 0x786   : > { %v11548_v51 = vadd.f32 %v11547_v30, %v11546_v0  ;;  %v11549_v1 = vpop.f32.mrb[114].mxu0  ;;  %v11459_v6 = vpop.f32.mrb[93].mxu1 }
 0x787   : > { %v11550_v41 = vpop.f32.mrb[115].mxu0  ;;  %v11460_v48 = vadd.f32 %v11459_v6, %v11458_v4  ;;  %v11461_v19 = vpop.f32.mrb[94].mxu1 }
 0x788   : > { %v11551_v60 = vadd.f32 %v11550_v41, %v11549_v1  ;;  %v11462_v32 = vpop.f32.mrb[95].mxu1  ;;  %v17722_v61 = vadd.f32 %v11548_v51, %v8380_v10 }
 0x789   : > { %v11463_v26 = vadd.f32 %v11462_v32, %v11461_v19  ;;  %v8388_v46 = vadd.f32 %v11460_v48, %v17646_v38 }
 0x78a   : > { %v17724_v62 = vadd.f32 %v11551_v60, %v8383_v3 }
 0x78b   : > { %v8391_v45 = vadd.f32 %v11463_v26, %v17646_v38 }
 0x78c   : > { %v11552_v59 = vpop.f32.mrb[116].mxu0 }
 0x78d   : > { %v11553_v37 = vpop.f32.mrb[117].mxu0  ;;  %v11464_v58 = vpop.f32.mrb[96].mxu1 }
 0x78e   : > { %v11554_v17 = vadd.f32 %v11553_v37, %v11552_v59  ;;  %v11555_v24 = vpop.f32.mrb[118].mxu0  ;;  %v11465_v14 = vpop.f32.mrb[97].mxu1 }
 0x78f   : > { %v11556_v7 = vpop.f32.mrb[119].mxu0  ;;  %v11466_v2 = vadd.f32 %v11465_v14, %v11464_v58  ;;  %v11467_v0 = vpop.f32.mrb[98].mxu1 }
 0x790   : > { %v11557_v30 = vadd.f32 %v11556_v7, %v11555_v24  ;;  %v11468_v4 = vpop.f32.mrb[99].mxu1  ;;  %v17728_v10 = vadd.f32 %v11554_v17, %v8388_v46 }
 0x791   : > { %v11469_v51 = vadd.f32 %v11468_v4, %v11467_v0  ;;  %v8396_v1 = vadd.f32 %v11466_v2, %v17646_v38 }
 0x792   : > { %v17730_v3 = vadd.f32 %v11557_v30, %v8391_v45 }
 0x793   : > { %v8399_v19 = vadd.f32 %v11469_v51, %v17646_v38 }
 0x794   : > { %v11558_v6 = vpop.f32.mrb[120].mxu0 }
 0x795   : > { %v11559_v41 = vpop.f32.mrb[121].mxu0  ;;  %v11470_v48 = vpop.f32.mrb[100].mxu1 }
 0x796   : > { %v11560_v60 = vadd.f32 %v11559_v41, %v11558_v6  ;;  %v11561_v32 = vpop.f32.mrb[122].mxu0  ;;  %v11471_v26 = vpop.f32.mrb[101].mxu1 }
 0x797   : > { %v11562_v59 = vpop.f32.mrb[123].mxu0  ;;  %v11472_v37 = vadd.f32 %v11471_v26, %v11470_v48  ;;  %v11473_v58 = vpop.f32.mrb[102].mxu1 }
 0x798   : > { %v11563_v24 = vadd.f32 %v11562_v59, %v11561_v32  ;;  %v11474_v14 = vpop.f32.mrb[103].mxu1  ;;  %v17734_v46 = vadd.f32 %v11560_v60, %v8396_v1 }
 0x799   : > { %v11475_v17 = vadd.f32 %v11474_v14, %v11473_v58  ;;  %v8404_v7 = vadd.f32 %v11472_v37, %v17646_v38 }
 0x79a   : > { %v17736_v45 = vadd.f32 %v11563_v24, %v8399_v19 }
 0x79b   : > { %v8407_v4 = vadd.f32 %v11475_v17, %v17646_v38 }
 0x79c   : > { %v11564_v2 = vpop.f32.mrb[124].mxu0 }
 0x79d   : > { %v11565_v0 = vpop.f32.mrb[125].mxu0  ;;  %v11476_v30 = vpop.f32.mrb[104].mxu1 }
 0x79e   : > { %v11566_v51 = vadd.f32 %v11565_v0, %v11564_v2  ;;  %v11567_v6 = vpop.f32.mrb[126].mxu0  ;;  %v11477_v41 = vpop.f32.mrb[105].mxu1 }
 0x79f   : > { %v11568_v15 = vpop.f32.mrb[127].mxu0  ;;  %v11478_v48 = vadd.f32 %v11477_v41, %v11476_v30  ;;  %v11479_v26 = vpop.f32.mrb[106].mxu1 }
 0x7a0   : > { %v11569_v32 = vadd.f32 %v11568_v15, %v11567_v6  ;;  %v11480_v59 = vpop.f32.mrb[107].mxu1  ;;  %v17740_v1 = vadd.f32 %v11566_v51, %v8404_v7 }
 0x7a1   : > { %v11481_v60 = vadd.f32 %v11480_v59, %v11479_v26  ;;  %v8412_v37 = vadd.f32 %v11478_v48, %v17646_v38 }
 0x7a2   : > { %v17742_v19 = vadd.f32 %v11569_v32, %v8407_v4 }
 0x7a3   : > { %v8415_v17 = vadd.f32 %v11481_v60, %v17646_v38 }
 0x7a4   : > { %v11570_v58 = vpop.f32.mrb[128].mxu0 }
 0x7a5   : > { %v11571_v24 = vpop.f32.mrb[129].mxu0  ;;  %v11482_v14 = vpop.f32.mrb[108].mxu1 }
 0x7a6   : > { %v11572_v2 = vadd.f32 %v11571_v24, %v11570_v58  ;;  %v11573_v0 = vpop.f32.mrb[130].mxu0  ;;  %v11483_v5 = vpop.f32.mrb[109].mxu1 }
 0x7a7   : > { %v11574_v29 = vpop.f32.mrb[131].mxu0  ;;  %v11484_v30 = vadd.f32 %v11483_v5, %v11482_v14  ;;  %v11485_v41 = vpop.f32.mrb[110].mxu1 }
 0x7a8   : > { %v11575_v15 = vadd.f32 %v11574_v29, %v11573_v0  ;;  %v11486_v6 = vpop.f32.mrb[111].mxu1  ;;  %v17746_v7 = vadd.f32 %v11572_v2, %v8412_v37 }
 0x7a9   : > { %v11487_v51 = vadd.f32 %v11486_v6, %v11485_v41  ;;  %v8420_v48 = vadd.f32 %v11484_v30, %v17646_v38 }
 0x7aa   : > { %v17748_v4 = vadd.f32 %v11575_v15, %v8415_v17 }
 0x7ab   : > { %v8423_v60 = vadd.f32 %v11487_v51, %v17646_v38 }
 0x7ac   : > { %v11576_v26 = vpop.f32.mrb[132].mxu0 }
 0x7ad   : > { %v11577_v32 = vpop.f32.mrb[133].mxu0  ;;  %v11488_v59 = vpop.f32.mrb[112].mxu1 }
 0x7ae   : > { %v11578_v58 = vadd.f32 %v11577_v32, %v11576_v26  ;;  %v11579_v24 = vpop.f32.mrb[134].mxu0  ;;  %v11489_v63 = vpop.f32.mrb[113].mxu1 }
 0x7af   : > { %v11580_v36 = vpop.f32.mrb[135].mxu0  ;;  %v11490_v5 = vadd.f32 %v11489_v63, %v11488_v59  ;;  %v11491_v14 = vpop.f32.mrb[114].mxu1 }
 0x7b0   : > { %v11581_v29 = vadd.f32 %v11580_v36, %v11579_v24  ;;  %v11492_v0 = vpop.f32.mrb[115].mxu1  ;;  %v17752_v37 = vadd.f32 %v11578_v58, %v8420_v48 }
 0x7b1   : > { %v11493_v2 = vadd.f32 %v11492_v0, %v11491_v14  ;;  %v8428_v30 = vadd.f32 %v11490_v5, %v17646_v38 }
 0x7b2   : > { %v17754_v17 = vadd.f32 %v11581_v29, %v8423_v60 }
 0x7b3   : > { %v8431_v51 = vadd.f32 %v11493_v2, %v17646_v38 }
 0x7b4   : > { %v11582_v41 = vpop.f32.mrb[136].mxu0 }
 0x7b5   : > { %v11583_v15 = vpop.f32.mrb[137].mxu0  ;;  %v8605_v6 = vpop.f32.mrb[116].mxu1 }
 0x7b6   : > { %v11584_v26 = vadd.f32 %v11583_v15, %v11582_v41  ;;  %v11585_v32 = vpop.f32.mrb[138].mxu0  ;;  %v8606_v33 = vadd.f32 %v8605_v6, %v17665_v50  ;;  %v12155_v63 = vpop.f32.mrb[117].mxu1  ;;  %v19983_v15 = vld [vmem:[#allocation67_spill] sm:$0xff] }
 0x7b7   : > { %v11586_v59 = vpop.f32.mrb[139].mxu0  ;;  %v8608_v36 = vpop.f32.mrb[118].mxu1 }
 0x7b8   : > { %v11587_v24 = vadd.f32 %v11586_v59, %v11585_v32  ;;  %v8708_v48 = vmul.f32 0.1, %v8606_v33  ;;  %v8609_v58 = vadd.f32 %v8608_v36, %v17670_v53  ;;  %v12156_v60 = vpop.f32.mrb[119].mxu1  ;;  %v17760_v14 = vadd.f32 %v11584_v26, %v8428_v30 }
 0x7b9   : > { %v19985_v60 = vld [vmem:[#allocation57_spill] sm:$0xff] }
 0x7ba   : > { %v8734_v5 = vmax.f32 %v8606_v33, %v8708_v48  ;;  %v8709_v29 = vmul.f32 0.1, %v8609_v58  ;;  %v17762_v0 = vadd.f32 %v11587_v24, %v8431_v51 }
 0x7bc   : > { %v8761_v38 = vmul.f32 %v8734_v5, %v19982_v21  ;;  %v8735_v2 = vmax.f32 %v8609_v58, %v8709_v29 }
 0x7bd   : > { %v8613_v41 = vpop.f32.mrb[120].mxu1 }
 0x7be   : > { %v8762_v50 = vmul.f32 %v8735_v2, %v19983_v15  ;;  %v8614_v6 = vadd.f32 %v8613_v41, %v17692_v16  ;;  %v12159_v63 = vpop.f32.mrb[121].mxu1  ;;  %v8885_v32 = vrot.slane %v8761_v38, 6  ;;  %v8812_v26 = vrot.slane %v8761_v38, 3  ;;  %v19986_v41 = vld [vmem:[#allocation68_spill] sm:$0xff] }
 0x7bf   : > { %v8616_v59 = vpop.f32.mrb[122].mxu1 }
 0x7c0   : > { %v8886_v18 = vrot.slane %v8762_v50, 6  ;;  %v9105_v53 = vpack.c.bf16 %v8762_v50, %v8761_v38  ;;  %v8710_v36 = vmul.f32 0.1, %v8614_v6  ;;  %v8617_v30 = vadd.f32 %v8616_v59, %v17694_v44  ;;  %v12160_v33 = vpop.f32.mrb[123].mxu1 }
 0x7c1   : > { %v8813_v51 = vrot.slane %v8762_v50, 3 }
 0x7c2   : > { %v8887_v24 = vsel %vm2782_vm14, %v8885_v32, %v8886_v18  ;;  %v8736_v21 = vmax.f32 %v8614_v6, %v8710_v36  ;;  %v8711_v48 = vmul.f32 0.1, %v8617_v30  ;;  %v8959_v6 = vrot.slane %v8762_v50, 1 }
 0x7c3   : > { %v8814_v58 = vsel %vm19984_vm2, %v8812_v26, %v8813_v51  ;;  %v9032_v36 = vrot.slane %v8762_v50, 4  ;;  %vm20007_vm2 = vmmov %vm20003_vm4 }
 0x7c4   : > { %v17771_v5 = vmul.f32 %v8736_v21, %v19985_v60  ;;  %v8737_v16 = vmax.f32 %v8617_v30, %v8711_v48 }
 0x7c5   : > { %v8621_v29 = vpop.f32.mrb[124].mxu1 }
 0x7c6   : > { %v8888_v2 = vrot.slane %v17771_v5, 6  ;;  %v17775_v15 = vmul.f32 %v8737_v16, %v19986_v41  ;;  %v8622_v44 = vadd.f32 %v8621_v29, %v17698_v22  ;;  %v12163_v38 = vpop.f32.mrb[125].mxu1  ;;  %v8815_v63 = vrot.slane %v17771_v5, 3 }
 0x7c7   : > { %v8624_v32 = vpop.f32.mrb[126].mxu1  ;;  %v8960_v59 = vrot.slane %v17771_v5, 1  ;;  %v9033_v33 = vrot.slane %v17771_v5, 4 }
 0x7c8   : > { %v8889_v30 = vsel %vm2782_vm14, %v8886_v18, %v8888_v2  ;;  %v8890_v26 = vrot.slane %v17775_v15, 6  ;;  %v8712_v48 = vmul.f32 0.1, %v8622_v44  ;;  %v12164_v60 = vpop.f32.mrb[127].mxu1  ;;  %v8625_v16 = vadd.f32 %v8624_v32, %v17700_v28  ;;  %v19989_v32 = vld [vmem:[#allocation74_spill] sm:$0xff] }
 0x7c9   : > { %v9107_v22 = vpack.c.bf16 %v8889_v30, %v8887_v24  ;;  %v8816_v29 = vsel %vm19987_vm15, %v8813_v51, %v8815_v63  ;;  %v8961_v41 = vsel %vm19988_vm6, %v8959_v6, %v8960_v59  ;;  %v8962_v18 = vrot.slane %v17775_v15, 1  ;;  %v12596_v24 = vld [vmem:[%s18565_s17 + $0x108] sm:$0xff]   ;;  %vm20010_vm15 = vmmov %vm20007_vm2 }
 0x7ca   : > { %v17789_v50 = vsel %vm2782_vm14, %v8888_v2, %v8890_v26  ;;  %v8738_v38 = vmax.f32 %v8622_v44, %v8712_v48  ;;  %v9106_v20 = vpack.c.bf16 %v8816_v29, %v8814_v58  ;;  %v8713_v42 = vmul.f32 0.1, %v8625_v16  ;;  %vm20011_vm6 = vmmov %vm20004_vm1 }
 0x7cb   : > { %v8817_v12 = vrot.slane %v17775_v15, 3  ;;  %v17797_v28 = vsel %vm4902_vm0, %v9032_v36, %v9033_v33  ;;  %v9035_v51 = vrot.slane %v17775_v15, 4  ;;  %v8963_v58 = vsel %vm19990_vm5, %v8960_v59, %v8962_v18  ;;  %vm20013_vm5 = vmmov %vm20004_vm1 }
 0x7cc   : > { %v17801_v6 = vmul.f32 %v8738_v38, %v19989_v32  ;;  %9443 = vmatprep.mubr.bf16.mxu0 %v9106_v20  ;;  %v8739_v2 = vmax.f32 %v8625_v16, %v8713_v42  ;;  %v9108_v30 = vpack.c.bf16 %v8963_v58, %v8961_v41  ;;  %v19992_v42 = vld [vmem:[#allocation77_spill] sm:$0xff] }
 0x7cd   : > { %9444 = vmatmul.mubr.bf16.vlgmr.msra.gmra.mrb[140].mxu0 %v9105_v53  ;;  %v8629_v44 = vpop.f32.mrb[128].mxu1  ;;  %v8818_v48 = vsel %vm19991_vm13, %v8815_v63, %v8817_v12  ;;  %v17806_v60 = vsel %vm4902_vm0, %v9033_v33, %v9035_v51  ;;  %v12597_v33 = vld [vmem:[%s18565_s17 + $0x110] sm:$0xff]   ;;  %vm20014_vm13 = vmmov %vm20007_vm2 }
 0x7ce   : > { %v8892_v36 = vrot.slane %v17801_v6, 6  ;;  %12206 = vmatpush3.bf16.msra.mxu0 %v17684_v52  ;;  %v8630_v29 = vadd.f32 %v8629_v44, %v17704_v25  ;;  %v12167_v38 = vpop.f32.mrb[129].mxu1  ;;  %v8819_v20 = vrot.slane %v17801_v6, 3  ;;  %v9037_v59 = vrot.slane %v17801_v6, 4  ;;  %9572 = vmatprep.mubr.bf16.mxu1 %v9108_v30 }
 0x7cf   : > { %v17814_v53 = vmul.f32 %v8739_v2, %v19992_v42  ;;  %v8632_v16 = vpop.f32.mrb[130].mxu1  ;;  %v8964_v63 = vrot.slane %v17801_v6, 1  ;;  %12207 = vmatprep.subr.bf16.mxu0 %v12596_v24  ;;  %9573 = vmatmul.mubr.bf16.vlgmr.msra.gmra.mrb[168].mxu1 %v9107_v22 }
 0x7d0   : > { %v8893_v25 = vsel %vm2782_vm14, %v8890_v26, %v8892_v36  ;;  %v8714_v41 = vmul.f32 0.1, %v8630_v29  ;;  %v8633_v32 = vadd.f32 %v8632_v16, %v17706_v49  ;;  %v12168_v58 = vpop.f32.mrb[131].mxu1  ;;  %v8820_v2 = vsel %vm19993_vm10, %v8817_v12, %v8819_v20  ;;  %vm20016_vm10 = vmmov %vm20007_vm2 }
 0x7d1   : > { %v9112_v44 = vpack.c.bf16 %v8893_v25, %v17789_v50  ;;  %v8894_v30 = vrot.slane %v17814_v53, 6  ;;  %v9039_v38 = vrot.slane %v17814_v53, 4  ;;  %v9115_v42 = vpack.c.bf16 %v17814_v53, %v17801_v6  ;;  %v12598_v50 = vld [vmem:[%s18565_s17 + $0x118] sm:$0xff]  }
 0x7d2   : > { %v8740_v21 = vmax.f32 %v8630_v29, %v8714_v41  ;;  %v8715_v52 = vmul.f32 0.1, %v8633_v32  ;;  %v9111_v40 = vpack.c.bf16 %v8820_v2, %v8818_v48  ;;  %v8965_v26 = vsel %vm19994_vm8, %v8962_v18, %v8964_v63  ;;  %12208 = vmatpush3.bf16.msra.mxu0 %v12596_v24  ;;  %v19995_v29 = vld [vmem:[#allocation62_spill] sm:$0xff]  ;;  %v19999_v41 = vld [vmem:[#allocation88_spill] sm:$0xff]  ;;  %vm20017_vm8 = vmmov %vm20004_vm1 }
 0x7d3   : > { %v17832_v49 = vsel %vm2782_vm14, %v8892_v36, %v8894_v30  ;;  %v8966_v12 = vrot.slane %v17814_v53, 1  ;;  %v8821_v22 = vrot.slane %v17814_v53, 3  ;;  %12209 = vmatprep.subr.bf16.mxu0 %v12597_v33  ;;  %v17840_v6 = vsel %vm4902_vm0, %v9035_v51, %v9037_v59 }
 0x7d4   : > { %v17843_v48 = vmul.f32 %v8740_v21, %v19995_v29  ;;  %v8741_v18 = vmax.f32 %v8633_v32, %v8715_v52  ;;  %9451 = vmatprep.mubr.bf16.mxu0 %v9111_v40  ;;  %v17846_v24 = vsel %vm4902_vm0, %v9037_v59, %v9039_v38  ;;  %v19996_v36 = vpack.c.bf16 %v17775_v15, %v17771_v5 }
 0x7d5   : > { %v8637_v53 = vpop.f32.mrb[132].mxu1  ;;  %v8967_v16 = vsel %vm19997_vm12, %v8964_v63, %v8966_v12  ;;  %v8822_v25 = vsel %vm19998_vm3, %v8819_v20, %v8821_v22  ;;  %v12599_v20 = vld [vmem:[%s18565_s17 + $0x120] sm:$0xff]   ;;  %vm20019_vm12 = vmmov %vm20004_vm1 }
 0x7d6   : > { %9452 = vmatmul.mubr.bf16.gmra.mrb[144].mxu0 %v19996_v36  ;;  %v8896_v21 = vrot.slane %v17843_v48, 6  ;;  %v17857_v52 = vmul.f32 %v8741_v18, %v19999_v41  ;;  %v8638_v40 = vadd.f32 %v8637_v53, %v17710_v55  ;;  %v9113_v59 = vpack.c.bf16 %v8967_v16, %v8965_v26  ;;  %v12171_v32 = vpop.f32.mrb[133].mxu1  ;;  %vm20020_vm3 = vmmov %vm20007_vm2 }
 0x7d7   : > { %12210 = vmatpush3.bf16.msra.mxu0 %v12597_v33  ;;  %v8640_v5 = vpop.f32.mrb[134].mxu1  ;;  %v8823_v15 = vrot.slane %v17843_v48, 3  ;;  %v8968_v63 = vrot.slane %v17843_v48, 1  ;;  %v9041_v58 = vrot.slane %v17843_v48, 4 }
 0x7d8   : > { %12211 = vmatprep.subr.bf16.mxu0 %v12598_v50  ;;  %v8897_v2 = vsel %vm2782_vm14, %v8894_v30, %v8896_v21  ;;  %v8898_v29 = vrot.slane %v17857_v52, 6  ;;  %v8716_v33 = vmul.f32 0.1, %v8638_v40  ;;  %9580 = vmatprep.mubr.bf16.mxu1 %v9113_v59  ;;  %v12172_v26 = vpop.f32.mrb[135].mxu1  ;;  %v8641_v36 = vadd.f32 %v8640_v5, %v17712_v54  ;;  %v12600_v54 = vld [vmem:[%s18565_s17 + $0x128] sm:$0xff]  }
 0x7d9   : > { %v9117_v18 = vpack.c.bf16 %v8897_v2, %v17832_v49  ;;  %9581 = vmatmul.mubr.bf16.gmra.mrb[172].mxu1 %v9112_v44  ;;  %v8824_v53 = vsel %vm20000_vm7, %v8821_v22, %v8823_v15  ;;  %v8969_v16 = vsel %vm20001_vm11, %v8966_v12, %v8968_v63  ;;  %v8970_v51 = vrot.slane %v17857_v52, 1  ;;  %v20002_v12 = vld [vmem:[#allocation85_spill] sm:$0xff]  ;;  %vm20022_vm7 = vmmov %vm20007_vm2 }
 0x7da   : > { %v17875_v41 = vsel %vm2782_vm14, %v8896_v21, %v8898_v29  ;;  %v8742_v30 = vmax.f32 %v8638_v40, %v8716_v33  ;;  %v9116_v32 = vpack.c.bf16 %v8824_v53, %v8822_v25  ;;  %v8717_v55 = vmul.f32 0.1, %v8641_v36  ;;  %vm20023_vm11 = vmmov %vm20004_vm1 }
 0x7db   : > { %12212 = vmatpush3.bf16.msra.mxu0 %v12598_v50  ;;  %v8825_v59 = vrot.slane %v17857_v52, 3  ;;  %v17883_v44 = vsel %vm4902_vm0, %v9039_v38, %v9041_v58  ;;  %v9043_v49 = vrot.slane %v17857_v52, 4  ;;  %v8971_v25 = vsel %vm20003_vm4, %v8968_v63, %v8970_v51  ;;  %v20005_v63 = vld [vmem:[#allocation64_spill] sm:$0xff]  ;;  %vm20025_vm4 = vmmov %vm20004_vm1 }
 0x7dc   : > { %12213 = vmatprep.subr.bf16.mxu0 %v12599_v20  ;;  %v17887_v22 = vmul.f32 %v8742_v30, %v20002_v12  ;;  %9459 = vmatprep.mubr.bf16.mxu0 %v9116_v32  ;;  %v8743_v50 = vmax.f32 %v8641_v36, %v8717_v55  ;;  %v9118_v40 = vpack.c.bf16 %v8971_v25, %v8969_v16 }
 0x7dd   : > { %v8645_v21 = vpop.f32.mrb[136].mxu1  ;;  %v8826_v5 = vsel %vm20004_vm1, %v8823_v15, %v8825_v59  ;;  %v17892_v2 = vsel %vm4902_vm0, %v9041_v58, %v9043_v49  ;;  %v12601_v58 = vld [vmem:[%s18565_s17 + $0x130] sm:$0xff]   ;;  %vm20026_vm1 = vmmov %vm20007_vm2 }
 0x7de   : > { %9460 = vmatmul.mubr.bf16.gmra.mrb[148].mxu0 %v9115_v42  ;;  %v8900_v38 = vrot.slane %v17887_v22, 6  ;;  %v8646_v33 = vadd.f32 %v8645_v21, %v17716_v56  ;;  %v12175_v26 = vpop.f32.mrb[137].mxu1  ;;  %v8827_v53 = vrot.slane %v17887_v22, 3  ;;  %v9045_v30 = vrot.slane %v17887_v22, 4  ;;  %9588 = vmatprep.mubr.bf16.mxu1 %v9118_v40 }
 0x7df   : > { %12214 = vmatpush3.bf16.msra.mxu0 %v12599_v20  ;;  %v17899_v55 = vmul.f32 %v8743_v50, %v20005_v63  ;;  %v8648_v42 = vpop.f32.mrb[138].mxu1  ;;  %v8972_v15 = vrot.slane %v17887_v22, 1 }
 0x7e0   : > { %12215 = vmatprep.subr.bf16.mxu0 %v12600_v54  ;;  %v8901_v36 = vsel %vm2782_vm14, %v8898_v29, %v8900_v38  ;;  %v8718_v20 = vmul.f32 0.1, %v8646_v33  ;;  %v8649_v16 = vadd.f32 %v8648_v42, %v17718_v35  ;;  %v12176_v32 = vpop.f32.mrb[139].mxu1  ;;  %v8828_v12 = vsel %vm20006_vm9, %v8825_v59, %v8827_v53  ;;  %v12602_v42 = vld [vmem:[%s18565_s17 + $0x138] sm:$0xff]   ;;  %vm20028_vm9 = vmmov %vm20026_vm1 }
 0x7e1   : > { %v9122_v25 = vpack.c.bf16 %v8901_v36, %v17875_v41  ;;  %v8902_v50 = vrot.slane %v17899_v55, 6  ;;  %v9047_v21 = vrot.slane %v17899_v55, 4  ;;  %v9125_v40 = vpack.c.bf16 %v17899_v55, %v17887_v22  ;;  %9589 = vmatmul.mubr.bf16.gmra.mrb[176].mxu1 %v9117_v18  ;;  %v20008_v22 = vld [vmem:[#allocation76_spill] sm:$0xff] }
 0x7e2   : > { %v8744_v26 = vmax.f32 %v8646_v33, %v8718_v20  ;;  %v8719_v63 = vmul.f32 0.1, %v8649_v16  ;;  %v9121_v56 = vpack.c.bf16 %v8828_v12, %v8826_v5  ;;  %v8973_v29 = vsel %vm20007_vm2, %v8970_v51, %v8972_v15  ;;  %v20012_v32 = vld [vmem:[#allocation72_spill] sm:$0xff]  ;;  %vm20029_vm2 = vmmov %vm20025_vm4 }
 0x7e3   : > { %12216 = vmatpush3.bf16.msra.mxu0 %v12600_v54  ;;  %v17917_v35 = vsel %vm2782_vm14, %v8900_v38, %v8902_v50  ;;  %v8974_v59 = vrot.slane %v17899_v55, 1  ;;  %v8829_v41 = vrot.slane %v17899_v55, 3  ;;  %v17925_v18 = vsel %vm4902_vm0, %v9043_v49, %v9045_v30 }
 0x7e4   : > { %12217 = vmatprep.subr.bf16.mxu0 %v12601_v58  ;;  %v17928_v5 = vmul.f32 %v8744_v26, %v20008_v22  ;;  %v8745_v51 = vmax.f32 %v8649_v16, %v8719_v63  ;;  %9467 = vmatprep.mubr.bf16.mxu0 %v9121_v56  ;;  %v17931_v54 = vsel %vm4902_vm0, %v9045_v30, %v9047_v21 }
 0x7e5   : > { %v20009_v38 = vpack.c.bf16 %v17857_v52, %v17843_v48  ;;  %v8653_v33 = vpop.f32.mrb[140].mxu1  ;;  %v8975_v55 = vsel %vm20010_vm15, %v8972_v15, %v8974_v59  ;;  %v8830_v36 = vsel %vm20011_vm6, %v8827_v53, %v8829_v41  ;;  %vm20031_vm15 = vmmov %vm20029_vm2 }
 0x7e6   : > { %v8904_v20 = vrot.slane %v17928_v5, 6  ;;  %v17942_v16 = vmul.f32 %v8745_v51, %v20012_v32  ;;  %v8654_v30 = vadd.f32 %v8653_v33, %v17722_v61  ;;  %v9123_v56 = vpack.c.bf16 %v8975_v55, %v8973_v29  ;;  %v12179_v12 = vpop.f32.mrb[141].mxu1  ;;  %vm20032_vm6 = vmmov %vm20026_vm1 }
 0x7e7   : > { %9468 = vmatmul.mubr.bf16.gmra.mrb[152].mxu0 %v20009_v38  ;;  %v8656_v48 = vpop.f32.mrb[142].mxu1  ;;  %v8831_v52 = vrot.slane %v17928_v5, 3  ;;  %v8976_v15 = vrot.slane %v17928_v5, 1  ;;  %v9049_v53 = vrot.slane %v17928_v5, 4 }
 0x7e8   : > { %12218 = vmatpush3.bf16.msra.mxu0 %v12601_v58  ;;  %v8905_v26 = vsel %vm2782_vm14, %v8902_v50, %v8904_v20  ;;  %v8906_v63 = vrot.slane %v17942_v16, 6  ;;  %v9130_v22 = vpack.c.bf16 %v17942_v16, %v17928_v5  ;;  %v8720_v51 = vmul.f32 0.1, %v8654_v30  ;;  %9596 = vmatprep.mubr.bf16.mxu1 %v9123_v56  ;;  %v12180_v61 = vpop.f32.mrb[143].mxu1 }
 0x7e9   : > { %12219 = vmatprep.subr.bf16.mxu0 %v12602_v42  ;;  %v9127_v58 = vpack.c.bf16 %v8905_v26, %v17917_v35  ;;  %9597 = vmatmul.mubr.bf16.gmra.mrb[180].mxu1 %v9122_v25  ;;  %v8657_v29 = vadd.f32 %v8656_v48, %v17724_v62  ;;  %v8832_v38 = vsel %vm20013_vm5, %v8829_v41, %v8831_v52  ;;  %v8978_v12 = vrot.slane %v17942_v16, 1  ;;  %v20015_v25 = vld [vmem:[#allocation89_spill] sm:$0xff]  ;;  %vm20034_vm5 = vmmov %vm20026_vm1 }
 0x7ea   : > { %v8977_v33 = vsel %vm20014_vm13, %v8974_v59, %v8976_v15  ;;  %v17957_v55 = vsel %vm2782_vm14, %v8904_v20, %v8906_v63  ;;  %v8746_v50 = vmax.f32 %v8654_v30, %v8720_v51  ;;  %v9126_v32 = vpack.c.bf16 %v8832_v38, %v8830_v36  ;;  %v20018_v38 = vld [vmem:[#allocation71_spill] sm:$0xff]  ;;  %vm20035_vm13 = vmmov %vm20029_vm2 }
 0x7eb   : > { %v8721_v5 = vmul.f32 0.1, %v8657_v29  ;;  %v8833_v56 = vrot.slane %v17942_v16, 3  ;;  %v17962_v35 = vsel %vm4902_vm0, %v9047_v21, %v9049_v53  ;;  %v9051_v62 = vrot.slane %v17942_v16, 4 }
 0x7ec   : > { %12220 = vmatpush3.bf16.msra.mxu0 %v12602_v42  ;;  %v17966_v41 = vmul.f32 %v8746_v50, %v20015_v25  ;;  %9475 = vmatprep.mubr.bf16.mxu0 %v9126_v32  ;;  %v8979_v59 = vsel %vm20016_vm10, %v8976_v15, %v8978_v12  ;;  %vm20037_vm10 = vmmov %vm20029_vm2 }
 0x7ed   : > { %v8747_v20 = vmax.f32 %v8657_v29, %v8721_v5  ;;  %v8661_v36 = vpop.f32.mrb[144].mxu1  ;;  %v9128_v30 = vpack.c.bf16 %v8979_v59, %v8977_v33  ;;  %v8834_v42 = vsel %vm20017_vm8, %v8831_v52, %v8833_v56  ;;  %v17971_v48 = vsel %vm4902_vm0, %v9049_v53, %v9051_v62  ;;  %vm20038_vm8 = vmmov %vm20026_vm1 }
 0x7ee   : > { %v8908_v21 = vrot.slane %v17966_v41, 6  ;;  %v8662_v26 = vadd.f32 %v8661_v36, %v17728_v10  ;;  %v12183_v16 = vpop.f32.mrb[145].mxu1  ;;  %v8835_v51 = vrot.slane %v17966_v41, 3  ;;  %v9053_v61 = vrot.slane %v17966_v41, 4 }
 0x7ef   : > { %9476 = vmatmul.mubr.bf16.gmra.mrb[156].mxu0 %v9125_v40  ;;  %v17978_v15 = vmul.f32 %v8747_v20, %v20018_v38  ;;  %9604 = vmatprep.mubr.bf16.mxu1 %v9128_v30  ;;  %v8664_v40 = vpop.f32.mrb[146].mxu1  ;;  %v8980_v29 = vrot.slane %v17966_v41, 1 }
 0x7f0   : > { %v8909_v53 = vsel %vm2782_vm14, %v8906_v63, %v8908_v21  ;;  %v8722_v33 = vmul.f32 0.1, %v8662_v26  ;;  %v8665_v10 = vadd.f32 %v8664_v40, %v17730_v3  ;;  %v12184_v50 = vpop.f32.mrb[147].mxu1  ;;  %v8836_v32 = vsel %vm20019_vm12, %v8833_v56, %v8835_v51  ;;  %v20021_v40 = vld [vmem:[#allocation97_spill] sm:$0xff]  ;;  %vm20040_vm12 = vmmov %vm20026_vm1 }
 0x7f1   : > { %v9132_v5 = vpack.c.bf16 %v8909_v53, %v17957_v55  ;;  %v8910_v25 = vrot.slane %v17978_v15, 6  ;;  %v9055_v59 = vrot.slane %v17978_v15, 4  ;;  %v9135_v20 = vpack.c.bf16 %v17978_v15, %v17966_v41  ;;  %9605 = vmatmul.mubr.bf16.gmra.mrb[184].mxu1 %v9127_v58 }
 0x7f2   : > { %v8748_v36 = vmax.f32 %v8662_v26, %v8722_v33  ;;  %v8723_v30 = vmul.f32 0.1, %v8665_v10  ;;  %v9131_v16 = vpack.c.bf16 %v8836_v32, %v8834_v42  ;;  %v8981_v63 = vsel %vm20020_vm3, %v8978_v12, %v8980_v29  ;;  %vm20041_vm3 = vmmov %vm20029_vm2 }
 0x7f3   : > { %v17993_v3 = vsel %vm2782_vm14, %v8908_v21, %v8910_v25  ;;  %v8982_v56 = vrot.slane %v17978_v15, 1  ;;  %v8837_v55 = vrot.slane %v17978_v15, 3  ;;  %v17998_v38 = vsel %vm4902_vm0, %v9051_v62, %v9053_v61  ;;  %v20024_v15 = vld [vmem:[#allocation95_spill] sm:$0xff] }
 0x7f4   : > { %v18001_v53 = vmul.f32 %v8748_v36, %v20021_v40  ;;  %v8749_v41 = vmax.f32 %v8665_v10, %v8723_v30  ;;  %9483 = vmatprep.mubr.bf16.mxu0 %v9131_v16  ;;  %v18004_v58 = vsel %vm4902_vm0, %v9053_v61, %v9055_v59 }
 0x7f5   : > { %v8669_v12 = vpop.f32.mrb[148].mxu1  ;;  %v8983_v42 = vsel %vm20022_vm7, %v8980_v29, %v8982_v56  ;;  %v8838_v21 = vsel %vm20023_vm11, %v8835_v51, %v8837_v55  ;;  %vm20043_vm7 = vmmov %vm20029_vm2 }
 0x7f6   : > { %v8912_v62 = vrot.slane %v18001_v53, 6  ;;  %v18012_v33 = vmul.f32 %v8749_v41, %v20024_v15  ;;  %v8670_v10 = vadd.f32 %v8669_v12, %v17734_v46  ;;  %v9133_v50 = vpack.c.bf16 %v8983_v42, %v8981_v63  ;;  %v12187_v32 = vpop.f32.mrb[149].mxu1  ;;  %vm20044_vm11 = vmmov %vm20026_vm1 }
 0x7f7   : > { %9484 = vmatmul.mubr.bf16.gmra.mrb[160].mxu0 %v9130_v22  ;;  %v8672_v61 = vpop.f32.mrb[150].mxu1  ;;  %v8839_v22 = vrot.slane %v18001_v53, 3  ;;  %v8984_v36 = vrot.slane %v18001_v53, 1  ;;  %v9057_v29 = vrot.slane %v18001_v53, 4 }
 0x7f8   : > { %v8913_v51 = vsel %vm2782_vm14, %v8910_v25, %v8912_v62  ;;  %v8914_v30 = vrot.slane %v18012_v33, 6  ;;  %v9140_v16 = vpack.c.bf16 %v18012_v33, %v18001_v53  ;;  %v8724_v40 = vmul.f32 0.1, %v8670_v10  ;;  %9612 = vmatprep.mubr.bf16.mxu1 %v9133_v50  ;;  %v12188_v41 = vpop.f32.mrb[151].mxu1 }
 0x7f9   : > { %v9137_v46 = vpack.c.bf16 %v8913_v51, %v17993_v3  ;;  %9613 = vmatmul.mubr.bf16.gmra.mrb[188].mxu1 %v9132_v5  ;;  %v8673_v63 = vadd.f32 %v8672_v61, %v17736_v45  ;;  %v8840_v12 = vsel %vm20025_vm4, %v8837_v55, %v8839_v22  ;;  %v8985_v42 = vsel %vm20026_vm1, %v8982_v56, %v8984_v36  ;;  %v20027_v45 = vld [vmem:[#allocation98_spill] sm:$0xff]  ;;  %vm20046_vm4 = vmmov %vm20026_vm1 }
 0x7fa   : > { %v18027_v15 = vsel %vm2782_vm14, %v8912_v62, %v8914_v30  ;;  %v8750_v25 = vmax.f32 %v8670_v10, %v8724_v40  ;;  %v9136_v32 = vpack.c.bf16 %v8840_v12, %v8838_v21  ;;  %v8986_v26 = vrot.slane %v18012_v33, 1  ;;  %vm20047_vm1 = vmmov %vm20029_vm2 }
 0x7fb   : > { %v8725_v53 = vmul.f32 0.1, %v8673_v63  ;;  %v8841_v50 = vrot.slane %v18012_v33, 3  ;;  %v18032_v41 = vsel %vm4902_vm0, %v9055_v59, %v9057_v29  ;;  %v9059_v5 = vrot.slane %v18012_v33, 4 }
 0x7fc   : > { %v18036_v3 = vmul.f32 %v8750_v25, %v20027_v45  ;;  %9491 = vmatprep.mubr.bf16.mxu0 %v9136_v32  ;;  %v8987_v56 = vsel %vm20028_vm9, %v8984_v36, %v8986_v26  ;;  %v20030_v25 = vld [vmem:[#allocation86_spill] sm:$0xff]  ;;  %vm20049_vm9 = vmmov %vm20047_vm1 }
 0x7fd   : > { %v8751_v55 = vmax.f32 %v8673_v63, %v8725_v53  ;;  %v8677_v62 = vpop.f32.mrb[152].mxu1  ;;  %v9138_v21 = vpack.c.bf16 %v8987_v56, %v8985_v42  ;;  %v8842_v10 = vsel %vm20029_vm2, %v8839_v22, %v8841_v50  ;;  %v18041_v61 = vsel %vm4902_vm0, %v9057_v29, %v9059_v5  ;;  %vm20050_vm2 = vmmov %vm20046_vm4 }
 0x7fe   : > { %v8916_v59 = vrot.slane %v18036_v3, 6  ;;  %v8678_v51 = vadd.f32 %v8677_v62, %v17740_v1  ;;  %v12191_v33 = vpop.f32.mrb[153].mxu1  ;;  %v8843_v40 = vrot.slane %v18036_v3, 3  ;;  %v9061_v12 = vrot.slane %v18036_v3, 4 }
 0x7ff   : > { %9492 = vmatmul.mubr.bf16.gmra.mrb[164].mxu0 %v9135_v20  ;;  %v18048_v36 = vmul.f32 %v8751_v55, %v20030_v25  ;;  %9620 = vmatprep.mubr.bf16.mxu1 %v9138_v21  ;;  %v8680_v20 = vpop.f32.mrb[154].mxu1  ;;  %v8988_v63 = vrot.slane %v18036_v3, 1 }
 0x800   : > { %v8917_v29 = vsel %vm2782_vm14, %v8914_v30, %v8916_v59  ;;  %v8726_v42 = vmul.f32 0.1, %v8678_v51  ;;  %v8681_v1 = vadd.f32 %v8680_v20, %v17742_v19  ;;  %v12192_v32 = vpop.f32.mrb[155].mxu1  ;;  %v8844_v53 = vsel %vm20031_vm15, %v8841_v50, %v8843_v40  ;;  %vm20052_vm15 = vmmov %vm20050_vm2 }
 0x801   : > { %v9142_v45 = vpack.c.bf16 %v8917_v29, %v18027_v15  ;;  %v8918_v56 = vrot.slane %v18048_v36, 6  ;;  %v9063_v55 = vrot.slane %v18048_v36, 4  ;;  %v9145_v62 = vpack.c.bf16 %v18048_v36, %v18036_v3  ;;  %9621 = vmatmul.mubr.bf16.gmra.mrb[192].mxu1 %v9137_v46  ;;  %v20033_v29 = vld [vmem:[#allocation80_spill] sm:$0xff] }
 0x802   : > { %v8752_v21 = vmax.f32 %v8678_v51, %v8726_v42  ;;  %v8727_v33 = vmul.f32 0.1, %v8681_v1  ;;  %v9141_v25 = vpack.c.bf16 %v8844_v53, %v8842_v10  ;;  %v8989_v30 = vsel %vm20032_vm6, %v8986_v26, %v8988_v63  ;;  %vm20053_vm6 = vmmov %vm20047_vm1 }
 0x803   : > { %v18063_v19 = vsel %vm2782_vm14, %v8916_v59, %v8918_v56  ;;  %v8990_v50 = vrot.slane %v18048_v36, 1  ;;  %v8845_v15 = vrot.slane %v18048_v36, 3  ;;  %v18068_v20 = vsel %vm4902_vm0, %v9059_v5, %v9061_v12  ;;  %v20036_v36 = vld [vmem:[#allocation83_spill] sm:$0xff] }
 0x804   : > { %v18071_v32 = vmul.f32 %v8752_v21, %v20033_v29  ;;  %v8753_v3 = vmax.f32 %v8681_v1, %v8727_v33  ;;  %9499 = vmatprep.mubr.bf16.mxu0 %v9141_v25  ;;  %v18074_v46 = vsel %vm4902_vm0, %v9061_v12, %v9063_v55 }
 0x805   : > { %v8685_v26 = vpop.f32.mrb[156].mxu1  ;;  %v8991_v10 = vsel %vm20034_vm5, %v8988_v63, %v8990_v50  ;;  %v8846_v59 = vsel %vm20035_vm13, %v8843_v40, %v8845_v15  ;;  %vm20055_vm5 = vmmov %vm20047_vm1 }
 0x806   : > { %v8920_v5 = vrot.slane %v18071_v32, 6  ;;  %v18082_v42 = vmul.f32 %v8753_v3, %v20036_v36  ;;  %v8686_v1 = vadd.f32 %v8685_v26, %v17746_v7  ;;  %v9143_v53 = vpack.c.bf16 %v8991_v10, %v8989_v30  ;;  %v12195_v21 = vpop.f32.mrb[157].mxu1  ;;  %vm20056_vm13 = vmmov %vm20050_vm2 }
 0x807   : > { %9500 = vmatmul.mubr.bf16.gmra.mrb[168].mxu0 %v9140_v16  ;;  %v8688_v12 = vpop.f32.mrb[158].mxu1  ;;  %v8847_v16 = vrot.slane %v18071_v32, 3  ;;  %v8992_v33 = vrot.slane %v18071_v32, 1  ;;  %v9065_v63 = vrot.slane %v18071_v32, 4 }
 0x808   : > { %v8921_v40 = vsel %vm2782_vm14, %v8918_v56, %v8920_v5  ;;  %v8922_v25 = vrot.slane %v18082_v42, 6  ;;  %v9150_v29 = vpack.c.bf16 %v18082_v42, %v18071_v32  ;;  %v8728_v3 = vmul.f32 0.1, %v8686_v1  ;;  %9628 = vmatprep.mubr.bf16.mxu1 %v9143_v53  ;;  %v12196_v36 = vpop.f32.mrb[159].mxu1 }
 0x809   : > { %v9147_v7 = vpack.c.bf16 %v8921_v40, %v18063_v19  ;;  %9629 = vmatmul.mubr.bf16.gmra.mrb[196].mxu1 %v9142_v45  ;;  %v8689_v30 = vadd.f32 %v8688_v12, %v17748_v4  ;;  %v8848_v26 = vsel %vm20037_vm10, %v8845_v15, %v8847_v16  ;;  %v8993_v10 = vsel %vm20038_vm8, %v8990_v50, %v8992_v33  ;;  %v20039_v4 = vld [vmem:[#allocation84_spill] sm:$0xff]  ;;  %vm20057_vm10 = vmmov %vm20050_vm2 }
 0x80a   : > { %v18097_v21 = vsel %vm2782_vm14, %v8920_v5, %v8922_v25  ;;  %v8754_v56 = vmax.f32 %v8686_v1, %v8728_v3  ;;  %v9146_v51 = vpack.c.bf16 %v8848_v26, %v8846_v59  ;;  %v8994_v22 = vrot.slane %v18082_v42, 1  ;;  %v20042_v26 = vld [vmem:[#allocation96_spill] sm:$0xff] }
 0x80b   : > { %v8729_v32 = vmul.f32 0.1, %v8689_v30  ;;  %v8849_v53 = vrot.slane %v18082_v42, 3  ;;  %v18102_v36 = vsel %vm4902_vm0, %v9063_v55, %v9065_v63  ;;  %v9067_v45 = vrot.slane %v18082_v42, 4 }
 0x80c   : > { %v18106_v19 = vmul.f32 %v8754_v56, %v20039_v4  ;;  %9507 = vmatprep.mubr.bf16.mxu0 %v9146_v51  ;;  %v8995_v50 = vsel %vm20040_vm12, %v8992_v33, %v8994_v22 }
 0x80d   : > { %v8755_v15 = vmax.f32 %v8689_v30, %v8729_v32  ;;  %v8693_v5 = vpop.f32.mrb[160].mxu1  ;;  %v9148_v59 = vpack.c.bf16 %v8995_v50, %v8993_v10  ;;  %v8850_v1 = vsel %vm20041_vm3, %v8847_v16, %v8849_v53  ;;  %v18111_v12 = vsel %vm4902_vm0, %v9065_v63, %v9067_v45 }
 0x80e   : > { %v8924_v55 = vrot.slane %v18106_v19, 6  ;;  %v8694_v40 = vadd.f32 %v8693_v5, %v17752_v37  ;;  %v12199_v42 = vpop.f32.mrb[161].mxu1  ;;  %v8851_v3 = vrot.slane %v18106_v19, 3  ;;  %v9069_v51 = vrot.slane %v18106_v19, 4 }
 0x80f   : > { %9508 = vmatmul.mubr.bf16.gmra.mrb[172].mxu0 %v9145_v62  ;;  %v18118_v33 = vmul.f32 %v8755_v15, %v20042_v26  ;;  %9636 = vmatprep.mubr.bf16.mxu1 %v9148_v59  ;;  %v8696_v62 = vpop.f32.mrb[162].mxu1  ;;  %v8996_v30 = vrot.slane %v18106_v19, 1 }
 0x810   : > { %v8925_v63 = vsel %vm2782_vm14, %v8922_v25, %v8924_v55  ;;  %v8730_v10 = vmul.f32 0.1, %v8694_v40  ;;  %v8697_v37 = vadd.f32 %v8696_v62, %v17754_v17  ;;  %v12200_v56 = vpop.f32.mrb[163].mxu1  ;;  %v8852_v32 = vsel %vm20043_vm7, %v8849_v53, %v8851_v3 }
 0x811   : > { %v9152_v4 = vpack.c.bf16 %v8925_v63, %v18097_v21  ;;  %v8926_v50 = vrot.slane %v18118_v33, 6  ;;  %v9071_v15 = vrot.slane %v18118_v33, 4  ;;  %v9155_v5 = vpack.c.bf16 %v18118_v33, %v18106_v19  ;;  %9637 = vmatmul.mubr.bf16.gmra.mrb[200].mxu1 %v9147_v7  ;;  %v20045_v63 = vld [vmem:[#allocation18_spill] sm:$0xff] }
 0x812   : > { %v8756_v59 = vmax.f32 %v8694_v40, %v8730_v10  ;;  %v8731_v42 = vmul.f32 0.1, %v8697_v37  ;;  %v9151_v26 = vpack.c.bf16 %v8852_v32, %v8850_v1  ;;  %v8997_v25 = vsel %vm20044_vm11, %v8994_v22, %v8996_v30 }
 0x813   : > { %v18133_v17 = vsel %vm2782_vm14, %v8924_v55, %v8926_v50  ;;  %v8998_v53 = vrot.slane %v18118_v33, 1  ;;  %v8853_v21 = vrot.slane %v18118_v33, 3  ;;  %v18138_v62 = vsel %vm4902_vm0, %v9067_v45, %v9069_v51  ;;  %v20048_v33 = vld [vmem:[#allocation117_spill] sm:$0xff] }
 0x814   : > { %v18141_v56 = vmul.f32 %v8756_v59, %v20045_v63  ;;  %v8757_v19 = vmax.f32 %v8697_v37, %v8731_v42  ;;  %9515 = vmatprep.mubr.bf16.mxu0 %v9151_v26  ;;  %v18144_v7 = vsel %vm4902_vm0, %v9069_v51, %v9071_v15 }
 0x815   : > { %v8701_v22 = vpop.f32.mrb[164].mxu1  ;;  %v8999_v1 = vsel %vm20046_vm4, %v8996_v30, %v8998_v53  ;;  %v8854_v55 = vsel %vm20047_vm1, %v8851_v3, %v8853_v21 }
 0x816   : > { %v8928_v45 = vrot.slane %v18141_v56, 6  ;;  %v8784_v10 = vmul.f32 %v8757_v19, %v20048_v33  ;;  %v8702_v32 = vadd.f32 %v8701_v22, %v17760_v14  ;;  %v9153_v37 = vpack.c.bf16 %v8999_v1, %v8997_v25  ;;  %v12203_v59 = vpop.f32.mrb[165].mxu1 }
 0x817   : > { %9516 = vmatmul.mubr.bf16.gmra.mrb[176].mxu0 %v9150_v29  ;;  %v8704_v42 = vpop.f32.mrb[166].mxu1  ;;  %v8855_v51 = vrot.slane %v18141_v56, 3  ;;  %v9000_v29 = vrot.slane %v18141_v56, 1  ;;  %v9073_v30 = vrot.slane %v18141_v56, 4 }
 0x818   : > { %v8929_v3 = vsel %vm2782_vm14, %v8926_v50, %v8928_v45  ;;  %v8930_v26 = vrot.slane %v8784_v10, 6  ;;  %v9160_v63 = vpack.c.bf16 %v8784_v10, %v18141_v56  ;;  %v8732_v40 = vmul.f32 0.1, %v8702_v32  ;;  %9644 = vmatprep.mubr.bf16.mxu1 %v9153_v37  ;;  %v12204_v16 = vpop.f32.mrb[167].mxu1 }
 0x819   : > { %v9157_v19 = vpack.c.bf16 %v8929_v3, %v18133_v17  ;;  %9645 = vmatmul.mubr.bf16.gmra.mrb[204].mxu1 %v9152_v4  ;;  %v8705_v14 = vadd.f32 %v8704_v42, %v17762_v0  ;;  %v8856_v25 = vsel %vm20049_vm9, %v8853_v21, %v8855_v51  ;;  %v9001_v22 = vsel %vm20050_vm2, %v8998_v53, %v9000_v29  ;;  %v20051_v16 = vld [vmem:[#allocation120_spill] sm:$0xff] }
 0x81a   : > { %v8758_v1 = vmax.f32 %v8702_v32, %v8732_v40  ;;  %v8931_v33 = vsel %vm2782_vm14, %v8928_v45, %v8930_v26  ;;  %v9156_v59 = vpack.c.bf16 %v8856_v25, %v8854_v55  ;;  %v9002_v50 = vrot.slane %v8784_v10, 1  ;;  %v20054_v42 = vld [vmem:[#allocation116_spill] sm:$0xff] }
 0x81b   : > { %v8733_v52 = vmul.f32 0.1, %v8705_v14  ;;  %v8857_v49 = vrot.slane %v8784_v10, 3  ;;  %v9074_v56 = vsel %vm4902_vm0, %v9071_v15, %v9073_v30  ;;  %v9075_v37 = vrot.slane %v8784_v10, 4 }
 0x81c   : > { %v8785_v57 = vmul.f32 %v8758_v1, %v20051_v16  ;;  %9523 = vmatprep.mubr.bf16.mxu0 %v9156_v59  ;;  %v9003_v4 = vsel %vm20052_vm15, %v9000_v29, %v9002_v50 }
 0x81d   : > { %v8759_v0 = vmax.f32 %v8705_v14, %v8733_v52  ;;  %v9158_v17 = vpack.c.bf16 %v9003_v4, %v9001_v22  ;;  %v8858_v53 = vsel %vm20053_vm6, %v8855_v51, %v8857_v49  ;;  %v9076_v21 = vsel %vm4902_vm0, %v9073_v30, %v9075_v37 }
 0x81e   : > { %v8932_v40 = vrot.slane %v8785_v57, 6  ;;  %v9077_v55 = vrot.slane %v8785_v57, 4  ;;  %v8859_v45 = vrot.slane %v8785_v57, 3  ;;  %v9004_v32 = vrot.slane %v8785_v57, 1 }
 0x81f   : > { %9524 = vmatmul.mubr.bf16.gmra.mrb[180].mxu0 %v9155_v5  ;;  %v8786_v3 = vmul.f32 %v8759_v0, %v20054_v42  ;;  %9652 = vmatprep.mubr.bf16.mxu1 %v9158_v17  ;;  %v9159_v15 = vpack.c.bf16 %v9076_v21, %v9074_v56 }
 0x820   : > { %v8933_v10 = vsel %vm2782_vm14, %v8930_v26, %v8932_v40  ;;  %v8860_v25 = vsel %vm20055_vm5, %v8857_v49, %v8859_v45  ;;  %v9005_v52 = vsel %vm20056_vm13, %v9002_v50, %v9004_v32  ;;  %v9078_v5 = vsel %vm4902_vm0, %v9075_v37, %v9077_v55 }
 0x821   : > { %v9162_v29 = vpack.c.bf16 %v8933_v10, %v8931_v33  ;;  %v9006_v51 = vrot.slane %v8786_v3, 1  ;;  %v9079_v14 = vrot.slane %v8786_v3, 4  ;;  %9653 = vmatmul.mubr.bf16.gmra.mrb[208].mxu1 %v9157_v19  ;;  %v9161_v30 = vpack.c.bf16 %v8860_v25, %v8858_v53 }
 0x822   : > { %v20059_v49 = vpack.c.bf16 %v17806_v60, %v17797_v28  ;;  %v20060_v26 = vpack.c.bf16 %v17846_v24, %v17840_v6  ;;  %v20061_v19 = vpack.c.bf16 %v17892_v2, %v17883_v44  ;;  %v20062_v33 = vpack.c.bf16 %v17931_v54, %v17925_v18  ;;  %v18209_v18 = vld [vmem:[%s20069_s28] ss:$0 sm:$0xff] }
 0x823   : > { %v9080_v22 = vsel %vm4902_vm0, %v9077_v55, %v9079_v14  ;;  %9531 = vmatprep.mubr.bf16.mxu0 %v9161_v30  ;;  %v9007_v57 = vsel %vm20057_vm10, %v9004_v32, %v9006_v51  ;;  %v20064_v28 = vpack.c.bf16 %v18004_v58, %v17998_v38  ;;  %v20065_v60 = vpack.c.bf16 %v18041_v61, %v18032_v41 }
 0x824   : > { %v9163_v1 = vpack.c.bf16 %v9007_v57, %v9005_v52  ;;  %v9164_v59 = vpack.c.bf16 %v9080_v22, %v9078_v5  ;;  %v20066_v6 = vpack.c.bf16 %v18074_v46, %v18068_v20  ;;  %v20067_v24 = vpack.c.bf16 %v18111_v12, %v18102_v36 }
 0x825   : > { %v20068_v44 = vpack.c.bf16 %v18144_v7, %v18138_v62 }
 0x826   : > { %9660 = vmatprep.mubr.bf16.mxu1 %v9163_v1 }
 0x827   : > { %9532 = vmatmul.mubr.bf16.gmra.mrb[184].mxu0 %v9160_v63  ;;  %v20063_v63 = vpack.c.bf16 %v17971_v48, %v17962_v35 }
 0x828   : > { %12221 = vmatprep.mubr.bf16.mxu0 %v20059_v49 }
 0x829   : > { %9661 = vmatmul.mubr.bf16.gmra.mrb[212].mxu1 %v9162_v29 }
 0x82f   : > { %12222 = vmatmul.mubr.bf16.vlgmr.msra.gmra.mrb[188].mxu0 %v20060_v26 }
 0x830   : > { %12225 = vmatprep.mubr.bf16.mxu0 %v20061_v19 }
 0x837   : > { %12226 = vmatmul.mubr.bf16.gmra.mrb[192].mxu0 %v20062_v33 }
 0x838   : > { %12229 = vmatprep.mubr.bf16.mxu0 %v20063_v63 }
 0x83f   : > { %12230 = vmatmul.mubr.bf16.gmra.mrb[196].mxu0 %v20064_v28 }
 0x840   : > { %12233 = vmatprep.mubr.bf16.mxu0 %v20065_v60 }
 0x847   : > { %12234 = vmatmul.mubr.bf16.gmra.mrb[200].mxu0 %v20066_v6 }
 0x848   : > { %12237 = vmatprep.mubr.bf16.mxu0 %v20067_v24 }
 0x84f   : > { %12238 = vmatmul.mubr.bf16.gmra.mrb[204].mxu0 %v20068_v44 }
 0x850   : > { %12241 = vmatprep.mubr.bf16.mxu0 %v9159_v15 }
 0x857   : > { %12242 = vmatmul.mubr.bf16.gmra.mrb[208].mxu0 %v9164_v59 }
 0x8a0   : > { %v11625_v2 = vpop.f32.mrb[140].mxu0 }
 0x8a1   : > { %v11626_v54 = vpop.f32.mrb[141].mxu0 }
 0x8a2   : > { %v11627_v35 = vadd.f32 %v11626_v54, %v11625_v2  ;;  %v11628_v48 = vpop.f32.mrb[142].mxu0  ;;  %v11713_v38 = vpop.f32.mrb[168].mxu1 }
 0x8a3   : > { %v11629_v58 = vpop.f32.mrb[143].mxu0  ;;  %v11714_v20 = vpop.f32.mrb[169].mxu1 }
 0x8a4   : > { %v9446_v41 = vadd.f32 %v11627_v35, %v18209_v18  ;;  %v11630_v61 = vadd.f32 %v11629_v58, %v11628_v48  ;;  %v11715_v46 = vadd.f32 %v11714_v20, %v11713_v38  ;;  %v11716_v36 = vpop.f32.mrb[170].mxu1 }
 0x8a5   : > { %v11717_v62 = vpop.f32.mrb[171].mxu1 }
 0x8a6   : > { %v9449_v12 = vadd.f32 %v11630_v61, %v18209_v18  ;;  %v11718_v7 = vadd.f32 %v11717_v62, %v11716_v36  ;;  %v18213_v50 = vadd.f32 %v11715_v46, %v9446_v41 }
 0x8a8   : > { %v18215_v16 = vadd.f32 %v11718_v7, %v9449_v12 }
 0x8a9   : > { %v11631_v56 = vpop.f32.mrb[144].mxu0 }
 0x8aa   : > { %v11632_v37 = vpop.f32.mrb[145].mxu0 }
 0x8ab   : > { %v11633_v4 = vadd.f32 %v11632_v37, %v11631_v56  ;;  %v11634_v0 = vpop.f32.mrb[146].mxu0 }
 0x8ac   : > { %v11635_v17 = vpop.f32.mrb[147].mxu0  ;;  %v11719_v21 = vpop.f32.mrb[172].mxu1 }
 0x8ad   : > { %v9454_v53 = vadd.f32 %v11633_v4, %v18209_v18  ;;  %v11636_v40 = vadd.f32 %v11635_v17, %v11634_v0  ;;  %v11720_v55 = vpop.f32.mrb[173].mxu1 }
 0x8ae   : > { %v11721_v32 = vadd.f32 %v11720_v55, %v11719_v21  ;;  %v11722_v42 = vpop.f32.mrb[174].mxu1 }
 0x8af   : > { %v9457_v45 = vadd.f32 %v11636_v40, %v18209_v18  ;;  %v11723_v3 = vpop.f32.mrb[175].mxu1 }
 0x8b0   : > { %v11724_v15 = vadd.f32 %v11723_v3, %v11722_v42  ;;  %v18219_v25 = vadd.f32 %v11721_v32, %v9454_v53 }
 0x8b1   : > { %v11637_v10 = vpop.f32.mrb[148].mxu0 }
 0x8b2   : > { %v11638_v52 = vpop.f32.mrb[149].mxu0  ;;  %v18221_v51 = vadd.f32 %v11724_v15, %v9457_v45 }
 0x8b3   : > { %v11639_v5 = vadd.f32 %v11638_v52, %v11637_v10  ;;  %v11640_v29 = vpop.f32.mrb[150].mxu0 }
 0x8b4   : > { %v11641_v14 = vpop.f32.mrb[151].mxu0  ;;  %v11725_v22 = vpop.f32.mrb[176].mxu1 }
 0x8b5   : > { %v9462_v30 = vadd.f32 %v11639_v5, %v18209_v18  ;;  %v11642_v57 = vadd.f32 %v11641_v14, %v11640_v29  ;;  %v11726_v1 = vpop.f32.mrb[177].mxu1 }
 0x8b6   : > { %v11727_v49 = vadd.f32 %v11726_v1, %v11725_v22  ;;  %v11728_v26 = vpop.f32.mrb[178].mxu1 }
 0x8b7   : > { %v9465_v59 = vadd.f32 %v11642_v57, %v18209_v18  ;;  %v11729_v19 = vpop.f32.mrb[179].mxu1 }
 0x8b8   : > { %v11730_v33 = vadd.f32 %v11729_v19, %v11728_v26  ;;  %v18225_v28 = vadd.f32 %v11727_v49, %v9462_v30 }
 0x8ba   : > { %v11643_v63 = vpop.f32.mrb[152].mxu0  ;;  %v18227_v44 = vadd.f32 %v11730_v33, %v9465_v59 }
 0x8bb   : > { %v11644_v60 = vpop.f32.mrb[153].mxu0 }
 0x8bc   : > { %v11645_v6 = vadd.f32 %v11644_v60, %v11643_v63  ;;  %v11646_v24 = vpop.f32.mrb[154].mxu0  ;;  %v11731_v35 = vpop.f32.mrb[180].mxu1 }
 0x8bd   : > { %v11647_v2 = vpop.f32.mrb[155].mxu0  ;;  %v11732_v38 = vpop.f32.mrb[181].mxu1 }
 0x8be   : > { %v9470_v54 = vadd.f32 %v11645_v6, %v18209_v18  ;;  %v11648_v48 = vadd.f32 %v11647_v2, %v11646_v24  ;;  %v11733_v41 = vadd.f32 %v11732_v38, %v11731_v35  ;;  %v11734_v61 = vpop.f32.mrb[182].mxu1 }
 0x8bf   : > { %v11735_v20 = vpop.f32.mrb[183].mxu1 }
 0x8c0   : > { %v9473_v58 = vadd.f32 %v11648_v48, %v18209_v18  ;;  %v11736_v46 = vadd.f32 %v11735_v20, %v11734_v61  ;;  %v18231_v12 = vadd.f32 %v11733_v41, %v9470_v54 }
 0x8c2   : > { %v11649_v36 = vpop.f32.mrb[156].mxu0  ;;  %v18233_v37 = vadd.f32 %v11736_v46, %v9473_v58 }
 0x8c3   : > { %v11650_v62 = vpop.f32.mrb[157].mxu0 }
 0x8c4   : > { %v11651_v7 = vadd.f32 %v11650_v62, %v11649_v36  ;;  %v11652_v56 = vpop.f32.mrb[158].mxu0  ;;  %v11737_v17 = vpop.f32.mrb[184].mxu1 }
 0x8c5   : > { %v11653_v4 = vpop.f32.mrb[159].mxu0  ;;  %v11738_v21 = vpop.f32.mrb[185].mxu1 }
 0x8c6   : > { %v9478_v0 = vadd.f32 %v11651_v7, %v18209_v18  ;;  %v11654_v53 = vadd.f32 %v11653_v4, %v11652_v56  ;;  %v11739_v55 = vadd.f32 %v11738_v21, %v11737_v17  ;;  %v11740_v45 = vpop.f32.mrb[186].mxu1 }
 0x8c7   : > { %v11741_v32 = vpop.f32.mrb[187].mxu1 }
 0x8c8   : > { %v9481_v40 = vadd.f32 %v11654_v53, %v18209_v18  ;;  %v11742_v42 = vadd.f32 %v11741_v32, %v11740_v45  ;;  %v18237_v15 = vadd.f32 %v11739_v55, %v9478_v0 }
 0x8ca   : > { %v11655_v3 = vpop.f32.mrb[160].mxu0  ;;  %v18239_v29 = vadd.f32 %v11742_v42, %v9481_v40 }
 0x8cb   : > { %v11656_v10 = vpop.f32.mrb[161].mxu0 }
 0x8cc   : > { %v11657_v52 = vadd.f32 %v11656_v10, %v11655_v3  ;;  %v11658_v5 = vpop.f32.mrb[162].mxu0  ;;  %v11743_v22 = vpop.f32.mrb[188].mxu1 }
 0x8cd   : > { %v11659_v14 = vpop.f32.mrb[163].mxu0  ;;  %v11744_v1 = vpop.f32.mrb[189].mxu1 }
 0x8ce   : > { %v9486_v30 = vadd.f32 %v11657_v52, %v18209_v18  ;;  %v11660_v57 = vadd.f32 %v11659_v14, %v11658_v5  ;;  %v11745_v49 = vadd.f32 %v11744_v1, %v11743_v22  ;;  %v11746_v26 = vpop.f32.mrb[190].mxu1 }
 0x8cf   : > { %v11747_v19 = vpop.f32.mrb[191].mxu1 }
 0x8d0   : > { %v9489_v59 = vadd.f32 %v11660_v57, %v18209_v18  ;;  %v11748_v33 = vadd.f32 %v11747_v19, %v11746_v26  ;;  %v18243_v60 = vadd.f32 %v11745_v49, %v9486_v30 }
 0x8d2   : > { %v11661_v63 = vpop.f32.mrb[164].mxu0  ;;  %v18245_v54 = vadd.f32 %v11748_v33, %v9489_v59 }
 0x8d3   : > { %v11662_v6 = vpop.f32.mrb[165].mxu0 }
 0x8d4   : > { %v11663_v24 = vadd.f32 %v11662_v6, %v11661_v63  ;;  %v11664_v2 = vpop.f32.mrb[166].mxu0  ;;  %v11749_v38 = vpop.f32.mrb[192].mxu1 }
 0x8d5   : > { %v11665_v35 = vpop.f32.mrb[167].mxu0  ;;  %v11750_v41 = vpop.f32.mrb[193].mxu1 }
 0x8d6   : > { %v9494_v48 = vadd.f32 %v11663_v24, %v18209_v18  ;;  %v11666_v58 = vadd.f32 %v11665_v35, %v11664_v2  ;;  %v11751_v20 = vadd.f32 %v11750_v41, %v11749_v38  ;;  %v11752_v46 = vpop.f32.mrb[194].mxu1 }
 0x8d7   : > { %v11753_v36 = vpop.f32.mrb[195].mxu1 }
 0x8d8   : > { %v9497_v61 = vadd.f32 %v11666_v58, %v18209_v18  ;;  %v11754_v62 = vadd.f32 %v11753_v36, %v11752_v46  ;;  %v18249_v56 = vadd.f32 %v11751_v20, %v9494_v48 }
 0x8da   : > { %v11667_v7 = vpop.f32.mrb[168].mxu0  ;;  %v18251_v53 = vadd.f32 %v11754_v62, %v9497_v61 }
 0x8db   : > { %v11668_v4 = vpop.f32.mrb[169].mxu0 }
 0x8dc   : > { %v11669_v0 = vadd.f32 %v11668_v4, %v11667_v7  ;;  %v11670_v17 = vpop.f32.mrb[170].mxu0  ;;  %v11755_v55 = vpop.f32.mrb[196].mxu1 }
 0x8dd   : > { %v11671_v21 = vpop.f32.mrb[171].mxu0  ;;  %v11756_v32 = vpop.f32.mrb[197].mxu1 }
 0x8de   : > { %v9502_v40 = vadd.f32 %v11669_v0, %v18209_v18  ;;  %v11672_v45 = vadd.f32 %v11671_v21, %v11670_v17  ;;  %v11757_v3 = vadd.f32 %v11756_v32, %v11755_v55  ;;  %v11758_v10 = vpop.f32.mrb[198].mxu1 }
 0x8df   : > { %v11759_v52 = vpop.f32.mrb[199].mxu1 }
 0x8e0   : > { %v9505_v42 = vadd.f32 %v11672_v45, %v18209_v18  ;;  %v11760_v5 = vadd.f32 %v11759_v52, %v11758_v10  ;;  %v18255_v30 = vadd.f32 %v11757_v3, %v9502_v40 }
 0x8e2   : > { %v11673_v14 = vpop.f32.mrb[172].mxu0  ;;  %v18257_v59 = vadd.f32 %v11760_v5, %v9505_v42 }
 0x8e3   : > { %v11674_v22 = vpop.f32.mrb[173].mxu0 }
 0x8e4   : > { %v11675_v57 = vadd.f32 %v11674_v22, %v11673_v14  ;;  %v11676_v1 = vpop.f32.mrb[174].mxu0  ;;  %v11761_v19 = vpop.f32.mrb[200].mxu1 }
 0x8e5   : > { %v11677_v49 = vpop.f32.mrb[175].mxu0  ;;  %v11762_v63 = vpop.f32.mrb[201].mxu1 }
 0x8e6   : > { %v9510_v26 = vadd.f32 %v11675_v57, %v18209_v18  ;;  %v11678_v33 = vadd.f32 %v11677_v49, %v11676_v1  ;;  %v11763_v24 = vadd.f32 %v11762_v63, %v11761_v19  ;;  %v11764_v2 = vpop.f32.mrb[202].mxu1  ;;  %v20071_v63 = vld [vmem:[#allocation30_spill] sm:$0xff] }
 0x8e7   : > { %v11765_v35 = vpop.f32.mrb[203].mxu1 }
 0x8e8   : > { %v9513_v6 = vadd.f32 %v11678_v33, %v18209_v18  ;;  %v11766_v48 = vadd.f32 %v11765_v35, %v11764_v2  ;;  %v18261_v58 = vadd.f32 %v11763_v24, %v9510_v26  ;;  %v20072_v2 = vld [vmem:[#allocation19_spill] sm:$0xff] }
 0x8e9   : > { %v4570_v35 = vmul.f32 0.1, %v20072_v2 }
 0x8ea   : > { %v11679_v38 = vpop.f32.mrb[176].mxu0  ;;  %v18263_v46 = vadd.f32 %v11766_v48, %v9513_v6  ;;  %v4569_v6 = vmul.f32 0.1, %v20071_v63 }
 0x8eb   : > { %v11680_v41 = vpop.f32.mrb[177].mxu0 }
 0x8ec   : > { %v11681_v61 = vadd.f32 %v11680_v41, %v11679_v38  ;;  %v11682_v20 = vpop.f32.mrb[178].mxu0  ;;  %20070 = vst [vmem:[#allocation48_spill] sm:$0xff] %v18263_v46  ;;  %v11767_v7 = vpop.f32.mrb[204].mxu1 }
 0x8ed   : > { %v11683_v36 = vpop.f32.mrb[179].mxu0  ;;  %v11768_v0 = vpop.f32.mrb[205].mxu1 }
 0x8ee   : > { %v9518_v62 = vadd.f32 %v11681_v61, %v18209_v18  ;;  %v11684_v4 = vadd.f32 %v11683_v36, %v11682_v20  ;;  %v11769_v21 = vadd.f32 %v11768_v0, %v11767_v7  ;;  %v11770_v40 = vpop.f32.mrb[206].mxu1  ;;  %v20074_v61 = vld [vmem:[#allocation20_spill] sm:$0xff]  ;;  %v4593_v0 = vmax.f32 %v20071_v63, %v4569_v6 }
 0x8ef   : > { %v11771_v55 = vpop.f32.mrb[207].mxu1  ;;  %v4571_v20 = vmul.f32 0.1, %v20074_v61 }
 0x8f0   : > { %v9521_v17 = vadd.f32 %v11684_v4, %v18209_v18  ;;  %v11772_v45 = vadd.f32 %v11771_v55, %v11770_v40  ;;  %v18267_v42 = vadd.f32 %v11769_v21, %v9518_v62  ;;  %v4594_v21 = vmax.f32 %v20072_v2, %v4570_v35  ;;  %v20076_v40 = vld [vmem:[#allocation33_spill] sm:$0xff] }
 0x8f1   : > { %v4572_v55 = vmul.f32 0.1, %v20076_v40  ;;  %v20081_v2 = vld [vmem:[#allocation153_spill] sm:$0xff] }
 0x8f2   : > { %v11685_v32 = vpop.f32.mrb[180].mxu0  ;;  %v18269_v5 = vadd.f32 %v11772_v45, %v9521_v17  ;;  %v4617_v35 = vadd.f32 %v4593_v0, %v20081_v2 }
 0x8f3   : > { %v11686_v3 = vpop.f32.mrb[181].mxu0 }
 0x8f4   : > { %v11687_v10 = vadd.f32 %v11686_v3, %v11685_v32  ;;  %v11688_v52 = vpop.f32.mrb[182].mxu0  ;;  %v11773_v57 = vpop.f32.mrb[208].mxu1 }
 0x8f5   : > { %v11689_v14 = vpop.f32.mrb[183].mxu0  ;;  %v11774_v49 = vpop.f32.mrb[209].mxu1 }
 0x8f6   : > { %v9526_v22 = vadd.f32 %v11687_v10, %v18209_v18  ;;  %v11690_v1 = vadd.f32 %v11689_v14, %v11688_v52  ;;  %v11775_v19 = vadd.f32 %v11774_v49, %v11773_v57  ;;  %v11776_v33 = vpop.f32.mrb[210].mxu1  ;;  %v4595_v10 = vmax.f32 %v20074_v61, %v4571_v20  ;;  %v20077_v52 = vld [vmem:[#allocation31_spill] sm:$0xff] }
 0x8f7   : > { %v11777_v24 = vpop.f32.mrb[211].mxu1  ;;  %v4573_v14 = vmul.f32 0.1, %v20077_v52  ;;  %v20079_v49 = vld [vmem:[#allocation35_spill] sm:$0xff]  ;;  %v4596_v20 = vmax.f32 %v20076_v40, %v4572_v55 }
 0x8f8   : > { %v9529_v26 = vadd.f32 %v11690_v1, %v18209_v18  ;;  %v11778_v48 = vadd.f32 %v11777_v24, %v11776_v33  ;;  %v18275_v41 = vadd.f32 %v11775_v19, %v9526_v22  ;;  %v20078_v22 = vld [vmem:[#allocation32_spill] sm:$0xff]  ;;  %v20080_v19 = vld [vmem:[#allocation21_spill] sm:$0xff] }
 0x8f9   : > { %v4574_v57 = vmul.f32 0.1, %v20078_v22  ;;  %v4576_v33 = vmul.f32 0.1, %v20080_v19 }
 0x8fa   : > { %v11691_v38 = vpop.f32.mrb[184].mxu0  ;;  %20073 = vst [vmem:[#allocation45_spill] sm:$0xff] %v18275_v41  ;;  %v18278_v4 = vadd.f32 %v11778_v48, %v9529_v26  ;;  %v4575_v26 = vmul.f32 0.1, %v20079_v49  ;;  %v20082_v48 = vld [vmem:[#allocation22_spill] sm:$0xff]  ;;  %v4597_v41 = vmax.f32 %v20077_v52, %v4573_v14  ;;  %v20085_v52 = vld [vmem:[#allocation39_spill] sm:$0xff] }
 0x8fb   : > { %v11692_v36 = vpop.f32.mrb[185].mxu0  ;;  %v4598_v46 = vmax.f32 %v20078_v22, %v4574_v57  ;;  %v4600_v2 = vmax.f32 %v20080_v19, %v4576_v33  ;;  %v4578_v14 = vmul.f32 0.1, %v20085_v52 }
 0x8fc   : > { %v11693_v62 = vadd.f32 %v11692_v36, %v11691_v38  ;;  %v11694_v7 = vpop.f32.mrb[186].mxu0  ;;  %20075 = vst [vmem:[#allocation58_spill] sm:$0xff] %v18278_v4  ;;  %v11779_v32 = vpop.f32.mrb[212].mxu1  ;;  %v4577_v38 = vmul.f32 0.1, %v20082_v48 }
 0x8fd   : > { %v11695_v17 = vpop.f32.mrb[187].mxu0  ;;  %v11780_v1 = vpop.f32.mrb[213].mxu1 }
 0x8fe   : > { %v9534_v45 = vadd.f32 %v11693_v62, %v18209_v18  ;;  %v11696_v3 = vadd.f32 %v11695_v17, %v11694_v7  ;;  %v11781_v6 = vadd.f32 %v11780_v1, %v11779_v32  ;;  %v11782_v24 = vpop.f32.mrb[214].mxu1  ;;  %v20083_v62 = vld [vmem:[#allocation154_spill] sm:$0xff]  ;;  %v4599_v1 = vmax.f32 %v20079_v49, %v4575_v26  ;;  %v20087_v49 = vld [vmem:[#allocation156_spill] sm:$0xff] }
 0x8ff   : > { %v11783_v36 = vpop.f32.mrb[215].mxu1  ;;  %v4618_v61 = vadd.f32 %v4594_v21, %v20083_v62  ;;  %v4620_v26 = vadd.f32 %v4596_v20, %v20087_v49  ;;  %v20092_v20 = vld [vmem:[#allocation161_spill] sm:$0xff] }
 0x900   : > { %v9537_v63 = vadd.f32 %v11696_v3, %v18209_v18  ;;  %v11784_v7 = vadd.f32 %v11783_v36, %v11782_v24  ;;  %v18294_v4 = vadd.f32 %v11781_v6, %v9534_v45  ;;  %v20084_v18 = vld [vmem:[#allocation155_spill] sm:$0xff]  ;;  %v4601_v45 = vmax.f32 %v20082_v48, %v4577_v38 }
 0x901   : > { %v4619_v32 = vadd.f32 %v4595_v10, %v20084_v18  ;;  %v20091_v18 = vld [vmem:[#allocation160_spill] sm:$0xff] }
 0x902   : > { %v12223_v17 = vpop.f32.mrb[188].mxu0  ;;  %v18303_v55 = vadd.f32 %v11784_v7, %v9537_v63  ;;  %v20089_v63 = vld [vmem:[#allocation158_spill] sm:$0xff]  ;;  %v20090_v7 = vld [vmem:[#allocation159_spill] sm:$0xff] }
 0x903   : > { %v9712_v3 = vadd.f32 %v12223_v17, %v18219_v25  ;;  %v9703_v0 = vpop.f32.mrb[189].mxu0  ;;  %v20086_v25 = vld [vmem:[#allocation46_spill] sm:$0xff]  ;;  %v18315_v36 = vadd.f32 %v4598_v46, %v20089_v63  ;;  %v4623_v17 = vadd.f32 %v4599_v1, %v20090_v7 }
 0x904   : > { %v9704_v21 = vadd.f32 %v9703_v0, %v18213_v50  ;;  %v12224_v40 = vpop.f32.mrb[190].mxu0  ;;  %v4579_v6 = vmul.f32 0.1, %v20086_v25  ;;  %v20088_v50 = vld [vmem:[#allocation157_spill] sm:$0xff]  ;;  %v4624_v0 = vadd.f32 %v4600_v2, %v20091_v18  ;;  %v20094_v1 = vld [vmem:[#allocation38_spill] sm:$0xff] }
 0x905   : > { %v9800_v22 = vmul.f32 0.1, %v9712_v3  ;;  %v9715_v10 = vadd.f32 %v12224_v40, %v18221_v51  ;;  %v9706_v57 = vpop.f32.mrb[191].mxu0  ;;  %v18312_v33 = vadd.f32 %v4597_v41, %v20088_v50  ;;  %v18324_v40 = vadd.f32 %v4601_v45, %v20092_v20  ;;  %v20096_v18 = vld [vmem:[#allocation162_spill] sm:$0xff] }
 0x906   : > { %v9798_v24 = vmul.f32 0.1, %v9704_v21  ;;  %v9707_v19 = vadd.f32 %v9706_v57, %v18215_v16  ;;  %v4602_v16 = vmax.f32 %v20085_v52, %v4578_v14  ;;  %v18334_v50 = vmul.f32 0.1, %v20094_v1 }
 0x907   : > { %v9824_v48 = vmax.f32 %v9712_v3, %v9800_v22  ;;  %v9801_v38 = vmul.f32 0.1, %v9715_v10  ;;  %v4603_v3 = vmax.f32 %v20086_v25, %v4579_v6  ;;  %v20093_v22 = vld [vmem:[#allocation34_spill] sm:$0xff] }
 0x908   : > { %v9822_v51 = vmax.f32 %v9704_v21, %v9798_v24  ;;  %v9799_v62 = vmul.f32 0.1, %v9707_v19  ;;  %v18330_v57 = vmul.f32 0.1, %v20093_v22  ;;  %v18346_v20 = vadd.f32 %v4602_v16, %v20096_v18 }
 0x909   : > { %v9848_v41 = vadd.f32 %v9824_v48, %v16926_v47  ;;  %v9825_v46 = vmax.f32 %v9715_v10, %v9801_v38  ;;  %v20095_v47 = vld [vmem:[#allocation26_spill] sm:$0xff]  ;;  %v4605_v16 = vmax.f32 %v20094_v1, %v18334_v50 }
 0x90a   : > { %v9846_v21 = vadd.f32 %v9822_v51, %v16901_v43  ;;  %v9823_v24 = vmax.f32 %v9707_v19, %v9799_v62  ;;  %v12227_v49 = vpop.f32.mrb[192].mxu0  ;;  %v18339_v10 = vmul.f32 0.1, %v20095_v47 }
 0x90b   : > { %v9872_v2 = vadd.f32 %v9848_v41, %v4619_v32  ;;  %v9849_v45 = vadd.f32 %v9825_v46, %v16958_v39  ;;  %v9728_v52 = vadd.f32 %v12227_v49, %v18231_v12  ;;  %v9719_v14 = vpop.f32.mrb[193].mxu0  ;;  %v20098_v49 = vld [vmem:[#allocation36_spill] sm:$0xff] }
 0x90c   : > { %v9870_v25 = vadd.f32 %v9846_v21, %v4617_v35  ;;  %v9847_v6 = vadd.f32 %v9823_v24, %v16918_v27  ;;  %v9720_v43 = vadd.f32 %v9719_v14, %v18225_v28  ;;  %v12228_v19 = vpop.f32.mrb[194].mxu0  ;;  %v20097_v21 = vld [vmem:[#allocation163_spill] sm:$0xff]  ;;  %v20099_v14 = vld [vmem:[#allocation50_spill] sm:$0xff] }
 0x90d   : > { %v9896_v63 = vmul.f32 0.5, %v9872_v2  ;;  %v9873_v48 = vadd.f32 %v9849_v45, %v4620_v26  ;;  %v9804_v38 = vmul.f32 0.1, %v9728_v52  ;;  %v9731_v32 = vadd.f32 %v12228_v19, %v18233_v37  ;;  %v9722_v51 = vpop.f32.mrb[195].mxu0 }
 0x90e   : > { %v9894_v39 = vmul.f32 0.5, %v9870_v25  ;;  %v9871_v62 = vadd.f32 %v9847_v6, %v4618_v61  ;;  %v9802_v12 = vmul.f32 0.1, %v9720_v43  ;;  %v9723_v7 = vadd.f32 %v9722_v51, %v18227_v44  ;;  %v20100_v6 = vld [vmem:[#allocation53_spill] sm:$0xff] }
 0x90f   : > { %9920 = vst [vmem:[%s18349_s30 + $0x10] sm:$0xff] %v9896_v63  ;;  %v9897_v27 = vmul.f32 0.5, %v9873_v48  ;;  %v9828_v28 = vmax.f32 %v9728_v52, %v9804_v38  ;;  %v9805_v35 = vmul.f32 0.1, %v9731_v32  ;;  %v4604_v37 = vmax.f32 %v20093_v22, %v18330_v57 }
 0x910   : > { %9918 = vst [vmem:[%s18349_s30] sm:$0xff] %v9894_v39  ;;  %v9895_v61 = vmul.f32 0.5, %v9871_v62  ;;  %v9826_v26 = vmax.f32 %v9720_v43, %v9802_v12  ;;  %v9803_v44 = vmul.f32 0.1, %v9723_v7  ;;  %v4627_v24 = vadd.f32 %v4603_v3, %v20097_v21 }
 0x911   : > { %9921 = vst [vmem:[%s18349_s30 + $0x18] sm:$0xff] %v9897_v27  ;;  %v9852_v41 = vadd.f32 %v9828_v28, %v16990_v11  ;;  %v9829_v46 = vmax.f32 %v9731_v32, %v9805_v35  ;;  %v18361_v2 = vmul.f32 0.1, %v20098_v49  ;;  %v4606_v45 = vmax.f32 %v20095_v47, %v18339_v10 }
 0x912   : > { %9919 = vst [vmem:[%s18349_s30 + $0x8] sm:$0xff] %v9895_v61  ;;  %v9850_v22 = vadd.f32 %v9826_v26, %v16961_v9  ;;  %v9827_v57 = vmax.f32 %v9723_v7, %v9803_v44  ;;  %v12231_v52 = vpop.f32.mrb[196].mxu0  ;;  %v18368_v25 = vmul.f32 0.1, %v20099_v14  ;;  %v18373_v43 = vmul.f32 0.1, %v20100_v6 }
 0x913   : > { %v9876_v1 = vadd.f32 %v9852_v41, %v4623_v17  ;;  %v9853_v11 = vadd.f32 %v9829_v46, %v17107_v13  ;;  %v9744_v50 = vadd.f32 %v12231_v52, %v18243_v60  ;;  %v9735_v3 = vpop.f32.mrb[197].mxu0  ;;  %v20102_v7 = vld [vmem:[#allocation165_spill] sm:$0xff]  ;;  %v4607_v28 = vmax.f32 %v20098_v49, %v18361_v2  ;;  %v20104_v46 = vld [vmem:[#allocation40_spill] sm:$0xff] }
 0x914   : > { %v9874_v47 = vadd.f32 %v9850_v22, %v18312_v33  ;;  %v9851_v10 = vadd.f32 %v9827_v57, %v16979_v34  ;;  %v9736_v9 = vadd.f32 %v9735_v3, %v18237_v15  ;;  %v12232_v19 = vpop.f32.mrb[198].mxu0  ;;  %v20101_v15 = vld [vmem:[#allocation164_spill] sm:$0xff]  ;;  %v4609_v26 = vmax.f32 %v20100_v6, %v18373_v43  ;;  %v20105_v22 = vld [vmem:[#allocation47_spill] sm:$0xff] }
 0x915   : > { %v9900_v63 = vmul.f32 0.5, %v9876_v1  ;;  %v9877_v48 = vadd.f32 %v9853_v11, %v4624_v0  ;;  %v9808_v17 = vmul.f32 0.1, %v9744_v50  ;;  %v9747_v13 = vadd.f32 %v12232_v19, %v18245_v54  ;;  %v9738_v38 = vpop.f32.mrb[199].mxu0 }
 0x916   : > { %v9898_v60 = vmul.f32 0.5, %v9874_v47  ;;  %v9875_v32 = vadd.f32 %v9851_v10, %v18315_v36  ;;  %v9806_v51 = vmul.f32 0.1, %v9736_v9  ;;  %v9739_v39 = vadd.f32 %v9738_v38, %v18239_v29  ;;  %v20103_v36 = vld [vmem:[#allocation166_spill] sm:$0xff]  ;;  %v20109_v38 = vld [vmem:[#allocation169_spill] sm:$0xff] }
 0x917   : > { %9924 = vst [vmem:[%s18349_s30 + $0x30] sm:$0xff] %v9900_v63  ;;  %v9901_v33 = vmul.f32 0.5, %v9877_v48  ;;  %v9832_v34 = vmax.f32 %v9744_v50, %v9808_v17  ;;  %v4628_v62 = vadd.f32 %v4604_v37, %v20101_v15  ;;  %v9809_v12 = vmul.f32 0.1, %v9747_v13  ;;  %v20108_v48 = vld [vmem:[#allocation167_spill] sm:$0xff]  ;;  %v20112_v15 = vld [vmem:[#allocation124_spill] sm:$0xff] }
 0x918   : > { %v4629_v0 = vadd.f32 %v4605_v16, %v20102_v7  ;;  %9922 = vst [vmem:[%s18349_s30 + $0x20] sm:$0xff] %v9898_v60  ;;  %v9899_v18 = vmul.f32 0.5, %v9875_v32  ;;  %v9830_v54 = vmax.f32 %v9736_v9, %v9806_v51  ;;  %v9807_v27 = vmul.f32 0.1, %v9739_v39  ;;  %v20111_v51 = vld [vmem:[#allocation168_spill] sm:$0xff] }
 0x919   : > { %v18388_v35 = vadd.f32 %v4606_v45, %v20103_v36  ;;  %9925 = vst [vmem:[%s18349_s30 + $0x38] sm:$0xff] %v9901_v33  ;;  %v9856_v29 = vadd.f32 %v9832_v34, %v17198_v31  ;;  %v9833_v61 = vmax.f32 %v9747_v13, %v9809_v12  ;;  %v4608_v37 = vmax.f32 %v20099_v14, %v18368_v25  ;;  %v20106_v14 = vld [vmem:[#allocation100_spill] sm:$0xff] }
 0x91a   : > { %9923 = vst [vmem:[%s18349_s30 + $0x28] sm:$0xff] %v9899_v18  ;;  %v9854_v44 = vadd.f32 %v9830_v54, %v17110_v23  ;;  %v9831_v16 = vmax.f32 %v9739_v39, %v9807_v27  ;;  %v12235_v41 = vpop.f32.mrb[200].mxu0  ;;  %v4586_v21 = vmul.f32 0.1, %v20104_v46  ;;  %v18402_v57 = vmul.f32 0.1, %v20105_v22 }
 0x91b   : > { %v9880_v49 = vadd.f32 %v9856_v29, %v4627_v24  ;;  %v9857_v2 = vadd.f32 %v9833_v61, %v17207_v8  ;;  %v9760_v45 = vadd.f32 %v12235_v41, %v18255_v30  ;;  %v9751_v31 = vpop.f32.mrb[201].mxu0  ;;  %v4631_v17 = vadd.f32 %v4607_v28, %v20108_v48  ;;  %v20113_v27 = vld [vmem:[#allocation113_spill] sm:$0xff]  ;;  %v20114_v61 = vld [vmem:[#allocation42_spill] sm:$0xff] }
 0x91c   : > { %v9878_v52 = vadd.f32 %v9854_v44, %v18324_v40  ;;  %v9855_v25 = vadd.f32 %v9831_v16, %v20106_v14  ;;  %v9752_v23 = vadd.f32 %v9751_v31, %v18249_v56  ;;  %v12236_v1 = vpop.f32.mrb[202].mxu0  ;;  %v20107_v40 = vld [vmem:[#allocation41_spill] sm:$0xff]  ;;  %v4633_v60 = vadd.f32 %v4609_v26, %v20109_v38 }
 0x91d   : > { %v9904_v11 = vmul.f32 0.5, %v9880_v49  ;;  %v9881_v50 = vadd.f32 %v9857_v2, %v4628_v62  ;;  %v9812_v24 = vmul.f32 0.1, %v9760_v45  ;;  %v9763_v8 = vadd.f32 %v12236_v1, %v18257_v59  ;;  %v9754_v3 = vpop.f32.mrb[203].mxu0  ;;  %v20115_v44 = vld [vmem:[#allocation121_spill] sm:$0xff] }
 0x91e   : > { %v9902_v30 = vmul.f32 0.5, %v9878_v52  ;;  %v9879_v6 = vadd.f32 %v9855_v25, %v18346_v20  ;;  %v9810_v43 = vmul.f32 0.1, %v9752_v23  ;;  %v9755_v47 = vadd.f32 %v9754_v3, %v18251_v53  ;;  %v20110_v20 = vld [vmem:[#allocation119_spill] sm:$0xff]  ;;  %v20116_v52 = vld [vmem:[#allocation48_spill] sm:$0xff] }
 0x91f   : > { %v4588_v10 = vmul.f32 0.1, %v20107_v40  ;;  %9928 = vst [vmem:[%s18349_s30 + $0x50] sm:$0xff] %v9904_v11  ;;  %v9905_v56 = vmul.f32 0.5, %v9881_v50  ;;  %v9836_v9 = vmax.f32 %v9760_v45, %v9812_v24  ;;  %v9813_v19 = vmul.f32 0.1, %v9763_v8 }
 0x920   : > { %9926 = vst [vmem:[%s18349_s30 + $0x40] sm:$0xff] %v9902_v30  ;;  %v9903_v63 = vmul.f32 0.5, %v9879_v6  ;;  %v9834_v59 = vmax.f32 %v9752_v23, %v9810_v43  ;;  %v9811_v13 = vmul.f32 0.1, %v9755_v47  ;;  %v4632_v53 = vadd.f32 %v4608_v37, %v20111_v51  ;;  %v20118_v11 = vld [vmem:[#allocation61_spill] sm:$0xff]  ;;  %v20119_v3 = vld [vmem:[#allocation171_spill] sm:$0xff] }
 0x921   : > { %9929 = vst [vmem:[%s18349_s30 + $0x58] sm:$0xff] %v9905_v56  ;;  %v9860_v32 = vadd.f32 %v9836_v9, %v20110_v20  ;;  %v9837_v39 = vmax.f32 %v9763_v8, %v9813_v19  ;;  %v4611_v33 = vmax.f32 %v20105_v22, %v18402_v57  ;;  %v4610_v34 = vmax.f32 %v20104_v46, %v4586_v21  ;;  %v20121_v43 = vld [vmem:[#allocation172_spill] sm:$0xff]  ;;  %v20122_v56 = vld [vmem:[#allocation54_spill] sm:$0xff]  ;;  %v20123_v19 = vld [vmem:[#allocation105_spill] sm:$0xff] }
 0x922   : > { %9927 = vst [vmem:[%s18349_s30 + $0x48] sm:$0xff] %v9903_v63  ;;  %v9858_v62 = vadd.f32 %v9834_v59, %v20112_v15  ;;  %v9835_v12 = vmax.f32 %v9755_v47, %v9811_v13  ;;  %v12239_v7 = vpop.f32.mrb[204].mxu0  ;;  %v4612_v18 = vmax.f32 %v20107_v40, %v4588_v10  ;;  %v18427_v37 = vmul.f32 0.1, %v20114_v61  ;;  %v20124_v59 = vld [vmem:[#allocation51_spill] sm:$0xff] }
 0x923   : > { %v9884_v54 = vadd.f32 %v9860_v32, %v4631_v17  ;;  %v9861_v28 = vadd.f32 %v9837_v39, %v20113_v27  ;;  %v9776_v36 = vadd.f32 %v12239_v7, %v18267_v42  ;;  %v9767_v29 = vpop.f32.mrb[205].mxu0  ;;  %v4591_v50 = vmul.f32 0.1, %v20118_v11  ;;  %v20125_v20 = vld [vmem:[#allocation123_spill] sm:$0xff] }
 0x924   : > { %v9882_v26 = vadd.f32 %v9858_v62, %v4629_v0  ;;  %v9859_v16 = vadd.f32 %v9835_v12, %v20115_v44  ;;  %v9768_v41 = vadd.f32 %v9767_v29, %v18261_v58  ;;  %v12240_v46 = vpop.f32.mrb[206].mxu0  ;;  %v20117_v0 = vld [vmem:[#allocation170_spill] sm:$0xff]  ;;  %v4635_v30 = vadd.f32 %v4611_v33, %v20119_v3  ;;  %v20127_v62 = vld [vmem:[#allocation45_spill] sm:$0xff] }
 0x925   : > { %v9908_v21 = vmul.f32 0.5, %v9884_v54  ;;  %v9885_v49 = vadd.f32 %v9861_v28, %v4632_v53  ;;  %v9816_v2 = vmul.f32 0.1, %v9776_v36  ;;  %v9779_v45 = vadd.f32 %v12240_v46, %v18269_v5  ;;  %v9770_v31 = vpop.f32.mrb[207].mxu0  ;;  %v20136_v3 = vld [vmem:[#allocation125_spill] sm:$0xff] }
 0x926   : > { %v9906_v42 = vmul.f32 0.5, %v9882_v26  ;;  %v9883_v22 = vadd.f32 %v9859_v16, %v18388_v35  ;;  %v9814_v57 = vmul.f32 0.1, %v9768_v41  ;;  %v9771_v14 = vadd.f32 %v9770_v31, %v20116_v52  ;;  %v20120_v35 = vld [vmem:[#allocation108_spill] sm:$0xff]  ;;  %v20130_v31 = vld [vmem:[#allocation111_spill] sm:$0xff] }
 0x927   : > { %v4634_v25 = vadd.f32 %v4610_v34, %v20117_v0  ;;  %9932 = vst [vmem:[%s18349_s30 + $0x70] sm:$0xff] %v9908_v21  ;;  %v9909_v58 = vmul.f32 0.5, %v9885_v49  ;;  %v9840_v23 = vmax.f32 %v9776_v36, %v9816_v2  ;;  %v9817_v1 = vmul.f32 0.1, %v9779_v45  ;;  %v20126_v34 = vld [vmem:[#allocation122_spill] sm:$0xff]  ;;  %v20129_v2 = vld [vmem:[#allocation175_spill] sm:$0xff] }
 0x928   : > { %9930 = vst [vmem:[%s18349_s30 + $0x60] sm:$0xff] %v9906_v42  ;;  %v9907_v24 = vmul.f32 0.5, %v9883_v22  ;;  %v9838_v5 = vmax.f32 %v9768_v41, %v9814_v57  ;;  %v9815_v8 = vmul.f32 0.1, %v9771_v14  ;;  %v4636_v47 = vadd.f32 %v4612_v18, %v20121_v43  ;;  %v20131_v57 = vld [vmem:[#allocation173_spill] sm:$0xff] }
 0x929   : > { %9933 = vst [vmem:[%s18349_s30 + $0x78] sm:$0xff] %v9909_v58  ;;  %v9864_v6 = vadd.f32 %v9840_v23, %v20120_v35  ;;  %v9841_v40 = vmax.f32 %v9779_v45, %v9817_v1  ;;  %v4613_v10 = vmax.f32 %v20114_v61, %v18427_v37  ;;  %v4590_v9 = vmul.f32 0.1, %v20122_v56  ;;  %v20128_v37 = vld [vmem:[#allocation58_spill] sm:$0xff]  ;;  %v20133_v23 = vld [vmem:[#allocation176_spill] sm:$0xff] }
 0x92a   : > { %9931 = vst [vmem:[%s18349_s30 + $0x68] sm:$0xff] %v9907_v24  ;;  %v9862_v63 = vadd.f32 %v9838_v5, %v20123_v19  ;;  %v9839_v48 = vmax.f32 %v9771_v14, %v9815_v8  ;;  %v12243_v17 = vpop.f32.mrb[208].mxu0  ;;  %v4592_v13 = vmul.f32 0.1, %v20124_v59  ;;  %v4615_v39 = vmax.f32 %v20118_v11, %v4591_v50  ;;  %v20132_v14 = vld [vmem:[#allocation126_spill] sm:$0xff]  ;;  %v20134_v11 = vld [vmem:[#allocation55_spill] sm:$0xff] }
 0x92b   : > { %v9888_v38 = vadd.f32 %v9864_v6, %v4635_v30  ;;  %v9865_v32 = vadd.f32 %v9841_v40, %v20125_v20  ;;  %v9792_v51 = vadd.f32 %v12243_v17, %v18294_v4  ;;  %v9783_v53 = vpop.f32.mrb[209].mxu0  ;;  %v4614_v46 = vmax.f32 %v20122_v56, %v4590_v9  ;;  %v20135_v24 = vld [vmem:[#allocation174_spill] sm:$0xff] }
 0x92c   : > { %v9886_v33 = vadd.f32 %v9862_v63, %v4633_v60  ;;  %v9863_v15 = vadd.f32 %v9839_v48, %v20126_v34  ;;  %v9784_v12 = vadd.f32 %v9783_v53, %v20127_v62  ;;  %v12244_v7 = vpop.f32.mrb[210].mxu0  ;;  %v4616_v60 = vmax.f32 %v20124_v59, %v4592_v13 }
 0x92d   : > { %v9912_v18 = vmul.f32 0.5, %v9888_v38  ;;  %v9889_v54 = vadd.f32 %v9865_v32, %v4636_v47  ;;  %v9820_v27 = vmul.f32 0.1, %v9792_v51  ;;  %v9795_v28 = vadd.f32 %v12244_v7, %v18303_v55  ;;  %v9786_v36 = vpop.f32.mrb[211].mxu0 }
 0x92e   : > { %v9910_v29 = vmul.f32 0.5, %v9886_v33  ;;  %v9887_v4 = vadd.f32 %v9863_v15, %v4634_v25  ;;  %v9818_v61 = vmul.f32 0.1, %v9784_v12  ;;  %v9787_v26 = vadd.f32 %v9786_v36, %v20128_v37 }
 0x92f   : > { %9936 = vst [vmem:[%s18349_s30 + $0x90] sm:$0xff] %v9912_v18  ;;  %v9913_v44 = vmul.f32 0.5, %v9889_v54  ;;  %v9844_v16 = vmax.f32 %v9792_v51, %v9820_v27  ;;  %v9821_v41 = vmul.f32 0.1, %v9795_v28  ;;  %v4639_v45 = vadd.f32 %v4615_v39, %v20129_v2 }
 0x930   : > { %9934 = vst [vmem:[%s18349_s30 + $0x80] sm:$0xff] %v9910_v29  ;;  %v9911_v21 = vmul.f32 0.5, %v9887_v4  ;;  %v9842_v49 = vmax.f32 %v9784_v12, %v9818_v61  ;;  %v9819_v55 = vmul.f32 0.1, %v9787_v26  ;;  %v4637_v52 = vadd.f32 %v4613_v10, %v20131_v57 }
 0x931   : > { %9937 = vst [vmem:[%s18349_s30 + $0x98] sm:$0xff] %v9913_v44  ;;  %v9868_v42 = vadd.f32 %v9844_v16, %v20130_v31  ;;  %v9845_v22 = vmax.f32 %v9795_v28, %v9821_v41  ;;  %v4640_v1 = vadd.f32 %v4616_v60, %v20133_v23  ;;  %v4638_v5 = vadd.f32 %v4614_v46, %v20135_v24 }
 0x932   : > { %9935 = vst [vmem:[%s18349_s30 + $0x88] sm:$0xff] %v9911_v21  ;;  %v9866_v0 = vadd.f32 %v9842_v49, %v20132_v14  ;;  %v9843_v25 = vmax.f32 %v9787_v26, %v9819_v55 }
 0x933   : > { %v9892_v58 = vadd.f32 %v9868_v42, %v4639_v45  ;;  %v9869_v50 = vadd.f32 %v9845_v22, %v20134_v11 }
 0x934   : > { %v9890_v8 = vadd.f32 %v9866_v0, %v4637_v52  ;;  %v9867_v30 = vadd.f32 %v9843_v25, %v20136_v3  ;;  %9949 = sbr.rel (!%p12883_p3) target bundleno = 2395 (0x95b), region = 100 }
 0x935   : > { %v9916_v35 = vmul.f32 0.5, %v9892_v58  ;;  %v9893_v6 = vadd.f32 %v9869_v50, %v4640_v1 }
 0x936   : > { %v9914_v43 = vmul.f32 0.5, %v9890_v8  ;;  %v9891_v47 = vadd.f32 %v9867_v30, %v4638_v5 }
 0x937   : > { %9940 = vst [vmem:[%s18349_s30 + $0xb0] sm:$0xff] %v9916_v35  ;;  %v9917_v40 = vmul.f32 0.5, %v9893_v6 }
 0x938   : > { %9938 = vst [vmem:[%s18349_s30 + $0xa0] sm:$0xff] %v9914_v43  ;;  %v9915_v10 = vmul.f32 0.5, %v9891_v47 }
 0x939   : > { %9941 = vst [vmem:[%s18349_s30 + $0xb8] sm:$0xff] %v9917_v40 }
 0x93a   : > { %9939 = vst [vmem:[%s18349_s30 + $0xa8] sm:$0xff] %v9915_v10 }
 0x93b   : > { %s20165_s23 = smov (!%p9952_p5, %s9951_s23), 24 }
 0x93c   : > { %s18480_s29 = sshll.u32 %s20165_s23, 7 }
 0x93d   : > { %s9956_s3 = ssub.s32 3072, %s18480_s29 }
 0x93e   : > { %9957 = vsyncadd %s18475_s1, %s9956_s3  ;;  %s20138_s21 = sld [smem:[#allocation8_spill]]  ;;  %p10470_p6 = scmp.ne.s32.totalorder %s18480_s29, 0 }
 0x93f   : > { %s9964_s24 = sshll.u32 %s18349_s30, 4  ;;  %s20139_s28 = sld [smem:[#allocation182_spill]]  ;;  %s18488_s24 = int_to_ptr.vmem [resolvable:$true] %s9964_s24 }
 0x940   : > { %s12631_s18 = scalar_lea.vmem %s18488_s24, %s18480_s29  ;;  %s12729_s23 = smov [#allocation2]  }
 0x941   : > { %p12632_p3 = scmp.ne.s32.totalorder %s18488_s24, %s12631_s18  ;;  %s12635_s3 = sshll.u32 %s12729_s23, 4  ;;  %s12636_s3 = int_to_ptr.vmem [resolvable:$false] %s12635_s3 }
 0x942   : > { %p12638_p10 = scmp.lt.s32.totalorder %s18488_s24, %s12636_s3 }
 0x943   : > { %p12633_p7 = pnand %p12632_p3, %p10470_p6 }
 0x944   : > { %s12247_s20 = smul.u32 25, %s20138_s21 }
 0x945   : > { %p12634_p9 = pneg %p12633_p7 }
 0x946   : > { %s9960_s2 = sadd.s32 %s12247_s20, %s12911_s27  ;;  %s12637_s27 = scalar_lea.vmem %s12636_s3, 6144 }
 0x947   : > { %s10471_s19 = sshll.u32 %s9960_s2, 7  ;;  %p12639_p11 = scmp.lt.s32.totalorder %s12637_s27, %s12631_s18 }
 0x948   : > { %s18493_s26 = scalar_lea.hbm %s20139_s28, %s10471_s19 }
 0x949   : > { %p12640_p12 = por %p12639_p11, %p12638_p10 }
 0x94b   : > { %p12641_p13 = pnand %p12640_p12, %p12634_p9 }
 0x94d   : > { %12644 = shalt.err (!%p12641_p13)
}
 0x94e   : > { %s12645_s30 = scalar_lea.hbm %s18493_s26, %s18480_s29  ;;  %s12649_s2 = scalar_lea.hbm %s20139_s28, 6400 }
 0x94f   : > { %p12646_p0 = scmp.ne.s32.totalorder %s18493_s26, %s12645_s30  ;;  %p12650_p4 = scmp.lt.u32.totalorder %s18493_s26, %s20139_s28 }
 0x950   : > { %p12651_p5 = scmp.lt.u32.totalorder %s12649_s2, %s12645_s30  ;;  %p12653_p7 = scmp.lt.u32.totalorder %s12645_s30, %s18493_s26 }
 0x951   : > { %p12647_p1 = pnand %p12646_p0, %p10470_p6 }
 0x952   : > { %p12652_p3 = por %p12651_p5, %p12650_p4 }
 0x953   : > { %p12648_p2 = pneg %p12647_p1 }
 0x954   : > { %p12654_p9 = por %p12653_p7, %p12652_p3 }
 0x956   : > { %p12655_p10 = pnand %p12654_p9, %p12648_p2 }
 0x958   : > { %12658 = shalt.err (!%p12655_p10)
}
 0x959   : > { %s12730_s22 = smov 128   ;;  %s12731_s18 = smov 8  }
 0x95a   : > { %9970 = dma.vmem_to_hbm [thread:$0]  (%p10470_p6), %s18488_s24, %s18480_s29, %s18493_s26, %s18475_s1, %s12730_s22, %s12730_s22, %s12731_s18  }
 0x95b PF: > { %s20140_s23 = sld [smem:[#allocation11_spill]]  ;;  %s20141_s3 = sld [smem:[#allocation5_spill]] }
 0x961   : > { %p12253_p11 = scmp.ge.s32.totalorder %s20140_s23, 2  ;;  %s9979_s21 = sand.u32 1, %s20141_s3  }
 0x962   : > { %s9980_s30 = scalar_lea.sflag [#allocation3], %s9979_s21 }
 0x963   : > { %p12250_p12 = pnand %p12253_p11, %p12892_p8 }
 0x965   : > { %12692 = dma.done.wait (!%p12250_p12), %s9980_s30, 3072  }
 0x966   : > { %12694 = vsyncadd (!%p12250_p12), %s9980_s30, 4294964224  ;;  %s32_s23 = sadd.s32 1, %s20140_s23   ;;  %s20143_s0 = sld [smem:[#allocation6_spill]] }
 0x967   : > { %p29_p13 = scmp.ge.s32.totalorder %s32_s23, 6   ;;  %s20144_s30 = sld [smem:[#allocation7_spill]] }
 0x968   : > { %s20145_s20 = sld [smem:[#allocation16_spill]]  ;;  %s20146_s21 = sld [smem:[#allocation9_spill]] }
 0x969   : > { %s20147_s1 = sld [smem:[#allocation10_spill]]  ;;  %s20148_s22 = sld [smem:[#allocation12_spill]] }
 0x96a   : > { %s20149_s2 = sld [smem:[#allocation14_spill]]  ;;  %31 = sbr.rel (!%p29_p13) target bundleno = 12 (0xc), region = 137 }
 0x971   :  { %9985 = vsyncpa [#allocation3], 1 }
 0x972   :  { %9987 = vsyncpa [#allocation3 + $0x1], 1 }

</bundles_post_ra>
